<compile_context>
chip_gen: v5e
topology: v5e:2x2
jax: 0.10.0
libtpu: 0.0.40
codegen_flags: <defaults>
</compile_context>

<pallas_src>
import functools
import math

import jax
import jax.numpy as jnp
import numpy as np
from jax.experimental import pallas as pl
from jax.experimental.pallas import tpu as pltpu

LN_EPS = 1e-5  # PyTorch nn.LayerNorm default


def _round_up(a, m):
    return ((a + m - 1) // m) * m


# ----------------------------- fused kernel ----------------------------------
def _prenorm_residual_kernel(x_ref, vec_ref, w1_ref, b1_ref, w2_ref, o_ref,
                             *, batch, tile_b, ragged):
    x = x_ref[...]                                       # (TILE_B, D) f32
    if ragged:
        # Last tile extends past the batch: zero the garbage rows so LayerNorm
        # and the matmuls stay finite.  All ops below are row-wise, and the
        # out-of-range output rows are never written back.
        row = pl.program_id(0) * tile_b + jax.lax.broadcasted_iota(
            jnp.int32, x.shape, 0)
        x = jnp.where(row < batch, x, 0.0)

    gamma = vec_ref[0:1, :]                              # (1, D)
    beta = vec_ref[1:2, :]                               # (1, D)
    b2 = vec_ref[2:3, :]                                 # (1, D)

    # LayerNorm with a single fused reduction pass (f32).
    inv_d = 1.0 / x.shape[-1]
    mu = jnp.sum(x, axis=-1, keepdims=True) * inv_d
    ex2 = jnp.sum(x * x, axis=-1, keepdims=True) * inv_d
    var = jnp.maximum(ex2 - mu * mu, 0.0)                # clamp cancellation
    xn = (x - mu) * jax.lax.rsqrt(var + LN_EPS) * gamma + beta

    # Linear(dim, 4*dim) + SiLU  (bf16 MXU operands, f32 accumulation).
    h = jnp.dot(xn.astype(jnp.bfloat16), w1_ref[...],
                preferred_element_type=jnp.float32) + b1_ref[...]
    h = h * jax.nn.sigmoid(h)                            # SiLU (EUP)
    # TODO(synk): nn.Dropout is identity at inference; no RNG mask applied.
    # TODO(synk): for large Dff, chunk this region over Dff (accumulate y) so the
    # (TILE_B, Dff) intermediate does not dominate VMEM.

    # Linear(4*dim, dim) + residual.
    y = jnp.dot(h.astype(jnp.bfloat16), w2_ref[...],
                preferred_element_type=jnp.float32) + b2
    o_ref[...] = x + y


# ----------------------------- wrapper ---------------------------------------
def prenorm_residual(x, params, *, tile_b=512):
    """x: (B, D) f32.
    params: (vecs(3,D) f32 = [gamma; beta; b2], w1(D,4D) bf16, b1(1,4D) f32,
             w2(4D,D) bf16)."""
    vecs, w1, b1, w2 = params
    B, D = x.shape
    Dff = w1.shape[1]

    # Biggest batch tile that still covers B; multiple of 8 sublanes.
    tile_b = _round_up(max(8, min(tile_b, _round_up(B, 8))), 8)
    n_tiles = pl.cdiv(B, tile_b)
    ragged = (B % tile_b) != 0

    # VMEM budget: double-buffered x/out tiles + single-buffered weights + scratch.
    est = (4 * tile_b * D * 4                 # x + out tiles, 2 buffers each
           + (w1.size + w2.size) * 2          # bf16 weights, single buffer
           + (vecs.size + b1.size) * 4        # bias slabs
           + tile_b * Dff * 6                 # h (f32) + its bf16 copy
           + tile_b * D * 12)                 # xn / residual temporaries
    try:
        phys_vmem = pltpu.get_tpu_info().vmem_capacity_bytes
    except Exception:
        phys_vmem = 64 * 1024 * 1024          # v7x lower bound
    vmem_limit = int(min(max(est * 5 // 4, 32 * 1024 * 1024),
                         phys_vmem * 9 // 10))

    Bp = n_tiles * tile_b
    cost = pl.CostEstimate(
        flops=4 * Bp * D * Dff,               # two batched matmuls
        transcendentals=Bp * Dff,             # sigmoid
        bytes_accessed=(2 * B * D * 4 + (w1.size + w2.size) * 2
                        + (vecs.size + b1.size) * 4))

    kernel = functools.partial(_prenorm_residual_kernel,
                               batch=B, tile_b=tile_b, ragged=ragged)
    resident = dict(pipeline_mode=pl.Buffered(1))   # constant-index_map operands

    return pl.pallas_call(
        kernel,
        out_shape=jax.ShapeDtypeStruct((B, D), jnp.float32),
        grid=(n_tiles,),
        in_specs=[
            pl.BlockSpec((tile_b, D), lambda i: (i, 0)),            # x (pipelined)
            pl.BlockSpec((3, D), lambda i: (0, 0), **resident),     # gamma/beta/b2
            pl.BlockSpec((D, Dff), lambda i: (0, 0), **resident),   # w1
            pl.BlockSpec((1, Dff), lambda i: (0, 0), **resident),   # b1
            pl.BlockSpec((Dff, D), lambda i: (0, 0), **resident),   # w2
        ],
        out_specs=pl.BlockSpec((tile_b, D), lambda i: (i, 0)),
        compiler_params=pltpu.CompilerParams(
            dimension_semantics=("parallel",),
            vmem_limit_bytes=vmem_limit),
        cost_estimate=cost,
    )(x, vecs, w1, b1, w2)


# ----------------------------- pure-JAX reference (same bf16 matmul math) ----
def prenorm_residual_ref(x, params):
    vecs, w1, b1, w2 = params
    gamma, beta, b2 = vecs[0:1, :], vecs[1:2, :], vecs[2:3, :]
    mu = jnp.mean(x, axis=-1, keepdims=True)
    var = jnp.mean((x - mu) ** 2, axis=-1, keepdims=True)
    xn = (x - mu) * jax.lax.rsqrt(var + LN_EPS) * gamma + beta
    h = jnp.dot(xn.astype(jnp.bfloat16), w1, preferred_element_type=jnp.float32) + b1
    h = h * jax.nn.sigmoid(h)
    y = jnp.dot(h.astype(jnp.bfloat16), w2, preferred_element_type=jnp.float32) + b2
    return x + y


# ----------------------------- parameter init (deterministic) ----------------
def init_params(key, dim):
    k1, k2, k3, k4, k5, k6 = jax.random.split(key, 6)
    gamma = 1.0 + 0.05 * jax.random.normal(k1, (dim,), jnp.float32)
    beta = 0.05 * jax.random.normal(k2, (dim,), jnp.float32)
    b2 = 0.01 * jax.random.normal(k6, (dim,), jnp.float32)
    vecs = jnp.stack([gamma, beta, b2], axis=0)                          # (3, dim)
    w1 = (jax.random.normal(k3, (dim, 4 * dim), jnp.float32)
          / math.sqrt(dim)).astype(jnp.bfloat16)                         # (dim, 4dim)
    b1 = 0.01 * jax.random.normal(k4, (1, 4 * dim), jnp.float32)
    w2 = (jax.random.normal(k5, (4 * dim, dim), jnp.float32)
          / math.sqrt(4 * dim)).astype(jnp.bfloat16)                     # (4dim, dim)
    return (vecs, w1, b1, w2)


# ----------------------------- main -------------------------------------------
if __name__ == "__main__":
    DIM = 128                                  # lane-dense (multiple of 128)
    key = jax.random.PRNGKey(0)
    kx, kp, kx2 = jax.random.split(key, 3)
    params = init_params(kp, DIM)

    # Case 1: tile-divisible batch (single large tile, unmasked stores).
    x = jax.random.normal(kx, (256, DIM), jnp.float32)
    out = jax.block_until_ready(prenorm_residual(x, params))
    ref = jax.block_until_ready(prenorm_residual_ref(x, params))
    np.testing.assert_allclose(np.asarray(out), np.asarray(ref), rtol=5e-3, atol=5e-3)

    # Case 2: ragged batch with a forced small tile — exercises the in-kernel
    # tail mask that replaced the jnp.pad extra HBM pass.
    x2 = jax.random.normal(kx2, (200, DIM), jnp.float32)
    out2 = jax.block_until_ready(prenorm_residual(x2, params, tile_b=128))
    ref2 = jax.block_until_ready(prenorm_residual_ref(x2, params))
    np.testing.assert_allclose(np.asarray(out2), np.asarray(ref2), rtol=5e-3, atol=5e-3)

    print("KERNEL_OK")
</pallas_src>

<mosaic_0001>
module attributes {stable_mosaic.version = 11 : i64} {
  func.func @_prenorm_residual_kernel(%arg0: i32, %arg1: memref<256x128xf32, #tpu.memory_space<vmem>>, %arg2: memref<3x128xf32, #tpu.memory_space<vmem>>, %arg3: memref<128x512xbf16, #tpu.memory_space<vmem>>, %arg4: memref<1x512xf32, #tpu.memory_space<vmem>>, %arg5: memref<512x128xbf16, #tpu.memory_space<vmem>>, %arg6: memref<256x128xf32, #tpu.memory_space<vmem>>) attributes {dimension_semantics = [#tpu.dimension_semantics<parallel>], iteration_bounds = array<i64: 1>, scalar_prefetch = 0 : i64, scratch_operands = 0 : i64, tpu.core_type = #tpu.core_type<tc>, window_params = [{transform_indices = @transform_0, window_bounds = array<i64: 256, 128>}, {pipeline_mode = #tpu.pipeline_mode<synchronous>, transform_indices = @transform_1, window_bounds = array<i64: 3, 128>}, {pipeline_mode = #tpu.pipeline_mode<synchronous>, transform_indices = @transform_2, window_bounds = array<i64: 128, 512>}, {pipeline_mode = #tpu.pipeline_mode<synchronous>, transform_indices = @transform_3, window_bounds = array<i64: 1, 512>}, {pipeline_mode = #tpu.pipeline_mode<synchronous>, transform_indices = @transform_4, window_bounds = array<i64: 512, 128>}, {transform_indices = @transform_5, window_bounds = array<i64: 256, 128>}]} {
    %c0 = arith.constant 0 : index
    %c0_0 = arith.constant 0 : index
    %0 = vector.load %arg1[%c0, %c0_0] : memref<256x128xf32, #tpu.memory_space<vmem>>, vector<256x128xf32>
    %c0_1 = arith.constant 0 : index
    %c0_2 = arith.constant 0 : index
    %1 = vector.load %arg2[%c0_1, %c0_2] : memref<3x128xf32, #tpu.memory_space<vmem>>, vector<1x128xf32>
    %c1 = arith.constant 1 : index
    %c0_3 = arith.constant 0 : index
    %2 = vector.load %arg2[%c1, %c0_3] : memref<3x128xf32, #tpu.memory_space<vmem>>, vector<1x128xf32>
    %c2 = arith.constant 2 : index
    %c0_4 = arith.constant 0 : index
    %3 = vector.load %arg2[%c2, %c0_4] : memref<3x128xf32, #tpu.memory_space<vmem>>, vector<1x128xf32>
    %cst = arith.constant dense<0.000000e+00> : vector<256xf32>
    %4 = vector.multi_reduction <add>, %0, %cst [1] : vector<256x128xf32> to vector<256xf32>
    %5 = vector.shape_cast %4 : vector<256xf32> to vector<256x1xf32>
    %cst_5 = arith.constant 7.812500e-03 : f32
    %6 = vector.broadcast %cst_5 : f32 to vector<256x1xf32>
    %7 = arith.mulf %5, %6 : vector<256x1xf32>
    %8 = arith.mulf %0, %0 : vector<256x128xf32>
    %cst_6 = arith.constant dense<0.000000e+00> : vector<256xf32>
    %9 = vector.multi_reduction <add>, %8, %cst_6 [1] : vector<256x128xf32> to vector<256xf32>
    %10 = vector.shape_cast %9 : vector<256xf32> to vector<256x1xf32>
    %cst_7 = arith.constant 7.812500e-03 : f32
    %11 = vector.broadcast %cst_7 : f32 to vector<256x1xf32>
    %12 = arith.mulf %10, %11 : vector<256x1xf32>
    %13 = arith.mulf %7, %7 : vector<256x1xf32>
    %14 = arith.subf %12, %13 : vector<256x1xf32>
    %cst_8 = arith.constant 0.000000e+00 : f32
    %15 = vector.broadcast %cst_8 : f32 to vector<256x1xf32>
    %16 = arith.maximumf %14, %15 : vector<256x1xf32>
    %17 = vector.broadcast %7 : vector<256x1xf32> to vector<256x128xf32>
    %18 = arith.subf %0, %17 : vector<256x128xf32>
    %cst_9 = arith.constant 9.99999974E-6 : f32
    %19 = vector.broadcast %cst_9 : f32 to vector<256x1xf32>
    %20 = arith.addf %16, %19 : vector<256x1xf32>
    %21 = math.rsqrt %20 : vector<256x1xf32>
    %22 = vector.broadcast %21 : vector<256x1xf32> to vector<256x128xf32>
    %23 = arith.mulf %18, %22 : vector<256x128xf32>
    %24 = vector.broadcast %1 : vector<1x128xf32> to vector<256x128xf32>
    %25 = arith.mulf %23, %24 : vector<256x128xf32>
    %26 = vector.broadcast %2 : vector<1x128xf32> to vector<256x128xf32>
    %27 = arith.addf %25, %26 : vector<256x128xf32>
    %28 = arith.truncf %27 : vector<256x128xf32> to vector<256x128xbf16>
    %c0_10 = arith.constant 0 : index
    %c0_11 = arith.constant 0 : index
    %29 = vector.load %arg3[%c0_10, %c0_11] : memref<128x512xbf16, #tpu.memory_space<vmem>>, vector<128x512xbf16>
    %cst_12 = arith.constant dense<0.000000e+00> : vector<256x512xf32>
    %30 = tpu.matmul %28, %29, %cst_12 {dimension_numbers = #tpu.dot_dimension_numbers<[1], [0], [0], [1], [0, 0, 1, 1], [], []>} : vector<256x128xbf16>, vector<128x512xbf16>, vector<256x512xf32> -> vector<256x512xf32>
    %c0_13 = arith.constant 0 : index
    %c0_14 = arith.constant 0 : index
    %31 = vector.load %arg4[%c0_13, %c0_14] : memref<1x512xf32, #tpu.memory_space<vmem>>, vector<1x512xf32>
    %32 = vector.broadcast %31 : vector<1x512xf32> to vector<256x512xf32>
    %33 = arith.addf %30, %32 : vector<256x512xf32>
    %34 = arith.negf %33 : vector<256x512xf32>
    %35 = math.exp %34 : vector<256x512xf32>
    %cst_15 = arith.constant 1.000000e+00 : f32
    %36 = vector.broadcast %cst_15 : f32 to vector<256x512xf32>
    %37 = arith.addf %36, %35 : vector<256x512xf32>
    %38 = arith.divf %36, %37 : vector<256x512xf32>
    %39 = arith.mulf %33, %38 : vector<256x512xf32>
    %40 = arith.truncf %39 : vector<256x512xf32> to vector<256x512xbf16>
    %c0_16 = arith.constant 0 : index
    %c0_17 = arith.constant 0 : index
    %41 = vector.load %arg5[%c0_16, %c0_17] : memref<512x128xbf16, #tpu.memory_space<vmem>>, vector<512x128xbf16>
    %cst_18 = arith.constant dense<0.000000e+00> : vector<256x128xf32>
    %42 = tpu.matmul %40, %41, %cst_18 {dimension_numbers = #tpu.dot_dimension_numbers<[1], [0], [0], [1], [0, 0, 1, 1], [], []>} : vector<256x512xbf16>, vector<512x128xbf16>, vector<256x128xf32> -> vector<256x128xf32>
    %43 = vector.broadcast %3 : vector<1x128xf32> to vector<256x128xf32>
    %44 = arith.addf %42, %43 : vector<256x128xf32>
    %45 = arith.addf %0, %44 : vector<256x128xf32>
    %c0_19 = arith.constant 0 : index
    %c0_20 = arith.constant 0 : index
    %46 = vector.load %arg6[%c0_19, %c0_20] : memref<256x128xf32, #tpu.memory_space<vmem>>, vector<256x128xf32>
    tpu.vector_store %arg6[%c0_19, %c0_20], %45 {strides = array<i32>} : memref<256x128xf32, #tpu.memory_space<vmem>>, vector<256x128xf32>,
    return
  }
  func.func @transform_0(%arg0: i32) -> (i32, i32) {
    %c0_i32 = arith.constant 0 : i32
    %c0_i32_0 = arith.constant 0 : i32
    return %arg0, %c0_i32 : i32, i32
  }
  func.func @transform_1(%arg0: i32) -> (i32, i32) {
    %c0_i32 = arith.constant 0 : i32
    %c0_i32_0 = arith.constant 0 : i32
    %c0_i32_1 = arith.constant 0 : i32
    return %c0_i32, %c0_i32_0 : i32, i32
  }
  func.func @transform_2(%arg0: i32) -> (i32, i32) {
    %c0_i32 = arith.constant 0 : i32
    %c0_i32_0 = arith.constant 0 : i32
    %c0_i32_1 = arith.constant 0 : i32
    return %c0_i32, %c0_i32_0 : i32, i32
  }
  func.func @transform_3(%arg0: i32) -> (i32, i32) {
    %c0_i32 = arith.constant 0 : i32
    %c0_i32_0 = arith.constant 0 : i32
    %c0_i32_1 = arith.constant 0 : i32
    return %c0_i32, %c0_i32_0 : i32, i32
  }
  func.func @transform_4(%arg0: i32) -> (i32, i32) {
    %c0_i32 = arith.constant 0 : i32
    %c0_i32_0 = arith.constant 0 : i32
    %c0_i32_1 = arith.constant 0 : i32
    return %c0_i32, %c0_i32_0 : i32, i32
  }
  func.func @transform_5(%arg0: i32) -> (i32, i32) {
    %c0_i32 = arith.constant 0 : i32
    %c0_i32_0 = arith.constant 0 : i32
    return %arg0, %c0_i32 : i32, i32
  }
}

</mosaic_0001>

<bundles_post_ra>
// kernel: tpu_custom_call.1
= control target key start
LH: loop header
LB: loop body
LE: loop exit
PB: predicated region body
PF: predicated region fallthrough
CT: control target
= control target key end

     0   :  { %10 = vsyncpa [#allocation3], 0  ;;  %s12214_s0 = inlined_call_operand.hbm [shape: f32[256,128], index: 0, kind: input, shape index: {}]   ;;  %s12215_s1 = inlined_call_operand.hbm [shape: f32[3,128], index: 1, kind: input, shape index: {}]   ;;  %s12216_s2 = inlined_call_operand.hbm [shape: bf16[128,512], index: 2, kind: input, shape index: {}]   ;;  %s12217_s3 = inlined_call_operand.hbm [shape: f32[1,512], index: 3, kind: input, shape index: {}]   ;;  %s12218_s4 = inlined_call_operand.hbm [shape: bf16[512,128], index: 4, kind: input, shape index: {}]   ;;  %s12219_s5 = inlined_call_operand.hbm [shape: f32[256,128], index: 5, kind: output, shape index: {}]  }
   0x1   :  { %11 = vsyncpa [#allocation6], 0 }
   0x2   :  { %12 = vsyncpa [#allocation9], 0  ;;  %s32_s20 = sshll.u32 %s12215_s1, 4  ;;  %s33_s20 = int_to_ptr.hbm [resolvable:$true] %s32_s20 }
   0x3   :  { %13 = vsyncpa [#allocation4], 0  ;;  %s6080_s21 = smov [#allocation5]   ;;  %s56_s25 = sshll.u32 %s12217_s3, 4  ;;  %s57_s25 = int_to_ptr.hbm [resolvable:$true] %s56_s25 }
   0x4   :  { %s34_s22 = sshll.u32 %s6080_s21, 4  ;;  %s6081_s26 = smov [#allocation8]   ;;  %s35_s22 = int_to_ptr.vmem [resolvable:$true] %s34_s22 }
   0x5   :  { %37 = dma.hbm_to_vmem [thread:$0]  %s33_s20, 64, %s35_s22, [#allocation6]  }
   0x6   :  { %s58_s27 = sshll.u32 %s6081_s26, 4  ;;  %s18_s30 = sshll.u32 %s12214_s0, 4  ;;  %s59_s27 = int_to_ptr.vmem [resolvable:$true] %s58_s27  ;;  %s19_s30 = int_to_ptr.hbm [resolvable:$true] %s18_s30 }
   0x7   :  { %61 = dma.hbm_to_vmem [thread:$0]  %s57_s25, 64, %s59_s27, [#allocation9]  }
   0x8   :  { %s6082_s1 = smov [#allocation2]   ;;  %s42_s9 = sshll.u32 %s12216_s2, 4  ;;  %s43_s9 = int_to_ptr.hbm [resolvable:$true] %s42_s9 }
   0x9   :  { %s20_s6 = sshll.u32 %s6082_s1, 4  ;;  %s6083_s10 = smov 128   ;;  %s21_s6 = int_to_ptr.vmem [resolvable:$true] %s20_s6 }
   0xa   :  { %s6084_s3 = smov 8   ;;  %s6085_s11 = smov [#allocation7]  }
   0xb   :  { %26 = dma.hbm_to_vmem [thread:$0]  %s19_s30, 4096, %s21_s6, [#allocation3], %s6083_s10, %s6083_s10, %s6084_s3  }
   0xc   :  { %s44_s12 = sshll.u32 %s6085_s11, 4  ;;  %s6086_s0 = smov 256   ;;  %s45_s12 = int_to_ptr.vmem [resolvable:$true] %s44_s12 }
   0xd   :  { %s6087_s13 = smov 16   ;;  %s66_s16 = sshll.u32 %s12218_s4, 4  ;;  %s67_s16 = int_to_ptr.hbm [resolvable:$true] %s66_s16 }
   0xe   :  { %50 = dma.hbm_to_vmem [thread:$0]  %s43_s9, 4096, %s45_s12, [#allocation6], %s6086_s0, %s6086_s0, %s6087_s13  }
   0xf   :  { %s6088_s17 = smov [#allocation10]   ;;  %s6089_s18 = smov 64  }
  0x10   :  { %s68_s2 = sshll.u32 %s6088_s17, 4  ;;  %s6090_s19 = smov 4   ;;  %s69_s2 = int_to_ptr.vmem [resolvable:$true] %s68_s2 }
  0x11   :  { %74 = dma.hbm_to_vmem [thread:$0]  %s67_s16, 4096, %s69_s2, [#allocation9], %s6089_s18, %s6089_s18, %s6090_s19  }
  0x12   :  { %6072 = dma.done.wait [#allocation3], 4096  }
  0x13   :  { %6073 = vsyncadd [#allocation3], 4294963200 }
  0x14   :  { %6074 = dma.done.wait [#allocation6], 4160  }
  0x15   :  { %6075 = vsyncadd [#allocation6], 4294963136 }
  0x16   :  { %6076 = dma.done.wait [#allocation9], 4160  }
  0x17   :  { %6077 = vsyncadd [#allocation9], 4294963136  ;;  %v6140_v0 = vld [vmem:[#allocation2] sm:$0xff]  ;;  %v6142_v1 = vld [vmem:[#allocation2 + $0x10] sm:$0xff]  ;;  %s6091_s4 = smov [#allocation11]   ;;  %s4813_s23 = sshll.u32 %s12219_s5, 4  ;;  %s4814_s23 = int_to_ptr.hbm [resolvable:$true] %s4813_s23 }
  0x18   :  { %130 = vadd.xlane.f32.xlu0 %v6140_v0  ;;  %134 = vadd.xlane.f32.xlu2 %v6142_v1  ;;  %v226_v2 = vmul.f32 %v6140_v0, %v6140_v0  ;;  %v6148_v3 = vld [vmem:[#allocation2 + $0x8] sm:$0xff]  ;;  %v6150_v4 = vld [vmem:[#allocation2 + $0x18] sm:$0xff]  ;;  %v228_v6 = vmul.f32 %v6142_v1, %v6142_v1  ;;  %v6158_v7 = vld [vmem:[#allocation2 + $0x20] sm:$0xff]  ;;  %s4811_s20 = sshll.u32 %s6091_s4, 4  ;;  %s4812_s20 = int_to_ptr.vmem [resolvable:$true] %s4811_s20 }
  0x19   :  { %v227_v5 = vmul.f32 %v6148_v3, %v6148_v3  ;;  %v229_v8 = vmul.f32 %v6150_v4, %v6150_v4  ;;  %v6163_v9 = vld [vmem:[#allocation2 + $0x28] sm:$0xff]  ;;  %v230_v11 = vmul.f32 %v6158_v7, %v6158_v7  ;;  %v6170_v12 = vld [vmem:[#allocation2 + $0x30] sm:$0xff]  ;;  %v6174_v14 = vld [vmem:[#allocation2 + $0x38] sm:$0xff] }
  0x1a   :  { %258 = vadd.xlane.f32.xlu1 %v226_v2  ;;  %v231_v10 = vmul.f32 %v6163_v9, %v6163_v9  ;;  %v232_v13 = vmul.f32 %v6170_v12, %v6170_v12  ;;  %v233_v15 = vmul.f32 %v6174_v14, %v6174_v14  ;;  %v104_v16 = vld [vmem:[#allocation2 + $0x48] sm:$0xff]  ;;  %v103_v17 = vld [vmem:[#allocation2 + $0x40] sm:$0xff]  ;;  %v105_v19 = vld [vmem:[#allocation2 + $0x50] sm:$0xff] }
  0x1b   :  { %v234_v18 = vmul.f32 %v103_v17, %v103_v17  ;;  %v235_v20 = vmul.f32 %v104_v16, %v104_v16  ;;  %v106_v21 = vld [vmem:[#allocation2 + $0x58] sm:$0xff]  ;;  %v236_v23 = vmul.f32 %v105_v19, %v105_v19  ;;  %v107_v24 = vld [vmem:[#allocation2 + $0x60] sm:$0xff]  ;;  %v108_v26 = vld [vmem:[#allocation2 + $0x68] sm:$0xff] }
  0x1c   :  { %v237_v22 = vmul.f32 %v106_v21, %v106_v21  ;;  %v238_v25 = vmul.f32 %v107_v24, %v107_v24  ;;  %v239_v27 = vmul.f32 %v108_v26, %v108_v26  ;;  %v110_v28 = vld [vmem:[#allocation2 + $0x78] sm:$0xff]  ;;  %v109_v29 = vld [vmem:[#allocation2 + $0x70] sm:$0xff]  ;;  %v111_v31 = vld [vmem:[#allocation2 + $0x80] sm:$0xff] }
  0x1d   :  { %v240_v30 = vmul.f32 %v109_v29, %v109_v29  ;;  %v241_v32 = vmul.f32 %v110_v28, %v110_v28  ;;  %v112_v33 = vld [vmem:[#allocation2 + $0x88] sm:$0xff]  ;;  %v242_v35 = vmul.f32 %v111_v31, %v111_v31  ;;  %v113_v36 = vld [vmem:[#allocation2 + $0x90] sm:$0xff]  ;;  %v114_v38 = vld [vmem:[#allocation2 + $0x98] sm:$0xff] }
  0x1e   :  { %v243_v34 = vmul.f32 %v112_v33, %v112_v33  ;;  %v244_v37 = vmul.f32 %v113_v36, %v113_v36  ;;  %v4942_v39 = vld [vmem:[#allocation7 + $0xe0] sm:$0xf]  ;;  %v5242_v40 = vld [vmem:[#allocation7 + $0xec] sm:$0xf0]  ;;  %v5240_v41 = vld [vmem:[#allocation7 + $0xe4] sm:$0xf]  ;;  %v245_v54 = vmul.f32 %v114_v38, %v114_v38 }
  0x1f   :  { %v4943_v42 = vor.u32 %v5242_v40, %v4942_v39  ;;  %v4944_v43 = vld [vmem:[#allocation7 + $0xf0] sm:$0xf0]  ;;  %v4950_v44 = vld [vmem:[#allocation7 + $0xe8] sm:$0xf]  ;;  %v5243_v45 = vld [vmem:[#allocation7 + $0xf4] sm:$0xf0] }
  0x20   :  { %132 = vadd.xlane.f32.xlu0 %v6148_v3  ;;  %136 = vadd.xlane.f32.xlu2 %v6150_v4  ;;  %v4947_v46 = vor.u32 %v5240_v41, %v4944_v43  ;;  %v4951_v47 = vor.u32 %v5243_v45, %v4950_v44  ;;  %v5241_v48 = vld [vmem:[#allocation7 + $0xec] sm:$0xf]  ;;  %v4952_v49 = vld [vmem:[#allocation7 + $0xf8] sm:$0xf0]  ;;  %v4926_v51 = vld [vmem:[#allocation7 + $0xc0] sm:$0xf] }
  0x21   :  { %1150 = vmatpush.bf16.msra.mxu0 %v4943_v42  ;;  %v4955_v50 = vor.u32 %v5241_v48, %v4952_v49  ;;  %v5238_v52 = vld [vmem:[#allocation7 + $0xcc] sm:$0xf0]  ;;  %v5236_v53 = vld [vmem:[#allocation7 + $0xc4] sm:$0xf]  ;;  %v4928_v56 = vld [vmem:[#allocation7 + $0xd0] sm:$0xf0] }
  0x22   :  { %260 = vadd.xlane.f32.xlu1 %v227_v5  ;;  %1239 = vmatpush.bf16.msra.mxu1 %v4947_v46  ;;  %v4927_v55 = vor.u32 %v5238_v52, %v4926_v51  ;;  %v4934_v57 = vld [vmem:[#allocation7 + $0xc8] sm:$0xf]  ;;  %v4931_v58 = vor.u32 %v5236_v53, %v4928_v56  ;;  %v5239_v59 = vld [vmem:[#allocation7 + $0xd4] sm:$0xf0]  ;;  %v5237_v60 = vld [vmem:[#allocation7 + $0xcc] sm:$0xf] }
  0x23   :  { %1328 = vmatpush.bf16.msra.mxu2 %v4951_v47  ;;  %1417 = vmatpush.bf16.msra.mxu3 %v4955_v50  ;;  %v4936_v61 = vld [vmem:[#allocation7 + $0xd8] sm:$0xf0]  ;;  %v4935_v63 = vor.u32 %v5239_v59, %v4934_v57  ;;  %v4910_v5 = vld [vmem:[#allocation7 + $0xa0] sm:$0xf]  ;;  %v4880_v40 = vld [vmem:[#allocation7 + $0x70] sm:$0xf0] }
  0x24   :  { %v115_v62 = vld [vmem:[#allocation2 + $0xa0] sm:$0xff]  ;;  %v4939_v2 = vor.u32 %v5237_v60, %v4936_v61  ;;  %v4886_v41 = vld [vmem:[#allocation7 + $0x68] sm:$0xf]  ;;  %v5227_v42 = vld [vmem:[#allocation7 + $0x74] sm:$0xf0] }
  0x25   :  { %1151 = vmatpush.bf16.msra.mxu0 %v4927_v55  ;;  %v4887_v44 = vor.u32 %v5227_v42, %v4886_v41  ;;  %v5225_v45 = vld [vmem:[#allocation7 + $0x6c] sm:$0xf]  ;;  %v4888_v46 = vld [vmem:[#allocation7 + $0x78] sm:$0xf0]  ;;  %v4862_v51 = vld [vmem:[#allocation7 + $0x40] sm:$0xf] }
  0x26   :  { %1240 = vmatpush.bf16.msra.mxu1 %v4931_v58  ;;  %v4891_v47 = vor.u32 %v5225_v45, %v4888_v46  ;;  %v5222_v52 = vld [vmem:[#allocation7 + $0x4c] sm:$0xf0]  ;;  %v5220_v56 = vld [vmem:[#allocation7 + $0x44] sm:$0xf]  ;;  %v4864_v57 = vld [vmem:[#allocation7 + $0x50] sm:$0xf0] }
  0x27   :  { %1329 = vmatpush.bf16.msra.mxu2 %v4935_v63  ;;  %1418 = vmatpush.bf16.msra.mxu3 %v4939_v2  ;;  %v4863_v55 = vor.u32 %v5222_v52, %v4862_v51  ;;  %v4870_v59 = vld [vmem:[#allocation7 + $0x48] sm:$0xf]  ;;  %v5223_v60 = vld [vmem:[#allocation7 + $0x54] sm:$0xf0]  ;;  %v5221_v61 = vld [vmem:[#allocation7 + $0x4c] sm:$0xf]  ;;  %v4867_v63 = vor.u32 %v5220_v56, %v4864_v57 }
  0x28   :  { %262 = vadd.xlane.f32.xlu0 %v228_v6  ;;  %138 = vadd.xlane.f32.xlu2 %v6158_v7  ;;  %v5234_v6 = vld [vmem:[#allocation7 + $0xac] sm:$0xf0]  ;;  %v4871_v2 = vor.u32 %v5223_v60, %v4870_v59  ;;  %v5215_v42 = vld [vmem:[#allocation7 + $0x14] sm:$0xf0]  ;;  %v4840_v46 = vld [vmem:[#allocation7 + $0x18] sm:$0xf0] }
  0x2a   :  { %264 = vadd.xlane.f32.xlu1 %v229_v8  ;;  %v5232_v8 = vld [vmem:[#allocation7 + $0xa4] sm:$0xf] }
  0x30   :  { %140 = vadd.xlane.f32.xlu0 %v6163_v9  ;;  %268 = vadd.xlane.f32.xlu2 %v231_v10  ;;  %v4911_v10 = vor.u32 %v5234_v6, %v4910_v5  ;;  %v4872_v5 = vld [vmem:[#allocation7 + $0x58] sm:$0xf0] }
  0x31   :  { %v4875_v6 = vor.u32 %v5221_v61, %v4872_v5 }
  0x32   :  { %266 = vadd.xlane.f32.xlu1 %v230_v11  ;;  %v4912_v11 = vld [vmem:[#allocation7 + $0xb0] sm:$0xf0]  ;;  %1152 = vmatpush.bf16.msra.mxu0 %v4911_v10  ;;  %v4846_v10 = vld [vmem:[#allocation7 + $0x20] sm:$0xf] }
  0x38   :  { %142 = vadd.xlane.f32.xlu0 %v6170_v12  ;;  %270 = vadd.xlane.f32.xlu2 %v232_v13  ;;  %v4918_v13 = vld [vmem:[#allocation7 + $0xa8] sm:$0xf] }
  0x3a   :  { %144 = vadd.xlane.f32.xlu1 %v6174_v14 }
  0x40   :  { %272 = vadd.xlane.f32.xlu0 %v233_v15  ;;  %148 = vadd.xlane.f32.xlu2 %v104_v16  ;;  %v5235_v15 = vld [vmem:[#allocation7 + $0xb4] sm:$0xf0]  ;;  %v4915_v16 = vor.u32 %v5232_v8, %v4912_v11  ;;  %v5218_v11 = vld [vmem:[#allocation7 + $0x2c] sm:$0xf0] }
  0x42   :  { %146 = vadd.xlane.f32.xlu1 %v103_v17  ;;  %v4919_v17 = vor.u32 %v5235_v15, %v4918_v13  ;;  %1241 = vmatpush.bf16.msra.mxu1 %v4915_v16  ;;  %v5216_v13 = vld [vmem:[#allocation7 + $0x24] sm:$0xf]  ;;  %v4847_v15 = vor.u32 %v5218_v11, %v4846_v10  ;;  %v4848_v16 = vld [vmem:[#allocation7 + $0x30] sm:$0xf0] }
  0x44   :  { %1330 = vmatpush.bf16.msra.mxu2 %v4919_v17  ;;  %v4854_v17 = vld [vmem:[#allocation7 + $0x28] sm:$0xf] }
  0x48   :  { %274 = vadd.xlane.f32.xlu0 %v234_v18  ;;  %150 = vadd.xlane.f32.xlu2 %v105_v19  ;;  %v5233_v18 = vld [vmem:[#allocation7 + $0xac] sm:$0xf]  ;;  %v4920_v19 = vld [vmem:[#allocation7 + $0xb8] sm:$0xf0] }
  0x4a   :  { %276 = vadd.xlane.f32.xlu1 %v235_v20  ;;  %v4923_v20 = vor.u32 %v5233_v18, %v4920_v19  ;;  %v5219_v18 = vld [vmem:[#allocation7 + $0x34] sm:$0xf0] }
  0x4c   :  { %1419 = vmatpush.bf16.msra.mxu3 %v4923_v20 }
  0x50   :  { %152 = vadd.xlane.f32.xlu0 %v106_v21  ;;  %280 = vadd.xlane.f32.xlu2 %v237_v22  ;;  %v116_v21 = vld [vmem:[#allocation2 + $0xa8] sm:$0xff]  ;;  %v4894_v22 = vld [vmem:[#allocation7 + $0x80] sm:$0xf] }
  0x52   :  { %278 = vadd.xlane.f32.xlu1 %v236_v23  ;;  %v5230_v23 = vld [vmem:[#allocation7 + $0x8c] sm:$0xf0] }
  0x58   :  { %154 = vadd.xlane.f32.xlu0 %v107_v24  ;;  %282 = vadd.xlane.f32.xlu2 %v238_v25  ;;  %v5228_v24 = vld [vmem:[#allocation7 + $0x84] sm:$0xf]  ;;  %v246_v25 = vmul.f32 %v115_v62, %v115_v62 }
  0x5a   :  { %156 = vadd.xlane.f32.xlu1 %v108_v26  ;;  %v4895_v26 = vor.u32 %v5230_v23, %v4894_v22  ;;  %v4851_v22 = vor.u32 %v5216_v13, %v4848_v16  ;;  %v4855_v23 = vor.u32 %v5219_v18, %v4854_v17 }
  0x5c   :  { %1153 = vmatpush.bf16.msra.mxu0 %v4895_v26 }
  0x60   :  { %284 = vadd.xlane.f32.xlu0 %v239_v27  ;;  %160 = vadd.xlane.f32.xlu2 %v110_v28  ;;  %v4896_v27 = vld [vmem:[#allocation7 + $0x90] sm:$0xf0]  ;;  %v4902_v28 = vld [vmem:[#allocation7 + $0x88] sm:$0xf] }
  0x62   :  { %158 = vadd.xlane.f32.xlu1 %v109_v29  ;;  %v5231_v29 = vld [vmem:[#allocation7 + $0x94] sm:$0xf0] }
  0x68   :  { %286 = vadd.xlane.f32.xlu0 %v240_v30  ;;  %162 = vadd.xlane.f32.xlu2 %v111_v31  ;;  %v4899_v30 = vor.u32 %v5228_v24, %v4896_v27  ;;  %v4903_v31 = vor.u32 %v5231_v29, %v4902_v28  ;;  %v5217_v24 = vld [vmem:[#allocation7 + $0x2c] sm:$0xf]  ;;  %v118_v29 = vld [vmem:[#allocation2 + $0xb8] sm:$0xff] }
  0x6a   :  { %288 = vadd.xlane.f32.xlu1 %v241_v32  ;;  %v5229_v32 = vld [vmem:[#allocation7 + $0x8c] sm:$0xf]  ;;  %1242 = vmatpush.bf16.msra.mxu1 %v4899_v30 }
  0x6b   :  { %1331 = vmatpush.bf16.msra.mxu2 %v4903_v31 }
  0x6f   :  { %1332 = vmatpush.bf16.msra.mxu2 %v4887_v44 }
  0x70   :  { %164 = vadd.xlane.f32.xlu0 %v112_v33  ;;  %292 = vadd.xlane.f32.xlu2 %v243_v34  ;;  %v4904_v33 = vld [vmem:[#allocation7 + $0x98] sm:$0xf0]  ;;  %v247_v34 = vmul.f32 %v116_v21, %v116_v21 }
  0x72   :  { %290 = vadd.xlane.f32.xlu1 %v242_v35  ;;  %v4907_v35 = vor.u32 %v5229_v32, %v4904_v33  ;;  %v249_v32 = vmul.f32 %v118_v29, %v118_v29 }
  0x73   :  { %1333 = vmatpush.bf16.msra.mxu2 %v4871_v2 }
  0x74   :  { %1420 = vmatpush.bf16.msra.mxu3 %v4907_v35  ;;  %v5214_v35 = vld [vmem:[#allocation7 + $0xc] sm:$0xf0] }
  0x77   :  { %1334 = vmatpush.bf16.msra.mxu2 %v4855_v23 }
  0x78   :  { %166 = vadd.xlane.f32.xlu0 %v113_v36  ;;  %294 = vadd.xlane.f32.xlu2 %v244_v37  ;;  %v4878_v36 = vld [vmem:[#allocation7 + $0x60] sm:$0xf]  ;;  %v5226_v37 = vld [vmem:[#allocation7 + $0x6c] sm:$0xf0] }
  0x79   :  { %v4879_v39 = vor.u32 %v5226_v37, %v4878_v36  ;;  %1421 = vmatpush.bf16.msra.mxu3 %v4891_v47  ;;  %v5212_v37 = vld [vmem:[#allocation7 + $0x4] sm:$0xf] }
  0x7a   :  { %168 = vadd.xlane.f32.xlu1 %v114_v38  ;;  %v5224_v38 = vld [vmem:[#allocation7 + $0x64] sm:$0xf] }
  0x7b   :  { %v4883_v43 = vor.u32 %v5224_v38, %v4880_v40  ;;  %1154 = vmatpush.bf16.msra.mxu0 %v4879_v39  ;;  %v4832_v38 = vld [vmem:[#allocation7 + $0x10] sm:$0xf0]  ;;  %v4838_v39 = vld [vmem:[#allocation7 + $0x8] sm:$0xf] }
  0x7c   :  { %v4835_v44 = vor.u32 %v5212_v37, %v4832_v38  ;;  %v4839_v45 = vor.u32 %v5215_v42, %v4838_v39 }
  0x7d   :  { %1243 = vmatpush.bf16.msra.mxu1 %v4883_v43  ;;  %1422 = vmatpush.bf16.msra.mxu3 %v4875_v6  ;;  %v5213_v43 = vld [vmem:[#allocation7 + $0xc] sm:$0xf] }
  0x7e   :  { %1335 = vmatpush.bf16.msra.mxu2 %v4839_v45 }
  0x7f   :  { %1155 = vmatpush.bf16.msra.mxu0 %v4863_v55 }
  0x80   :  { %296 = vadd.xlane.f32.xlu0 %v245_v54  ;;  %172 = vadd.xlane.f32.xlu2 %v116_v21  ;;  %v117_v54 = vld [vmem:[#allocation2 + $0xb0] sm:$0xff] }
  0x81   :  { %1244 = vmatpush.bf16.msra.mxu1 %v4867_v63  ;;  %v248_v33 = vmul.f32 %v117_v54, %v117_v54 }
  0x82   :  { %170 = vadd.xlane.f32.xlu1 %v115_v62 }
  0x83   :  { %1156 = vmatpush.bf16.msra.mxu0 %v4847_v15 }
  0x85   :  { %1245 = vmatpush.bf16.msra.mxu1 %v4851_v22 }
  0x88   :  { %298 = vadd.xlane.f32.xlu0 %v246_v25  ;;  %174 = vadd.xlane.f32.xlu2 %v117_v54  ;;  %v4856_v25 = vld [vmem:[#allocation7 + $0x38] sm:$0xf0] }
  0x89   :  { %v4859_v28 = vor.u32 %v5217_v24, %v4856_v25  ;;  %1246 = vmatpush.bf16.msra.mxu1 %v4835_v44 }
  0x8a   :  { %300 = vadd.xlane.f32.xlu1 %v247_v34  ;;  %v4830_v34 = vld [vmem:[#allocation7] sm:$0xf] }
  0x8b   :  { %v131_v48 = vpop.xlane.xlu0 %130  ;;  %v135_v49 = vpop.xlane.xlu2 %134  ;;  %1423 = vmatpush.bf16.msra.mxu3 %v4859_v28  ;;  %v4831_v41 = vor.u32 %v5214_v35, %v4830_v34 }
  0x8c   :  { %v6180_v50 = vmul.f32 0.0078125, %v131_v48  ;;  %v6184_v26 = vmul.f32 0.0078125, %v135_v49  ;;  %v4843_v49 = vor.u32 %v5213_v43, %v4840_v46 }
  0x8d   :  { %v259_v53 = vpop.xlane.xlu1 %258  ;;  %1157 = vmatpush.bf16.msra.mxu0 %v4831_v41 }
  0x8e   :  { %v354_v58 = vmul.f32 %v6180_v50, %v6180_v50  ;;  %v322_v62 = vmul.f32 0.0078125, %v259_v53  ;;  %v356_v51 = vmul.f32 %v6184_v26, %v6184_v26  ;;  %v450_v43 = vsub.f32 %v6140_v0, %v6180_v50 }
  0x8f   :  { %1424 = vmatpush.bf16.msra.mxu3 %v4843_v49 }
  0x90   :  { %v386_v8 = vsub.f32 %v322_v62, %v354_v58  ;;  %176 = vadd.xlane.f32.xlu0 %v118_v29  ;;  %304 = vadd.xlane.f32.xlu2 %v249_v32  ;;  %v120_v29 = vld [vmem:[#allocation2 + $0xc8] sm:$0xff] }
  0x92   :  { %v418_v19 = vmax.f32 %v386_v8, 0.0  ;;  %302 = vadd.xlane.f32.xlu1 %v248_v33  ;;  %v119_v8 = vld [vmem:[#allocation2 + $0xc0] sm:$0xff] }
  0x93   :  { %v133_v20 = vpop.xlane.xlu0 %132  ;;  %v137_v21 = vpop.xlane.xlu2 %136  ;;  %v250_v33 = vmul.f32 %v119_v8, %v119_v8 }
  0x94   :  { %v6186_v27 = vmul.f32 0.0078125, %v133_v20  ;;  %v6188_v30 = vadd.f32 1e-05, %v418_v19  ;;  %v6193_v47 = vmul.f32 0.0078125, %v137_v21 }
  0x95   :  { %v261_v31 = vpop.xlane.xlu1 %260 }
  0x96   :  { %v355_v36 = vmul.f32 %v6186_v27, %v6186_v27  ;;  %5291 = vrsqrt.f32 %v6188_v30  ;;  %v323_v40 = vmul.f32 0.0078125, %v261_v31  ;;  %v357_v57 = vmul.f32 %v6193_v47, %v6193_v47 }
  0x97   :  { %vm520_vm1 = vweird.f32 %v6188_v30 }
  0x98   :  { %v387_v48 = vsub.f32 %v323_v40, %v355_v36  ;;  %178 = vadd.xlane.f32.xlu0 %v119_v8  ;;  %v251_v36 = vmul.f32 %v120_v29, %v120_v29  ;;  %306 = vadd.xlane.f32.xlu2 %v250_v33  ;;  %v6259_v8 = vld [vmem:[#allocation5] ss:$0 sm:$0xff] }
  0x9a   :  { %v419_v52 = vmax.f32 %v387_v48, 0.0  ;;  %180 = vadd.xlane.f32.xlu1 %v120_v29 }
  0x9b   :  { %v263_v53 = vpop.xlane.xlu0 %262  ;;  %v139_v54 = vpop.xlane.xlu2 %138 }
  0x9c   :  { %v324_v55 = vmul.f32 0.0078125, %v263_v53  ;;  %v6197_v56 = vpop.eup %5291  ;;  %v6201_v58 = vadd.f32 1e-05, %v419_v52  ;;  %v6207_v5 = vmul.f32 0.0078125, %v139_v54 }
  0x9d   :  { %v265_v59 = vpop.xlane.xlu1 %264  ;;  %v515_v60 = vmul.f32 %v6197_v56, %v6188_v30  ;;  %vm521_vm0 = vweird.f32 %v6197_v56 }
  0x9e   :  { %v388_v61 = vsub.f32 %v324_v55, %v356_v51  ;;  %5293 = vrsqrt.f32 %v6201_v58  ;;  %v325_v62 = vmul.f32 0.0078125, %v265_v59  ;;  %v358_v20 = vmul.f32 %v6207_v5, %v6207_v5  ;;  %vm6231_vm2 = vmor %vm520_vm1, %vm521_vm0  ;;  %v5267_v59 = vld [vmem:[#allocation10 + $0xb8] sm:$0xff] }
  0x9f   :  { %v516_v63 = vmul.f32 %v6197_v56, %v515_v60  ;;  %vm530_vm4 = vweird.f32 %v6201_v58  ;;  %v451_v55 = vsub.f32 %v6148_v3, %v6186_v27  ;;  %v5251_v60 = vld [vmem:[#allocation10 + $0x38] sm:$0xff]  ;;  %v6261_v3 = vld [vmem:[#allocation2 + $0xd0] sm:$0xff]  ;;  %4565 = vmatpush.bf16.msrb.mxu2 %v5267_v59 }
  0xa0   :  { %v420_v2 = vmax.f32 %v388_v61, 0.0  ;;  %v389_v6 = vsub.f32 %v325_v62, %v357_v57  ;;  %308 = vadd.xlane.f32.xlu0 %v251_v36  ;;  %v5275_v61 = vld [vmem:[#allocation10 + $0xf8] sm:$0xff]  ;;  %4387 = vmatpush.bf16.msrb.mxu0 %v5251_v60  ;;  %v122_v36 = vld [vmem:[#allocation2 + $0xd8] sm:$0xff] }
  0xa1   :  { %v517_v10 = vmul.f32 0.5, %v516_v63  ;;  %4654 = vmatpush.bf16.msrb.mxu3 %v5275_v61  ;;  %184 = vadd.xlane.f32.xlu2 %v122_v36 }
  0xa2   :  { %v6209_v11 = vadd.f32 1e-05, %v420_v2  ;;  %v421_v13 = vmax.f32 %v389_v6, 0.0  ;;  %182 = vadd.xlane.f32.xlu1 %v6261_v3 }
  0xa3   :  { %v141_v15 = vpop.xlane.xlu0 %140  ;;  %v269_v16 = vpop.xlane.xlu2 %268  ;;  %v518_v19 = vsub.f32 1.5, %v517_v10 }
  0xa4   :  { %5295 = vrsqrt.f32 %v6209_v11  ;;  %v6212_v17 = vmul.f32 0.0078125, %v141_v15  ;;  %v5294_v18 = vpop.eup %5293  ;;  %v6216_v21 = vadd.f32 1e-05, %v421_v13  ;;  %v327_v22 = vmul.f32 0.0078125, %v269_v16 }
  0xa5   :  { %v267_v23 = vpop.xlane.xlu1 %266  ;;  %v525_v24 = vmul.f32 %v5294_v18, %v6201_v58  ;;  %v519_v34 = vmul.f32 %v6197_v56, %v518_v19  ;;  %vm531_vm3 = vweird.f32 %v5294_v18  ;;  %vm540_vm9 = vweird.f32 %v6209_v11 }
  0xa6   :  { %v359_v25 = vmul.f32 %v6212_v17, %v6212_v17  ;;  %5297 = vrsqrt.f32 %v6216_v21  ;;  %v326_v28 = vmul.f32 0.0078125, %v267_v23  ;;  %vm532_vm5 = vmor %vm530_vm4, %vm531_vm3  ;;  %vm550_vm6 = vweird.f32 %v6216_v21 }
  0xa7   :  { %v526_v31 = vmul.f32 %v5294_v18, %v525_v24  ;;  %v523_v30 = vsel %vm6231_vm2, %v6197_v56, %v519_v34 }
  0xa8   :  { %v391_v32 = vsub.f32 %v327_v22, %v359_v25  ;;  %v390_v35 = vsub.f32 %v326_v28, %v358_v20  ;;  %v834_v56 = vmul.f32 %v523_v30, %v450_v43  ;;  %v6272_v28 = vld [vmem:[#allocation5 + $0x1] ss:$0 sm:$0xff] }
  0xa9   :  { %v527_v38 = vmul.f32 0.5, %v526_v31 }
  0xaa   :  { %v6224_v37 = vpop.eup %5295  ;;  %v423_v39 = vmax.f32 %v391_v32, 0.0  ;;  %v422_v41 = vmax.f32 %v390_v35, 0.0  ;;  %v867_v25 = vmul.f32 %v6259_v8, %v834_v56  ;;  %v5259_v35 = vld [vmem:[#allocation10 + $0x78] sm:$0xff] }
  0xab   :  { %v535_v40 = vmul.f32 %v6224_v37, %v6209_v11  ;;  %v143_v42 = vpop.xlane.xlu0 %142  ;;  %v528_v45 = vsub.f32 1.5, %v527_v38  ;;  %v271_v54 = vpop.xlane.xlu2 %270  ;;  %4476 = vmatpush.bf16.msrb.mxu1 %v5259_v35  ;;  %vm541_vm8 = vweird.f32 %v6224_v37  ;;  %v453_v11 = vsub.f32 %v6150_v4, %v6193_v47 }
  0xac   :  { %v6235_v46 = vadd.f32 1e-05, %v423_v39  ;;  %v6237_v48 = vpop.eup %5297  ;;  %v6243_v49 = vadd.f32 1e-05, %v422_v41  ;;  %v6245_v51 = vmul.f32 0.0078125, %v143_v42  ;;  %v328_v2 = vmul.f32 0.0078125, %v271_v54  ;;  %vm6303_vm11 = vmor %vm540_vm9, %vm541_vm8 }
  0xad   :  { %v145_v0 = vpop.xlane.xlu1 %144  ;;  %v529_v50 = vmul.f32 %v5294_v18, %v528_v45  ;;  %v536_v52 = vmul.f32 %v6224_v37, %v535_v40  ;;  %v545_v53 = vmul.f32 %v6237_v48, %v6216_v21  ;;  %vm551_vm7 = vweird.f32 %v6237_v48 }
  0xae   :  { %5299 = vrsqrt.f32 %v6235_v46  ;;  %v360_v63 = vmul.f32 %v6245_v51, %v6245_v51  ;;  %v6257_v6 = vmul.f32 0.0078125, %v145_v0  ;;  %v900_v41 = vadd.f32 %v6272_v28, %v867_v25  ;;  %vm6286_vm10 = vmor %vm550_vm6, %vm551_vm7 }
  0xaf   :  { %5301 = vrsqrt.f32 %v6243_v49  ;;  %v533_v57 = vsel %vm532_vm5, %v5294_v18, %v529_v50  ;;  %v546_v58 = vmul.f32 %v6237_v48, %v545_v53  ;;  %v537_v27 = vmul.f32 0.5, %v536_v52 }
  0xb0   :  { %v835_v62 = vmul.f32 %v533_v57, %v451_v55  ;;  %v361_v13 = vmul.f32 %v6257_v6, %v6257_v6  ;;  %v392_v23 = vsub.f32 %v328_v2, %v360_v63  ;;  %v252_v2 = vmul.f32 %v6261_v3, %v6261_v3 }
  0xb1   :  { %v547_v10 = vmul.f32 0.5, %v546_v58  ;;  %v538_v29 = vsub.f32 1.5, %v537_v27  ;;  %v253_v27 = vmul.f32 %v122_v36, %v122_v36  ;;  %vm570_vm12 = vweird.f32 %v6235_v46 }
  0xb2   :  { %v868_v16 = vmul.f32 %v6259_v8, %v835_v62  ;;  %v424_v40 = vmax.f32 %v392_v23, 0.0  ;;  %310 = vadd.xlane.f32.xlu0 %v252_v2  ;;  %vm560_vm14 = vweird.f32 %v6243_v49 }
  0xb3   :  { %v273_v15 = vpop.xlane.xlu0 %272  ;;  %v548_v19 = vsub.f32 1.5, %v547_v10  ;;  %v149_v31 = vpop.xlane.xlu2 %148  ;;  %v539_v42 = vmul.f32 %v6224_v37, %v538_v29  ;;  %312 = vadd.xlane.f32.xlu1 %v253_v27 }
  0xb4   :  { %v6266_v18 = vpop.eup %5299  ;;  %v329_v20 = vmul.f32 0.0078125, %v273_v15  ;;  %v901_v34 = vadd.f32 %v6272_v28, %v868_v16  ;;  %v6291_v45 = vmul.f32 0.0078125, %v149_v31  ;;  %v6307_v55 = vadd.f32 1e-05, %v424_v40  ;;  %v124_v31 = vld [vmem:[#allocation2 + $0xe8] sm:$0xff] }
  0xb5   :  { %v6269_v22 = vpop.eup %5301  ;;  %v147_v24 = vpop.xlane.xlu1 %146  ;;  %v565_v32 = vmul.f32 %v6266_v18, %v6235_v46  ;;  %v549_v38 = vmul.f32 %v6237_v48, %v548_v19  ;;  %v543_v58 = vsel %vm6303_vm11, %v6224_v37, %v539_v42  ;;  %v123_v37 = vld [vmem:[#allocation2 + $0xe0] sm:$0xff]  ;;  %vm571_vm13 = vweird.f32 %v6266_v18 }
  0xb6   :  { %v393_v33 = vsub.f32 %v329_v20, %v361_v13  ;;  %v555_v39 = vmul.f32 %v6269_v22, %v6243_v49  ;;  %v932_v30 = vpack.c.bf16 %v901_v34, %v900_v41  ;;  %v6299_v53 = vmul.f32 0.0078125, %v147_v24  ;;  %186 = vadd.xlane.f32.xlu2 %v123_v37  ;;  %vm6337_vm0 = vmor %vm570_vm12, %vm571_vm13 }
  0xb7   :  { %v566_v21 = vmul.f32 %v6266_v18, %v565_v32  ;;  %v553_v0 = vsel %vm6286_vm10, %v6237_v48, %v549_v38  ;;  %v452_v48 = vsub.f32 %v6142_v1, %v6184_v26  ;;  %v363_v47 = vmul.f32 %v6291_v45, %v6291_v45 }
  0xb8   :  { %v425_v43 = vmax.f32 %v393_v33, 0.0  ;;  %v556_v50 = vmul.f32 %v6269_v22, %v555_v39  ;;  %1158 = vmatmul.bf16.vlgmr.msra.gmra.mxu0 %v932_v30  ;;  %1247 = vmatmul.bf16.vlgmr.msra.gmra.mxu1 %v932_v30  ;;  %v837_v4 = vmul.f32 %v553_v0, %v453_v11  ;;  %v362_v62 = vmul.f32 %v6299_v53, %v6299_v53 }
  0xb9   :  { %1336 = vmatmul.bf16.vlgmr.msra.gmra.mxu2 %v932_v30  ;;  %1425 = vmatmul.bf16.vlgmr.msra.gmra.mxu3 %v932_v30  ;;  %v567_v60 = vmul.f32 0.5, %v566_v21  ;;  %v836_v26 = vmul.f32 %v543_v58, %v452_v48  ;;  %vm561_vm15 = vweird.f32 %v6269_v22  ;;  %v255_v39 = vmul.f32 %v124_v31, %v124_v31 }
  0xba   :  { %v6297_v52 = vadd.f32 1e-05, %v425_v43  ;;  %v557_v61 = vmul.f32 0.5, %v556_v50  ;;  %v870_v13 = vmul.f32 %v6259_v8, %v837_v4  ;;  %v254_v43 = vmul.f32 %v123_v37, %v123_v37  ;;  %vm6352_vm1 = vmor %vm560_vm14, %vm561_vm15  ;;  %188 = vadd.xlane.f32.xlu0 %v124_v31  ;;  %v5266_v4 = vld [vmem:[#allocation10 + $0xb0] sm:$0xff] }
  0xbb   :  { %v275_v56 = vpop.xlane.xlu0 %274  ;;  %v151_v1 = vpop.xlane.xlu2 %150  ;;  %v568_v15 = vsub.f32 1.5, %v567_v60  ;;  %v869_v23 = vmul.f32 %v6259_v8, %v836_v26  ;;  %4566 = vmatpush.bf16.msrb.mxu2 %v5266_v4  ;;  %vm580_vm4 = vweird.f32 %v6307_v55  ;;  %v5273_v4 = vld [vmem:[#allocation10 + $0xe8] sm:$0xff] }
  0xbc   :  { %5303 = vrsqrt.f32 %v6297_v52  ;;  %v330_v63 = vmul.f32 0.0078125, %v275_v56  ;;  %v558_v16 = vsub.f32 1.5, %v557_v61  ;;  %v903_v29 = vadd.f32 %v6272_v28, %v870_v13  ;;  %314 = vadd.xlane.f32.xlu1 %v254_v43 }
  0xbd   :  { %v277_v57 = vpop.xlane.xlu1 %276  ;;  %5305 = vrsqrt.f32 %v6307_v55  ;;  %v569_v32 = vmul.f32 %v6266_v18, %v568_v15  ;;  %v902_v38 = vadd.f32 %v6272_v28, %v869_v23  ;;  %v6346_v41 = vmul.f32 0.0078125, %v151_v1  ;;  %v125_v1 = vld [vmem:[#allocation2 + $0xf0] sm:$0xff] }
  0xbe   :  { %v331_v59 = vmul.f32 0.0078125, %v277_v57  ;;  %v394_v19 = vsub.f32 %v330_v63, %v362_v62  ;;  %v559_v33 = vmul.f32 %v6269_v22, %v558_v16  ;;  %316 = vadd.xlane.f32.xlu2 %v255_v39  ;;  %v454_v56 = vsub.f32 %v6158_v7, %v6207_v5 }
  0xbf   :  { %v933_v30 = vpack.c.bf16 %v903_v29, %v902_v38  ;;  %v573_v0 = vsel %vm6337_vm0, %v6266_v18, %v569_v32  ;;  %v455_v57 = vsub.f32 %v6163_v9, %v6212_v17  ;;  %v364_v58 = vmul.f32 %v6346_v41, %v6346_v41  ;;  %v5258_v17 = vld [vmem:[#allocation10 + $0x70] sm:$0xff] }
  0xc0   :  { %v395_v10 = vsub.f32 %v331_v59, %v363_v47  ;;  %v426_v34 = vmax.f32 %v394_v19, 0.0  ;;  %v563_v50 = vsel %vm6352_vm1, %v6269_v22, %v559_v33  ;;  %v5250_v47 = vld [vmem:[#allocation10 + $0x30] sm:$0xff]  ;;  %4477 = vmatpush.bf16.msrb.mxu1 %v5258_v17  ;;  %vm590_vm2 = vweird.f32 %v6297_v52 }
  0xc1   :  { %v5274_v59 = vld [vmem:[#allocation10 + $0xf0] sm:$0xff]  ;;  %v839_v7 = vmul.f32 %v573_v0, %v455_v57  ;;  %v838_v5 = vmul.f32 %v563_v50, %v454_v56  ;;  %4388 = vmatpush.bf16.msrb.mxu0 %v5250_v47  ;;  %v256_v43 = vmul.f32 %v125_v1, %v125_v1  ;;  %v457_v50 = vsub.f32 %v6174_v14, %v6257_v6 }
  0xc2   :  { %v6323_v20 = vpop.eup %5303  ;;  %v427_v25 = vmax.f32 %v395_v10, 0.0  ;;  %v6365_v54 = vadd.f32 1e-05, %v426_v34  ;;  %4655 = vmatpush.bf16.msrb.mxu3 %v5274_v59  ;;  %190 = vadd.xlane.f32.xlu0 %v125_v1  ;;  %v126_v32 = vld [vmem:[#allocation2 + $0xf8] sm:$0xff]  ;;  %v456_v56 = vsub.f32 %v6170_v12, %v6245_v51 }
  0xc3   :  { %v153_v24 = vpop.xlane.xlu0 %152  ;;  %v6328_v3 = vpop.eup %5305  ;;  %v585_v46 = vmul.f32 %v6323_v20, %v6297_v52  ;;  %v871_v37 = vmul.f32 %v6259_v8, %v838_v5  ;;  %v872_v2 = vmul.f32 %v6259_v8, %v839_v7  ;;  %vm591_vm3 = vweird.f32 %v6323_v20  ;;  %v5257_v7 = vld [vmem:[#allocation10 + $0x68] sm:$0xff] }
  0xc4   :  { %v6341_v36 = vmul.f32 0.0078125, %v153_v24  ;;  %v575_v40 = vmul.f32 %v6328_v3, %v6307_v55  ;;  %v281_v42 = vpop.xlane.xlu2 %280  ;;  %v6356_v21 = vadd.f32 1e-05, %v427_v25  ;;  %vm581_vm5 = vweird.f32 %v6328_v3  ;;  %vm6393_vm6 = vmor %vm590_vm2, %vm591_vm3  ;;  %192 = vadd.xlane.f32.xlu1 %v126_v32  ;;  %4478 = vmatpush.bf16.msrb.mxu1 %v5257_v7 }
  0xc5   :  { %v586_v11 = vmul.f32 %v6323_v20, %v585_v46  ;;  %v279_v49 = vpop.xlane.xlu1 %278  ;;  %v333_v48 = vmul.f32 0.0078125, %v281_v42  ;;  %v904_v23 = vadd.f32 %v6272_v28, %v871_v37  ;;  %v905_v24 = vadd.f32 %v6272_v28, %v872_v2  ;;  %vm6404_vm7 = vmor %vm580_vm4, %vm581_vm5 }
  0xc6   :  { %v365_v18 = vmul.f32 %v6341_v36, %v6341_v36  ;;  %v576_v22 = vmul.f32 %v6328_v3, %v575_v40  ;;  %5307 = vrsqrt.f32 %v6356_v21  ;;  %v332_v9 = vmul.f32 0.0078125, %v279_v49  ;;  %318 = vadd.xlane.f32.xlu2 %v256_v43  ;;  %4656 = vmatpush.bf16.msrb.mxu3 %v5273_v4 }
  0xc7   :  { %v587_v60 = vmul.f32 0.5, %v586_v11  ;;  %5309 = vrsqrt.f32 %v6365_v54  ;;  %v934_v42 = vpack.c.bf16 %v905_v24, %v904_v23  ;;  %v257_v49 = vmul.f32 %v126_v32, %v126_v32 }
  0xc8   :  { %1163 = vmatmul.bf16.gmra.mxu0 %v933_v30  ;;  %1252 = vmatmul.bf16.gmra.mxu1 %v933_v30  ;;  %v397_v61 = vsub.f32 %v333_v48, %v365_v18  ;;  %v577_v62 = vmul.f32 0.5, %v576_v22  ;;  %v396_v26 = vsub.f32 %v332_v9, %v364_v58  ;;  %v5265_v58 = vld [vmem:[#allocation10 + $0xa8] sm:$0xff]  ;;  %vm610_vm8 = vweird.f32 %v6356_v21 }
  0xc9   :  { %1341 = vmatmul.bf16.gmra.mxu2 %v933_v30  ;;  %1430 = vmatmul.bf16.gmra.mxu3 %v933_v30  ;;  %v588_v27 = vsub.f32 1.5, %v587_v60  ;;  %vm600_vm10 = vweird.f32 %v6365_v54 }
  0xca   :  { %v429_v13 = vmax.f32 %v397_v61, 0.0  ;;  %v578_v16 = vsub.f32 1.5, %v577_v62  ;;  %v428_v19 = vmax.f32 %v396_v26, 0.0  ;;  %320 = vadd.xlane.f32.xlu0 %v257_v49  ;;  %4567 = vmatpush.bf16.msrb.mxu2 %v5265_v58 }
  0xcb   :  { %v155_v63 = vpop.xlane.xlu0 %154  ;;  %v589_v25 = vmul.f32 %v6323_v20, %v588_v27 }
  0xcc   :  { %v6380_v10 = vpop.eup %5307  ;;  %v6399_v46 = vadd.f32 1e-05, %v429_v13  ;;  %v579_v55 = vmul.f32 %v6328_v3, %v578_v16  ;;  %v6402_v34 = vmul.f32 0.0078125, %v155_v63  ;;  %v6408_v38 = vadd.f32 1e-05, %v428_v19  ;;  %v283_v40 = vpop.xlane.xlu2 %282 }
  0xcd   :  { %v6382_v15 = vpop.eup %5309  ;;  %v605_v29 = vmul.f32 %v6380_v10, %v6356_v21  ;;  %v157_v31 = vpop.xlane.xlu1 %156  ;;  %v593_v44 = vsel %vm6393_vm6, %v6323_v20, %v589_v25  ;;  %v334_v18 = vmul.f32 0.0078125, %v283_v40  ;;  %vm611_vm9 = vweird.f32 %v6380_v10 }
  0xce   :  { %v595_v33 = vmul.f32 %v6382_v15, %v6365_v54  ;;  %v6410_v39 = vmul.f32 0.0078125, %v157_v31  ;;  %5311 = vrsqrt.f32 %v6399_v46  ;;  %v583_v20 = vsel %vm6404_vm7, %v6328_v3, %v579_v55  ;;  %v5249_v3 = vld [vmem:[#allocation10 + $0x28] sm:$0xff]  ;;  %vm6447_vm12 = vmor %vm610_vm8, %vm611_vm9  ;;  %v5867_v31 = vld [vmem:[#allocation2 + $0x48] sm:$0xff] }
  0xcf   :  { %v606_v30 = vmul.f32 %v6380_v10, %v605_v29  ;;  %v366_v57 = vmul.f32 %v6402_v34, %v6402_v34  ;;  %v841_v14 = vmul.f32 %v593_v44, %v457_v50  ;;  %5313 = vrsqrt.f32 %v6408_v38  ;;  %4389 = vmatpush.bf16.msrb.mxu0 %v5249_v3  ;;  %v5868_v44 = vld [vmem:[#allocation2 + $0x40] sm:$0xff] }
  0xd0   :  { %v596_v11 = vmul.f32 %v6382_v15, %v595_v33  ;;  %v367_v6 = vmul.f32 %v6410_v39, %v6410_v39  ;;  %v840_v51 = vmul.f32 %v583_v20, %v456_v56  ;;  %vm601_vm11 = vweird.f32 %v6382_v15 }
  0xd1   :  { %v607_v12 = vmul.f32 0.5, %v606_v30  ;;  %v398_v47 = vsub.f32 %v334_v18, %v366_v57  ;;  %v874_v17 = vmul.f32 %v6259_v8, %v841_v14  ;;  %vm6452_vm13 = vmor %vm600_vm10, %vm601_vm11  ;;  %v459_v32 = vsub.f32 %v5867_v31, %v6291_v45 }
  0xd2   :  { %v597_v22 = vmul.f32 0.5, %v596_v11  ;;  %v873_v63 = vmul.f32 %v6259_v8, %v840_v51  ;;  %v458_v30 = vsub.f32 %v5868_v44, %v6299_v53  ;;  %vm630_vm14 = vweird.f32 %v6399_v46  ;;  %v5256_v44 = vld [vmem:[#allocation10 + $0x60] sm:$0xff] }
  0xd3   :  { %v285_v0 = vpop.xlane.xlu0 %284  ;;  %v608_v60 = vsub.f32 1.5, %v607_v12  ;;  %v430_v26 = vmax.f32 %v398_v47, 0.0  ;;  %v907_v2 = vadd.f32 %v6272_v28, %v874_v17  ;;  %vm620_vm0 = vweird.f32 %v6408_v38  ;;  %4479 = vmatpush.bf16.msrb.mxu1 %v5256_v44 }
  0xd4   :  { %v335_v48 = vmul.f32 0.0078125, %v285_v0  ;;  %v6430_v5 = vpop.eup %5311  ;;  %v598_v62 = vsub.f32 1.5, %v597_v22  ;;  %v161_v16 = vpop.xlane.xlu2 %160  ;;  %v906_v23 = vadd.f32 %v6272_v28, %v873_v63  ;;  %v5869_v63 = vld [vmem:[#allocation2 + $0x50] sm:$0xff] }
  0xd5   :  { %v159_v59 = vpop.xlane.xlu1 %158  ;;  %v6433_v61 = vpop.eup %5313  ;;  %v625_v1 = vmul.f32 %v6430_v5, %v6399_v46  ;;  %v609_v27 = vmul.f32 %v6380_v10, %v608_v60  ;;  %v6457_v25 = vadd.f32 1e-05, %v430_v26  ;;  %v6464_v33 = vmul.f32 0.0078125, %v161_v16  ;;  %v5870_v26 = vld [vmem:[#allocation2 + $0x58] sm:$0xff] }
  0xd6   :  { %v399_v9 = vsub.f32 %v335_v48, %v367_v6  ;;  %v615_v13 = vmul.f32 %v6433_v61, %v6408_v38  ;;  %v599_v21 = vmul.f32 %v6382_v15, %v598_v62  ;;  %v6459_v29 = vmul.f32 0.0078125, %v159_v59 }
  0xd7   :  { %v626_v24 = vmul.f32 %v6430_v5, %v625_v1  ;;  %v935_v35 = vpack.c.bf16 %v907_v2, %v906_v23  ;;  %v613_v40 = vsel %vm6447_vm12, %v6380_v10, %v609_v27  ;;  %5315 = vrsqrt.f32 %v6457_v25 }
  0xd8   :  { %1168 = vmatmul.bf16.gmra.mxu0 %v934_v42  ;;  %1257 = vmatmul.bf16.gmra.mxu1 %v934_v42  ;;  %v431_v37 = vmax.f32 %v399_v9, 0.0  ;;  %v603_v45 = vsel %vm6452_vm13, %v6382_v15, %v599_v21  ;;  %v368_v50 = vmul.f32 %v6459_v29, %v6459_v29  ;;  %v843_v10 = vmul.f32 %v613_v40, %v459_v32 }
  0xd9   :  { %1346 = vmatmul.bf16.gmra.mxu2 %v934_v42  ;;  %1435 = vmatmul.bf16.gmra.mxu3 %v934_v42  ;;  %v616_v42 = vmul.f32 %v6433_v61, %v615_v13  ;;  %v627_v0 = vmul.f32 0.5, %v626_v24  ;;  %v369_v53 = vmul.f32 %v6464_v33, %v6464_v33  ;;  %v842_v15 = vmul.f32 %v603_v45, %v458_v30 }
  0xda   :  { %v6462_v52 = vadd.f32 1e-05, %v431_v37  ;;  %v876_v6 = vmul.f32 %v6259_v8, %v843_v10  ;;  %vm631_vm15 = vweird.f32 %v6430_v5  ;;  %vm621_vm1 = vweird.f32 %v6433_v61 }
  0xdb   :  { %v287_v55 = vpop.xlane.xlu0 %286  ;;  %v617_v56 = vmul.f32 0.5, %v616_v42  ;;  %v628_v18 = vsub.f32 1.5, %v627_v0  ;;  %v875_v22 = vmul.f32 %v6259_v8, %v842_v15  ;;  %vm6494_vm2 = vmor %vm630_vm14, %vm631_vm15  ;;  %v460_v1 = vsub.f32 %v5869_v63, %v6346_v41 }
  0xdc   :  { %v336_v11 = vmul.f32 0.0078125, %v287_v55  ;;  %5317 = vrsqrt.f32 %v6462_v52  ;;  %v163_v20 = vpop.xlane.xlu2 %162  ;;  %v909_v7 = vadd.f32 %v6272_v28, %v876_v6  ;;  %vm6501_vm3 = vmor %vm620_vm0, %vm621_vm1  ;;  %v461_v37 = vsub.f32 %v5870_v26, %v6341_v36  ;;  %v5264_v55 = vld [vmem:[#allocation10 + $0xa0] sm:$0xff] }
  0xdd   :  { %v289_v43 = vpop.xlane.xlu1 %288  ;;  %v6481_v48 = vpop.eup %5315  ;;  %v618_v12 = vsub.f32 1.5, %v617_v56  ;;  %v629_v3 = vmul.f32 %v6430_v5, %v628_v18  ;;  %v6505_v60 = vmul.f32 0.0078125, %v163_v20  ;;  %v908_v62 = vadd.f32 %v6272_v28, %v875_v22  ;;  %4568 = vmatpush.bf16.msrb.mxu2 %v5264_v55 }
  0xde   :  { %v337_v49 = vmul.f32 0.0078125, %v289_v43  ;;  %v400_v57 = vsub.f32 %v336_v11, %v368_v50  ;;  %v635_v4 = vmul.f32 %v6481_v48, %v6457_v25  ;;  %vm640_vm4 = vweird.f32 %v6457_v25 }
  0xdf   :  { %v619_v9 = vmul.f32 %v6433_v61, %v618_v12  ;;  %v633_v13 = vsel %vm6494_vm2, %v6430_v5, %v629_v3  ;;  %v936_v23 = vpack.c.bf16 %v909_v7, %v908_v62  ;;  %v370_v24 = vmul.f32 %v6505_v60, %v6505_v60 }
  0xe0   :  { %v401_v14 = vsub.f32 %v337_v49, %v369_v53  ;;  %v432_v58 = vmax.f32 %v400_v57, 0.0  ;;  %v636_v16 = vmul.f32 %v6481_v48, %v635_v4  ;;  %v845_v31 = vmul.f32 %v633_v13, %v461_v37  ;;  %v5871_v4 = vld [vmem:[#allocation2 + $0x60] sm:$0xff] }
  0xe1   :  { %v623_v41 = vsel %vm6501_vm3, %v6433_v61, %v619_v9  ;;  %v5272_v61 = vld [vmem:[#allocation10 + $0xe0] sm:$0xff]  ;;  %vm641_vm5 = vweird.f32 %v6481_v48  ;;  %vm650_vm6 = vweird.f32 %v6462_v52 }
  0xe2   :  { %v6483_v51 = vpop.eup %5317  ;;  %v433_v47 = vmax.f32 %v401_v14, 0.0  ;;  %v6510_v2 = vadd.f32 1e-05, %v432_v58  ;;  %v844_v40 = vmul.f32 %v623_v41, %v460_v1  ;;  %v637_v42 = vmul.f32 0.5, %v636_v16  ;;  %4657 = vmatpush.bf16.msrb.mxu3 %v5272_v61  ;;  %vm6543_vm8 = vmor %vm640_vm4, %vm641_vm5 }
  0xe3   :  { %v165_v59 = vpop.xlane.xlu0 %164  ;;  %v645_v38 = vmul.f32 %v6483_v51, %v6462_v52  ;;  %v878_v53 = vmul.f32 %v6259_v8, %v845_v31  ;;  %vm651_vm7 = vweird.f32 %v6483_v51 }
  0xe4   :  { %v6512_v27 = vmul.f32 0.0078125, %v165_v59  ;;  %v6518_v21 = vadd.f32 1e-05, %v433_v47  ;;  %v293_v19 = vpop.xlane.xlu2 %292  ;;  %5319 = vrsqrt.f32 %v6510_v2  ;;  %v638_v50 = vsub.f32 1.5, %v637_v42  ;;  %vm6552_vm9 = vmor %vm650_vm6, %vm651_vm7  ;;  %v5872_v59 = vld [vmem:[#allocation2 + $0x68] sm:$0xff] }
  0xe5   :  { %v646_v36 = vmul.f32 %v6483_v51, %v645_v38  ;;  %v291_v54 = vpop.xlane.xlu1 %290  ;;  %v339_v32 = vmul.f32 0.0078125, %v293_v19  ;;  %v877_v10 = vmul.f32 %v6259_v8, %v844_v40  ;;  %v911_v6 = vadd.f32 %v6272_v28, %v878_v53 }
  0xe6   :  { %v371_v5 = vmul.f32 %v6512_v27, %v6512_v27  ;;  %5321 = vrsqrt.f32 %v6518_v21  ;;  %v338_v43 = vmul.f32 0.0078125, %v291_v54  ;;  %v639_v57 = vmul.f32 %v6481_v48, %v638_v50 }
  0xe7   :  { %v647_v30 = vmul.f32 0.5, %v646_v36  ;;  %v910_v14 = vadd.f32 %v6272_v28, %v877_v10  ;;  %v462_v47 = vsub.f32 %v5871_v4, %v6402_v34  ;;  %v463_v7 = vsub.f32 %v5872_v59, %v6410_v39  ;;  %v5873_v10 = vld [vmem:[#allocation2 + $0x70] sm:$0xff] }
  0xe8   :  { %1173 = vmatmul.bf16.gmra.mxu0 %v935_v35  ;;  %1262 = vmatmul.bf16.gmra.mxu1 %v935_v35  ;;  %v403_v45 = vsub.f32 %v339_v32, %v371_v5  ;;  %v402_v11 = vsub.f32 %v338_v43, %v370_v24  ;;  %v643_v38 = vsel %vm6543_vm8, %v6481_v48, %v639_v57  ;;  %vm660_vm10 = vweird.f32 %v6510_v2 }
  0xe9   :  { %1351 = vmatmul.bf16.gmra.mxu2 %v935_v35  ;;  %1440 = vmatmul.bf16.gmra.mxu3 %v935_v35  ;;  %v5248_v35 = vld [vmem:[#allocation10 + $0x20] sm:$0xff]  ;;  %v648_v56 = vsub.f32 1.5, %v647_v30  ;;  %v937_v1 = vpack.c.bf16 %v911_v6, %v910_v14  ;;  %v846_v13 = vmul.f32 %v643_v38, %v462_v47  ;;  %vm670_vm12 = vweird.f32 %v6518_v21 }
  0xea   :  { %4390 = vmatpush.bf16.msrb.mxu0 %v5248_v35  ;;  %v6532_v49 = vpop.eup %5319  ;;  %v435_v20 = vmax.f32 %v403_v45, 0.0  ;;  %v434_v18 = vmax.f32 %v402_v11, 0.0  ;;  %v464_v53 = vsub.f32 %v5873_v10, %v6459_v29  ;;  %v5878_v45 = vld [vmem:[#allocation2 + $0x98] sm:$0xff] }
  0xeb   :  { %v167_v0 = vpop.xlane.xlu0 %166  ;;  %v649_v25 = vmul.f32 %v6483_v51, %v648_v56  ;;  %v655_v22 = vmul.f32 %v6532_v49, %v6510_v2  ;;  %v879_v31 = vmul.f32 %v6259_v8, %v846_v13  ;;  %vm661_vm11 = vweird.f32 %v6532_v49  ;;  %v5874_v56 = vld [vmem:[#allocation2 + $0x78] sm:$0xff] }
  0xec   :  { %v6534_v15 = vpop.eup %5321  ;;  %v6558_v46 = vadd.f32 1e-05, %v435_v20  ;;  %v6560_v9 = vmul.f32 0.0078125, %v167_v0  ;;  %v6565_v17 = vadd.f32 1e-05, %v434_v18  ;;  %v295_v63 = vpop.xlane.xlu2 %294  ;;  %vm6593_vm14 = vmor %vm660_vm10, %vm661_vm11  ;;  %v465_v20 = vsub.f32 %v5874_v56, %v6464_v33 }
  0xed   :  { %v665_v52 = vmul.f32 %v6534_v15, %v6518_v21  ;;  %v169_v58 = vpop.xlane.xlu1 %168  ;;  %v653_v34 = vsel %vm6552_vm9, %v6483_v51, %v649_v25  ;;  %v656_v39 = vmul.f32 %v6532_v49, %v655_v22  ;;  %v340_v16 = vmul.f32 0.0078125, %v295_v63 }
  0xee   :  { %v6567_v62 = vmul.f32 0.0078125, %v169_v58  ;;  %5323 = vrsqrt.f32 %v6558_v46  ;;  %v372_v48 = vmul.f32 %v6560_v9, %v6560_v9  ;;  %v847_v19 = vmul.f32 %v653_v34, %v463_v7 }
  0xef   :  { %v666_v26 = vmul.f32 %v6534_v15, %v665_v52  ;;  %5325 = vrsqrt.f32 %v6565_v17  ;;  %v657_v41 = vmul.f32 0.5, %v656_v39  ;;  %vm671_vm13 = vweird.f32 %v6534_v15 }
  0xf0   :  { %v373_v51 = vmul.f32 %v6567_v62, %v6567_v62  ;;  %v404_v54 = vsub.f32 %v340_v16, %v372_v48  ;;  %v880_v5 = vmul.f32 %v6259_v8, %v847_v19  ;;  %v912_v43 = vadd.f32 %v6272_v28, %v879_v31  ;;  %vm6602_vm15 = vmor %vm670_vm12, %vm671_vm13 }
  0xf1   :  { %v667_v36 = vmul.f32 0.5, %v666_v26  ;;  %v658_v55 = vsub.f32 1.5, %v657_v41  ;;  %vm690_vm0 = vweird.f32 %v6558_v46  ;;  %vm680_vm2 = vweird.f32 %v6565_v17  ;;  %v5876_v26 = vld [vmem:[#allocation2 + $0x88] sm:$0xff] }
  0xf2   :  { %v436_v40 = vmax.f32 %v404_v54, 0.0  ;;  %v913_v44 = vadd.f32 %v6272_v28, %v880_v5 }
  0xf3   :  { %v297_v37 = vpop.xlane.xlu0 %296  ;;  %v668_v35 = vsub.f32 1.5, %v667_v36  ;;  %v659_v30 = vmul.f32 %v6532_v49, %v658_v55 }
  0xf4   :  { %v6582_v32 = vpop.eup %5323  ;;  %v6606_v11 = vadd.f32 1e-05, %v436_v40  ;;  %v938_v18 = vpack.c.bf16 %v913_v44, %v912_v43  ;;  %v5247_v43 = vld [vmem:[#allocation10 + $0x18] sm:$0xff]  ;;  %v5877_v44 = vld [vmem:[#allocation2 + $0x90] sm:$0xff] }
  0xf5   :  { %v6584_v61 = vpop.eup %5325  ;;  %v669_v2 = vmul.f32 %v6534_v15, %v668_v35  ;;  %v685_v0 = vmul.f32 %v6582_v32, %v6558_v46  ;;  %v663_v14 = vsel %vm6593_vm14, %v6532_v49, %v659_v30  ;;  %vm691_vm1 = vweird.f32 %v6582_v32  ;;  %4391 = vmatpush.bf16.msrb.mxu0 %v5247_v43  ;;  %v980_v43 = vld [vmem:[#allocation8] sm:$0xf] }
  0xf6   :  { %v675_v21 = vmul.f32 %v6584_v61, %v6565_v17  ;;  %5327 = vrsqrt.f32 %v6606_v11  ;;  %v848_v29 = vmul.f32 %v663_v14, %v464_v53  ;;  %vm681_vm3 = vweird.f32 %v6584_v61  ;;  %vm6633_vm4 = vmor %vm690_vm0, %vm691_vm1  ;;  %v5875_v17 = vld [vmem:[#allocation2 + $0x80] sm:$0xff]  ;;  %v171_v14 = vpop.xlane.xlu1 %170 }
  0xf7   :  { %v673_v6 = vsel %vm6602_vm15, %v6534_v15, %v669_v2  ;;  %v686_v12 = vmul.f32 %v6582_v32, %v685_v0  ;;  %vm682_vm5 = vmor %vm680_vm2, %vm681_vm3  ;;  %v466_v39 = vsub.f32 %v5875_v17, %v6505_v60  ;;  %vm700_vm6 = vweird.f32 %v6606_v11  ;;  %v5255_v53 = vld [vmem:[#allocation10 + $0x58] sm:$0xff] }
  0xf8   :  { %1178 = vmatmul.bf16.gmra.mxu0 %v936_v23  ;;  %1267 = vmatmul.bf16.gmra.mxu1 %v936_v23  ;;  %v676_v25 = vmul.f32 %v6584_v61, %v675_v21  ;;  %v849_v33 = vmul.f32 %v673_v6, %v465_v20  ;;  %v881_v52 = vmul.f32 %v6259_v8, %v848_v29  ;;  %v5271_v21 = vld [vmem:[#allocation10 + $0xd8] sm:$0xff]  ;;  %v173_v6 = vpop.xlane.xlu2 %172 }
  0xf9   :  { %1356 = vmatmul.bf16.gmra.mxu2 %v936_v23  ;;  %1445 = vmatmul.bf16.gmra.mxu3 %v936_v23  ;;  %v341_v23 = vmul.f32 0.0078125, %v297_v37  ;;  %v687_v22 = vmul.f32 0.5, %v686_v12  ;;  %v467_v37 = vsub.f32 %v5876_v26, %v6512_v27  ;;  %v468_v30 = vsub.f32 %v5877_v44, %v6560_v9 }
  0xfa   :  { %v677_v49 = vmul.f32 0.5, %v676_v25  ;;  %v882_v15 = vmul.f32 %v6259_v8, %v849_v33  ;;  %v914_v59 = vadd.f32 %v6272_v28, %v881_v52  ;;  %v469_v2 = vsub.f32 %v5878_v45, %v6567_v62  ;;  %4658 = vmatpush.bf16.msrb.mxu3 %v5271_v21  ;;  %4480 = vmatpush.bf16.msrb.mxu1 %v5255_v53 }
  0xfb   :  { %v405_v24 = vsub.f32 %v341_v23, %v373_v51  ;;  %v688_v3 = vsub.f32 1.5, %v687_v22  ;;  %v6675_v12 = vmul.f32 0.0078125, %v171_v14  ;;  %v6677_v25 = vmul.f32 0.0078125, %v173_v6  ;;  %v299_v29 = vpop.xlane.xlu0 %298 }
  0xfc   :  { %v6624_v58 = vpop.eup %5327  ;;  %v678_v4 = vsub.f32 1.5, %v677_v49  ;;  %v915_v7 = vadd.f32 %v6272_v28, %v882_v15  ;;  %v342_v22 = vmul.f32 0.0078125, %v299_v29  ;;  %v6714_v53 = vperm.slane %v980_v43, 1 }
  0xfd   :  { %v437_v42 = vmax.f32 %v405_v24, 0.0  ;;  %v689_v38 = vmul.f32 %v6582_v32, %v688_v3  ;;  %v695_v46 = vmul.f32 %v6624_v58, %v6606_v11  ;;  %vm701_vm7 = vweird.f32 %v6624_v58 }
  0xfe   :  { %v939_v13 = vpack.c.bf16 %v915_v7, %v914_v59  ;;  %vm6656_vm10 = vmor %vm700_vm6, %vm701_vm7  ;;  %v301_v33 = vpop.xlane.xlu1 %300  ;;  %12303 = vst [vmem:[#allocation16_spill] sm:$0xff] %v6714_v53 }
  0xff   :  { %v6610_v57 = vadd.f32 1e-05, %v437_v42  ;;  %v693_v48 = vsel %vm6633_vm4, %v6582_v32, %v689_v38  ;;  %v696_v19 = vmul.f32 %v6624_v58, %v695_v46  ;;  %v5263_v42 = vld [vmem:[#allocation10 + $0x98] sm:$0xff]  ;;  %v343_v49 = vmul.f32 0.0078125, %v301_v33 }
 0x100   :  { %v851_v23 = vmul.f32 %v693_v48, %v467_v37  ;;  %4569 = vmatpush.bf16.msrb.mxu2 %v5263_v42 }
 0x101   :  { %5329 = vrsqrt.f32 %v6610_v57  ;;  %v697_v60 = vmul.f32 0.5, %v696_v19  ;;  %vm710_vm8 = vweird.f32 %v6610_v57 }
 0x102   :  { %v884_v54 = vmul.f32 %v6259_v8, %v851_v23 }
 0x103   :  { %v698_v24 = vsub.f32 1.5, %v697_v60 }
 0x104   :  { %v917_v32 = vadd.f32 %v6272_v28, %v884_v54 }
 0x105   :  { %v699_v55 = vmul.f32 %v6624_v58, %v698_v24 }
 0x106   :  { %v303_v38 = vpop.xlane.xlu1 %302 }
 0x107   :  { %v5330_v47 = vpop.eup %5329  ;;  %v703_v50 = vsel %vm6656_vm10, %v6624_v58, %v699_v55  ;;  %v344_v37 = vmul.f32 0.0078125, %v303_v38 }
 0x108   :  { %1183 = vmatmul.bf16.gmra.mxu0 %v937_v1  ;;  %1272 = vmatmul.bf16.gmra.mxu1 %v937_v1  ;;  %v705_v34 = vmul.f32 %v5330_v47, %v6610_v57  ;;  %vm711_vm9 = vweird.f32 %v5330_v47  ;;  %v852_v10 = vmul.f32 %v703_v50, %v468_v30 }
 0x109   :  { %1361 = vmatmul.bf16.gmra.mxu2 %v937_v1  ;;  %1450 = vmatmul.bf16.gmra.mxu3 %v937_v1  ;;  %v679_v1 = vmul.f32 %v6584_v61, %v678_v4  ;;  %vm6660_vm11 = vmor %vm710_vm8, %vm711_vm9  ;;  %v175_v4 = vpop.xlane.xlu2 %174 }
 0x10a   :  { %v706_v51 = vmul.f32 %v5330_v47, %v705_v34  ;;  %v885_v62 = vmul.f32 %v6259_v8, %v852_v10  ;;  %v6683_v46 = vmul.f32 0.0078125, %v175_v4 }
 0x10b   :  { %v683_v16 = vsel %vm682_vm5, %v6584_v61, %v679_v1 }
 0x10c   :  { %v850_v41 = vmul.f32 %v683_v16, %v466_v39  ;;  %v707_v36 = vmul.f32 0.5, %v706_v51  ;;  %v918_v20 = vadd.f32 %v6272_v28, %v885_v62  ;;  %v376_v26 = vmul.f32 %v6683_v46, %v6683_v46 }
 0x10e   :  { %v883_v27 = vmul.f32 %v6259_v8, %v850_v41  ;;  %v708_v31 = vsub.f32 1.5, %v707_v36  ;;  %v408_v36 = vsub.f32 %v344_v37, %v376_v26  ;;  %v6759_v26 = vperm.slane %v980_v43, 3 }
 0x110   :  { %v916_v5 = vadd.f32 %v6272_v28, %v883_v27  ;;  %v709_v61 = vmul.f32 %v5330_v47, %v708_v31 }
 0x111   :  { %v305_v63 = vpop.xlane.xlu2 %304 }
 0x112   :  { %v940_v0 = vpack.c.bf16 %v917_v32, %v916_v5  ;;  %v713_v11 = vsel %vm6660_vm11, %v5330_v47, %v709_v61  ;;  %v177_v47 = vpop.xlane.xlu0 %176  ;;  %v345_v23 = vmul.f32 0.0078125, %v305_v63  ;;  %v440_v61 = vmax.f32 %v408_v36, 0.0 }
 0x113   :  { %v853_v9 = vmul.f32 %v713_v11, %v469_v2  ;;  %v6689_v39 = vmul.f32 0.0078125, %v177_v47 }
 0x114   :  { %v6707_v2 = vadd.f32 1e-05, %v440_v61 }
 0x115   :  { %v886_v56 = vmul.f32 %v6259_v8, %v853_v9  ;;  %v374_v8 = vmul.f32 %v6675_v12, %v6675_v12  ;;  %v377_v51 = vmul.f32 %v6689_v39, %v6689_v39 }
 0x116   :  { %vm740_vm2 = vweird.f32 %v6707_v2 }
 0x117   :  { %v919_v57 = vadd.f32 %v6272_v28, %v886_v56  ;;  %v375_v28 = vmul.f32 %v6677_v25, %v6677_v25  ;;  %v406_v52 = vsub.f32 %v342_v22, %v374_v8  ;;  %v409_v32 = vsub.f32 %v345_v23, %v377_v51  ;;  %v5879_v22 = vld [vmem:[#allocation2 + $0xa0] sm:$0xff] }
 0x118   :  { %1188 = vmatmul.bf16.gmra.mxu0 %v938_v18  ;;  %1277 = vmatmul.bf16.gmra.mxu1 %v938_v18  ;;  %v6768_v51 = vld [vmem:[#allocation5] ss:$0 sm:$0xff] }
 0x119   :  { %1366 = vmatmul.bf16.gmra.mxu2 %v938_v18  ;;  %1455 = vmatmul.bf16.gmra.mxu3 %v938_v18  ;;  %v941_v18 = vpack.c.bf16 %v919_v57, %v918_v20  ;;  %v407_v15 = vsub.f32 %v343_v49, %v375_v28  ;;  %v438_v58 = vmax.f32 %v406_v52, 0.0  ;;  %v307_v41 = vpop.xlane.xlu2 %306  ;;  %v441_v30 = vmax.f32 %v409_v32, 0.0  ;;  %v5880_v49 = vld [vmem:[#allocation2 + $0xa8] sm:$0xff] }
 0x11a   :  { %v179_v1 = vpop.xlane.xlu0 %178  ;;  %v346_v5 = vmul.f32 0.0078125, %v307_v41  ;;  %v470_v28 = vsub.f32 %v5879_v22, %v6675_v12  ;;  %v471_v52 = vsub.f32 %v5880_v49, %v6677_v25  ;;  %v5262_v12 = vld [vmem:[#allocation10 + $0x90] sm:$0xff]  ;;  %v6753_v25 = vperm.slane %v980_v43, 2 }
 0x11b   :  { %v439_v3 = vmax.f32 %v407_v15, 0.0  ;;  %v502_v59 = vadd.f32 1e-05, %v438_v58  ;;  %v6695_v19 = vmul.f32 0.0078125, %v179_v1  ;;  %v6712_v9 = vadd.f32 1e-05, %v441_v30  ;;  %4570 = vmatpush.bf16.msrb.mxu2 %v5262_v12 }
 0x11c   :  { %12308 = vst [vmem:[#allocation17_spill] sm:$0xff] %v6753_v25  ;;  %v5254_v22 = vld [vmem:[#allocation10 + $0x50] sm:$0xff] }
 0x11d   :  { %v503_v7 = vadd.f32 1e-05, %v439_v3  ;;  %5331 = vrsqrt.f32 %v502_v59  ;;  %v378_v31 = vmul.f32 %v6695_v19, %v6695_v19  ;;  %vm720_vm12 = vweird.f32 %v502_v59  ;;  %4481 = vmatpush.bf16.msrb.mxu1 %v5254_v22 }
 0x11e   :  { %vm750_vm4 = vweird.f32 %v6712_v9 }
 0x11f   :  { %5333 = vrsqrt.f32 %v503_v7  ;;  %v410_v44 = vsub.f32 %v346_v5, %v378_v31  ;;  %vm730_vm14 = vweird.f32 %v503_v7 }
 0x120   :  { %5335 = vrsqrt.f32 %v6707_v2 }
 0x121   :  { %v442_v10 = vmax.f32 %v410_v44, 0.0  ;;  %5337 = vrsqrt.f32 %v6712_v9 }
 0x122   :  { %v309_v27 = vpop.xlane.xlu0 %308 }
 0x123   :  { %v6685_v34 = vpop.eup %5331  ;;  %v347_v35 = vmul.f32 0.0078125, %v309_v27  ;;  %v6727_v6 = vadd.f32 1e-05, %v442_v10 }
 0x124   :  { %v715_v48 = vmul.f32 %v6685_v34, %v502_v59  ;;  %vm721_vm13 = vweird.f32 %v6685_v34  ;;  %v5246_v59 = vld [vmem:[#allocation10 + $0x10] sm:$0xff] }
 0x125   :  { %v6687_v17 = vpop.eup %5333  ;;  %vm6722_vm0 = vmor %vm720_vm12, %vm721_vm13  ;;  %5339 = vrsqrt.f32 %v6727_v6  ;;  %4392 = vmatpush.bf16.msrb.mxu0 %v5246_v59  ;;  %vm760_vm8 = vweird.f32 %v6727_v6 }
 0x126   :  { %v725_v16 = vmul.f32 %v6687_v17, %v503_v7  ;;  %v716_v54 = vmul.f32 %v6685_v34, %v715_v48  ;;  %vm731_vm15 = vweird.f32 %v6687_v17  ;;  %v6749_v4 = vpop.eup %5335  ;;  %v5270_v7 = vld [vmem:[#allocation10 + $0xd0] sm:$0xff] }
 0x127   :  { %vm6729_vm1 = vmor %vm730_vm14, %vm731_vm15  ;;  %v6755_v38 = vpop.eup %5337  ;;  %4659 = vmatpush.bf16.msrb.mxu3 %v5270_v7  ;;  %vm741_vm3 = vweird.f32 %v6749_v4 }
 0x128   :  { %1193 = vmatmul.bf16.gmra.mxu0 %v939_v13  ;;  %1282 = vmatmul.bf16.gmra.mxu1 %v939_v13  ;;  %v726_v24 = vmul.f32 %v6687_v17, %v725_v16  ;;  %v717_v40 = vmul.f32 0.5, %v716_v54  ;;  %vm751_vm5 = vweird.f32 %v6755_v38  ;;  %vm6814_vm6 = vmor %vm740_vm2, %vm741_vm3 }
 0x129   :  { %1371 = vmatmul.bf16.gmra.mxu2 %v939_v13  ;;  %1460 = vmatmul.bf16.gmra.mxu3 %v939_v13  ;;  %v181_v13 = vpop.xlane.xlu1 %180  ;;  %vm6821_vm7 = vmor %vm750_vm4, %vm751_vm5 }
 0x12a   :  { %v6699_v60 = vmul.f32 0.0078125, %v181_v13  ;;  %v727_v42 = vmul.f32 0.5, %v726_v24  ;;  %v718_v21 = vsub.f32 1.5, %v717_v40  ;;  %v745_v13 = vmul.f32 %v6755_v38, %v6712_v9 }
 0x12b   :  { %v6761_v37 = vpop.eup %5339 }
 0x12c   :  { %v379_v55 = vmul.f32 %v6699_v60, %v6699_v60  ;;  %v728_v50 = vsub.f32 1.5, %v727_v42  ;;  %v719_v57 = vmul.f32 %v6685_v34, %v718_v21  ;;  %v755_v31 = vmul.f32 %v6761_v37, %v6727_v6 }
 0x12d   :  { %vm761_vm9 = vweird.f32 %v6761_v37 }
 0x12e   :  { %v411_v45 = vsub.f32 %v347_v35, %v379_v55  ;;  %v729_v14 = vmul.f32 %v6687_v17, %v728_v50  ;;  %v723_v58 = vsel %vm6722_vm0, %v6685_v34, %v719_v57  ;;  %v746_v55 = vmul.f32 %v6755_v38, %v745_v13  ;;  %vm6848_vm12 = vmor %vm760_vm8, %vm761_vm9 }
 0x12f   :  { %v854_v63 = vmul.f32 %v723_v58, %v470_v28 }
 0x130   :  { %v443_v56 = vmax.f32 %v411_v45, 0.0  ;;  %v733_v3 = vsel %vm6729_vm1, %v6687_v17, %v729_v14  ;;  %v735_v17 = vmul.f32 %v6749_v4, %v6707_v2  ;;  %v747_v57 = vmul.f32 0.5, %v746_v55 }
 0x131   :  { %v855_v1 = vmul.f32 %v733_v3, %v471_v52  ;;  %v887_v23 = vmul.f32 %v6768_v51, %v854_v63  ;;  %v183_v3 = vpop.xlane.xlu1 %182 }
 0x132   :  { %v6737_v8 = vadd.f32 1e-05, %v443_v56  ;;  %v736_v27 = vmul.f32 %v6749_v4, %v735_v17  ;;  %v748_v58 = vsub.f32 1.5, %v747_v57 }
 0x133   :  { %v888_v41 = vmul.f32 %v6768_v51, %v855_v1 }
 0x134   :  { %5341 = vrsqrt.f32 %v6737_v8  ;;  %v737_v45 = vmul.f32 0.5, %v736_v27  ;;  %vm770_vm10 = vweird.f32 %v6737_v8 }
 0x135   :  { %v1159_v11 = vpop.f32.mrf.mxu0  ;;  %v1248_v62 = vpop.f32.mrf.mxu1 }
 0x136   :  { %v6735_v33 = vadd.f32 %v1248_v62, %v6714_v53  ;;  %v738_v28 = vsub.f32 1.5, %v737_v45 }
 0x138   :  { %1198 = vmatmul.bf16.gmra.mxu0 %v940_v0  ;;  %1287 = vmatmul.bf16.gmra.mxu1 %v940_v0  ;;  %v4957_v47 = vmul.f32 -1.442695, %v6735_v33  ;;  %v739_v59 = vmul.f32 %v6749_v4, %v738_v28 }
 0x139   :  { %1376 = vmatmul.bf16.gmra.mxu2 %v940_v0  ;;  %1465 = vmatmul.bf16.gmra.mxu3 %v940_v0  ;;  %v6709_v0 = vperm.slane %v980_v43, 0  ;;  %v6787_v43 = vld [vmem:[#allocation5 + $0x1] ss:$0 sm:$0xff] }
 0x13a   :  { %v6772_v36 = vpop.eup %5341  ;;  %v920_v44 = vadd.f32 %v6787_v43, %v887_v23  ;;  %v921_v30 = vadd.f32 %v6787_v43, %v888_v41  ;;  %v5883_v41 = vld [vmem:[#allocation2 + $0xb0] sm:$0xff] }
 0x13b   :  { %v6719_v20 = vadd.f32 %v1159_v11, %v6709_v0  ;;  %v765_v40 = vmul.f32 %v6772_v36, %v6737_v8  ;;  %v756_v11 = vmul.f32 %v6761_v37, %v755_v31  ;;  %v472_v27 = vsub.f32 %v5883_v41, %v6683_v46 }
 0x13c   :  { %v1337_v34 = vpop.f32.mrf.mxu2  ;;  %v1426_v16 = vpop.f32.mrf.mxu3  ;;  %v942_v56 = vpack.c.bf16 %v921_v30, %v920_v44  ;;  %vm771_vm11 = vweird.f32 %v6772_v36  ;;  %v6852_v30 = vmul.f32 0.0078125, %v183_v3  ;;  %v5886_v3 = vld [vmem:[#allocation2 + $0xc8] sm:$0xff] }
 0x13d   :  { %v4956_v15 = vmul.f32 -1.442695, %v6719_v20  ;;  %v6766_v48 = vadd.f32 %v1337_v34, %v6753_v25  ;;  %v1161_v54 = vpop.f32.mrf.mxu0  ;;  %v6778_v5 = vadd.f32 %v1426_v16, %v6759_v26  ;;  %v1250_v32 = vpop.f32.mrf.mxu1  ;;  %v766_v14 = vmul.f32 %v6772_v36, %v765_v40  ;;  %v5884_v40 = vld [vmem:[#allocation2 + $0xb8] sm:$0xff]  ;;  %vm6867_vm13 = vmor %vm770_vm10, %vm771_vm11 }
 0x13e   :  { %v6785_v42 = vadd.f32 %v1161_v54, %v6709_v0  ;;  %v6794_v50 = vadd.f32 %v1250_v32, %v6714_v53  ;;  %v749_v34 = vmul.f32 %v6755_v38, %v748_v58  ;;  %v743_v54 = vsel %vm6814_vm6, %v6749_v4, %v739_v59 }
 0x13f   :  { %5343 = vpow2.f32 %v4956_v15  ;;  %v4958_v35 = vmul.f32 -1.442695, %v6766_v48  ;;  %v4959_v10 = vmul.f32 -1.442695, %v6778_v5  ;;  %v757_v15 = vmul.f32 0.5, %v756_v11 }
 0x140   :  { %5345 = vpow2.f32 %v4957_v47  ;;  %v4960_v29 = vmul.f32 -1.442695, %v6785_v42  ;;  %v4961_v49 = vmul.f32 -1.442695, %v6794_v50  ;;  %v767_v47 = vmul.f32 0.5, %v766_v14 }
 0x141   :  { %5347 = vpow2.f32 %v4958_v35  ;;  %v758_v2 = vsub.f32 1.5, %v757_v15  ;;  %v473_v46 = vsub.f32 %v5884_v40, %v6689_v39  ;;  %v753_v4 = vsel %vm6821_vm7, %v6755_v38, %v749_v34 }
 0x142   :  { %v768_v13 = vsub.f32 1.5, %v767_v47  ;;  %v6860_v38 = vmul.f32 %v743_v54, %v472_v27  ;;  %v475_v47 = vsub.f32 %v5886_v3, %v6699_v60 }
 0x143   :  { %v759_v55 = vmul.f32 %v6761_v37, %v758_v2  ;;  %v6883_v58 = vmul.f32 %v753_v4, %v473_v46 }
 0x144   :  { %v1339_v62 = vpop.f32.mrf.mxu2  ;;  %v1428_v35 = vpop.f32.mrf.mxu3  ;;  %v769_v45 = vmul.f32 %v6772_v36, %v768_v13 }
 0x145   :  { %v5344_v24 = vpop.eup %5343  ;;  %v6805_v52 = vadd.f32 %v1339_v62, %v6753_v25  ;;  %v5885_v62 = vld [vmem:[#allocation2 + $0xc0] sm:$0xff]  ;;  %v6874_v14 = vadd.f32 %v1428_v35, %v6759_v26  ;;  %v1164_v8 = vpop.f32.mrf.mxu0 }
 0x146   :  { %v5346_v61 = vpop.eup %5345  ;;  %v6791_v21 = vadd.f32 1.0, %v5344_v24  ;;  %v185_v24 = vpop.xlane.xlu2 %184  ;;  %v474_v6 = vsub.f32 %v5885_v62, %v6695_v19  ;;  %v763_v19 = vsel %vm6848_vm12, %v6761_v37, %v759_v55  ;;  %v6899_v34 = vadd.f32 %v1164_v8, %v6709_v0 }
 0x147   :  { %v5348_v12 = vpop.eup %5347  ;;  %v4962_v7 = vmul.f32 -1.442695, %v6805_v52  ;;  %v6858_v39 = vmul.f32 0.0078125, %v185_v24  ;;  %v4963_v60 = vmul.f32 -1.442695, %v6874_v14  ;;  %v1253_v41 = vpop.f32.mrf.mxu1 }
 0x148   :  { %1203 = vmatmul.bf16.gmra.mxu0 %v941_v18  ;;  %1292 = vmatmul.bf16.gmra.mxu1 %v941_v18  ;;  %5349 = vrcp.f32 %v6791_v21  ;;  %v6827_v16 = vadd.f32 1.0, %v5348_v12  ;;  %v380_v12 = vmul.f32 %v6852_v30, %v6852_v30  ;;  %v6894_v2 = vmul.f32 %v763_v19, %v474_v6 }
 0x149   :  { %1381 = vmatmul.bf16.gmra.mxu2 %v941_v18  ;;  %1470 = vmatmul.bf16.gmra.mxu3 %v941_v18  ;;  %v6798_v18 = vadd.f32 1.0, %v5346_v61  ;;  %5351 = vpow2.f32 %v4959_v10  ;;  %v311_v10 = vpop.xlane.xlu0 %310  ;;  %v381_v37 = vmul.f32 %v6858_v39, %v6858_v39  ;;  %v2027_v27 = vand.u32 2147483647, %v6791_v21 }
 0x14a   :  { %v348_v59 = vmul.f32 0.0078125, %v311_v10  ;;  %v2029_v54 = vand.u32 2147483648, %v6791_v21  ;;  %vm2023_vm14 = vweird.f32 %v6791_v21  ;;  %v4964_v40 = vmul.f32 -1.442695, %v6899_v34 }
 0x14b   :  { %5353 = vrcp.f32 %v6798_v18  ;;  %v2044_v55 = vand.u32 2147483648, %v6798_v18  ;;  %v6918_v46 = vadd.f32 %v1253_v41, %v6714_v53  ;;  %vm6928_vm0 = vcmp.eq.f32.partialorder %v2027_v27, 8.507059e+37 }
 0x14c   :  { %5355 = vpow2.f32 %v4960_v29  ;;  %v313_v29 = vpop.xlane.xlu1 %312  ;;  %v2030_v6 = vor.u32 1.1754944e-38, %v2029_v54  ;;  %vm2038_vm1 = vweird.f32 %v6798_v18  ;;  %v2059_v8 = vand.u32 2147483648, %v6827_v16  ;;  %v1342_v27 = vpop.f32.mrf.mxu2 }
 0x14d   :  { %5357 = vpow2.f32 %v4961_v49  ;;  %v349_v63 = vmul.f32 0.0078125, %v313_v29  ;;  %v2045_v19 = vor.u32 1.1754944e-38, %v2044_v55  ;;  %vm2053_vm5 = vweird.f32 %v6827_v16 }
 0x14e   :  { %v6818_v1 = vpop.eup %5349  ;;  %5359 = vpow2.f32 %v4962_v7  ;;  %v773_v7 = vsel %vm6867_vm13, %v6772_v36, %v769_v45  ;;  %v6992_v62 = vadd.f32 %v1342_v27, %v6753_v25 }
 0x14f   :  { %v5352_v9 = vpop.eup %5351  ;;  %v2019_v32 = vmul.f32 %v6818_v1, %v6791_v21  ;;  %5361 = vrcp.f32 %v6827_v16  ;;  %v6909_v24 = vmul.f32 %v773_v7, %v475_v47  ;;  %v413_v35 = vsub.f32 %v349_v63, %v381_v37 }
 0x150   :  { %v6856_v11 = vadd.f32 1.0, %v5352_v9  ;;  %vm2024_vm15 = vweird.f32 %v6818_v1  ;;  %v4965_v7 = vmul.f32 -1.442695, %v6918_v46 }
 0x151   :  { %v6829_v23 = vpop.eup %5353  ;;  %v2020_v22 = vsub.f32 1.0, %v2019_v32  ;;  %v2042_v32 = vand.u32 2147483647, %v6798_v18  ;;  %vm6949_vm3 = vmor %vm2023_vm14, %vm2024_vm15  ;;  %v445_v41 = vmax.f32 %v413_v35, 0.0 }
 0x152   :  { %v5356_v31 = vpop.eup %5355  ;;  %v2034_v28 = vmul.f32 %v6829_v23, %v6798_v18  ;;  %5363 = vrcp.f32 %v6856_v11  ;;  %vm2039_vm4 = vweird.f32 %v6829_v23  ;;  %vm2068_vm8 = vweird.f32 %v6856_v11 }
 0x153   :  { %v5358_v61 = vpop.eup %5357  ;;  %v6871_v57 = vadd.f32 1.0, %v5356_v31  ;;  %v2021_v17 = vmul.f32 %v6818_v1, %v2020_v22  ;;  %v412_v31 = vsub.f32 %v348_v59, %v380_v12  ;;  %vm6939_vm2 = vcmp.eq.f32.partialorder %v2042_v32, 8.507059e+37  ;;  %vm6981_vm6 = vmor %vm2038_vm1, %vm2039_vm4 }
 0x154   :  { %v6881_v49 = vadd.f32 1.0, %v5358_v61  ;;  %v5360_v15 = vpop.eup %5359  ;;  %v2035_v36 = vsub.f32 1.0, %v2034_v28 }
 0x155   :  { %5365 = vrcp.f32 %v6871_v57  ;;  %v6901_v9 = vpop.eup %5361  ;;  %v6905_v13 = vadd.f32 1.0, %v5360_v15  ;;  %v2022_v44 = vadd.f32 %v6818_v1, %v2021_v17  ;;  %v2074_v15 = vand.u32 2147483648, %v6856_v11 }
 0x156   :  { %5367 = vrcp.f32 %v6881_v49  ;;  %v2049_v61 = vmul.f32 %v6901_v9, %v6827_v16  ;;  %v2036_v45 = vmul.f32 %v6829_v23, %v2035_v36  ;;  %v444_v3 = vmax.f32 %v412_v31, 0.0 }
 0x157   :  { %5369 = vpow2.f32 %v4963_v60  ;;  %v2026_v37 = vsel %vm6949_vm3, %v6818_v1, %v2022_v44  ;;  %v2057_v17 = vand.u32 2147483647, %v6827_v16  ;;  %v6969_v31 = vor.u32 1.1754944e-38, %v2059_v8 }
 0x158   :  { %1208 = vmatmul.bf16.gmra.mxu0 %v942_v56  ;;  %1297 = vmatmul.bf16.gmra.mxu1 %v942_v56  ;;  %v6920_v4 = vpop.eup %5363  ;;  %5371 = vrcp.f32 %v6905_v13  ;;  %v2050_v12 = vsub.f32 1.0, %v2049_v61  ;;  %v2037_v63 = vadd.f32 %v6829_v23, %v2036_v45  ;;  %v2072_v1 = vand.u32 2147483647, %v6856_v11 }
 0x159   :  { %1386 = vmatmul.bf16.gmra.mxu2 %v942_v56  ;;  %1475 = vmatmul.bf16.gmra.mxu3 %v942_v56  ;;  %v6933_v56 = vld [vmem:[#allocation2 + $0xd0] sm:$0xff]  ;;  %v2064_v59 = vmul.f32 %v6920_v4, %v6856_v11  ;;  %5373 = vpow2.f32 %v4964_v40  ;;  %v6972_v32 = vor.u32 1.1754944e-38, %v2074_v15  ;;  %v2087_v55 = vand.u32 2147483647, %v6871_v57 }
 0x15a   :  { %v2031_v61 = vsel %vm6928_vm0, %v2030_v6, %v2026_v37  ;;  %v2051_v40 = vmul.f32 %v6901_v9, %v2050_v12  ;;  %5375 = vpow2.f32 %v4965_v7  ;;  %v2041_v45 = vsel %vm6981_vm6, %v6829_v23, %v2037_v63  ;;  %v1431_v37 = vpop.f32.mrf.mxu3 }
 0x15b   :  { %v6926_v10 = vpop.eup %5365  ;;  %v2065_v44 = vsub.f32 1.0, %v2064_v59  ;;  %vm2054_vm7 = vweird.f32 %v6901_v9  ;;  %v2089_v18 = vand.u32 2147483648, %v6871_v57  ;;  %v7000_v59 = vmul.f32 %v2031_v61, %v6719_v20 }
 0x15c   :  { %v6937_v22 = vpop.eup %5367  ;;  %v2079_v21 = vmul.f32 %v6926_v10, %v6871_v57  ;;  %vm7002_vm9 = vcmp.eq.f32.partialorder %v2057_v17, 8.507059e+37  ;;  %vm2083_vm10 = vweird.f32 %v6871_v57  ;;  %v7007_v7 = vadd.f32 1e-05, %v444_v3  ;;  %v1166_v3 = vpop.f32.mrf.mxu0  ;;  %vm7034_vm13 = vmor %vm2053_vm5, %vm2054_vm7 }
 0x15d   :  { %v5370_v60 = vpop.eup %5369  ;;  %v2094_v36 = vmul.f32 %v6937_v22, %v6881_v49  ;;  %12325 = vst [vmem:[#allocation18_spill] sm:$0xff] %v7000_v59  ;;  %v889_v63 = vmul.f32 %v6768_v51, %v6860_v38  ;;  %v2052_v20 = vadd.f32 %v6901_v9, %v2051_v40  ;;  %v2066_v17 = vmul.f32 %v6920_v4, %v2065_v44 }
 0x15e   :  { %v6967_v54 = vpop.eup %5371  ;;  %v2080_v8 = vsub.f32 1.0, %v2079_v21  ;;  %v6989_v15 = vadd.f32 1.0, %v5370_v60  ;;  %v890_v21 = vmul.f32 %v6768_v51, %v6883_v58  ;;  %v2046_v60 = vsel %vm6939_vm2, %v2045_v19, %v2041_v45 }
 0x15f   :  { %v2095_v6 = vsub.f32 1.0, %v2094_v36  ;;  %v2109_v47 = vmul.f32 %v6967_v54, %v6905_v13  ;;  %v5374_v12 = vpop.eup %5373  ;;  %vm2098_vm11 = vweird.f32 %v6881_v49  ;;  %v7018_v36 = vadd.f32 1e-05, %v445_v41 }
 0x160   :  { %vm2069_vm12 = vweird.f32 %v6920_v4  ;;  %v2081_v27 = vmul.f32 %v6926_v10, %v2080_v8  ;;  %5377 = vrcp.f32 %v6989_v15  ;;  %v4966_v38 = vmul.f32 -1.442695, %v6992_v62  ;;  %v5376_v58 = vpop.eup %5375 }
 0x161   :  { %v2096_v28 = vmul.f32 %v6937_v22, %v2095_v6  ;;  %v2110_v19 = vsub.f32 1.0, %v2109_v47  ;;  %v7025_v61 = vadd.f32 1.0, %v5374_v12  ;;  %v7028_v35 = vadd.f32 %v1431_v37, %v6759_v26  ;;  %vm7072_vm2 = vmor %vm2068_vm8, %vm2069_vm12 }
 0x162   :  { %5379 = vrsqrt.f32 %v7007_v7  ;;  %v7040_v40 = vadd.f32 %v1166_v3, %v6709_v0  ;;  %v922_v44 = vadd.f32 %v6787_v43, %v889_v63  ;;  %v923_v45 = vadd.f32 %v6787_v43, %v890_v21 }
 0x163   :  { %v2056_v8 = vsel %vm7034_vm13, %v6901_v9, %v2052_v20  ;;  %v2067_v6 = vadd.f32 %v6920_v4, %v2066_v17  ;;  %vm7048_vm14 = vcmp.eq.f32.partialorder %v2072_v1, 8.507059e+37  ;;  %vm2084_vm15 = vweird.f32 %v6926_v10 }
 0x164   :  { %vm7053_vm0 = vcmp.eq.f32.partialorder %v2087_v55, 8.507059e+37  ;;  %5381 = vrsqrt.f32 %v7018_v36  ;;  %v2082_v12 = vadd.f32 %v6926_v10, %v2081_v27  ;;  %vm2099_vm1 = vweird.f32 %v6937_v22  ;;  %vm7088_vm3 = vmor %vm2083_vm10, %vm2084_vm15 }
 0x165   :  { %v7060_v37 = vadd.f32 1.0, %v5376_v58  ;;  %5383 = vpow2.f32 %v4966_v38  ;;  %v2097_v9 = vadd.f32 %v6937_v22, %v2096_v28  ;;  %v2111_v1 = vmul.f32 %v6967_v54, %v2110_v19  ;;  %v1255_v19 = vpop.f32.mrf.mxu1  ;;  %vm7106_vm4 = vmor %vm2098_vm11, %vm2099_vm1 }
 0x166   :  { %5385 = vrcp.f32 %v7025_v61  ;;  %v4967_v55 = vmul.f32 -1.442695, %v7028_v35  ;;  %v7066_v63 = vpop.eup %5377  ;;  %v2090_v20 = vor.u32 1.1754944e-38, %v2089_v18  ;;  %v2104_v17 = vand.u32 2147483648, %v6881_v49 }
 0x167   :  { %v4968_v3 = vmul.f32 -1.442695, %v7040_v40  ;;  %v943_v27 = vpack.c.bf16 %v923_v45, %v922_v44  ;;  %v7079_v38 = vmul.f32 %v2046_v60, %v6735_v33  ;;  %v2061_v58 = vsel %vm7002_vm9, %v6969_v31, %v2056_v8 }
 0x168   :  { %v2102_v18 = vand.u32 2147483647, %v6881_v49  ;;  %v2117_v28 = vand.u32 2147483647, %v6905_v13  ;;  %v7094_v41 = vpop.eup %5379  ;;  %v2071_v33 = vsel %vm7072_vm2, %v6920_v4, %v2067_v6  ;;  %v2086_v31 = vsel %vm7088_vm3, %v6926_v10, %v2082_v12  ;;  %v7130_v12 = vld [vmem:[#allocation2 + $0xd8] sm:$0xff] }
 0x169   :  { %12336 = vst [vmem:[#allocation19_spill] sm:$0xff] %v7079_v38  ;;  %vm2114_vm5 = vweird.f32 %v6967_v54  ;;  %5387 = vrcp.f32 %v7060_v37  ;;  %1213 = vmatmul.bf16.gmra.mxu0 %v943_v27  ;;  %1302 = vmatmul.bf16.gmra.mxu1 %v943_v27  ;;  %v2101_v4 = vsel %vm7106_vm4, %v6937_v22, %v2097_v9  ;;  %v2112_v10 = vadd.f32 %v6967_v54, %v2111_v1 }
 0x16a   :  { %v7112_v23 = vpop.eup %5381  ;;  %v2124_v49 = vmul.f32 %v7066_v63, %v6989_v15  ;;  %5389 = vpow2.f32 %v4967_v55  ;;  %1391 = vmatmul.bf16.gmra.mxu2 %v943_v27  ;;  %1480 = vmatmul.bf16.gmra.mxu3 %v943_v27  ;;  %v2105_v44 = vor.u32 1.1754944e-38, %v2104_v17  ;;  %v2119_v45 = vand.u32 2147483648, %v6905_v13 }
 0x16b   :  { %v5384_v60 = vpop.eup %5383  ;;  %5391 = vpow2.f32 %v4968_v3  ;;  %v7122_v8 = vadd.f32 %v1255_v19, %v6714_v53  ;;  %v7127_v22 = vmul.f32 %v2061_v58, %v6766_v48  ;;  %vm2103_vm6 = vcmp.eq.f32.partialorder %v2102_v18, 8.507059e+37 }
 0x16c   :  { %v7124_v6 = vpop.eup %5385  ;;  %vm2113_vm7 = vweird.f32 %v6905_v13  ;;  %v2076_v1 = vsel %vm7048_vm14, %v6972_v32, %v2071_v33  ;;  %v2091_v55 = vsel %vm7053_vm0, %v2090_v20, %v2086_v31  ;;  %v2106_v21 = vsel %vm2103_vm6, %v2105_v44, %v2101_v4  ;;  %v1433_v13 = vpop.f32.mrf.mxu3 }
 0x16d   :  { %12341 = vst [vmem:[#allocation20_spill] sm:$0xff] %v7127_v22  ;;  %vm7141_vm8 = vmor %vm2113_vm7, %vm2114_vm5  ;;  %vm7145_vm9 = vcmp.eq.f32.partialorder %v2117_v28, 8.507059e+37  ;;  %v2125_v16 = vsub.f32 1.0, %v2124_v49  ;;  %v775_v32 = vmul.f32 %v7094_v41, %v7007_v7  ;;  %v7154_v47 = vadd.f32 1.0, %v5384_v60 }
 0x16e   :  { %v2116_v17 = vsel %vm7141_vm8, %v6967_v54, %v2112_v10  ;;  %v2120_v3 = vor.u32 1.1754944e-38, %v2119_v45  ;;  %v2139_v27 = vmul.f32 %v7124_v6, %v7025_v61  ;;  %v785_v58 = vmul.f32 %v7112_v23, %v7018_v36  ;;  %v1344_v45 = vpop.f32.mrf.mxu2 }
 0x16f   :  { %v7156_v20 = vpop.eup %5387  ;;  %v4969_v11 = vmul.f32 -1.442695, %v7122_v8  ;;  %v7164_v54 = vmul.f32 %v2076_v1, %v6778_v5  ;;  %v7167_v28 = vmul.f32 %v2091_v55, %v6785_v42  ;;  %v7170_v19 = vmul.f32 %v2106_v21, %v6794_v50 }
 0x170   :  { %v5390_v18 = vpop.eup %5389  ;;  %v2134_v33 = vand.u32 2147483648, %v6989_v15  ;;  %v2121_v57 = vsel %vm7145_vm9, %v2120_v3, %v2116_v17  ;;  %vm2128_vm10 = vweird.f32 %v6989_v15  ;;  %v2132_v4 = vand.u32 2147483647, %v6989_v15 }
 0x171   :  { %12346 = vst [vmem:[#allocation21_spill] sm:$0xff] %v7164_v54  ;;  %v5392_v31 = vpop.eup %5391  ;;  %v2149_v10 = vand.u32 2147483648, %v7025_v61  ;;  %v2126_v5 = vmul.f32 %v7066_v63, %v2125_v16  ;;  %v2154_v42 = vmul.f32 %v7156_v20, %v7060_v37  ;;  %v776_v50 = vmul.f32 %v7094_v41, %v775_v32 }
 0x172   :  { %12347 = vst [vmem:[#allocation22_spill] sm:$0xff] %v7170_v19  ;;  %5393 = vrcp.f32 %v7154_v47  ;;  %v2140_v49 = vsub.f32 1.0, %v2139_v27  ;;  %v786_v60 = vmul.f32 %v7112_v23, %v785_v58  ;;  %v7184_v44 = vadd.f32 1.0, %v5390_v18  ;;  %v187_v27 = vpop.xlane.xlu2 %186 }
 0x173   :  { %5395 = vpow2.f32 %v4969_v11  ;;  %v2135_v21 = vor.u32 1.1754944e-38, %v2134_v33  ;;  %v7190_v48 = vadd.f32 1.0, %v5392_v31  ;;  %v7193_v17 = vmul.f32 %v2121_v57, %v6805_v52  ;;  %v1169_v33 = vpop.f32.mrf.mxu0 }
 0x174   :  { %vm2129_vm11 = vweird.f32 %v7066_v63  ;;  %vm7196_vm12 = vcmp.eq.f32.partialorder %v2132_v4, 8.507059e+37  ;;  %vm2143_vm13 = vweird.f32 %v7025_v61  ;;  %v2147_v32 = vand.u32 2147483647, %v7025_v61 }
 0x175   :  { %12348 = vst [vmem:[#allocation23_spill] sm:$0xff] %v7193_v17  ;;  %v7202_v3 = vor.u32 1.1754944e-38, %v2149_v10  ;;  %vm780_vm14 = vweird.f32 %v7007_v7  ;;  %v2127_v58 = vadd.f32 %v7066_v63, %v2126_v5  ;;  %v2155_v11 = vsub.f32 1.0, %v2154_v42  ;;  %vm7227_vm1 = vmor %vm2128_vm10, %vm2129_vm11 }
 0x176   :  { %v777_v52 = vmul.f32 0.5, %v776_v50  ;;  %vm790_vm15 = vweird.f32 %v7018_v36  ;;  %v7208_v18 = vadd.f32 %v1344_v45, %v6753_v25  ;;  %v2141_v31 = vmul.f32 %v7124_v6, %v2140_v49 }
 0x177   :  { %v787_v57 = vmul.f32 0.5, %v786_v60  ;;  %5397 = vrcp.f32 %v7184_v44  ;;  %v7213_v4 = vadd.f32 %v1433_v13, %v6759_v26  ;;  %v2164_v42 = vand.u32 2147483648, %v7060_v37  ;;  %v1258_v13 = vpop.f32.mrf.mxu1 }
 0x178   :  { %v7215_v10 = vpop.eup %5393  ;;  %vm781_vm0 = vweird.f32 %v7094_v41  ;;  %5399 = vrcp.f32 %v7190_v48  ;;  %vm2158_vm2 = vweird.f32 %v7060_v37  ;;  %v7233_v45 = vadd.f32 %v1169_v33, %v6709_v0 }
 0x179   :  { %v5396_v50 = vpop.eup %5395  ;;  %v891_v55 = vmul.f32 %v6768_v51, %v6894_v2  ;;  %v892_v49 = vmul.f32 %v6768_v51, %v6909_v24  ;;  %v2131_v15 = vsel %vm7227_vm1, %v7066_v63, %v2127_v58  ;;  %vm2144_vm3 = vweird.f32 %v7124_v6  ;;  %v189_v24 = vpop.xlane.xlu0 %188  ;;  %vm7289_vm8 = vmor %vm780_vm14, %vm781_vm0 }
 0x17a   :  { %vm7243_vm4 = vcmp.eq.f32.partialorder %v2147_v32, 8.507059e+37  ;;  %v778_v9 = vsub.f32 1.5, %v777_v52  ;;  %v4970_v33 = vmul.f32 -1.442695, %v7208_v18  ;;  %v2142_v29 = vadd.f32 %v7124_v6, %v2141_v31  ;;  %vm7273_vm7 = vmor %vm2143_vm13, %vm2144_vm3  ;;  %v317_v16 = vpop.xlane.xlu2 %316 }
 0x17b   :  { %v2156_v2 = vmul.f32 %v7156_v20, %v2155_v11  ;;  %v788_v5 = vsub.f32 1.5, %v787_v57  ;;  %v4971_v51 = vmul.f32 -1.442695, %v7213_v4  ;;  %vm791_vm5 = vweird.f32 %v7112_v23 }
 0x17c   :  { %v2169_v63 = vmul.f32 %v7215_v10, %v7154_v47  ;;  %v7254_v32 = vadd.f32 1.0, %v5396_v50  ;;  %v7257_v58 = vadd.f32 %v1258_v13, %v6714_v53  ;;  %vm2159_vm6 = vweird.f32 %v7156_v20  ;;  %vm7301_vm9 = vmor %vm790_vm15, %vm791_vm5 }
 0x17d   :  { %v7259_v52 = vpop.eup %5397  ;;  %v4972_v11 = vmul.f32 -1.442695, %v7233_v45  ;;  %v924_v31 = vadd.f32 %v6787_v43, %v891_v55  ;;  %v925_v57 = vadd.f32 %v6787_v43, %v892_v49  ;;  %v2136_v22 = vsel %vm7196_vm12, %v2135_v21, %v2131_v15  ;;  %vm7316_vm10 = vmor %vm2158_vm2, %vm2159_vm6 }
 0x17e   :  { %v7265_v60 = vpop.eup %5399  ;;  %v779_v13 = vmul.f32 %v7094_v41, %v778_v9  ;;  %5401 = vpow2.f32 %v4970_v33  ;;  %v7278_v17 = vmul.f32 0.0078125, %v189_v24  ;;  %v2146_v43 = vsel %vm7273_vm7, %v7124_v6, %v2142_v29 }
 0x17f   :  { %v2157_v55 = vadd.f32 %v7156_v20, %v2156_v2  ;;  %v789_v21 = vmul.f32 %v7112_v23, %v788_v5  ;;  %5403 = vpow2.f32 %v4971_v51  ;;  %v2170_v9 = vsub.f32 1.0, %v2169_v63 }
 0x180   :  { %v2184_v49 = vmul.f32 %v7259_v52, %v7184_v44  ;;  %5405 = vrcp.f32 %v7254_v32  ;;  %v4973_v29 = vmul.f32 -1.442695, %v7257_v58  ;;  %v2199_v7 = vmul.f32 %v7265_v60, %v7190_v48 }
 0x181   :  { %v7307_v5 = vmul.f32 0.0078125, %v187_v27  ;;  %5407 = vpow2.f32 %v4972_v11  ;;  %v944_v15 = vpack.c.bf16 %v925_v57, %v924_v31  ;;  %v7310_v33 = vmul.f32 %v2136_v22, %v6874_v14  ;;  %v315_v27 = vpop.xlane.xlu1 %314  ;;  %v5245_v31 = vld [vmem:[#allocation10 + $0x8] sm:$0xff] }
 0x182   :  { %v2165_v2 = vor.u32 1.1754944e-38, %v2164_v42  ;;  %v383_v51 = vmul.f32 %v7278_v17, %v7278_v17  ;;  %v351_v24 = vmul.f32 0.0078125, %v317_v16  ;;  %v2151_v63 = vsel %vm7243_vm4, %v7202_v3, %v2146_v43  ;;  %v5261_v42 = vld [vmem:[#allocation10 + $0x88] sm:$0xff]  ;;  %4393 = vmatpush.bf16.msrb.mxu0 %v5245_v31 }
 0x183   :  { %12361 = vst [vmem:[#allocation24_spill] sm:$0xff] %v7310_v33  ;;  %v2161_v14 = vsel %vm7316_vm10, %v7156_v20, %v2157_v55  ;;  %v783_v22 = vsel %vm7289_vm8, %v7094_v41, %v779_v13  ;;  %v2177_v11 = vand.u32 2147483647, %v7154_v47  ;;  %1218 = vmatmul.bf16.gmra.mxu0 %v944_v15  ;;  %1307 = vmatmul.bf16.gmra.mxu1 %v944_v15  ;;  %v2185_v50 = vsub.f32 1.0, %v2184_v49  ;;  %v5269_v20 = vld [vmem:[#allocation10 + $0xc8] sm:$0xff] }
 0x184   :  { %v5402_v57 = vpop.eup %5401  ;;  %v793_v1 = vsel %vm7301_vm9, %v7112_v23, %v789_v21  ;;  %v2171_v3 = vmul.f32 %v7215_v10, %v2170_v9  ;;  %5409 = vpow2.f32 %v4973_v29  ;;  %1396 = vmatmul.bf16.gmra.mxu2 %v944_v15  ;;  %1485 = vmatmul.bf16.gmra.mxu3 %v944_v15  ;;  %v2179_v41 = vand.u32 2147483648, %v7154_v47 }
 0x185   :  { %v5404_v43 = vpop.eup %5403  ;;  %v2200_v13 = vsub.f32 1.0, %v2199_v7  ;;  %v382_v55 = vmul.f32 %v7307_v5, %v7307_v5  ;;  %v350_v16 = vmul.f32 0.0078125, %v315_v27  ;;  %4571 = vmatpush.bf16.msrb.mxu2 %v5261_v42  ;;  %v12364_v21 = vand.u32 2147483647, %v7060_v37  ;;  %4660 = vmatpush.bf16.msrb.mxu3 %v5269_v20  ;;  %v7451_v42 = vld [vmem:[#allocation2 + $0xe8] sm:$0xff] }
 0x186   :  { %v7339_v61 = vpop.eup %5405  ;;  %vm2173_vm12 = vweird.f32 %v7154_v47  ;;  %v415_v9 = vsub.f32 %v351_v24, %v383_v51  ;;  %v7347_v29 = vmul.f32 %v2151_v63, %v6899_v34  ;;  %v12366_v7 = vsub.f32 %v6933_v56, %v6852_v30 }
 0x187   :  { %vm2163_vm11 = vcmp.eq.f32.partialorder %v12364_v21, 8.507059e+37  ;;  %v5408_v49 = vpop.eup %5407  ;;  %v12367_v36 = vsub.f32 %v7130_v12, %v6858_v39  ;;  %v2172_v37 = vadd.f32 %v7215_v10, %v2171_v3  ;;  %vm2174_vm13 = vweird.f32 %v7215_v10  ;;  %v1347_v3 = vpop.f32.mrf.mxu2 }
 0x188   :  { %12365 = vst [vmem:[#allocation25_spill] sm:$0xff] %v7347_v29  ;;  %v2166_v6 = vsel %vm2163_vm11, %v2165_v2, %v2161_v14  ;;  %v7352_v15 = vmul.f32 %v783_v22, %v12366_v7  ;;  %vm7361_vm14 = vcmp.eq.f32.partialorder %v2177_v11, 8.507059e+37  ;;  %v2186_v34 = vmul.f32 %v7259_v52, %v2185_v50  ;;  %vm7378_vm15 = vmor %vm2173_vm12, %vm2174_vm13 }
 0x189   :  { %v7357_v27 = vmul.f32 %v793_v1, %v12367_v36  ;;  %v7366_v2 = vadd.f32 1.0, %v5402_v57  ;;  %v2180_v30 = vor.u32 1.1754944e-38, %v2179_v41  ;;  %v2201_v56 = vmul.f32 %v7265_v60, %v2200_v13 }
 0x18a   :  { %v7369_v24 = vadd.f32 1.0, %v5404_v43  ;;  %v414_v39 = vsub.f32 %v350_v16, %v382_v55  ;;  %v5410_v12 = vpop.eup %5409  ;;  %v2192_v63 = vand.u32 2147483647, %v7184_v44  ;;  %v2214_v14 = vmul.f32 %v7339_v61, %v7254_v32 }
 0x18b   :  { %v7374_v22 = vadd.f32 1.0, %v5408_v49  ;;  %v447_v11 = vmax.f32 %v415_v9, 0.0  ;;  %vm2189_vm0 = vweird.f32 %v7259_v52  ;;  %v2194_v31 = vand.u32 2147483648, %v7184_v44  ;;  %v5253_v49 = vld [vmem:[#allocation10 + $0x48] sm:$0xff] }
 0x18c   :  { %v2207_v57 = vand.u32 2147483647, %v7190_v48  ;;  %v2209_v1 = vand.u32 2147483648, %v7190_v48  ;;  %v2176_v50 = vsel %vm7378_vm15, %v7215_v10, %v2172_v37  ;;  %v2187_v20 = vadd.f32 %v7259_v52, %v2186_v34  ;;  %v1436_v37 = vpop.f32.mrf.mxu3  ;;  %4482 = vmatpush.bf16.msrb.mxu1 %v5253_v49 }
 0x18d   :  { %vm2204_vm1 = vweird.f32 %v7265_v60  ;;  %5411 = vrcp.f32 %v7366_v2  ;;  %v2202_v47 = vadd.f32 %v7265_v60, %v2201_v56  ;;  %v7394_v43 = vadd.f32 1.0, %v5410_v12 }
 0x18e   :  { %5413 = vrcp.f32 %v7369_v24  ;;  %v446_v41 = vmax.f32 %v414_v39, 0.0  ;;  %v2215_v13 = vsub.f32 1.0, %v2214_v14  ;;  %v7397_v55 = vadd.f32 1e-05, %v447_v11 }
 0x18f   :  { %5415 = vrcp.f32 %v7374_v22  ;;  %v7400_v10 = vadd.f32 %v1347_v3, %v6753_v25  ;;  %v7403_v16 = vmul.f32 %v2166_v6, %v6918_v46  ;;  %vm2188_vm2 = vweird.f32 %v7184_v44  ;;  %v7421_v44 = vld [vmem:[#allocation2 + $0xe0] sm:$0xff] }
 0x190   :  { %vm7406_vm3 = vcmp.eq.f32.partialorder %v2192_v63, 8.507059e+37  ;;  %v2195_v9 = vor.u32 1.1754944e-38, %v2194_v31  ;;  %vm7412_vm4 = vmor %vm2188_vm2, %vm2189_vm0  ;;  %vm2203_vm5 = vweird.f32 %v7190_v48  ;;  %vm7417_vm6 = vcmp.eq.f32.partialorder %v2207_v57, 8.507059e+37  ;;  %v1171_v63 = vpop.f32.mrf.mxu0  ;;  %v1260_v57 = vpop.f32.mrf.mxu1 }
 0x191   :  { %12372 = vst [vmem:[#allocation26_spill] sm:$0xff] %v7403_v16  ;;  %v2210_v46 = vor.u32 1.1754944e-38, %v2209_v1  ;;  %v2181_v34 = vsel %vm7361_vm14, %v2180_v30, %v2176_v50  ;;  %v2191_v56 = vsel %vm7412_vm4, %v7259_v52, %v2187_v20  ;;  %vm7432_vm7 = vmor %vm2203_vm5, %vm2204_vm1  ;;  %5417 = vrcp.f32 %v7394_v43 }
 0x192   :  { %v7437_v39 = vadd.f32 1e-05, %v446_v41  ;;  %v2206_v51 = vsel %vm7432_vm7, %v7265_v60, %v2202_v47  ;;  %v2216_v30 = vmul.f32 %v7339_v61, %v2215_v13  ;;  %5419 = vrsqrt.f32 %v7397_v55 }
 0x193   :  { %v7439_v12 = vpop.eup %5411  ;;  %v4974_v52 = vmul.f32 -1.442695, %v7400_v10  ;;  %vm2218_vm8 = vweird.f32 %v7254_v32  ;;  %v2222_v11 = vand.u32 2147483647, %v7254_v32  ;;  %v7456_v60 = vadd.f32 %v1436_v37, %v6759_v26 }
 0x194   :  { %v7447_v14 = vpop.eup %5413  ;;  %v7461_v3 = vmul.f32 %v2181_v34, %v6992_v62  ;;  %v2196_v50 = vsel %vm7406_vm3, %v2195_v9, %v2191_v56  ;;  %v2224_v20 = vand.u32 2147483648, %v7254_v32  ;;  %v2239_v47 = vand.u32 2147483648, %v7366_v2  ;;  %v1438_v31 = vpop.f32.mrf.mxu3 }
 0x195   :  { %v7458_v1 = vpop.eup %5415  ;;  %v2211_v41 = vsel %vm7417_vm6, %v2210_v46, %v2206_v51  ;;  %v2229_v13 = vmul.f32 %v7439_v12, %v7366_v2  ;;  %5421 = vrsqrt.f32 %v7437_v39  ;;  %v7473_v49 = vadd.f32 %v1171_v63, %v6709_v0 }
 0x196   :  { %12381 = vst [vmem:[#allocation27_spill] sm:$0xff] %v7461_v3  ;;  %v2217_v62 = vadd.f32 %v7339_v61, %v2216_v30  ;;  %vm2219_vm9 = vweird.f32 %v7339_v61  ;;  %5423 = vpow2.f32 %v4974_v52  ;;  %v7478_v21 = vadd.f32 %v1260_v57, %v6714_v53 }
 0x197   :  { %v7480_v9 = vpop.eup %5417  ;;  %vm7482_vm10 = vcmp.eq.f32.partialorder %v2222_v11, 8.507059e+37  ;;  %v2244_v36 = vmul.f32 %v7447_v14, %v7369_v24  ;;  %v2259_v46 = vmul.f32 %v7458_v1, %v7374_v22  ;;  %v4975_v37 = vmul.f32 -1.442695, %v7456_v60  ;;  %vm7502_vm11 = vmor %vm2218_vm8, %vm2219_vm9 }
 0x198   :  { %v7491_v34 = vpop.eup %5419  ;;  %v7494_v56 = vmul.f32 %v2196_v50, %v7028_v35  ;;  %v7497_v48 = vmul.f32 %v2211_v41, %v7040_v40  ;;  %v2225_v51 = vor.u32 1.1754944e-38, %v2224_v20  ;;  %v2237_v30 = vand.u32 2147483647, %v7366_v2  ;;  %v1349_v50 = vpop.f32.mrf.mxu2 }
 0x199   :  { %v2230_v63 = vsub.f32 1.0, %v2229_v13  ;;  %v7506_v11 = vor.u32 1.1754944e-38, %v2239_v47  ;;  %v2254_v57 = vand.u32 2147483648, %v7369_v24  ;;  %v4976_v35 = vmul.f32 -1.442695, %v7473_v49 }
 0x19a   :  { %12384 = vst [vmem:[#allocation28_spill] sm:$0xff] %v7494_v56  ;;  %v2221_v40 = vsel %vm7502_vm11, %v7339_v61, %v2217_v62  ;;  %v2252_v20 = vand.u32 2147483647, %v7369_v24  ;;  %v2274_v32 = vmul.f32 %v7480_v9, %v7394_v43  ;;  %v4977_v41 = vmul.f32 -1.442695, %v7478_v21 }
 0x19b   :  { %12385 = vst [vmem:[#allocation29_spill] sm:$0xff] %v7497_v48  ;;  %v7517_v23 = vpop.eup %5421  ;;  %vm2233_vm12 = vweird.f32 %v7366_v2  ;;  %v2245_v47 = vsub.f32 1.0, %v2244_v36  ;;  %v2260_v13 = vsub.f32 1.0, %v2259_v46  ;;  %v805_v6 = vmul.f32 %v7491_v34, %v7397_v55 }
 0x19c   :  { %5425 = vpow2.f32 %v4975_v37  ;;  %v5424_v52 = vpop.eup %5423  ;;  %vm2234_vm13 = vweird.f32 %v7439_v12  ;;  %vm2248_vm14 = vweird.f32 %v7369_v24  ;;  %v2267_v61 = vand.u32 2147483647, %v7374_v22 }
 0x19d   :  { %v2269_v62 = vand.u32 2147483648, %v7374_v22  ;;  %v7527_v56 = vadd.f32 %v1349_v50, %v6753_v25  ;;  %v2226_v36 = vsel %vm7482_vm10, %v2225_v51, %v2221_v40  ;;  %v2231_v46 = vmul.f32 %v7439_v12, %v2230_v63  ;;  %vm7579_vm6 = vmor %vm2233_vm12, %vm2234_vm13 }
 0x19e   :  { %v7532_v3 = vor.u32 1.1754944e-38, %v2254_v57  ;;  %vm2263_vm15 = vweird.f32 %v7374_v22  ;;  %5427 = vpow2.f32 %v4976_v35  ;;  %v2275_v37 = vsub.f32 1.0, %v2274_v32 }
 0x19f   :  { %v795_v16 = vmul.f32 %v7517_v23, %v7437_v39  ;;  %5429 = vpow2.f32 %v4977_v41  ;;  %v7538_v48 = vadd.f32 %v1438_v31, %v6759_v26  ;;  %v2246_v50 = vmul.f32 %v7447_v14, %v2245_v47 }
 0x1a0   :  { %v2261_v7 = vmul.f32 %v7458_v1, %v2260_v13  ;;  %v806_v51 = vmul.f32 %v7491_v34, %v805_v6  ;;  %v7543_v63 = vadd.f32 1.0, %v5424_v52  ;;  %vm7545_vm0 = vcmp.eq.f32.partialorder %v2237_v30, 8.507059e+37 }
 0x1a1   :  { %v7549_v35 = vor.u32 1.1754944e-38, %v2269_v62  ;;  %vm2278_vm1 = vweird.f32 %v7394_v43  ;;  %v2282_v40 = vand.u32 2147483647, %v7394_v43  ;;  %v4978_v31 = vmul.f32 -1.442695, %v7527_v56 }
 0x1a2   :  { %v5426_v32 = vpop.eup %5425  ;;  %v7555_v41 = vmul.f32 %v2226_v36, %v7122_v8  ;;  %v2232_v6 = vadd.f32 %v7439_v12, %v2231_v46  ;;  %vm2249_vm2 = vweird.f32 %v7447_v14  ;;  %v2284_v30 = vand.u32 2147483648, %v7394_v43  ;;  %v1174_v36 = vpop.f32.mrf.mxu0 }
 0x1a3   :  { %vm7560_vm3 = vcmp.eq.f32.partialorder %v2252_v20, 8.507059e+37  ;;  %vm2264_vm4 = vweird.f32 %v7458_v1  ;;  %vm7565_vm5 = vcmp.eq.f32.partialorder %v2267_v61, 8.507059e+37  ;;  %v2276_v52 = vmul.f32 %v7480_v9, %v2275_v37  ;;  %vm7602_vm8 = vmor %vm2248_vm14, %vm2249_vm2 }
 0x1a4   :  { %12390 = vst [vmem:[#allocation30_spill] sm:$0xff] %v7555_v41  ;;  %v796_v8 = vmul.f32 %v7517_v23, %v795_v16  ;;  %v4979_v62 = vmul.f32 -1.442695, %v7538_v48  ;;  %v5428_v46 = vpop.eup %5427  ;;  %v2247_v41 = vadd.f32 %v7447_v14, %v2246_v50  ;;  %v2262_v20 = vadd.f32 %v7458_v1, %v2261_v7  ;;  %v1263_v50 = vpop.f32.mrf.mxu1  ;;  %v7589_v7 = vld [vmem:[#allocation5] ss:$0 sm:$0xff]  ;;  %vm7614_vm10 = vmor %vm2263_vm15, %vm2264_vm4 }
 0x1a5   :  { %v807_v29 = vmul.f32 0.5, %v806_v51  ;;  %5431 = vrcp.f32 %v7543_v63  ;;  %v5430_v54 = vpop.eup %5429  ;;  %vm7583_vm7 = vcmp.eq.f32.partialorder %v2282_v40, 8.507059e+37  ;;  %v7587_v37 = vadd.f32 1.0, %v5426_v32 }
 0x1a6   :  { %5433 = vpow2.f32 %v4978_v31  ;;  %v893_v51 = vmul.f32 %v7589_v7, %v7352_v15  ;;  %v894_v2 = vmul.f32 %v7589_v7, %v7357_v27  ;;  %v2236_v33 = vsel %vm7579_vm6, %v7439_v12, %v2232_v6  ;;  %v191_v6 = vpop.xlane.xlu0 %190 }
 0x1a7   :  { %vm2279_vm9 = vweird.f32 %v7480_v9  ;;  %v2285_v31 = vor.u32 1.1754944e-38, %v2284_v30  ;;  %v7608_v15 = vadd.f32 %v1174_v36, %v6709_v0  ;;  %v2277_v24 = vadd.f32 %v7480_v9, %v2276_v52  ;;  %v7633_v52 = vld [vmem:[#allocation5 + $0x1] ss:$0 sm:$0xff] }
 0x1a8   :  { %v797_v12 = vmul.f32 0.5, %v796_v8  ;;  %v7619_v32 = vadd.f32 1.0, %v5428_v46  ;;  %5435 = vpow2.f32 %v4979_v62  ;;  %v2251_v30 = vsel %vm7602_vm8, %v7447_v14, %v2247_v41  ;;  %vm7646_vm11 = vmor %vm2278_vm1, %vm2279_vm9 }
 0x1a9   :  { %v2266_v36 = vsel %vm7614_vm10, %v7458_v1, %v2262_v20  ;;  %v7627_v22 = vadd.f32 1.0, %v5430_v54  ;;  %v7630_v61 = vadd.f32 %v1263_v50, %v6714_v53  ;;  %v808_v38 = vsub.f32 1.5, %v807_v29 }
 0x1aa   :  { %5437 = vrcp.f32 %v7587_v37  ;;  %v926_v8 = vadd.f32 %v7633_v52, %v893_v51  ;;  %v927_v62 = vadd.f32 %v7633_v52, %v894_v2  ;;  %v2241_v14 = vsel %vm7545_vm0, %v7506_v11, %v2236_v33  ;;  %v193_v51 = vpop.xlane.xlu1 %192 }
 0x1ab   :  { %v7637_v46 = vpop.eup %5431  ;;  %vm810_vm12 = vweird.f32 %v7397_v55  ;;  %vm800_vm13 = vweird.f32 %v7437_v39  ;;  %v4980_v29 = vmul.f32 -1.442695, %v7608_v15  ;;  %v2281_v57 = vsel %vm7646_vm11, %v7480_v9, %v2277_v24 }
 0x1ac   :  { %v5434_v1 = vpop.eup %5433  ;;  %vm811_vm14 = vweird.f32 %v7491_v34  ;;  %v798_v33 = vsub.f32 1.5, %v797_v12  ;;  %5439 = vrcp.f32 %v7619_v32  ;;  %v2256_v43 = vsel %vm7560_vm3, %v7532_v3, %v2251_v30 }
 0x1ad   :  { %v2271_v11 = vsel %vm7565_vm5, %v7549_v35, %v2266_v36  ;;  %5441 = vrcp.f32 %v7627_v22  ;;  %v4981_v41 = vmul.f32 -1.442695, %v7630_v61  ;;  %v809_v9 = vmul.f32 %v7491_v34, %v808_v38  ;;  %vm7674_vm0 = vmor %vm810_vm12, %vm811_vm14  ;;  %v319_v38 = vpop.xlane.xlu2 %318 }
 0x1ae   :  { %v5436_v20 = vpop.eup %5435  ;;  %vm801_vm15 = vweird.f32 %v7517_v23  ;;  %v7668_v50 = vmul.f32 0.0078125, %v191_v6  ;;  %v945_v2 = vpack.c.bf16 %v927_v62, %v926_v8  ;;  %v2286_v3 = vsel %vm7583_vm7, %v2285_v31, %v2281_v57  ;;  %v321_v36 = vpop.xlane.xlu0 %320 }
 0x1af   :  { %v2289_v47 = vmul.f32 %v7637_v46, %v7543_v63  ;;  %v7680_v13 = vadd.f32 1.0, %v5434_v1  ;;  %5443 = vpow2.f32 %v4980_v29  ;;  %v7685_v27 = vmul.f32 %v2241_v14, %v7208_v18  ;;  %vm7698_vm1 = vmor %vm800_vm13, %vm801_vm15  ;;  %v7727_v1 = vld [vmem:[#allocation2 + $0xf0] sm:$0xff] }
 0x1b0   :  { %v7682_v40 = vpop.eup %5437  ;;  %v7688_v16 = vmul.f32 %v2256_v43, %v7213_v4  ;;  %v799_v55 = vmul.f32 %v7517_v23, %v798_v33  ;;  %1223 = vmatmul.bf16.gmra.mxu0 %v945_v2  ;;  %1312 = vmatmul.bf16.gmra.mxu1 %v945_v2  ;;  %v7692_v31 = vmul.f32 %v2271_v11, %v7233_v45  ;;  %v7702_v18 = vadd.f32 1.0, %v5436_v20 }
 0x1b1   :  { %12407 = vst [vmem:[#allocation31_spill] sm:$0xff] %v7685_v27  ;;  %5445 = vpow2.f32 %v4981_v41  ;;  %v7704_v4 = vmul.f32 0.0078125, %v193_v51  ;;  %1401 = vmatmul.bf16.gmra.mxu2 %v945_v2  ;;  %1490 = vmatmul.bf16.gmra.mxu3 %v945_v2  ;;  %v7709_v45 = vmul.f32 %v2286_v3, %v7257_v58  ;;  %v813_v39 = vsel %vm7674_vm0, %v7491_v34, %v809_v9  ;;  %v1352_v41 = vpop.f32.mrf.mxu2 }
 0x1b2   :  { %12408 = vst [vmem:[#allocation32_spill] sm:$0xff] %v7688_v16  ;;  %v7706_v12 = vpop.eup %5439  ;;  %v384_v6 = vmul.f32 %v7668_v50, %v7668_v50  ;;  %v352_v30 = vmul.f32 0.0078125, %v319_v38  ;;  %v2290_v62 = vsub.f32 1.0, %v2289_v47  ;;  %v2299_v14 = vand.u32 2147483648, %v7543_v63 }
 0x1b3   :  { %12409 = vst [vmem:[#allocation33_spill] sm:$0xff] %v7692_v31  ;;  %v7716_v8 = vpop.eup %5441  ;;  %v2304_v54 = vmul.f32 %v7682_v40, %v7587_v37  ;;  %5447 = vrcp.f32 %v7680_v13  ;;  %v803_v58 = vsel %vm7698_vm1, %v7517_v23, %v799_v55  ;;  %v2297_v34 = vand.u32 2147483647, %v7543_v63 }
 0x1b4   :  { %12412 = vst [vmem:[#allocation34_spill] sm:$0xff] %v7709_v45  ;;  %v2314_v29 = vand.u32 2147483648, %v7587_v37  ;;  %vm2293_vm2 = vweird.f32 %v7543_v63  ;;  %v2319_v43 = vmul.f32 %v7706_v12, %v7619_v32  ;;  %5449 = vrcp.f32 %v7702_v18  ;;  %v1265_v45 = vpop.f32.mrf.mxu1 }
 0x1b5   :  { %v5444_v33 = vpop.eup %5443  ;;  %v385_v23 = vmul.f32 %v7704_v4, %v7704_v4  ;;  %v353_v11 = vmul.f32 0.0078125, %v321_v36  ;;  %v12413_v20 = vsub.f32 %v7451_v42, %v7278_v17  ;;  %v2329_v51 = vand.u32 2147483648, %v7619_v32 }
 0x1b6   :  { %v2334_v2 = vmul.f32 %v7716_v8, %v7627_v22  ;;  %v416_v3 = vsub.f32 %v352_v30, %v384_v6  ;;  %v2291_v47 = vmul.f32 %v7637_v46, %v2290_v62  ;;  %v2300_v38 = vor.u32 1.1754944e-38, %v2299_v14  ;;  %v1441_v6 = vpop.f32.mrf.mxu3 }
 0x1b7   :  { %v7740_v9 = vmul.f32 %v813_v39, %v12413_v20  ;;  %v5446_v35 = vpop.eup %5445  ;;  %v2305_v55 = vsub.f32 1.0, %v2304_v54  ;;  %v2312_v24 = vand.u32 2147483647, %v7587_v37  ;;  %v12414_v36 = vsub.f32 %v7421_v44, %v7307_v5  ;;  %v1176_v20 = vpop.f32.mrf.mxu0 }
 0x1b8   :  { %v2327_v17 = vand.u32 2147483647, %v7619_v32  ;;  %v7753_v42 = vadd.f32 1.0, %v5444_v33  ;;  %v7756_v39 = vadd.f32 %v1352_v41, %v6753_v25  ;;  %vm2294_vm3 = vweird.f32 %v7637_v46 }
 0x1b9   :  { %v7750_v57 = vmul.f32 %v803_v58, %v12414_v36  ;;  %v7758_v30 = vpop.eup %5447  ;;  %v7761_v62 = vor.u32 1.1754944e-38, %v2314_v29  ;;  %v2320_v14 = vsub.f32 1.0, %v2319_v43  ;;  %v417_v54 = vsub.f32 %v353_v11, %v385_v23  ;;  %vm7796_vm9 = vmor %vm2293_vm2, %vm2294_vm3 }
 0x1ba   :  { %vm7763_vm4 = vcmp.eq.f32.partialorder %v2297_v34, 8.507059e+37  ;;  %vm2308_vm5 = vweird.f32 %v7587_v37  ;;  %v7768_v44 = vor.u32 1.1754944e-38, %v2329_v51  ;;  %v2335_v58 = vsub.f32 1.0, %v2334_v2  ;;  %v7772_v36 = vpop.eup %5449 }
 0x1bb   :  { %v7770_v33 = vadd.f32 1.0, %v5446_v35  ;;  %v448_v41 = vmax.f32 %v416_v3, 0.0  ;;  %v2292_v29 = vadd.f32 %v7637_v46, %v2291_v47  ;;  %v2306_v43 = vmul.f32 %v7682_v40, %v2305_v55 }
 0x1bc   :  { %vm2323_vm6 = vweird.f32 %v7619_v32  ;;  %v2342_v34 = vand.u32 2147483647, %v7627_v22  ;;  %v7779_v23 = vadd.f32 %v1441_v6, %v6759_v26  ;;  %vm2338_vm7 = vweird.f32 %v7627_v22 }
 0x1bd   :  { %v2349_v11 = vmul.f32 %v7758_v30, %v7680_v13  ;;  %5451 = vrcp.f32 %v7753_v42  ;;  %v4982_v51 = vmul.f32 -1.442695, %v7756_v39  ;;  %v7787_v2 = vadd.f32 %v1176_v20, %v6709_v0 }
 0x1be   :  { %vm2309_vm8 = vweird.f32 %v7682_v40  ;;  %v2321_v3 = vmul.f32 %v7706_v12, %v2320_v14  ;;  %v2344_v35 = vand.u32 2147483648, %v7627_v22  ;;  %v449_v47 = vmax.f32 %v417_v54, 0.0 }
 0x1bf   :  { %vm7800_vm10 = vcmp.eq.f32.partialorder %v2312_v24, 8.507059e+37  ;;  %v2336_v20 = vmul.f32 %v7716_v8, %v2335_v58  ;;  %v2364_v14 = vmul.f32 %v7772_v36, %v7702_v18  ;;  %5453 = vrcp.f32 %v7770_v33  ;;  %vm7844_vm15 = vmor %vm2308_vm5, %vm2309_vm8 }
 0x1c0   :  { %v7808_v54 = vadd.f32 1e-05, %v448_v41  ;;  %v2296_v63 = vsel %vm7796_vm9, %v7637_v46, %v2292_v29  ;;  %vm2324_vm11 = vweird.f32 %v7706_v12  ;;  %vm7814_vm12 = vcmp.eq.f32.partialorder %v2327_v17, 8.507059e+37 }
 0x1c1   :  { %v2357_v58 = vand.u32 2147483647, %v7680_v13  ;;  %v4983_v31 = vmul.f32 -1.442695, %v7779_v23  ;;  %v2307_v16 = vadd.f32 %v7682_v40, %v2306_v43  ;;  %vm7821_vm13 = vcmp.eq.f32.partialorder %v2342_v34, 8.507059e+37  ;;  %vm7858_vm1 = vmor %vm2323_vm6, %vm2324_vm11 }
 0x1c2   :  { %v2350_v27 = vsub.f32 1.0, %v2349_v11  ;;  %5455 = vpow2.f32 %v4982_v51  ;;  %v4984_v46 = vmul.f32 -1.442695, %v7787_v2  ;;  %v2322_v29 = vadd.f32 %v7706_v12, %v2321_v3 }
 0x1c3   :  { %v2359_v17 = vand.u32 2147483648, %v7680_v13  ;;  %v7828_v55 = vadd.f32 1e-05, %v449_v47  ;;  %v7831_v19 = vadd.f32 %v1265_v45, %v6714_v53  ;;  %v7833_v59 = vpop.eup %5451  ;;  %v2337_v43 = vadd.f32 %v7716_v8, %v2336_v20 }
 0x1c4   :  { %vm2339_vm14 = vweird.f32 %v7716_v8  ;;  %v2365_v34 = vsub.f32 1.0, %v2364_v14  ;;  %5457 = vrsqrt.f32 %v7808_v54  ;;  %v2301_v11 = vsel %vm7763_vm4, %v2300_v38, %v2296_v63 }
 0x1c5   :  { %v2345_v45 = vor.u32 1.1754944e-38, %v2344_v35  ;;  %vm2353_vm0 = vweird.f32 %v7680_v13  ;;  %5459 = vpow2.f32 %v4983_v31  ;;  %v7849_v3 = vpop.eup %5453  ;;  %v2311_v47 = vsel %vm7844_vm15, %v7682_v40, %v2307_v16  ;;  %vm7871_vm2 = vmor %vm2338_vm7, %vm2339_vm14  ;;  %v1443_v13 = vpop.f32.mrf.mxu3 }
 0x1c6   :  { %v2351_v38 = vmul.f32 %v7758_v30, %v2350_v27  ;;  %v2372_v5 = vand.u32 2147483647, %v7702_v18  ;;  %5461 = vpow2.f32 %v4984_v46  ;;  %v2326_v31 = vsel %vm7858_vm1, %v7706_v12, %v2322_v29  ;;  %v1268_v35 = vpop.f32.mrf.mxu1 }
 0x1c7   :  { %v2379_v32 = vmul.f32 %v7833_v59, %v7753_v42  ;;  %5463 = vrsqrt.f32 %v7828_v55  ;;  %v4985_v27 = vmul.f32 -1.442695, %v7831_v19  ;;  %v2341_v12 = vsel %vm7871_vm2, %v7716_v8, %v2337_v43 }
 0x1c8   :  { %v5456_v16 = vpop.eup %5455  ;;  %vm7882_vm3 = vcmp.eq.f32.partialorder %v2357_v58, 8.507059e+37  ;;  %v2360_v22 = vor.u32 1.1754944e-38, %v2359_v17  ;;  %v2366_v20 = vmul.f32 %v7772_v36, %v2365_v34  ;;  %vm2368_vm4 = vweird.f32 %v7702_v18  ;;  %v1354_v58 = vpop.f32.mrf.mxu2 }
 0x1c9   :  { %v7889_v14 = vmul.f32 %v2301_v11, %v7400_v10  ;;  %v2316_v63 = vsel %vm7800_vm10, %v7761_v62, %v2311_v47  ;;  %v2374_v46 = vand.u32 2147483648, %v7702_v18  ;;  %v2394_v8 = vmul.f32 %v7849_v3, %v7770_v33 }
 0x1ca   :  { %v7897_v29 = vpop.eup %5457  ;;  %v2331_v17 = vsel %vm7814_vm12, %v7768_v44, %v2326_v31  ;;  %v2352_v43 = vadd.f32 %v7758_v30, %v2351_v38  ;;  %vm2354_vm5 = vweird.f32 %v7758_v30  ;;  %vm7904_vm6 = vcmp.eq.f32.partialorder %v2372_v5, 8.507059e+37 }
 0x1cb   :  { %v5460_v62 = vpop.eup %5459  ;;  %v2346_v6 = vsel %vm7821_vm13, %v2345_v45, %v2341_v12  ;;  %v2380_v34 = vsub.f32 1.0, %v2379_v32  ;;  %v7910_v11 = vadd.f32 1.0, %v5456_v16  ;;  %5465 = vpow2.f32 %v4985_v27  ;;  %vm7927_vm8 = vmor %vm2353_vm0, %vm2354_vm5 }
 0x1cc   :  { %v5462_v51 = vpop.eup %5461  ;;  %v7913_v24 = vmul.f32 %v2316_v63, %v7456_v60  ;;  %v2367_v44 = vadd.f32 %v7772_v36, %v2366_v20  ;;  %vm2369_vm7 = vweird.f32 %v7772_v36  ;;  %v7918_v47 = vadd.f32 %v1354_v58, %v6753_v25 }
 0x1cd   :  { %v7920_v37 = vpop.eup %5463  ;;  %v7923_v41 = vmul.f32 %v2331_v17, %v7473_v49  ;;  %v2375_v60 = vor.u32 1.1754944e-38, %v2374_v46  ;;  %v2387_v38 = vand.u32 2147483647, %v7753_v42  ;;  %v2395_v5 = vsub.f32 1.0, %v2394_v8  ;;  %vm7943_vm10 = vmor %vm2368_vm4, %vm2369_vm7 }
 0x1ce   :  { %v7933_v31 = vmul.f32 %v2346_v6, %v7478_v21  ;;  %v2356_v40 = vsel %vm7927_vm8, %v7758_v30, %v2352_v43  ;;  %vm2383_vm9 = vweird.f32 %v7753_v42  ;;  %v7939_v49 = vadd.f32 1.0, %v5460_v62 }
 0x1cf   :  { %v2381_v27 = vmul.f32 %v7833_v59, %v2380_v34  ;;  %v815_v21 = vmul.f32 %v7897_v29, %v7808_v54  ;;  %5467 = vrcp.f32 %v7910_v11  ;;  %v7951_v16 = vadd.f32 1.0, %v5462_v51 }
 0x1d0   :  { %v2371_v30 = vsel %vm7943_vm10, %v7772_v36, %v2367_v44  ;;  %v2389_v12 = vand.u32 2147483648, %v7753_v42  ;;  %v825_v18 = vmul.f32 %v7920_v37, %v7828_v55  ;;  %v4986_v20 = vmul.f32 -1.442695, %v7918_v47  ;;  %v1179_v36 = vpop.f32.mrf.mxu0 }
 0x1d1   :  { %v5466_v63 = vpop.eup %5465  ;;  %v2361_v46 = vsel %vm7882_vm3, %v2360_v22, %v2356_v40  ;;  %vm7962_vm11 = vcmp.eq.f32.partialorder %v2387_v38, 8.507059e+37  ;;  %v2396_v58 = vmul.f32 %v7849_v3, %v2395_v5  ;;  %v7968_v17 = vadd.f32 %v1443_v13, %v6759_v26 }
 0x1d2   :  { %vm2384_vm12 = vweird.f32 %v7833_v59  ;;  %v2402_v43 = vand.u32 2147483647, %v7770_v33  ;;  %v2404_v62 = vand.u32 2147483648, %v7770_v33  ;;  %5469 = vrcp.f32 %v7939_v49 }
 0x1d3   :  { %v2376_v22 = vsel %vm7904_vm6, %v2375_v60, %v2371_v30  ;;  %v2382_v6 = vadd.f32 %v7833_v59, %v2381_v27  ;;  %v816_v34 = vmul.f32 %v7897_v29, %v815_v21  ;;  %5471 = vrcp.f32 %v7951_v16  ;;  %vm8000_vm14 = vmor %vm2383_vm9, %vm2384_vm12  ;;  %v8005_v27 = vld [vmem:[#allocation2 + $0xf8] sm:$0xff] }
 0x1d4   :  { %v826_v51 = vmul.f32 %v7920_v37, %v825_v18  ;;  %v7980_v44 = vadd.f32 1.0, %v5466_v63  ;;  %5473 = vpow2.f32 %v4986_v20  ;;  %v7983_v45 = vadd.f32 %v1179_v36, %v6709_v0  ;;  %v5260_v20 = vld [vmem:[#allocation10 + $0x80] sm:$0xff] }
 0x1d5   :  { %v7985_v38 = vpop.eup %5467  ;;  %v2397_v5 = vadd.f32 %v7849_v3, %v2396_v58  ;;  %vm2399_vm13 = vweird.f32 %v7849_v3  ;;  %v4987_v10 = vmul.f32 -1.442695, %v7968_v17  ;;  %v7991_v60 = vadd.f32 %v1268_v35, %v6714_v53  ;;  %v5268_v63 = vld [vmem:[#allocation10 + $0xc0] sm:$0xff]  ;;  %4572 = vmatpush.bf16.msrb.mxu2 %v5260_v20 }
 0x1d6   :  { %v7994_v40 = vmul.f32 %v2361_v46, %v7527_v56  ;;  %v2390_v32 = vor.u32 1.1754944e-38, %v2389_v12  ;;  %vm2398_vm15 = vweird.f32 %v7770_v33  ;;  %v8010_v30 = vmul.f32 %v2376_v22, %v7538_v48  ;;  %v1357_v12 = vpop.f32.mrf.mxu2  ;;  %v5244_v33 = vld [vmem:[#allocation10] sm:$0xff]  ;;  %4661 = vmatpush.bf16.msrb.mxu3 %v5268_v63 }
 0x1d7   :  { %v2386_v56 = vsel %vm8000_vm14, %v7833_v59, %v2382_v6  ;;  %vm8015_vm0 = vcmp.eq.f32.partialorder %v2402_v43, 8.507059e+37  ;;  %v817_v18 = vmul.f32 0.5, %v816_v34  ;;  %vm8023_vm1 = vmor %vm2398_vm15, %vm2399_vm13  ;;  %v827_v58 = vmul.f32 0.5, %v826_v51  ;;  %4394 = vmatpush.bf16.msrb.mxu0 %v5244_v33 }
 0x1d8   :  { %v8019_v46 = vpop.eup %5469  ;;  %v2409_v59 = vmul.f32 %v7985_v38, %v7910_v11  ;;  %5475 = vrcp.f32 %v7980_v44  ;;  %v4988_v36 = vmul.f32 -1.442695, %v7983_v45  ;;  %v2401_v35 = vsel %vm8023_vm1, %v7849_v3, %v2397_v5 }
 0x1d9   :  { %v8031_v43 = vpop.eup %5471  ;;  %v2405_v22 = vor.u32 1.1754944e-38, %v2404_v62  ;;  %5477 = vpow2.f32 %v4987_v10  ;;  %v4989_v6 = vmul.f32 -1.442695, %v7991_v60  ;;  %v2391_v51 = vsel %vm7962_vm11, %v2390_v32, %v2386_v56  ;;  %v1446_v32 = vpop.f32.mrf.mxu3 }
 0x1da   :  { %v5474_v34 = vpop.eup %5473  ;;  %vm820_vm2 = vweird.f32 %v7808_v54  ;;  %vm830_vm3 = vweird.f32 %v7828_v55  ;;  %v8042_v13 = vadd.f32 %v1357_v12, %v6753_v25  ;;  %v818_v48 = vsub.f32 1.5, %v817_v18 }
 0x1db   :  { %vm821_vm4 = vweird.f32 %v7897_v29  ;;  %v2419_v3 = vand.u32 2147483648, %v7910_v11  ;;  %v895_v62 = vmul.f32 %v7589_v7, %v7750_v57  ;;  %v2406_v8 = vsel %vm8015_vm0, %v2405_v22, %v2401_v35  ;;  %v5252_v35 = vld [vmem:[#allocation10 + $0x40] sm:$0xff] }
 0x1dc   :  { %v828_v5 = vsub.f32 1.5, %v827_v58  ;;  %v2410_v10 = vsub.f32 1.0, %v2409_v59  ;;  %5479 = vpow2.f32 %v4988_v36  ;;  %v2424_v56 = vmul.f32 %v8019_v46, %v7939_v49  ;;  %vm8079_vm7 = vmor %vm820_vm2, %vm821_vm4  ;;  %4483 = vmatpush.bf16.msrb.mxu1 %v5252_v35 }
 0x1dd   :  { %v2439_v18 = vmul.f32 %v8031_v43, %v7951_v16  ;;  %v8054_v12 = vadd.f32 1.0, %v5474_v34  ;;  %5481 = vpow2.f32 %v4989_v6  ;;  %v8059_v57 = vmul.f32 %v2391_v51, %v7608_v15 }
 0x1de   :  { %v8056_v20 = vpop.eup %5475  ;;  %vm831_vm5 = vweird.f32 %v7920_v37  ;;  %v4990_v42 = vmul.f32 -1.442695, %v8042_v13  ;;  %v896_v33 = vmul.f32 %v7589_v7, %v7740_v9  ;;  %v819_v58 = vmul.f32 %v7897_v29, %v818_v48 }
 0x1df   :  { %v5478_v63 = vpop.eup %5477  ;;  %vm2413_vm6 = vweird.f32 %v7910_v11  ;;  %v2417_v59 = vand.u32 2147483647, %v7910_v11  ;;  %v8069_v36 = vadd.f32 %v1446_v32, %v6759_v26  ;;  %v928_v15 = vadd.f32 %v7633_v52, %v895_v62  ;;  %vm8091_vm8 = vmor %vm830_vm3, %vm831_vm5 }
 0x1e0   :  { %v8073_v22 = vmul.f32 %v2406_v8, %v7630_v61  ;;  %v829_v6 = vmul.f32 %v7920_v37, %v828_v5  ;;  %v2411_v34 = vmul.f32 %v7985_v38, %v2410_v10  ;;  %v8085_v51 = vor.u32 1.1754944e-38, %v2419_v3 }
 0x1e1   :  { %v2425_v48 = vsub.f32 1.0, %v2424_v56  ;;  %v2440_v54 = vsub.f32 1.0, %v2439_v18  ;;  %5483 = vrcp.f32 %v8054_v12  ;;  %v929_v62 = vadd.f32 %v7633_v52, %v896_v33  ;;  %v1181_v33 = vpop.f32.mrf.mxu0 }
 0x1e2   :  { %12447 = vst [vmem:[#allocation35_spill] sm:$0xff] %v8073_v22  ;;  %v5480_v8 = vpop.eup %5479  ;;  %v2432_v5 = vand.u32 2147483647, %v7939_v49  ;;  %v2454_v3 = vmul.f32 %v8056_v20, %v7980_v44  ;;  %v8100_v10 = vadd.f32 1.0, %v5478_v63  ;;  %5485 = vpow2.f32 %v4990_v42 }
 0x1e3   :  { %v5482_v55 = vpop.eup %5481  ;;  %v823_v32 = vsel %vm8079_vm7, %v7897_v29, %v819_v58  ;;  %vm2428_vm9 = vweird.f32 %v7939_v49  ;;  %v2434_v56 = vand.u32 2147483648, %v7939_v49  ;;  %v4991_v18 = vmul.f32 -1.442695, %v8069_v36 }
 0x1e4   :  { %v946_v35 = vpack.c.bf16 %v929_v62, %v928_v15  ;;  %v833_v21 = vsel %vm8091_vm8, %v7920_v37, %v829_v6  ;;  %vm2414_vm10 = vweird.f32 %v7985_v38  ;;  %vm8112_vm11 = vcmp.eq.f32.partialorder %v2417_v59, 8.507059e+37  ;;  %v1270_v37 = vpop.f32.mrf.mxu1 }
 0x1e5   :  { %vm2443_vm12 = vweird.f32 %v7951_v16  ;;  %v2447_v29 = vand.u32 2147483647, %v7951_v16  ;;  %v2449_v63 = vand.u32 2147483648, %v7951_v16  ;;  %v2412_v58 = vadd.f32 %v7985_v38, %v2411_v34  ;;  %vm8143_vm14 = vmor %vm2413_vm6, %vm2414_vm10 }
 0x1e6   :  { %v2426_v15 = vmul.f32 %v8019_v46, %v2425_v48  ;;  %v2441_v9 = vmul.f32 %v8031_v43, %v2440_v54  ;;  %v8122_v61 = vadd.f32 1.0, %v5480_v8  ;;  %1228 = vmatmul.bf16.gmra.mxu0 %v946_v35  ;;  %1317 = vmatmul.bf16.gmra.mxu1 %v946_v35  ;;  %v2455_v59 = vsub.f32 1.0, %v2454_v3 }
 0x1e7   :  { %5487 = vrcp.f32 %v8100_v10  ;;  %v8125_v6 = vadd.f32 1.0, %v5482_v55  ;;  %v8128_v62 = vadd.f32 %v1181_v33, %v6709_v0  ;;  %1406 = vmatmul.bf16.gmra.mxu2 %v946_v35  ;;  %1495 = vmatmul.bf16.gmra.mxu3 %v946_v35  ;;  %v8130_v34 = vpop.eup %5483  ;;  %v12454_v48 = vsub.f32 %v7727_v1, %v7668_v50 }
 0x1e8   :  { %v12455_v8 = vsub.f32 %v8005_v27, %v7704_v4  ;;  %vm2429_vm13 = vweird.f32 %v8019_v46  ;;  %5489 = vpow2.f32 %v4991_v18  ;;  %v5486_v3 = vpop.eup %5485  ;;  %vm8147_vm15 = vcmp.eq.f32.partialorder %v2432_v5, 8.507059e+37 }
 0x1e9   :  { %v864_v54 = vmul.f32 %v823_v32, %v12454_v48  ;;  %vm2444_vm0 = vweird.f32 %v8031_v43  ;;  %v2462_v50 = vand.u32 2147483647, %v7980_v44  ;;  %v2464_v4 = vand.u32 2147483648, %v7980_v44  ;;  %vm8178_vm1 = vmor %vm2428_vm9, %vm2429_vm13 }
 0x1ea   :  { %v865_v22 = vmul.f32 %v833_v21, %v12455_v8  ;;  %v8155_v1 = vadd.f32 %v1270_v37, %v6714_v53  ;;  %v2416_v11 = vsel %vm8143_vm14, %v7985_v38, %v2412_v58  ;;  %v2427_v27 = vadd.f32 %v8019_v46, %v2426_v15  ;;  %vm8198_vm4 = vmor %vm2443_vm12, %vm2444_vm0 }
 0x1eb   :  { %v2442_v21 = vadd.f32 %v8031_v43, %v2441_v9  ;;  %5491 = vrcp.f32 %v8122_v61  ;;  %v2456_v5 = vmul.f32 %v8056_v20, %v2455_v59  ;;  %v2469_v32 = vmul.f32 %v8130_v34, %v8054_v12  ;;  %v1448_v9 = vpop.f32.mrf.mxu3 }
 0x1ec   :  { %5493 = vrcp.f32 %v8125_v6  ;;  %v4992_v18 = vmul.f32 -1.442695, %v8128_v62  ;;  %v2435_v35 = vor.u32 1.1754944e-38, %v2434_v56  ;;  %v8168_v37 = vadd.f32 1.0, %v5486_v3 }
 0x1ed   :  { %v897_v38 = vmul.f32 %v7589_v7, %v864_v54  ;;  %v898_v58 = vmul.f32 %v7589_v7, %v865_v22  ;;  %v8172_v15 = vpop.eup %5487  ;;  %vm8182_vm2 = vcmp.eq.f32.partialorder %v2447_v29, 8.507059e+37  ;;  %v2450_v56 = vor.u32 1.1754944e-38, %v2449_v63 }
 0x1ee   :  { %vm2458_vm3 = vweird.f32 %v7980_v44  ;;  %v4993_v48 = vmul.f32 -1.442695, %v8155_v1  ;;  %v5490_v7 = vpop.eup %5489  ;;  %v2421_v22 = vsel %vm8112_vm11, %v8085_v51, %v2416_v11  ;;  %v2431_v49 = vsel %vm8178_vm1, %v8019_v46, %v2427_v27  ;;  %v1359_v51 = vpop.f32.mrf.mxu2 }
 0x1ef   :  { %vm2459_vm5 = vweird.f32 %v8056_v20  ;;  %vm8203_vm6 = vcmp.eq.f32.partialorder %v2462_v50, 8.507059e+37  ;;  %v2465_v42 = vor.u32 1.1754944e-38, %v2464_v4  ;;  %v2446_v46 = vsel %vm8198_vm4, %v8031_v43, %v2442_v21 }
 0x1f0   :  { %v2457_v54 = vadd.f32 %v8056_v20, %v2456_v5  ;;  %v2470_v8 = vsub.f32 1.0, %v2469_v32  ;;  %5495 = vpow2.f32 %v4992_v18  ;;  %v2484_v3 = vmul.f32 %v8172_v15, %v8100_v10  ;;  %vm8235_vm7 = vmor %vm2458_vm3, %vm2459_vm5 }
 0x1f1   :  { %v8211_v16 = vpop.eup %5491  ;;  %5497 = vrcp.f32 %v8168_v37  ;;  %v930_v55 = vadd.f32 %v7633_v52, %v897_v38  ;;  %v931_v50 = vadd.f32 %v7633_v52, %v898_v58  ;;  %v2479_v11 = vand.u32 2147483648, %v8054_v12 }
 0x1f2   :  { %v8218_v4 = vpop.eup %5493  ;;  %v8221_v43 = vadd.f32 1.0, %v5490_v7  ;;  %5499 = vpow2.f32 %v4993_v48  ;;  %v8224_v27 = vadd.f32 %v1359_v51, %v6753_v25  ;;  %v8227_v21 = vmul.f32 %v2421_v22, %v7756_v39  ;;  %v1184_v22 = vpop.f32.mrf.mxu0 }
 0x1f3   :  { %v2436_v5 = vsel %vm8147_vm15, %v2435_v35, %v2431_v49  ;;  %vm2473_vm8 = vweird.f32 %v8054_v12  ;;  %v2477_v32 = vand.u32 2147483647, %v8054_v12  ;;  %v2451_v18 = vsel %vm8182_vm2, %v2450_v56, %v2446_v46  ;;  %v1273_v46 = vpop.f32.mrf.mxu1 }
 0x1f4   :  { %12468 = vst [vmem:[#allocation36_spill] sm:$0xff] %v8227_v21  ;;  %v2461_v39 = vsel %vm8235_vm7, %v8056_v20, %v2457_v54  ;;  %v2471_v33 = vmul.f32 %v8130_v34, %v2470_v8  ;;  %v2494_v35 = vand.u32 2147483648, %v8100_v10  ;;  %v2485_v44 = vsub.f32 1.0, %v2484_v3  ;;  %v12525_v21 = vld [vmem:[#allocation32_spill] sm:$0xff] }
 0x1f5   :  { %v2499_v38 = vmul.f32 %v8211_v16, %v8122_v61  ;;  %v2514_v58 = vmul.f32 %v8218_v4, %v8125_v6  ;;  %v947_v48 = vpack.c.bf16 %v931_v50, %v930_v55  ;;  %v8253_v59 = vmul.f32 %v2436_v5, %v7779_v23 }
 0x1f6   :  { %v5496_v7 = vpop.eup %5495  ;;  %v2480_v56 = vor.u32 1.1754944e-38, %v2479_v11  ;;  %5501 = vrcp.f32 %v8221_v43  ;;  %v4994_v20 = vmul.f32 -1.442695, %v8224_v27  ;;  %v8260_v29 = vmul.f32 %v2451_v18, %v7787_v2 }
 0x1f7   :  { %12471 = vst [vmem:[#allocation37_spill] sm:$0xff] %v8253_v59  ;;  %v8257_v49 = vpop.eup %5497  ;;  %vm2474_vm9 = vweird.f32 %v8130_v34  ;;  %vm8263_vm10 = vcmp.eq.f32.partialorder %v2477_v32, 8.507059e+37  ;;  %vm2488_vm11 = vweird.f32 %v8100_v10  ;;  %v2492_v23 = vand.u32 2147483647, %v8100_v10  ;;  %1233 = vmatmul.bf16.gmra.mxu0 %v947_v48  ;;  %1322 = vmatmul.bf16.gmra.mxu1 %v947_v48 }
 0x1f8   :  { %12472 = vst [vmem:[#allocation38_spill] sm:$0xff] %v8260_v29  ;;  %v5500_v54 = vpop.eup %5499  ;;  %v2466_v8 = vsel %vm8203_vm6, %v2465_v42, %v2461_v39  ;;  %v2472_v2 = vadd.f32 %v8130_v34, %v2471_v33  ;;  %v2495_v3 = vor.u32 1.1754944e-38, %v2494_v35  ;;  %v8273_v55 = vadd.f32 %v1448_v9, %v6759_v26  ;;  %1411 = vmatmul.bf16.gmra.mxu2 %v947_v48  ;;  %vm8304_vm14 = vmor %vm2473_vm8, %vm2474_vm9 }
 0x1f9   :  { %1500 = vmatmul.bf16.gmra.mxu3 %v947_v48  ;;  %v2486_v50 = vmul.f32 %v8172_v15, %v2485_v44  ;;  %v2500_v11 = vsub.f32 1.0, %v2499_v38  ;;  %v2515_v5 = vsub.f32 1.0, %v2514_v58  ;;  %v8277_v52 = vadd.f32 %v1184_v22, %v6709_v0  ;;  %v1362_v22 = vpop.f32.mrf.mxu2 }
 0x1fa   :  { %v2529_v32 = vmul.f32 %v8257_v49, %v8168_v37  ;;  %v8281_v63 = vadd.f32 1.0, %v5496_v7  ;;  %5503 = vpow2.f32 %v4994_v20  ;;  %v8284_v42 = vadd.f32 %v1273_v46, %v6714_v53 }
 0x1fb   :  { %vm8286_vm12 = vcmp.eq.f32.partialorder %v2492_v23, 8.507059e+37  ;;  %vm2503_vm13 = vweird.f32 %v8122_v61  ;;  %v2507_v39 = vand.u32 2147483647, %v8122_v61  ;;  %v2509_v33 = vand.u32 2147483648, %v8122_v61 }
 0x1fc   :  { %v8293_v35 = vadd.f32 1.0, %v5500_v54  ;;  %v8295_v44 = vpop.eup %5501  ;;  %v8298_v38 = vmul.f32 %v2466_v8, %v7831_v19  ;;  %vm2489_vm15 = vweird.f32 %v8172_v15  ;;  %v2522_v9 = vand.u32 2147483647, %v8125_v6 }
 0x1fd   :  { %v4995_v48 = vmul.f32 -1.442695, %v8273_v55  ;;  %v2476_v7 = vsel %vm8304_vm14, %v8130_v34, %v2472_v2  ;;  %v2487_v19 = vadd.f32 %v8172_v15, %v2486_v50  ;;  %v2501_v20 = vmul.f32 %v8211_v16, %v2500_v11  ;;  %vm8331_vm1 = vmor %vm2488_vm11, %vm2489_vm15 }
 0x1fe   :  { %12477 = vst [vmem:[#allocation39_spill] sm:$0xff] %v8298_v38  ;;  %v4996_v12 = vmul.f32 -1.442695, %v8277_v52  ;;  %v2516_v23 = vmul.f32 %v8218_v4, %v2515_v5  ;;  %v2530_v46 = vsub.f32 1.0, %v2529_v32  ;;  %5505 = vrcp.f32 %v8281_v63 }
 0x1ff   :  { %v4997_v54 = vmul.f32 -1.442695, %v8284_v42  ;;  %vm2504_vm0 = vweird.f32 %v8211_v16  ;;  %v2524_v8 = vand.u32 2147483648, %v8125_v6  ;;  %v2544_v34 = vmul.f32 %v8295_v44, %v8221_v43 }
 0x200   :  { %5507 = vrcp.f32 %v8293_v35  ;;  %v5504_v2 = vpop.eup %5503  ;;  %v2481_v50 = vsel %vm8263_vm10, %v2480_v56, %v2476_v7  ;;  %vm8335_vm2 = vcmp.eq.f32.partialorder %v2507_v39, 8.507059e+37  ;;  %vm2519_vm3 = vweird.f32 %v8218_v4  ;;  %vm8362_vm5 = vmor %vm2503_vm13, %vm2504_vm0 }
 0x201   :  { %5509 = vpow2.f32 %v4995_v48  ;;  %v8341_v32 = vadd.f32 %v1362_v22, %v6753_v25  ;;  %v2491_v56 = vsel %vm8331_vm1, %v8172_v15, %v2487_v19  ;;  %v2537_v10 = vand.u32 2147483647, %v8168_v37  ;;  %v12500_v19 = vld [vmem:[#allocation20_spill] sm:$0xff] }
 0x202   :  { %v2539_v51 = vand.u32 2147483648, %v8168_v37  ;;  %5511 = vpow2.f32 %v4996_v12  ;;  %v2502_v39 = vadd.f32 %v8211_v16, %v2501_v20  ;;  %v2517_v58 = vadd.f32 %v8218_v4, %v2516_v23 }
 0x203   :  { %v2531_v7 = vmul.f32 %v8257_v49, %v2530_v46  ;;  %5513 = vpow2.f32 %v4997_v54  ;;  %v2510_v48 = vor.u32 1.1754944e-38, %v2509_v33  ;;  %vm2518_vm4 = vweird.f32 %v8125_v6 }
 0x204   :  { %v2545_v22 = vsub.f32 1.0, %v2544_v34  ;;  %v8352_v59 = vadd.f32 1.0, %v5504_v2  ;;  %v8354_v11 = vpop.eup %5505  ;;  %v2496_v15 = vsel %vm8286_vm12, %v2495_v3, %v2491_v56  ;;  %vm8366_vm6 = vcmp.eq.f32.partialorder %v2522_v9, 8.507059e+37  ;;  %vm8378_vm7 = vmor %vm2518_vm4, %vm2519_vm3 }
 0x205   :  { %v2525_v6 = vor.u32 1.1754944e-38, %v2524_v8  ;;  %v4998_v20 = vmul.f32 -1.442695, %v8341_v32  ;;  %v8374_v18 = vmul.f32 %v2481_v50, %v7918_v47  ;;  %vm2533_vm8 = vweird.f32 %v8168_v37 }
 0x206   :  { %v8371_v12 = vpop.eup %5507  ;;  %vm8383_vm9 = vcmp.eq.f32.partialorder %v2537_v10, 8.507059e+37  ;;  %v2540_v9 = vor.u32 1.1754944e-38, %v2539_v51  ;;  %v2506_v46 = vsel %vm8362_vm5, %v8211_v16, %v2502_v39  ;;  %v2521_v47 = vsel %vm8378_vm7, %v8218_v4, %v2517_v58  ;;  %v12494_v16 = vld [vmem:[#allocation18_spill] sm:$0xff]  ;;  %v12497_v10 = vld [vmem:[#allocation19_spill] sm:$0xff] }
 0x207   :  { %12488 = vst [vmem:[#allocation40_spill] sm:$0xff] %v8374_v18  ;;  %v5510_v23 = vpop.eup %5509  ;;  %v2532_v54 = vadd.f32 %v8257_v49, %v2531_v7  ;;  %vm2534_vm10 = vweird.f32 %v8257_v49  ;;  %v8396_v34 = vmul.f32 %v2496_v15, %v7968_v17  ;;  %v2546_v2 = vmul.f32 %v8295_v44, %v2545_v22  ;;  %v12496_v4 = vld [vmem:[#allocation22_spill] sm:$0xff]  ;;  %v1451_v22 = vpop.f32.mrf.mxu3  ;;  %v12499_v15 = vld [vmem:[#allocation23_spill] sm:$0xff] }
 0x208   :  { %v5512_v8 = vpop.eup %5511  ;;  %v2559_v50 = vmul.f32 %v8354_v11, %v8281_v63  ;;  %5515 = vrcp.f32 %v8352_v59  ;;  %v12495_v56 = vpack.c.bf16 %v7167_v28, %v12494_v16  ;;  %v12498_v51 = vpack.c.bf16 %v12496_v4, %v12497_v10  ;;  %v12502_v28 = vld [vmem:[#allocation24_spill] sm:$0xff]  ;;  %v12503_v16 = vld [vmem:[#allocation21_spill] sm:$0xff]  ;;  %vm8426_vm11 = vmor %vm2533_vm8, %vm2534_vm10 }
 0x209   :  { %12493 = vst [vmem:[#allocation41_spill] sm:$0xff] %v8396_v34  ;;  %v5514_v39 = vpop.eup %5513  ;;  %v2552_v58 = vand.u32 2147483647, %v8221_v43  ;;  %v2554_v17 = vand.u32 2147483648, %v8221_v43  ;;  %v2574_v7 = vmul.f32 %v8371_v12, %v8293_v35  ;;  %5517 = vpow2.f32 %v4998_v20  ;;  %v12522_v34 = vld [vmem:[#allocation27_spill] sm:$0xff] }
 0x20a   :  { %4395 = vmatmul.bf16.vlgmr.msrb.gmra.mxu0 %v12495_v56  ;;  %4484 = vmatmul.bf16.vlgmr.msrb.gmra.mxu1 %v12498_v51  ;;  %v12501_v61 = vpack.c.bf16 %v12499_v15, %v12500_v19  ;;  %v12504_v56 = vpack.c.bf16 %v12502_v28, %v12503_v16  ;;  %v2511_v4 = vsel %vm8335_vm2, %v2510_v48, %v2506_v46  ;;  %vm2548_vm12 = vweird.f32 %v8221_v43  ;;  %v1186_v15 = vpop.f32.mrf.mxu0  ;;  %v12523_v18 = vld [vmem:[#allocation31_spill] sm:$0xff] }
 0x20b   :  { %v2526_v10 = vsel %vm8366_vm6, %v2525_v6, %v2521_v47  ;;  %v8431_v51 = vadd.f32 1.0, %v5510_v23  ;;  %v2536_v5 = vsel %vm8426_vm11, %v8257_v49, %v2532_v54  ;;  %vm2549_vm13 = vweird.f32 %v8295_v44 }
 0x20c   :  { %4573 = vmatmul.bf16.vlgmr.msrb.gmra.mxu2 %v12501_v61  ;;  %4662 = vmatmul.bf16.vlgmr.msrb.gmra.mxu3 %v12504_v56  ;;  %v2569_v48 = vand.u32 2147483648, %v8281_v63  ;;  %v8438_v33 = vadd.f32 1.0, %v5512_v8  ;;  %v2547_v37 = vadd.f32 %v8295_v44, %v2546_v2  ;;  %v2560_v6 = vsub.f32 1.0, %v2559_v50  ;;  %vm8469_vm15 = vmor %vm2548_vm12, %vm2549_vm13 }
 0x20d   :  { %v8441_v46 = vadd.f32 1.0, %v5514_v39  ;;  %v8444_v47 = vadd.f32 %v1451_v22, %v6759_v26  ;;  %vm8446_vm14 = vcmp.eq.f32.partialorder %v2552_v58, 8.507059e+37  ;;  %v2555_v19 = vor.u32 1.1754944e-38, %v2554_v17  ;;  %v1275_v39 = vpop.f32.mrf.mxu1 }
 0x20e   :  { %v2575_v49 = vsub.f32 1.0, %v2574_v7  ;;  %v8451_v54 = vadd.f32 %v1186_v15, %v6709_v0  ;;  %v8453_v61 = vpop.eup %5515  ;;  %v8456_v8 = vmul.f32 %v2511_v4, %v7983_v45  ;;  %v8459_v2 = vmul.f32 %v2526_v10, %v7991_v60  ;;  %v1364_v60 = vpop.f32.mrf.mxu2 }
 0x20f   :  { %v2567_v50 = vand.u32 2147483647, %v8281_v63  ;;  %5519 = vrcp.f32 %v8431_v51  ;;  %v5518_v58 = vpop.eup %5517  ;;  %v2541_v17 = vsel %vm8383_vm9, %v2540_v9, %v2536_v5  ;;  %vm2563_vm0 = vweird.f32 %v8281_v63 }
 0x210   :  { %12509 = vst [vmem:[#allocation18_spill] sm:$0xff] %v8456_v8  ;;  %v8474_v45 = vor.u32 1.1754944e-38, %v2569_v48  ;;  %5521 = vrcp.f32 %v8438_v33  ;;  %v2551_v3 = vsel %vm8469_vm15, %v8295_v44, %v2547_v37  ;;  %v2561_v9 = vmul.f32 %v8354_v11, %v2560_v6 }
 0x211   :  { %12510 = vst [vmem:[#allocation22_spill] sm:$0xff] %v8459_v2  ;;  %5523 = vrcp.f32 %v8441_v46  ;;  %v4999_v43 = vmul.f32 -1.442695, %v8444_v47  ;;  %v2576_v22 = vmul.f32 %v8371_v12, %v2575_v49  ;;  %vm2578_vm1 = vweird.f32 %v8293_v35  ;;  %v12519_v2 = vld [vmem:[#allocation30_spill] sm:$0xff] }
 0x212   :  { %v2589_v28 = vmul.f32 %v8453_v61, %v8352_v59  ;;  %v5000_v16 = vmul.f32 -1.442695, %v8451_v54  ;;  %v8489_v56 = vadd.f32 %v1275_v39, %v6714_v53  ;;  %vm8491_vm2 = vcmp.eq.f32.partialorder %v2567_v50, 8.507059e+37  ;;  %v1453_v39 = vpop.f32.mrf.mxu3 }
 0x213   :  { %v2582_v4 = vand.u32 2147483647, %v8293_v35  ;;  %v2584_v10 = vand.u32 2147483648, %v8293_v35  ;;  %v8497_v20 = vadd.f32 1.0, %v5518_v58  ;;  %v8500_v15 = vadd.f32 %v1364_v60, %v6753_v25  ;;  %v1189_v60 = vpop.f32.mrf.mxu0 }
 0x214   :  { %v8503_v5 = vmul.f32 %v2541_v17, %v8042_v13  ;;  %vm2564_vm3 = vweird.f32 %v8354_v11  ;;  %v2597_v48 = vand.u32 2147483647, %v8352_v59  ;;  %v2599_v37 = vand.u32 2147483648, %v8352_v59 }
 0x215   :  { %v8508_v6 = vpop.eup %5519  ;;  %v2556_v49 = vsel %vm8446_vm14, %v2555_v19, %v2551_v3  ;;  %v2562_v50 = vadd.f32 %v8354_v11, %v2561_v9  ;;  %vm2579_vm4 = vweird.f32 %v8371_v12  ;;  %5525 = vpow2.f32 %v4999_v43  ;;  %v12516_v19 = vld [vmem:[#allocation25_spill] sm:$0xff]  ;;  %v12518_v43 = vld [vmem:[#allocation26_spill] sm:$0xff]  ;;  %vm8530_vm5 = vmor %vm2563_vm0, %vm2564_vm3 }
 0x216   :  { %12515 = vst [vmem:[#allocation19_spill] sm:$0xff] %v8503_v5  ;;  %v8514_v58 = vpop.eup %5521  ;;  %v2577_v13 = vadd.f32 %v8371_v12, %v2576_v22  ;;  %v2590_v17 = vsub.f32 1.0, %v2589_v28  ;;  %5527 = vpow2.f32 %v5000_v16  ;;  %v5001_v7 = vmul.f32 -1.442695, %v8489_v56  ;;  %v12517_v3 = vld [vmem:[#allocation29_spill] sm:$0xff]  ;;  %vm8563_vm7 = vmor %vm2578_vm1, %vm2579_vm4 }
 0x217   :  { %v8518_v5 = vpop.eup %5523  ;;  %5529 = vrcp.f32 %v8497_v20  ;;  %v5002_v23 = vmul.f32 -1.442695, %v8500_v15  ;;  %v4070_v9 = vpack.c.bf16 %v12517_v3, %v12516_v19  ;;  %v4071_v8 = vpack.c.bf16 %v12519_v2, %v12518_v43  ;;  %v12524_v3 = vld [vmem:[#allocation28_spill] sm:$0xff] }
 0x218   :  { %v2604_v28 = vmul.f32 %v8508_v6, %v8431_v51  ;;  %v8537_v16 = vadd.f32 %v1453_v39, %v6759_v26  ;;  %v4072_v19 = vpack.c.bf16 %v12523_v18, %v12522_v34  ;;  %v4073_v2 = vpack.c.bf16 %v12525_v21, %v12524_v3 }
 0x219   :  { %v2566_v63 = vsel %vm8530_vm5, %v8354_v11, %v2562_v50  ;;  %vm8546_vm6 = vcmp.eq.f32.partialorder %v2582_v4, 8.507059e+37  ;;  %v2619_v38 = vmul.f32 %v8514_v58, %v8438_v33  ;;  %v8553_v39 = vadd.f32 %v1189_v60, %v6709_v0 }
 0x21a   :  { %4400 = vmatmul.bf16.gmra.mxu0 %v4070_v9  ;;  %4489 = vmatmul.bf16.gmra.mxu1 %v4071_v8  ;;  %v2591_v18 = vmul.f32 %v8453_v61, %v2590_v17  ;;  %v2614_v21 = vand.u32 2147483648, %v8431_v51  ;;  %v2634_v34 = vmul.f32 %v8518_v5, %v8441_v46  ;;  %5531 = vpow2.f32 %v5001_v7 }
 0x21b   :  { %v5526_v11 = vpop.eup %5525  ;;  %v2585_v8 = vor.u32 1.1754944e-38, %v2584_v10  ;;  %vm2593_vm8 = vweird.f32 %v8352_v59  ;;  %v2600_v50 = vor.u32 1.1754944e-38, %v2599_v37  ;;  %5533 = vpow2.f32 %v5002_v23 }
 0x21c   :  { %4578 = vmatmul.bf16.gmra.mxu2 %v4072_v19  ;;  %4667 = vmatmul.bf16.gmra.mxu3 %v4073_v2  ;;  %v5528_v17 = vpop.eup %5527  ;;  %v2571_v7 = vsel %vm8491_vm2, %v8474_v45, %v2566_v63  ;;  %v2581_v60 = vsel %vm8563_vm7, %v8371_v12, %v2577_v13  ;;  %vm8574_vm9 = vcmp.eq.f32.partialorder %v2597_v48, 8.507059e+37  ;;  %v2605_v9 = vsub.f32 1.0, %v2604_v28  ;;  %v1278_v13 = vpop.f32.mrf.mxu1 }
 0x21d   :  { %v5003_v10 = vmul.f32 -1.442695, %v8537_v16  ;;  %v8579_v22 = vpop.eup %5529  ;;  %v8582_v37 = vmul.f32 %v2556_v49, %v8069_v36  ;;  %v2612_v23 = vand.u32 2147483647, %v8431_v51  ;;  %v2620_v44 = vsub.f32 1.0, %v2619_v38 }
 0x21e   :  { %v5004_v45 = vmul.f32 -1.442695, %v8553_v39  ;;  %v2592_v19 = vadd.f32 %v8453_v61, %v2591_v18  ;;  %vm2594_vm10 = vweird.f32 %v8453_v61  ;;  %vm2608_vm11 = vweird.f32 %v8431_v51 }
 0x21f   :  { %12532 = vst [vmem:[#allocation23_spill] sm:$0xff] %v8582_v37  ;;  %v8589_v12 = vor.u32 1.1754944e-38, %v2614_v21  ;;  %v2635_v48 = vsub.f32 1.0, %v2634_v34  ;;  %v8592_v28 = vmul.f32 %v2571_v7, %v8128_v62  ;;  %v2586_v36 = vsel %vm8546_vm6, %v2585_v8, %v2581_v60  ;;  %vm8608_vm13 = vmor %vm2593_vm8, %vm2594_vm10 }
 0x220   :  { %vm2623_vm12 = vweird.f32 %v8438_v33  ;;  %v8597_v38 = vadd.f32 1.0, %v5526_v11  ;;  %v5532_v49 = vpop.eup %5531  ;;  %v2606_v3 = vmul.f32 %v8508_v6, %v2605_v9  ;;  %v2649_v2 = vmul.f32 %v8579_v22, %v8497_v20 }
 0x221   :  { %12533 = vst [vmem:[#allocation20_spill] sm:$0xff] %v8592_v28  ;;  %v8602_v63 = vadd.f32 1.0, %v5528_v17  ;;  %5535 = vpow2.f32 %v5003_v10  ;;  %v5534_v18 = vpop.eup %5533  ;;  %v2621_v43 = vmul.f32 %v8514_v58, %v2620_v44  ;;  %v2627_v21 = vand.u32 2147483647, %v8438_v33 }
 0x222   :  { %5537 = vpow2.f32 %v5004_v45  ;;  %v8615_v34 = vadd.f32 %v1278_v13, %v6714_v53  ;;  %v8618_v11 = vmul.f32 %v2586_v36, %v8155_v1  ;;  %v2596_v4 = vsel %vm8608_vm13, %v8453_v61, %v2592_v19  ;;  %v1367_v36 = vpop.f32.mrf.mxu2 }
 0x223   :  { %vm8623_vm14 = vcmp.eq.f32.partialorder %v2612_v23, 8.507059e+37  ;;  %v2629_v8 = vand.u32 2147483648, %v8438_v33  ;;  %v2636_v17 = vmul.f32 %v8518_v5, %v2635_v48  ;;  %vm2609_vm15 = vweird.f32 %v8508_v6 }
 0x224   :  { %12536 = vst [vmem:[#allocation24_spill] sm:$0xff] %v8618_v11  ;;  %v2642_v7 = vand.u32 2147483647, %v8441_v46  ;;  %5539 = vrcp.f32 %v8597_v38  ;;  %v8632_v1 = vadd.f32 1.0, %v5532_v49  ;;  %v2607_v60 = vadd.f32 %v8508_v6, %v2606_v3  ;;  %vm8653_vm3 = vmor %vm2608_vm11, %vm2609_vm15 }
 0x225   :  { %v2650_v9 = vsub.f32 1.0, %v2649_v2  ;;  %5541 = vrcp.f32 %v8602_v63  ;;  %v8636_v61 = vadd.f32 1.0, %v5534_v18  ;;  %v2601_v10 = vsel %vm8574_vm9, %v2600_v50, %v2596_v4  ;;  %v1456_v2 = vpop.f32.mrf.mxu3  ;;  %v1191_v50 = vpop.f32.mrf.mxu0 }
 0x226   :  { %v2622_v23 = vadd.f32 %v8514_v58, %v2621_v43  ;;  %vm2624_vm0 = vweird.f32 %v8514_v58  ;;  %v5005_v44 = vmul.f32 -1.442695, %v8615_v34  ;;  %vm8643_vm1 = vcmp.eq.f32.partialorder %v2627_v21, 8.507059e+37 }
 0x227   :  { %v5536_v45 = vpop.eup %5535  ;;  %v2630_v48 = vor.u32 1.1754944e-38, %v2629_v8  ;;  %v2637_v13 = vadd.f32 %v8518_v5, %v2636_v17  ;;  %vm2639_vm2 = vweird.f32 %v8518_v5  ;;  %vm2638_vm4 = vweird.f32 %v8441_v46  ;;  %vm8671_vm5 = vmor %vm2623_vm12, %vm2624_vm0 }
 0x228   :  { %v5538_v49 = vpop.eup %5537  ;;  %v2644_v35 = vand.u32 2147483648, %v8441_v46  ;;  %v2657_v3 = vand.u32 2147483647, %v8497_v20  ;;  %5543 = vrcp.f32 %v8632_v1  ;;  %v8662_v18 = vmul.f32 %v2601_v10, %v8224_v27  ;;  %vm8684_vm6 = vmor %vm2638_vm4, %vm2639_vm2 }
 0x229   :  { %v2611_v51 = vsel %vm8653_vm3, %v8508_v6, %v2607_v60  ;;  %v2651_v46 = vmul.f32 %v8579_v22, %v2650_v9  ;;  %5545 = vrcp.f32 %v8636_v61  ;;  %v2626_v27 = vsel %vm8671_vm5, %v8514_v58, %v2622_v23 }
 0x22a   :  { %12543 = vst [vmem:[#allocation21_spill] sm:$0xff] %v8662_v18  ;;  %v8677_v43 = vpop.eup %5539  ;;  %vm8688_vm7 = vcmp.eq.f32.partialorder %v2642_v7, 8.507059e+37  ;;  %v8692_v21 = vadd.f32 1.0, %v5536_v45  ;;  %5547 = vpow2.f32 %v5005_v44  ;;  %v2641_v8 = vsel %vm8684_vm6, %v8518_v5, %v2637_v13 }
 0x22b   :  { %v8694_v4 = vpop.eup %5541  ;;  %v2659_v58 = vand.u32 2147483648, %v8497_v20  ;;  %v8700_v17 = vadd.f32 1.0, %v5538_v49  ;;  %v8703_v60 = vadd.f32 %v1367_v36, %v6753_v25  ;;  %v2616_v7 = vsel %vm8623_vm14, %v8589_v12, %v2611_v51 }
 0x22c   :  { %v2645_v9 = vor.u32 1.1754944e-38, %v2644_v35  ;;  %vm2653_vm8 = vweird.f32 %v8497_v20  ;;  %vm8709_vm9 = vcmp.eq.f32.partialorder %v2657_v3, 8.507059e+37  ;;  %v2631_v5 = vsel %vm8643_vm1, %v2630_v48, %v2626_v27  ;;  %v1280_v27 = vpop.f32.mrf.mxu1 }
 0x22d   :  { %v2652_v23 = vadd.f32 %v8579_v22, %v2651_v46  ;;  %vm2654_vm10 = vweird.f32 %v8579_v22  ;;  %v2674_v44 = vand.u32 2147483648, %v8597_v38  ;;  %v2664_v59 = vmul.f32 %v8677_v43, %v8597_v38 }
 0x22e   :  { %v8718_v45 = vpop.eup %5543  ;;  %v2646_v12 = vsel %vm8688_vm7, %v2645_v9, %v2641_v8  ;;  %v2679_v13 = vmul.f32 %v8694_v4, %v8602_v63  ;;  %5549 = vrcp.f32 %v8692_v21  ;;  %v8730_v48 = vmul.f32 %v2616_v7, %v8273_v55  ;;  %vm8741_vm11 = vmor %vm2653_vm8, %vm2654_vm10  ;;  %v1369_v8 = vpop.f32.mrf.mxu2 }
 0x22f   :  { %v8727_v19 = vpop.eup %5545  ;;  %v2660_v36 = vor.u32 1.1754944e-38, %v2659_v58  ;;  %5551 = vrcp.f32 %v8700_v17  ;;  %v5006_v49 = vmul.f32 -1.442695, %v8703_v60  ;;  %v8735_v3 = vmul.f32 %v2631_v5, %v8277_v52  ;;  %v1458_v5 = vpop.f32.mrf.mxu3 }
 0x230   :  { %12552 = vst [vmem:[#allocation25_spill] sm:$0xff] %v8730_v48  ;;  %v5548_v35 = vpop.eup %5547  ;;  %v2672_v55 = vand.u32 2147483647, %v8597_v38  ;;  %v2689_v62 = vand.u32 2147483648, %v8602_v63  ;;  %v8748_v46 = vadd.f32 %v1456_v2, %v6759_v26  ;;  %v8751_v6 = vmul.f32 %v2646_v12, %v8284_v42 }
 0x231   :  { %12553 = vst [vmem:[#allocation29_spill] sm:$0xff] %v8735_v3  ;;  %v2656_v52 = vsel %vm8741_vm11, %v8579_v22, %v2652_v23  ;;  %v8756_v20 = vor.u32 1.1754944e-38, %v2674_v44  ;;  %v2687_v33 = vand.u32 2147483647, %v8602_v63  ;;  %v2665_v58 = vsub.f32 1.0, %v2664_v59 }
 0x232   :  { %12556 = vst [vmem:[#allocation26_spill] sm:$0xff] %v8751_v6  ;;  %v2680_v7 = vsub.f32 1.0, %v2679_v13  ;;  %v2694_v9 = vmul.f32 %v8718_v45, %v8632_v1  ;;  %v8762_v2 = vadd.f32 %v1191_v50, %v6709_v0  ;;  %v2709_v42 = vmul.f32 %v8727_v19, %v8636_v61 }
 0x233   :  { %v8766_v12 = vadd.f32 1.0, %v5548_v35  ;;  %5553 = vpow2.f32 %v5006_v49  ;;  %v8769_v22 = vadd.f32 %v1280_v27, %v6714_v53  ;;  %vm2668_vm12 = vweird.f32 %v8597_v38 }
 0x234   :  { %v8771_v23 = vpop.eup %5549  ;;  %v8774_v44 = vor.u32 1.1754944e-38, %v2689_v62  ;;  %v2702_v59 = vand.u32 2147483647, %v8632_v1  ;;  %v5007_v13 = vmul.f32 -1.442695, %v8748_v46  ;;  %v8779_v50 = vadd.f32 %v1369_v8, %v6753_v25 }
 0x235   :  { %v8781_v51 = vpop.eup %5551  ;;  %v2661_v49 = vsel %vm8709_vm9, %v2660_v36, %v2656_v52  ;;  %vm2669_vm13 = vweird.f32 %v8677_v43  ;;  %vm2683_vm14 = vweird.f32 %v8602_v63  ;;  %v2704_v35 = vand.u32 2147483648, %v8632_v1 }
 0x236   :  { %v8789_v62 = vadd.f32 %v1458_v5, %v6759_v26  ;;  %v2666_v27 = vmul.f32 %v8677_v43, %v2665_v58  ;;  %v2681_v6 = vmul.f32 %v8694_v4, %v2680_v7  ;;  %v2695_v8 = vsub.f32 1.0, %v2694_v9  ;;  %vm8832_vm4 = vmor %vm2668_vm12, %vm2669_vm13 }
 0x237   :  { %v5008_v3 = vmul.f32 -1.442695, %v8762_v2  ;;  %v2710_v48 = vsub.f32 1.0, %v2709_v42  ;;  %v2724_v10 = vmul.f32 %v8771_v23, %v8692_v21  ;;  %5555 = vrcp.f32 %v8766_v12 }
 0x238   :  { %v5009_v36 = vmul.f32 -1.442695, %v8769_v22  ;;  %vm8798_vm15 = vcmp.eq.f32.partialorder %v2672_v55, 8.507059e+37  ;;  %vm2684_vm0 = vweird.f32 %v8694_v4  ;;  %vm2698_vm1 = vweird.f32 %v8632_v1 }
 0x239   :  { %v2739_v58 = vmul.f32 %v8781_v51, %v8700_v17  ;;  %5557 = vpow2.f32 %v5007_v13  ;;  %v5010_v7 = vmul.f32 -1.442695, %v8779_v50  ;;  %v5554_v9 = vpop.eup %5553  ;;  %v8808_v5 = vmul.f32 %v2661_v49, %v8341_v32  ;;  %vm8850_vm7 = vmor %vm2683_vm14, %vm2684_vm0 }
 0x23a   :  { %vm8810_vm2 = vcmp.eq.f32.partialorder %v2687_v33, 8.507059e+37  ;;  %v8814_v55 = vor.u32 1.1754944e-38, %v2704_v35  ;;  %vm2713_vm3 = vweird.f32 %v8636_v61  ;;  %v5011_v37 = vmul.f32 -1.442695, %v8789_v62 }
 0x23b   :  { %12559 = vst [vmem:[#allocation30_spill] sm:$0xff] %v8808_v5  ;;  %v2667_v18 = vadd.f32 %v8677_v43, %v2666_v27  ;;  %v2696_v13 = vmul.f32 %v8718_v45, %v2695_v8  ;;  %v2717_v11 = vand.u32 2147483647, %v8636_v61  ;;  %5559 = vpow2.f32 %v5008_v3 }
 0x23c   :  { %v2682_v32 = vadd.f32 %v8694_v4, %v2681_v6  ;;  %v2711_v33 = vmul.f32 %v8727_v19, %v2710_v48  ;;  %v2725_v49 = vsub.f32 1.0, %v2724_v10  ;;  %5561 = vpow2.f32 %v5009_v36 }
 0x23d   :  { %v2719_v35 = vand.u32 2147483648, %v8636_v61  ;;  %v2740_v5 = vsub.f32 1.0, %v2739_v58  ;;  %v8824_v28 = vadd.f32 1.0, %v5554_v9  ;;  %5563 = vpow2.f32 %v5010_v7  ;;  %v8826_v29 = vpop.eup %5555  ;;  %v1194_v9 = vpop.f32.mrf.mxu0 }
 0x23e   :  { %vm8836_vm5 = vcmp.eq.f32.partialorder %v2702_v59, 8.507059e+37  ;;  %vm2728_vm6 = vweird.f32 %v8692_v21  ;;  %v2732_v6 = vand.u32 2147483647, %v8692_v21  ;;  %v2734_v27 = vand.u32 2147483648, %v8692_v21 }
 0x23f   :  { %5565 = vpow2.f32 %v5011_v37  ;;  %v5558_v8 = vpop.eup %5557  ;;  %v2671_v38 = vsel %vm8832_vm4, %v8677_v43, %v2667_v18  ;;  %v2697_v10 = vadd.f32 %v8718_v45, %v2696_v13  ;;  %vm2699_vm8 = vweird.f32 %v8718_v45 }
 0x240   :  { %vm8856_vm9 = vcmp.eq.f32.partialorder %v2717_v11, 8.507059e+37  ;;  %v2686_v37 = vsel %vm8850_vm7, %v8694_v4, %v2682_v32  ;;  %v2712_v18 = vadd.f32 %v8727_v19, %v2711_v33  ;;  %vm2714_vm10 = vweird.f32 %v8727_v19  ;;  %vm8875_vm11 = vmor %vm2698_vm1, %vm2699_vm8 }
 0x241   :  { %v2726_v63 = vmul.f32 %v8771_v23, %v2725_v49  ;;  %v5560_v43 = vpop.eup %5559  ;;  %v2720_v58 = vor.u32 1.1754944e-38, %v2719_v35  ;;  %v2741_v7 = vmul.f32 %v8781_v51, %v2740_v5  ;;  %v2754_v11 = vmul.f32 %v8826_v29, %v8766_v12  ;;  %vm8896_vm14 = vmor %vm2713_vm3, %vm2714_vm10 }
 0x242   :  { %5567 = vrcp.f32 %v8824_v28  ;;  %v5562_v13 = vpop.eup %5561  ;;  %v2676_v4 = vsel %vm8798_vm15, %v8756_v20, %v2671_v38  ;;  %vm8879_vm12 = vcmp.eq.f32.partialorder %v2732_v6, 8.507059e+37  ;;  %v2735_v5 = vor.u32 1.1754944e-38, %v2734_v27 }
 0x243   :  { %vm2743_vm13 = vweird.f32 %v8700_v17  ;;  %v8884_v49 = vadd.f32 1.0, %v5558_v8  ;;  %v5564_v35 = vpop.eup %5563  ;;  %v2691_v20 = vsel %vm8810_vm2, %v8774_v44, %v2686_v37  ;;  %v2701_v1 = vsel %vm8875_vm11, %v8718_v45, %v2697_v10  ;;  %v1283_v37 = vpop.f32.mrf.mxu1 }
 0x244   :  { %vm2729_vm15 = vweird.f32 %v8771_v23  ;;  %v2747_v3 = vand.u32 2147483647, %v8700_v17  ;;  %v2716_v44 = vsel %vm8896_vm14, %v8727_v19, %v2712_v18  ;;  %v2727_v42 = vadd.f32 %v8771_v23, %v2726_v63 }
 0x245   :  { %v5566_v6 = vpop.eup %5565  ;;  %v8906_v45 = vadd.f32 1.0, %v5560_v43  ;;  %v8909_v27 = vadd.f32 %v1194_v9, %v6709_v0  ;;  %v2742_v61 = vadd.f32 %v8781_v51, %v2741_v7  ;;  %vm2744_vm0 = vweird.f32 %v8781_v51  ;;  %vm8934_vm1 = vmor %vm2728_vm6, %vm2729_vm15 }
 0x246   :  { %v2755_v8 = vsub.f32 1.0, %v2754_v11  ;;  %v8913_v38 = vadd.f32 1.0, %v5562_v13  ;;  %v8916_v59 = vmul.f32 %v2676_v4, %v8444_v47  ;;  %v2749_v10 = vand.u32 2147483648, %v8700_v17  ;;  %vm8953_vm3 = vmor %vm2743_vm13, %vm2744_vm0  ;;  %v1372_v4 = vpop.f32.mrf.mxu2 }
 0x247   :  { %5569 = vrcp.f32 %v8884_v49  ;;  %v8920_v19 = vadd.f32 1.0, %v5564_v35  ;;  %v8925_v63 = vmul.f32 %v2691_v20, %v8451_v54  ;;  %v2706_v43 = vsel %vm8836_vm5, %v8814_v55, %v2701_v1  ;;  %v1461_v20 = vpop.f32.mrf.mxu3 }
 0x248   :  { %12576 = vst [vmem:[#allocation27_spill] sm:$0xff] %v8916_v59  ;;  %v8922_v18 = vpop.eup %5567  ;;  %vm8938_vm2 = vcmp.eq.f32.partialorder %v2747_v3, 8.507059e+37  ;;  %v8942_v11 = vadd.f32 1.0, %v5566_v6  ;;  %v2721_v54 = vsel %vm8856_vm9, %v2720_v58, %v2716_v44  ;;  %v2731_v55 = vsel %vm8934_vm1, %v8771_v23, %v2727_v42 }
 0x249   :  { %5571 = vrcp.f32 %v8906_v45  ;;  %v5012_v48 = vmul.f32 -1.442695, %v8909_v27  ;;  %v2746_v36 = vsel %vm8953_vm3, %v8781_v51, %v2742_v61  ;;  %v2756_v58 = vmul.f32 %v8826_v29, %v2755_v8 }
 0x24a   :  { %5573 = vrcp.f32 %v8913_v38  ;;  %v8965_v23 = vadd.f32 %v1283_v37, %v6714_v53  ;;  %v8968_v17 = vmul.f32 %v2706_v43, %v8489_v56  ;;  %v2750_v9 = vor.u32 1.1754944e-38, %v2749_v10 }
 0x24b   :  { %v2769_v13 = vmul.f32 %v8922_v18, %v8824_v28  ;;  %5575 = vrcp.f32 %v8920_v19  ;;  %v2736_v51 = vsel %vm8879_vm12, %v2735_v5, %v2731_v55  ;;  %v2762_v32 = vand.u32 2147483647, %v8766_v12 }
 0x24c   :  { %12583 = vst [vmem:[#allocation31_spill] sm:$0xff] %v8968_v17  ;;  %v2764_v35 = vand.u32 2147483648, %v8766_v12  ;;  %5577 = vrcp.f32 %v8942_v11  ;;  %v8981_v56 = vmul.f32 %v2721_v54, %v8500_v15  ;;  %v2751_v52 = vsel %vm8938_vm2, %v2750_v9, %v2746_v36 }
 0x24d   :  { %v8978_v1 = vpop.eup %5569  ;;  %vm2759_vm4 = vweird.f32 %v8826_v29  ;;  %5579 = vpow2.f32 %v5012_v48  ;;  %v2757_v33 = vadd.f32 %v8826_v29, %v2756_v58  ;;  %v2779_v5 = vand.u32 2147483648, %v8824_v28 }
 0x24e   :  { %12584 = vst [vmem:[#allocation28_spill] sm:$0xff] %v8981_v56  ;;  %v5013_v3 = vmul.f32 -1.442695, %v8965_v23  ;;  %v8990_v6 = vadd.f32 %v1372_v4, %v6753_v25  ;;  %v8995_v15 = vmul.f32 %v2736_v51, %v8537_v16  ;;  %vm2758_vm5 = vweird.f32 %v8766_v12  ;;  %v1196_v16 = vpop.f32.mrf.mxu0 }
 0x24f   :  { %v8992_v44 = vpop.eup %5571  ;;  %v2770_v42 = vsub.f32 1.0, %v2769_v13  ;;  %v8999_v61 = vadd.f32 %v1461_v20, %v6759_v26  ;;  %vm9003_vm6 = vcmp.eq.f32.partialorder %v2762_v32, 8.507059e+37  ;;  %v2765_v37 = vor.u32 1.1754944e-38, %v2764_v35  ;;  %vm9017_vm7 = vmor %vm2758_vm5, %vm2759_vm4 }
 0x250   :  { %12585 = vst [vmem:[#allocation32_spill] sm:$0xff] %v8995_v15  ;;  %v9001_v8 = vpop.eup %5573  ;;  %v2784_v43 = vmul.f32 %v8978_v1, %v8884_v49  ;;  %v2794_v47 = vand.u32 2147483648, %v8884_v49  ;;  %v9013_v12 = vmul.f32 %v2751_v52, %v8553_v39  ;;  %vm2773_vm8 = vweird.f32 %v8824_v28 }
 0x251   :  { %v9010_v7 = vpop.eup %5575  ;;  %v2777_v55 = vand.u32 2147483647, %v8824_v28  ;;  %v2792_v21 = vand.u32 2147483647, %v8884_v49  ;;  %v2761_v36 = vsel %vm9017_vm7, %v8826_v29, %v2757_v33  ;;  %v2780_v39 = vor.u32 1.1754944e-38, %v2779_v5  ;;  %v1374_v28 = vpop.f32.mrf.mxu2 }
 0x252   :  { %12588 = vst [vmem:[#allocation42_spill] sm:$0xff] %v9013_v12  ;;  %v9024_v48 = vpop.eup %5577  ;;  %5581 = vpow2.f32 %v5013_v3  ;;  %v5014_v58 = vmul.f32 -1.442695, %v8990_v6  ;;  %v2771_v13 = vmul.f32 %v8922_v18, %v2770_v42  ;;  %v2799_v4 = vmul.f32 %v8992_v44, %v8906_v45 }
 0x253   :  { %v5580_v9 = vpop.eup %5579  ;;  %v5015_v51 = vmul.f32 -1.442695, %v8999_v61  ;;  %v9035_v32 = vadd.f32 %v1196_v16, %v6709_v0  ;;  %v2785_v35 = vsub.f32 1.0, %v2784_v43  ;;  %v9037_v20 = vor.u32 1.1754944e-38, %v2794_v47  ;;  %v1285_v43 = vpop.f32.mrf.mxu1 }
 0x254   :  { %v2807_v29 = vand.u32 2147483647, %v8906_v45  ;;  %v2814_v52 = vmul.f32 %v9001_v8, %v8913_v38  ;;  %vm2774_vm9 = vweird.f32 %v8922_v18  ;;  %vm9043_vm10 = vcmp.eq.f32.partialorder %v2777_v55, 8.507059e+37 }
 0x255   :  { %v2809_v5 = vand.u32 2147483648, %v8906_v45  ;;  %v2824_v3 = vand.u32 2147483648, %v8913_v38  ;;  %v2829_v42 = vmul.f32 %v9010_v7, %v8920_v19  ;;  %v2766_v47 = vsel %vm9003_vm6, %v2765_v37, %v2761_v36  ;;  %vm9078_vm14 = vmor %vm2773_vm8, %vm2774_vm9 }
 0x256   :  { %vm2788_vm11 = vweird.f32 %v8884_v49  ;;  %v2844_v16 = vmul.f32 %v9024_v48, %v8942_v11  ;;  %v9056_v54 = vadd.f32 1.0, %v5580_v9  ;;  %5583 = vpow2.f32 %v5014_v58 }
 0x257   :  { %v2772_v55 = vadd.f32 %v8922_v18, %v2771_v13  ;;  %v2800_v12 = vsub.f32 1.0, %v2799_v4  ;;  %5585 = vpow2.f32 %v5015_v51  ;;  %v5016_v15 = vmul.f32 -1.442695, %v9035_v32 }
 0x258   :  { %v5582_v59 = vpop.eup %5581  ;;  %v2786_v56 = vmul.f32 %v8978_v1, %v2785_v35  ;;  %v2815_v17 = vsub.f32 1.0, %v2814_v52  ;;  %v2822_v10 = vand.u32 2147483647, %v8913_v38  ;;  %v9063_v37 = vadd.f32 %v1285_v43, %v6714_v53 }
 0x259   :  { %vm2789_vm12 = vweird.f32 %v8978_v1  ;;  %vm2803_vm13 = vweird.f32 %v8906_v45  ;;  %v9067_v36 = vor.u32 1.1754944e-38, %v2809_v5  ;;  %v9069_v58 = vor.u32 1.1754944e-38, %v2824_v3 }
 0x25a   :  { %v2830_v9 = vsub.f32 1.0, %v2829_v42  ;;  %v9072_v13 = vmul.f32 %v2766_v47, %v8615_v34  ;;  %vm2818_vm15 = vweird.f32 %v8913_v38  ;;  %v2837_v51 = vand.u32 2147483647, %v8920_v19  ;;  %vm9122_vm7 = vmor %vm2788_vm11, %vm2789_vm12 }
 0x25b   :  { %v2845_v35 = vsub.f32 1.0, %v2844_v16  ;;  %5587 = vrcp.f32 %v9056_v54  ;;  %v2776_v34 = vsel %vm9078_vm14, %v8922_v18, %v2772_v55  ;;  %v2801_v52 = vmul.f32 %v8992_v44, %v2800_v12  ;;  %v1463_v18 = vpop.f32.mrf.mxu3 }
 0x25c   :  { %12593 = vst [vmem:[#allocation43_spill] sm:$0xff] %v9072_v13  ;;  %v9089_v5 = vadd.f32 1.0, %v5582_v59  ;;  %5589 = vpow2.f32 %v5016_v15  ;;  %v5584_v3 = vpop.eup %5583  ;;  %v2787_v42 = vadd.f32 %v8978_v1, %v2786_v56  ;;  %vm9092_vm0 = vcmp.eq.f32.partialorder %v2792_v21, 8.507059e+37 }
 0x25d   :  { %vm2804_vm1 = vweird.f32 %v8992_v44  ;;  %v2816_v47 = vmul.f32 %v9001_v8, %v2815_v17  ;;  %v5017_v16 = vmul.f32 -1.442695, %v9063_v37  ;;  %v5586_v55 = vpop.eup %5585  ;;  %vm9099_vm2 = vcmp.eq.f32.partialorder %v2807_v29, 8.507059e+37 }
 0x25e   :  { %vm2819_vm3 = vweird.f32 %v9001_v8  ;;  %v2831_v56 = vmul.f32 %v9010_v7, %v2830_v9  ;;  %vm2833_vm4 = vweird.f32 %v8920_v19  ;;  %v2839_v15 = vand.u32 2147483648, %v8920_v19 }
 0x25f   :  { %v2781_v12 = vsel %vm9043_vm10, %v2780_v39, %v2776_v34  ;;  %vm9109_vm5 = vcmp.eq.f32.partialorder %v2822_v10, 8.507059e+37  ;;  %v2846_v21 = vmul.f32 %v9024_v48, %v2845_v35  ;;  %vm2848_vm6 = vweird.f32 %v8942_v11  ;;  %v1199_v35 = vpop.f32.mrf.mxu0  ;;  %vm9153_vm10 = vmor %vm2803_vm13, %vm2804_vm1 }
 0x260   :  { %v9116_v29 = vadd.f32 %v1374_v28, %v6753_v25  ;;  %v2802_v39 = vadd.f32 %v8992_v44, %v2801_v52  ;;  %vm9127_vm8 = vcmp.eq.f32.partialorder %v2837_v51, 8.507059e+37  ;;  %5591 = vrcp.f32 %v9089_v5  ;;  %vm9170_vm12 = vmor %vm2818_vm15, %vm2819_vm3 }
 0x261   :  { %v9132_v10 = vadd.f32 1.0, %v5584_v3  ;;  %v9135_v4 = vadd.f32 %v1463_v18, %v6759_v26  ;;  %v9137_v34 = vpop.eup %5587  ;;  %v2791_v49 = vsel %vm9122_vm7, %v8978_v1, %v2787_v42  ;;  %v2817_v52 = vadd.f32 %v9001_v8, %v2816_v47 }
 0x262   :  { %v9143_v51 = vadd.f32 1.0, %v5586_v55  ;;  %5593 = vpow2.f32 %v5017_v16  ;;  %v5590_v28 = vpop.eup %5589  ;;  %v2832_v13 = vadd.f32 %v9010_v7, %v2831_v56  ;;  %vm2834_vm9 = vweird.f32 %v9010_v7 }
 0x263   :  { %v2852_v3 = vand.u32 2147483647, %v8942_v11  ;;  %v2854_v18 = vand.u32 2147483648, %v8942_v11  ;;  %v2847_v42 = vadd.f32 %v9024_v48, %v2846_v21  ;;  %vm2849_vm11 = vweird.f32 %v9024_v48  ;;  %vm9183_vm13 = vmor %vm2833_vm4, %vm2834_vm9 }
 0x264   :  { %v5018_v47 = vmul.f32 -1.442695, %v9116_v29  ;;  %v9161_v16 = vadd.f32 %v1199_v35, %v6709_v0  ;;  %v2806_v55 = vsel %vm9153_vm10, %v8992_v44, %v2802_v39  ;;  %v2859_v56 = vmul.f32 %v9137_v34, %v9056_v54  ;;  %vm9205_vm14 = vmor %vm2848_vm6, %vm2849_vm11  ;;  %v12618_v44 = vld [vmem:[#allocation33_spill] sm:$0xff] }
 0x265   :  { %5595 = vrcp.f32 %v9132_v10  ;;  %v5019_v21 = vmul.f32 -1.442695, %v9135_v4  ;;  %v2821_v9 = vsel %vm9170_vm12, %v9001_v8, %v2817_v52  ;;  %v2840_v38 = vor.u32 1.1754944e-38, %v2839_v15 }
 0x266   :  { %5597 = vrcp.f32 %v9143_v51  ;;  %v9188_v39 = vadd.f32 1.0, %v5590_v28  ;;  %v9190_v35 = vpop.eup %5591  ;;  %v9193_v1 = vmul.f32 %v2781_v12, %v8703_v60  ;;  %v2796_v8 = vsel %vm9092_vm0, %v9037_v20, %v2791_v49  ;;  %v1288_v60 = vpop.f32.mrf.mxu1 }
 0x267   :  { %v2836_v19 = vsel %vm9183_vm13, %v9010_v7, %v2832_v13  ;;  %vm9209_vm15 = vcmp.eq.f32.partialorder %v2852_v3, 8.507059e+37  ;;  %v2811_v20 = vsel %vm9099_vm2, %v9067_v36, %v2806_v55  ;;  %v2851_v7 = vsel %vm9205_vm14, %v9024_v48, %v2847_v42  ;;  %v1377_v28 = vpop.f32.mrf.mxu2  ;;  %v1466_v42 = vpop.f32.mrf.mxu3 }
 0x268   :  { %v5594_v12 = vpop.eup %5593  ;;  %5599 = vpow2.f32 %v5018_v47  ;;  %v5020_v11 = vmul.f32 -1.442695, %v9161_v16  ;;  %v2826_v13 = vsel %vm9109_vm5, %v9069_v58, %v2821_v9  ;;  %v2855_v43 = vor.u32 1.1754944e-38, %v2854_v18  ;;  %v1201_v9 = vpop.f32.mrf.mxu0 }
 0x269   :  { %v2860_v49 = vsub.f32 1.0, %v2859_v56  ;;  %5601 = vpow2.f32 %v5019_v21  ;;  %v2841_v3 = vsel %vm9127_vm8, %v2840_v38, %v2836_v19  ;;  %v2874_v36 = vmul.f32 %v9190_v35, %v9089_v5 }
 0x26a   :  { %5603 = vrcp.f32 %v9188_v39  ;;  %v9229_v48 = vadd.f32 %v1288_v60, %v6714_v53  ;;  %v9234_v17 = vmul.f32 %v2796_v8, %v8748_v46  ;;  %v9237_v58 = vmul.f32 %v2811_v20, %v8762_v2 }
 0x26b   :  { %v9231_v59 = vpop.eup %5595  ;;  %v2856_v33 = vsel %vm9209_vm15, %v2855_v43, %v2851_v7  ;;  %v9241_v18 = vadd.f32 1.0, %v5594_v12  ;;  %v9246_v55 = vmul.f32 %v2826_v13, %v8769_v22  ;;  %v2869_v45 = vand.u32 2147483648, %v9056_v54 }
 0x26c   :  { %12616 = vst [vmem:[#allocation44_spill] sm:$0xff] %v9234_v17  ;;  %v9243_v47 = vpop.eup %5597  ;;  %5605 = vpow2.f32 %v5020_v11  ;;  %v9250_v46 = vadd.f32 %v1377_v28, %v6753_v25  ;;  %v9253_v2 = vmul.f32 %v2841_v3, %v8779_v50  ;;  %v2861_v56 = vmul.f32 %v9137_v34, %v2860_v49 }
 0x26d   :  { %v2867_v21 = vand.u32 2147483647, %v9056_v54  ;;  %v4074_v38 = vpack.c.bf16 %v7923_v41, %v12618_v44  ;;  %v9260_v22 = vmul.f32 %v2856_v33, %v8789_v62  ;;  %v2875_v19 = vsub.f32 1.0, %v2874_v36 }
 0x26e   :  { %12617 = vst [vmem:[#allocation45_spill] sm:$0xff] %v9253_v2  ;;  %v5600_v8 = vpop.eup %5599  ;;  %v5021_v15 = vmul.f32 -1.442695, %v9229_v48  ;;  %v9264_v52 = vadd.f32 %v1466_v42, %v6759_v26  ;;  %vm2863_vm0 = vweird.f32 %v9056_v54  ;;  %v2889_v60 = vmul.f32 %v9231_v59, %v9132_v10 }
 0x26f   :  { %12619 = vst [vmem:[#allocation33_spill] sm:$0xff] %v9260_v22  ;;  %v5602_v50 = vpop.eup %5601  ;;  %v2904_v12 = vmul.f32 %v9243_v47, %v9143_v51  ;;  %5607 = vrcp.f32 %v9241_v18  ;;  %4405 = vmatmul.bf16.gmra.mxu0 %v4074_v38  ;;  %v2870_v62 = vor.u32 1.1754944e-38, %v2869_v45  ;;  %v2884_v20 = vand.u32 2147483648, %v9089_v5 }
 0x270   :  { %v9272_v41 = vpop.eup %5603  ;;  %v5022_v7 = vmul.f32 -1.442695, %v9250_v46  ;;  %v9277_v11 = vadd.f32 %v1201_v9, %v6709_v0  ;;  %v2862_v13 = vadd.f32 %v9137_v34, %v2861_v56  ;;  %vm2864_vm1 = vweird.f32 %v9137_v34 }
 0x271   :  { %vm9281_vm2 = vcmp.eq.f32.partialorder %v2867_v21, 8.507059e+37  ;;  %vm2878_vm3 = vweird.f32 %v9089_v5  ;;  %v2882_v49 = vand.u32 2147483647, %v9089_v5  ;;  %v2876_v3 = vmul.f32 %v9190_v35, %v2875_v19  ;;  %vm9297_vm4 = vmor %vm2863_vm0, %vm2864_vm1 }
 0x272   :  { %v5606_v28 = vpop.eup %5605  ;;  %v9288_v36 = vadd.f32 1.0, %v5600_v8  ;;  %5609 = vpow2.f32 %v5021_v15  ;;  %v5023_v33 = vmul.f32 -1.442695, %v9264_v52  ;;  %v2890_v42 = vsub.f32 1.0, %v2889_v60 }
 0x273   :  { %v2905_v45 = vsub.f32 1.0, %v2904_v12  ;;  %v2919_v56 = vmul.f32 %v9272_v41, %v9188_v39  ;;  %v9293_v21 = vadd.f32 1.0, %v5602_v50  ;;  %v2885_v44 = vor.u32 1.1754944e-38, %v2884_v20  ;;  %v12626_v12 = vld [vmem:[#allocation34_spill] sm:$0xff] }
 0x274   :  { %vm2893_vm5 = vweird.f32 %v9132_v10  ;;  %v2897_v38 = vand.u32 2147483647, %v9132_v10  ;;  %v2899_v8 = vand.u32 2147483648, %v9132_v10  ;;  %v2866_v15 = vsel %vm9297_vm4, %v9137_v34, %v2862_v13 }
 0x275   :  { %v9304_v19 = vpop.eup %5607  ;;  %vm2879_vm6 = vweird.f32 %v9190_v35  ;;  %vm9310_vm7 = vcmp.eq.f32.partialorder %v2882_v49, 8.507059e+37  ;;  %vm2908_vm8 = vweird.f32 %v9143_v51  ;;  %v9315_v50 = vadd.f32 1.0, %v5606_v28 }
 0x276   :  { %v2877_v60 = vadd.f32 %v9190_v35, %v2876_v3  ;;  %5611 = vrcp.f32 %v9288_v36  ;;  %v4075_v20 = vpack.c.bf16 %v7933_v31, %v12626_v12  ;;  %v4076_v34 = vpack.c.bf16 %v7994_v40, %v7889_v14  ;;  %vm9334_vm9 = vmor %vm2878_vm3, %vm2879_vm6 }
 0x277   :  { %v2891_v13 = vmul.f32 %v9231_v59, %v2890_v42  ;;  %v2906_v49 = vmul.f32 %v9243_v47, %v2905_v45  ;;  %v2920_v9 = vsub.f32 1.0, %v2919_v56  ;;  %5613 = vrcp.f32 %v9293_v21  ;;  %v1290_v56 = vpop.f32.mrf.mxu1 }
 0x278   :  { %v5610_v22 = vpop.eup %5609  ;;  %v2900_v28 = vor.u32 1.1754944e-38, %v2899_v8  ;;  %v2912_v17 = vand.u32 2147483647, %v9143_v51  ;;  %v2914_v3 = vand.u32 2147483648, %v9143_v51  ;;  %v2934_v2 = vmul.f32 %v9304_v19, %v9241_v18  ;;  %4494 = vmatmul.bf16.gmra.mxu1 %v4075_v20  ;;  %4583 = vmatmul.bf16.gmra.mxu2 %v4076_v34 }
 0x279   :  { %vm2923_vm10 = vweird.f32 %v9188_v39  ;;  %v2927_v31 = vand.u32 2147483647, %v9188_v39  ;;  %v2929_v40 = vand.u32 2147483648, %v9188_v39  ;;  %5615 = vpow2.f32 %v5022_v7 }
 0x27a   :  { %v2871_v42 = vsel %vm9281_vm2, %v2870_v62, %v2866_v15  ;;  %v2881_v45 = vsel %vm9334_vm9, %v9190_v35, %v2877_v60  ;;  %vm2894_vm11 = vweird.f32 %v9231_v59  ;;  %vm9347_vm12 = vcmp.eq.f32.partialorder %v2897_v38, 8.507059e+37  ;;  %v1468_v35 = vpop.f32.mrf.mxu3 }
 0x27b   :  { %vm2909_vm13 = vweird.f32 %v9243_v47  ;;  %v2892_v8 = vadd.f32 %v9231_v59, %v2891_v13  ;;  %v2907_v7 = vadd.f32 %v9243_v47, %v2906_v49  ;;  %v2921_v43 = vmul.f32 %v9272_v41, %v2920_v9  ;;  %vm9366_vm15 = vmor %vm2893_vm5, %vm2894_vm11  ;;  %v1379_v49 = vpop.f32.mrf.mxu2 }
 0x27c   :  { %5617 = vrcp.f32 %v9315_v50  ;;  %v9356_v62 = vpop.eup %5611  ;;  %vm9358_vm14 = vcmp.eq.f32.partialorder %v2912_v17, 8.507059e+37  ;;  %v2915_v38 = vor.u32 1.1754944e-38, %v2914_v3  ;;  %v2935_v15 = vsub.f32 1.0, %v2934_v2  ;;  %vm9387_vm0 = vmor %vm2908_vm8, %vm2909_vm13 }
 0x27d   :  { %5619 = vpow2.f32 %v5023_v33  ;;  %v9362_v60 = vpop.eup %5613  ;;  %v2944_v20 = vand.u32 2147483648, %v9241_v18  ;;  %v9371_v34 = vadd.f32 1.0, %v5610_v22  ;;  %v9374_v17 = vadd.f32 %v1290_v56, %v6714_v53 }
 0x27e   :  { %v4077_v13 = vpack.c.bf16 %v8010_v30, %v7913_v24  ;;  %v9379_v2 = vmul.f32 %v2871_v42, %v8909_v27  ;;  %v2886_v10 = vsel %vm9310_vm7, %v2885_v44, %v2881_v45  ;;  %vm2924_vm1 = vweird.f32 %v9272_v41 }
 0x27f   :  { %vm9392_vm2 = vcmp.eq.f32.partialorder %v2927_v31, 8.507059e+37  ;;  %v2930_v24 = vor.u32 1.1754944e-38, %v2929_v40  ;;  %v5616_v30 = vpop.eup %5615  ;;  %v2896_v27 = vsel %vm9366_vm15, %v9231_v59, %v2892_v8  ;;  %v2911_v51 = vsel %vm9387_vm0, %v9243_v47, %v2907_v7  ;;  %vm9424_vm4 = vmor %vm2923_vm10, %vm2924_vm1 }
 0x280   :  { %v2922_v44 = vadd.f32 %v9272_v41, %v2921_v43  ;;  %v2942_v54 = vand.u32 2147483647, %v9241_v18  ;;  %4672 = vmatmul.bf16.gmra.mxu3 %v4077_v13  ;;  %v2936_v9 = vmul.f32 %v9304_v19, %v2935_v15  ;;  %vm2938_vm3 = vweird.f32 %v9241_v18 }
 0x281   :  { %v2949_v3 = vmul.f32 %v9356_v62, %v9288_v36  ;;  %v2964_v59 = vmul.f32 %v9362_v60, %v9293_v21  ;;  %v5024_v14 = vmul.f32 -1.442695, %v9277_v11  ;;  %v9414_v47 = vmul.f32 %v2886_v10, %v8965_v23 }
 0x282   :  { %v9411_v31 = vpop.eup %5617  ;;  %v9416_v40 = vor.u32 1.1754944e-38, %v2944_v20  ;;  %5621 = vrcp.f32 %v9371_v34  ;;  %v5025_v42 = vmul.f32 -1.442695, %v9374_v17  ;;  %v2957_v8 = vand.u32 2147483647, %v9288_v36 }
 0x283   :  { %v5620_v45 = vpop.eup %5619  ;;  %v2959_v23 = vand.u32 2147483648, %v9288_v36  ;;  %v9430_v7 = vadd.f32 1.0, %v5616_v30  ;;  %v9433_v43 = vadd.f32 %v1379_v49, %v6753_v25  ;;  %v2901_v15 = vsel %vm9347_vm12, %v2900_v28, %v2896_v27  ;;  %v1204_v27 = vpop.f32.mrf.mxu0  ;;  %v12646_v49 = vld [vmem:[#allocation36_spill] sm:$0xff] }
 0x284   :  { %v2916_v12 = vsel %vm9358_vm14, %v2915_v38, %v2911_v51  ;;  %v2926_v39 = vsel %vm9424_vm4, %v9272_v41, %v2922_v44  ;;  %vm2939_vm5 = vweird.f32 %v9304_v19  ;;  %v2937_v20 = vadd.f32 %v9304_v19, %v2936_v9  ;;  %v12643_v41 = vld [vmem:[#allocation38_spill] sm:$0xff]  ;;  %v12644_v51 = vld [vmem:[#allocation35_spill] sm:$0xff]  ;;  %v12647_v9 = vld [vmem:[#allocation40_spill] sm:$0xff] }
 0x285   :  { %vm9444_vm6 = vcmp.eq.f32.partialorder %v2942_v54, 8.507059e+37  ;;  %v2950_v10 = vsub.f32 1.0, %v2949_v3  ;;  %v2965_v33 = vsub.f32 1.0, %v2964_v59  ;;  %5623 = vpow2.f32 %v5024_v14  ;;  %v12645_v44 = vld [vmem:[#allocation39_spill] sm:$0xff]  ;;  %vm9483_vm8 = vmor %vm2938_vm3, %vm2939_vm5 }
 0x286   :  { %v2979_v28 = vmul.f32 %v9411_v31, %v9315_v50  ;;  %v9450_v5 = vadd.f32 1.0, %v5620_v45  ;;  %5625 = vpow2.f32 %v5025_v42  ;;  %v4078_v38 = vpack.c.bf16 %v12643_v41, %v8059_v57 }
 0x287   :  { %vm2953_vm7 = vweird.f32 %v9288_v36  ;;  %5627 = vrcp.f32 %v9430_v7  ;;  %v5026_v30 = vmul.f32 -1.442695, %v9433_v43  ;;  %v4079_v54 = vpack.c.bf16 %v12645_v44, %v12644_v51 }
 0x288   :  { %v4080_v3 = vpack.c.bf16 %v12647_v9, %v12646_v49  ;;  %v9461_v59 = vpop.eup %5621  ;;  %v9464_v14 = vmul.f32 %v2901_v15, %v8990_v6  ;;  %v9467_v57 = vmul.f32 %v2916_v12, %v8999_v61  ;;  %v2931_v42 = vsel %vm9392_vm2, %v2930_v24, %v2926_v39  ;;  %4410 = vmatmul.bf16.gmra.mxu0 %v4078_v38  ;;  %v12656_v49 = vld [vmem:[#allocation41_spill] sm:$0xff] }
 0x289   :  { %v9471_v45 = vor.u32 1.1754944e-38, %v2959_v23  ;;  %v2951_v56 = vmul.f32 %v9356_v62, %v2950_v10  ;;  %v2972_v41 = vand.u32 2147483647, %v9293_v21  ;;  %v2974_v51 = vand.u32 2147483648, %v9293_v21  ;;  %4499 = vmatmul.bf16.gmra.mxu1 %v4079_v54  ;;  %v12655_v54 = vld [vmem:[#allocation37_spill] sm:$0xff] }
 0x28a   :  { %12648 = vst [vmem:[#allocation34_spill] sm:$0xff] %v9467_v57  ;;  %v9477_v44 = vadd.f32 %v1468_v35, %v6759_v26  ;;  %4588 = vmatmul.bf16.gmra.mxu2 %v4080_v3  ;;  %vm2968_vm9 = vweird.f32 %v9293_v21  ;;  %v2980_v61 = vsub.f32 1.0, %v2979_v28  ;;  %5629 = vrcp.f32 %v9450_v5  ;;  %v12669_v57 = vld [vmem:[#allocation19_spill] sm:$0xff]  ;;  %v12670_v28 = vld [vmem:[#allocation21_spill] sm:$0xff] }
 0x28b   :  { %v9490_v22 = vadd.f32 %v1204_v27, %v6709_v0  ;;  %v5624_v24 = vpop.eup %5623  ;;  %v2941_v23 = vsel %vm9483_vm8, %v9304_v19, %v2937_v20  ;;  %v2966_v15 = vmul.f32 %v9362_v60, %v2965_v33  ;;  %v2994_v18 = vmul.f32 %v9461_v59, %v9371_v34 }
 0x28c   :  { %5631 = vpow2.f32 %v5026_v30  ;;  %v5626_v12 = vpop.eup %5625  ;;  %v9499_v39 = vmul.f32 %v2931_v42, %v9035_v32  ;;  %vm2954_vm10 = vweird.f32 %v9356_v62  ;;  %vm9502_vm11 = vcmp.eq.f32.partialorder %v2957_v8, 8.507059e+37 }
 0x28d   :  { %vm2983_vm12 = vweird.f32 %v9315_v50  ;;  %v2989_v19 = vand.u32 2147483648, %v9315_v50  ;;  %v9508_v20 = vpop.eup %5627  ;;  %v2952_v33 = vadd.f32 %v9356_v62, %v2951_v56  ;;  %vm9511_vm13 = vcmp.eq.f32.partialorder %v2972_v41, 8.507059e+37  ;;  %v1293_v41 = vpop.f32.mrf.mxu1  ;;  %vm9534_vm15 = vmor %vm2953_vm7, %vm2954_vm10 }
 0x28e   :  { %v2975_v32 = vor.u32 1.1754944e-38, %v2974_v51  ;;  %v2987_v35 = vand.u32 2147483647, %v9315_v50  ;;  %v5027_v8 = vmul.f32 -1.442695, %v9477_v44  ;;  %v2946_v38 = vsel %vm9444_vm6, %v9416_v40, %v2941_v23  ;;  %v12665_v50 = vld [vmem:[#allocation18_spill] sm:$0xff] }
 0x28f   :  { %v2981_v30 = vmul.f32 %v9411_v31, %v2980_v61  ;;  %v5028_v27 = vmul.f32 -1.442695, %v9490_v22  ;;  %v4081_v9 = vpack.c.bf16 %v12656_v49, %v12655_v54  ;;  %v2967_v3 = vadd.f32 %v9362_v60, %v2966_v15 }
 0x290   :  { %vm2969_vm14 = vweird.f32 %v9362_v60  ;;  %v2995_v42 = vsub.f32 1.0, %v2994_v18  ;;  %v9526_v56 = vadd.f32 1.0, %v5624_v24  ;;  %v9528_v51 = vpop.eup %5629  ;;  %v2990_v13 = vor.u32 1.1754944e-38, %v2989_v19  ;;  %v1382_v24 = vpop.f32.mrf.mxu2 }
 0x291   :  { %v3002_v6 = vand.u32 2147483647, %v9371_v34  ;;  %v3009_v61 = vmul.f32 %v9508_v20, %v9430_v7  ;;  %v9541_v23 = vadd.f32 1.0, %v5626_v12  ;;  %4677 = vmatmul.bf16.gmra.mxu3 %v4081_v9  ;;  %v9544_v18 = vmul.f32 %v2946_v38, %v9063_v37  ;;  %vm9559_vm2 = vmor %vm2968_vm9, %vm2969_vm14 }
 0x292   :  { %v5632_v15 = vpop.eup %5631  ;;  %v2956_v36 = vsel %vm9534_vm15, %v9356_v62, %v2952_v33  ;;  %vm9549_vm0 = vcmp.eq.f32.partialorder %v2987_v35, 8.507059e+37  ;;  %vm2998_vm1 = vweird.f32 %v9371_v34  ;;  %v3004_v19 = vand.u32 2147483648, %v9371_v34  ;;  %v1206_v34 = vpop.f32.mrf.mxu0 }
 0x293   :  { %5633 = vpow2.f32 %v5027_v8  ;;  %v2982_v12 = vadd.f32 %v9411_v31, %v2981_v30  ;;  %vm2984_vm3 = vweird.f32 %v9411_v31  ;;  %v9566_v62 = vadd.f32 %v1293_v41, %v6714_v53 }
 0x294   :  { %5635 = vpow2.f32 %v5028_v27  ;;  %v2971_v33 = vsel %vm9559_vm2, %v9362_v60, %v2967_v3  ;;  %v2996_v35 = vmul.f32 %v9461_v59, %v2995_v42  ;;  %v9574_v21 = vadd.f32 %v1382_v24, %v6753_v25  ;;  %vm9586_vm4 = vmor %vm2983_vm12, %vm2984_vm3  ;;  %v12666_v42 = vld [vmem:[#allocation20_spill] sm:$0xff] }
 0x295   :  { %5637 = vrcp.f32 %v9526_v56  ;;  %v3010_v8 = vsub.f32 1.0, %v3009_v61  ;;  %v3024_v38 = vmul.f32 %v9528_v51, %v9450_v5  ;;  %v9579_v30 = vadd.f32 1.0, %v5632_v15  ;;  %v12667_v15 = vld [vmem:[#allocation22_spill] sm:$0xff] }
 0x296   :  { %5639 = vrcp.f32 %v9541_v23  ;;  %v2961_v27 = vsel %vm9502_vm11, %v9471_v45, %v2956_v36  ;;  %vm2999_vm5 = vweird.f32 %v9461_v59  ;;  %v3017_v49 = vand.u32 2147483647, %v9430_v7  ;;  %v12668_v36 = vld [vmem:[#allocation24_spill] sm:$0xff] }
 0x297   :  { %v3019_v9 = vand.u32 2147483648, %v9430_v7  ;;  %v2976_v3 = vsel %vm9511_vm13, %v2975_v32, %v2971_v33  ;;  %v2986_v10 = vsel %vm9586_vm4, %v9411_v31, %v2982_v12  ;;  %v5029_v45 = vmul.f32 -1.442695, %v9566_v62  ;;  %vm9630_vm8 = vmor %vm2998_vm1, %vm2999_vm5 }
 0x298   :  { %v4082_v41 = vpack.c.bf16 %v12666_v42, %v12665_v50  ;;  %v2997_v61 = vadd.f32 %v9461_v59, %v2996_v35  ;;  %v5030_v24 = vmul.f32 -1.442695, %v9574_v21  ;;  %v4083_v37 = vpack.c.bf16 %v12668_v36, %v12667_v15  ;;  %v1471_v15 = vpop.f32.mrf.mxu3 }
 0x299   :  { %v5634_v40 = vpop.eup %5633  ;;  %v4084_v32 = vpack.c.bf16 %v12670_v28, %v12669_v57  ;;  %vm9607_vm6 = vcmp.eq.f32.partialorder %v3002_v6, 8.507059e+37  ;;  %v3011_v31 = vmul.f32 %v9508_v20, %v3010_v8  ;;  %v3025_v12 = vsub.f32 1.0, %v3024_v38 }
 0x29a   :  { %v5636_v33 = vpop.eup %5635  ;;  %5641 = vrcp.f32 %v9579_v30  ;;  %4415 = vmatmul.bf16.gmra.mxu0 %v4082_v41  ;;  %v9616_v50 = vmul.f32 %v2961_v27, %v9116_v29  ;;  %v3005_v42 = vor.u32 1.1754944e-38, %v3004_v19  ;;  %vm3013_vm7 = vweird.f32 %v9430_v7  ;;  %4504 = vmatmul.bf16.gmra.mxu1 %v4083_v37  ;;  %v1295_v29 = vpop.f32.mrf.mxu1 }
 0x29b   :  { %v9613_v35 = vpop.eup %5637  ;;  %v3020_v57 = vor.u32 1.1754944e-38, %v3019_v9  ;;  %4593 = vmatmul.bf16.gmra.mxu2 %v4084_v32  ;;  %v9622_v8 = vmul.f32 %v2976_v3, %v9135_v4  ;;  %v2991_v38 = vsel %vm9549_vm0, %v2990_v13, %v2986_v10  ;;  %vm9634_vm9 = vcmp.eq.f32.partialorder %v3017_v49, 8.507059e+37 }
 0x29c   :  { %v9619_v6 = vpop.eup %5639  ;;  %v9638_v27 = vadd.f32 1.0, %v5634_v40  ;;  %5643 = vpow2.f32 %v5029_v45  ;;  %v3001_v4 = vsel %vm9630_vm8, %v9461_v59, %v2997_v61  ;;  %vm3014_vm10 = vweird.f32 %v9508_v20 }
 0x29d   :  { %12673 = vst [vmem:[#allocation38_spill] sm:$0xff] %v9622_v8  ;;  %v9644_v13 = vadd.f32 1.0, %v5636_v33  ;;  %5645 = vpow2.f32 %v5030_v24  ;;  %v3012_v54 = vadd.f32 %v9508_v20, %v3011_v31  ;;  %v3026_v49 = vmul.f32 %v9528_v51, %v3025_v12  ;;  %vm9674_vm12 = vmor %vm3013_vm7, %vm3014_vm10  ;;  %v12693_v12 = vld [vmem:[#allocation29_spill] sm:$0xff] }
 0x29e   :  { %v3039_v9 = vmul.f32 %v9613_v35, %v9526_v56  ;;  %v9651_v3 = vadd.f32 %v1471_v15, %v6759_v26  ;;  %vm3028_vm11 = vweird.f32 %v9450_v5  ;;  %v3032_v59 = vand.u32 2147483647, %v9450_v5 }
 0x29f   :  { %v3034_v10 = vand.u32 2147483648, %v9450_v5  ;;  %v3054_v45 = vmul.f32 %v9619_v6, %v9541_v23  ;;  %v9661_v40 = vmul.f32 %v2991_v38, %v9161_v16  ;;  %v3049_v61 = vand.u32 2147483648, %v9526_v56 }
 0x2a0   :  { %v9658_v41 = vpop.eup %5641  ;;  %5647 = vrcp.f32 %v9638_v27  ;;  %v9666_v24 = vadd.f32 %v1206_v34, %v6709_v0  ;;  %v3006_v36 = vsel %vm9607_vm6, %v3005_v42, %v3001_v4  ;;  %vm3029_vm13 = vweird.f32 %v9528_v51 }
 0x2a1   :  { %12678 = vst [vmem:[#allocation35_spill] sm:$0xff] %v9661_v40  ;;  %v3064_v16 = vand.u32 2147483648, %v9541_v23  ;;  %5649 = vrcp.f32 %v9644_v13  ;;  %v3016_v32 = vsel %vm9674_vm12, %v9508_v20, %v3012_v54  ;;  %v3027_v33 = vadd.f32 %v9528_v51, %v3026_v49  ;;  %vm9706_vm0 = vmor %vm3028_vm11, %vm3029_vm13 }
 0x2a2   :  { %v5644_v28 = vpop.eup %5643  ;;  %v3040_v60 = vsub.f32 1.0, %v3039_v9  ;;  %v5031_v7 = vmul.f32 -1.442695, %v9651_v3  ;;  %vm9686_vm14 = vcmp.eq.f32.partialorder %v3032_v59, 8.507059e+37  ;;  %v3035_v42 = vor.u32 1.1754944e-38, %v3034_v10  ;;  %v12694_v9 = vld [vmem:[#allocation26_spill] sm:$0xff] }
 0x2a3   :  { %v5646_v31 = vpop.eup %5645  ;;  %v3055_v15 = vsub.f32 1.0, %v3054_v45  ;;  %v3069_v38 = vmul.f32 %v9658_v41, %v9579_v30  ;;  %v9693_v4 = vmul.f32 %v3006_v36, %v9229_v48  ;;  %vm3043_vm15 = vweird.f32 %v9526_v56 }
 0x2a4   :  { %v3047_v20 = vand.u32 2147483647, %v9526_v56  ;;  %v9697_v34 = vor.u32 1.1754944e-38, %v3049_v61  ;;  %v5032_v54 = vmul.f32 -1.442695, %v9666_v24  ;;  %v3021_v49 = vsel %vm9634_vm9, %v3020_v57, %v3016_v32  ;;  %v12687_v32 = vld [vmem:[#allocation25_spill] sm:$0xff] }
 0x2a5   :  { %12683 = vst [vmem:[#allocation39_spill] sm:$0xff] %v9693_v4  ;;  %vm3058_vm1 = vweird.f32 %v9541_v23  ;;  %v3062_v48 = vand.u32 2147483647, %v9541_v23  ;;  %v9712_v59 = vor.u32 1.1754944e-38, %v3064_v16  ;;  %v9714_v10 = vadd.f32 1.0, %v5644_v28  ;;  %v1384_v16 = vpop.f32.mrf.mxu2  ;;  %v12686_v28 = vld [vmem:[#allocation23_spill] sm:$0xff] }
 0x2a6   :  { %v9716_v45 = vpop.eup %5647  ;;  %v3031_v57 = vsel %vm9706_vm0, %v9528_v51, %v3027_v33  ;;  %v3041_v5 = vmul.f32 %v9613_v35, %v3040_v60  ;;  %v9722_v19 = vadd.f32 1.0, %v5646_v31  ;;  %5651 = vpow2.f32 %v5031_v7 }
 0x2a7   :  { %v9724_v61 = vpop.eup %5649  ;;  %vm3044_vm2 = vweird.f32 %v9613_v35  ;;  %v3056_v36 = vmul.f32 %v9619_v6, %v3055_v15  ;;  %v3070_v37 = vsub.f32 1.0, %v3069_v38  ;;  %v4085_v4 = vpack.c.bf16 %v12687_v32, %v12686_v28 }
 0x2a8   :  { %vm9730_vm3 = vcmp.eq.f32.partialorder %v3047_v20, 8.507059e+37  ;;  %v3077_v51 = vand.u32 2147483647, %v9579_v30  ;;  %v3079_v33 = vand.u32 2147483648, %v9579_v30  ;;  %5653 = vpow2.f32 %v5032_v54  ;;  %vm9776_vm7 = vmor %vm3043_vm15, %vm3044_vm2 }
 0x2a9   :  { %v9737_v60 = vadd.f32 %v1295_v29, %v6714_v53  ;;  %v9740_v7 = vmul.f32 %v3021_v49, %v9250_v46  ;;  %v3036_v31 = vsel %vm9686_vm14, %v3035_v42, %v3031_v57  ;;  %vm9744_vm4 = vcmp.eq.f32.partialorder %v3062_v48, 8.507059e+37  ;;  %4682 = vmatmul.bf16.gmra.mxu3 %v4085_v4  ;;  %v1473_v49 = vpop.f32.mrf.mxu3  ;;  %v12695_v48 = vld [vmem:[#allocation31_spill] sm:$0xff] }
 0x2aa   :  { %vm3073_vm5 = vweird.f32 %v9579_v30  ;;  %v3084_v38 = vmul.f32 %v9716_v45, %v9638_v27  ;;  %5655 = vrcp.f32 %v9714_v10  ;;  %v3042_v29 = vadd.f32 %v9613_v35, %v3041_v5 }
 0x2ab   :  { %12690 = vst [vmem:[#allocation36_spill] sm:$0xff] %v9740_v7  ;;  %v3099_v46 = vmul.f32 %v9724_v61, %v9644_v13  ;;  %5657 = vrcp.f32 %v9722_v19  ;;  %v4086_v42 = vpack.c.bf16 %v8925_v63, %v12693_v12  ;;  %v3057_v20 = vadd.f32 %v9619_v6, %v3056_v36  ;;  %v1209_v7 = vpop.f32.mrf.mxu0  ;;  %v12696_v63 = vld [vmem:[#allocation30_spill] sm:$0xff]  ;;  %v12697_v12 = vld [vmem:[#allocation28_spill] sm:$0xff] }
 0x2ac   :  { %vm3059_vm6 = vweird.f32 %v9619_v6  ;;  %v3071_v54 = vmul.f32 %v9658_v41, %v3070_v37  ;;  %v4087_v4 = vpack.c.bf16 %v12695_v48, %v12694_v9  ;;  %v5652_v57 = vpop.eup %5651  ;;  %v3080_v5 = vor.u32 1.1754944e-38, %v3079_v33  ;;  %v1298_v48 = vpop.f32.mrf.mxu1 }
 0x2ad   :  { %v5033_v28 = vmul.f32 -1.442695, %v9737_v60  ;;  %v9765_v32 = vadd.f32 %v1384_v16, %v6753_v25  ;;  %4420 = vmatmul.bf16.gmra.mxu0 %v4086_v42  ;;  %v4088_v36 = vpack.c.bf16 %v12697_v12, %v12696_v63  ;;  %v9770_v8 = vmul.f32 %v3036_v31, %v9264_v52  ;;  %vm9793_vm9 = vmor %vm3058_vm1, %vm3059_vm6 }
 0x2ae   :  { %vm9780_vm8 = vcmp.eq.f32.partialorder %v3077_v51, 8.507059e+37  ;;  %v3085_v16 = vsub.f32 1.0, %v3084_v38  ;;  %v3092_v42 = vand.u32 2147483647, %v9638_v27  ;;  %v3094_v9 = vand.u32 2147483648, %v9638_v27  ;;  %4509 = vmatmul.bf16.gmra.mxu1 %v4087_v4  ;;  %v5654_v52 = vpop.eup %5653 }
 0x2af   :  { %12698 = vst [vmem:[#allocation40_spill] sm:$0xff] %v9770_v8  ;;  %v3046_v56 = vsel %vm9776_vm7, %v9613_v35, %v3042_v29  ;;  %vm3074_vm10 = vweird.f32 %v9658_v41  ;;  %v3100_v31 = vsub.f32 1.0, %v3099_v46  ;;  %v9799_v38 = vadd.f32 %v1473_v49, %v6759_v26  ;;  %4598 = vmatmul.bf16.gmra.mxu2 %v4088_v36 }
 0x2b0   :  { %v9801_v4 = vpop.eup %5655  ;;  %v3061_v35 = vsel %vm9793_vm9, %v9619_v6, %v3057_v20  ;;  %v3072_v29 = vadd.f32 %v9658_v41, %v3071_v54  ;;  %v9807_v23 = vadd.f32 1.0, %v5652_v57  ;;  %v9810_v63 = vadd.f32 %v1209_v7, %v6709_v0  ;;  %v9825_v7 = vpop.f32.mrf.mxu2  ;;  %vm9834_vm12 = vmor %vm3073_vm5, %vm3074_vm10 }
 0x2b1   :  { %v9812_v12 = vpop.eup %5657  ;;  %vm3088_vm11 = vweird.f32 %v9638_v27  ;;  %5659 = vpow2.f32 %v5033_v28  ;;  %v5034_v46 = vmul.f32 -1.442695, %v9765_v32  ;;  %v9817_v49 = vadd.f32 %v1298_v48, %v6714_v53 }
 0x2b2   :  { %v3051_v6 = vsel %vm9730_vm3, %v9697_v34, %v3046_v56  ;;  %v3086_v20 = vmul.f32 %v9716_v45, %v3085_v16  ;;  %v3095_v54 = vor.u32 1.1754944e-38, %v3094_v9  ;;  %v9823_v57 = vadd.f32 1.0, %v5654_v52 }
 0x2b3   :  { %v3066_v28 = vsel %vm9744_vm4, %v9712_v59, %v3061_v35  ;;  %v3101_v40 = vmul.f32 %v9724_v61, %v3100_v31  ;;  %v3114_v34 = vmul.f32 %v9801_v4, %v9714_v10  ;;  %v5035_v37 = vmul.f32 -1.442695, %v9799_v38 }
 0x2b4   :  { %v3076_v15 = vsel %vm9834_vm12, %v9658_v41, %v3072_v29  ;;  %vm9845_vm13 = vcmp.eq.f32.partialorder %v3092_v42, 8.507059e+37  ;;  %v3129_v30 = vmul.f32 %v9812_v12, %v9722_v19  ;;  %5661 = vrcp.f32 %v9807_v23 }
 0x2b5   :  { %v5036_v16 = vmul.f32 -1.442695, %v9810_v63  ;;  %v3107_v9 = vand.u32 2147483647, %v9644_v13  ;;  %v3109_v48 = vand.u32 2147483648, %v9644_v13  ;;  %5663 = vpow2.f32 %v5034_v46  ;;  %v12709_v46 = vld [vmem:[#allocation27_spill] sm:$0xff] }
 0x2b6   :  { %v5037_v52 = vmul.f32 -1.442695, %v9817_v49  ;;  %v3087_v41 = vadd.f32 %v9716_v45, %v3086_v20  ;;  %vm3089_vm14 = vweird.f32 %v9716_v45  ;;  %vm3104_vm15 = vweird.f32 %v9724_v61  ;;  %v12710_v20 = vld [vmem:[#allocation32_spill] sm:$0xff] }
 0x2b7   :  { %5665 = vrcp.f32 %v9823_v57  ;;  %v5660_v42 = vpop.eup %5659  ;;  %v3081_v56 = vsel %vm9780_vm8, %v3080_v5, %v3076_v15  ;;  %v3102_v51 = vadd.f32 %v9724_v61, %v3101_v40  ;;  %v3115_v31 = vsub.f32 1.0, %v3114_v34  ;;  %vm9873_vm0 = vmor %vm3088_vm11, %vm3089_vm14  ;;  %v9900_v34 = vpop.f32.mrf.mxu1 }
 0x2b8   :  { %5667 = vpow2.f32 %v5035_v37  ;;  %v9864_v35 = vmul.f32 %v3051_v6, %v9277_v11  ;;  %v3130_v29 = vsub.f32 1.0, %v3129_v30  ;;  %v4089_v36 = vpack.c.bf16 %v12710_v20, %v12709_v46  ;;  %v9882_v11 = vpop.f32.mrf.mxu0  ;;  %v12719_v46 = vld [vmem:[#allocation45_spill] sm:$0xff] }
 0x2b9   :  { %5669 = vpow2.f32 %v5036_v16  ;;  %v9869_v8 = vmul.f32 %v3066_v28, %v9374_v17  ;;  %vm3103_vm1 = vweird.f32 %v9644_v13  ;;  %vm9878_vm2 = vcmp.eq.f32.partialorder %v3107_v9, 8.507059e+37 }
 0x2ba   :  { %5671 = vpow2.f32 %v5037_v52  ;;  %v9884_v6 = vpop.eup %5661  ;;  %v9887_v17 = vmul.f32 %v3081_v56, %v9433_v43  ;;  %v3091_v27 = vsel %vm9873_vm0, %v9716_v45, %v3087_v41  ;;  %vm9894_vm3 = vmor %vm3103_vm1, %vm3104_vm15  ;;  %v3110_v28 = vor.u32 1.1754944e-38, %v3109_v48  ;;  %4687 = vmatmul.bf16.gmra.mxu3 %v4089_v36  ;;  %v12717_v45 = vld [vmem:[#allocation42_spill] sm:$0xff]  ;;  %v1476_v41 = vpop.f32.mrf.mxu3  ;;  %v12718_v56 = vld [vmem:[#allocation43_spill] sm:$0xff] }
 0x2bb   :  { %v9898_v40 = vadd.f32 1.0, %v5660_v42  ;;  %v5664_v37 = vpop.eup %5663  ;;  %v3106_v43 = vsel %vm9894_vm3, %v9724_v61, %v3102_v51  ;;  %v3116_v15 = vmul.f32 %v9801_v4, %v3115_v31  ;;  %vm3118_vm4 = vweird.f32 %v9714_v10  ;;  %v9914_v42 = vpop.f32.mrf.mxu2 }
 0x2bc   :  { %v4090_v30 = vpack.c.bf16 %v9237_v58, %v12717_v45  ;;  %v3122_v9 = vand.u32 2147483647, %v9714_v10  ;;  %v3124_v48 = vand.u32 2147483648, %v9714_v10  ;;  %v3131_v52 = vmul.f32 %v9812_v12, %v3130_v29 }
 0x2bd   :  { %v9909_v16 = vpop.eup %5665  ;;  %v4091_v61 = vpack.c.bf16 %v9246_v55, %v12718_v56  ;;  %v3096_v31 = vsel %vm9845_vm13, %v3095_v54, %v3091_v27  ;;  %vm3133_vm5 = vweird.f32 %v9722_v19  ;;  %v3144_v58 = vmul.f32 %v9884_v6, %v9807_v23 }
 0x2be   :  { %v5668_v51 = vpop.eup %5667  ;;  %4425 = vmatmul.bf16.gmra.mxu0 %v4090_v30  ;;  %v4092_v20 = vpack.c.bf16 %v12719_v46, %v9193_v1  ;;  %v3111_v36 = vsel %vm9878_vm2, %v3110_v28, %v3106_v43  ;;  %v3137_v33 = vand.u32 2147483647, %v9722_v19  ;;  %v3139_v55 = vand.u32 2147483648, %v9722_v19 }
 0x2bf   :  { %v5670_v29 = vpop.eup %5669  ;;  %5673 = vrcp.f32 %v9898_v40  ;;  %4514 = vmatmul.bf16.gmra.mxu1 %v4091_v61  ;;  %v3117_v59 = vadd.f32 %v9801_v4, %v3116_v15  ;;  %vm3119_vm6 = vweird.f32 %v9801_v4  ;;  %v3159_v27 = vmul.f32 %v9909_v16, %v9823_v57  ;;  %v9987_v46 = vpop.f32.mrf.mxu1 }
 0x2c0   :  { %v5672_v54 = vpop.eup %5671  ;;  %v9934_v1 = vadd.f32 1.0, %v5664_v37  ;;  %4603 = vmatmul.bf16.gmra.mxu2 %v4092_v20  ;;  %v3132_v5 = vadd.f32 %v9812_v12, %v3131_v52  ;;  %vm3134_vm7 = vweird.f32 %v9812_v12  ;;  %v3154_v13 = vand.u32 2147483648, %v9807_v23  ;;  %vm9952_vm9 = vmor %vm3118_vm4, %vm3119_vm6  ;;  %v12730_v37 = vld [vmem:[#allocation44_spill] sm:$0xff] }
 0x2c1   :  { %v9939_v28 = vadd.f32 1.0, %v5668_v51  ;;  %v9942_v43 = vmul.f32 %v3096_v31, %v9477_v44  ;;  %vm9944_vm8 = vcmp.eq.f32.partialorder %v3122_v9, 8.507059e+37  ;;  %v3145_v45 = vsub.f32 1.0, %v3144_v58  ;;  %vm9970_vm11 = vmor %vm3133_vm5, %vm3134_vm7  ;;  %v9976_v31 = vpop.f32.mrf.mxu0 }
 0x2c2   :  { %v9948_v30 = vadd.f32 1.0, %v5670_v29  ;;  %v3125_v52 = vor.u32 1.1754944e-38, %v3124_v48  ;;  %vm9956_vm10 = vcmp.eq.f32.partialorder %v3137_v33, 8.507059e+37  ;;  %v3140_v44 = vor.u32 1.1754944e-38, %v3139_v55 }
 0x2c3   :  { %v9960_v61 = vadd.f32 1.0, %v5672_v54  ;;  %v9963_v9 = vmul.f32 %v3111_v36, %v9490_v22  ;;  %v3121_v51 = vsel %vm9952_vm9, %v9801_v4, %v3117_v59  ;;  %vm3148_vm12 = vweird.f32 %v9807_v23  ;;  %v1478_v54 = vpop.f32.mrf.mxu3  ;;  %v10001_v59 = vpop.f32.mrf.mxu2 }
 0x2c4   :  { %v3160_v48 = vsub.f32 1.0, %v3159_v27  ;;  %5675 = vrcp.f32 %v9934_v1  ;;  %v3136_v22 = vsel %vm9970_vm11, %v9812_v12, %v3132_v5  ;;  %v3152_v4 = vand.u32 2147483647, %v9807_v23 }
 0x2c5   :  { %v9978_v58 = vpop.eup %5673  ;;  %v9984_v19 = vor.u32 1.1754944e-38, %v3154_v13  ;;  %5677 = vrcp.f32 %v9939_v28  ;;  %v3146_v20 = vmul.f32 %v9884_v6, %v3145_v45  ;;  %v3167_v29 = vand.u32 2147483647, %v9823_v57 }
 0x2c6   :  { %v3169_v36 = vand.u32 2147483648, %v9823_v57  ;;  %5679 = vrcp.f32 %v9948_v30  ;;  %v3126_v33 = vsel %vm9944_vm8, %v3125_v52, %v3121_v51  ;;  %v3184_v12 = vand.u32 2147483648, %v9898_v40  ;;  %v12731_v52 = vld [vmem:[#allocation33_spill] sm:$0xff] }
 0x2c7   :  { %5681 = vrcp.f32 %v9960_v61  ;;  %v9999_v55 = vadd.f32 %v9825_v7, %v6753_v25  ;;  %v3141_v27 = vsel %vm9956_vm10, %v3140_v44, %v3136_v22  ;;  %v3161_v5 = vmul.f32 %v9909_v16, %v3160_v48 }
 0x2c8   :  { %v3174_v13 = vmul.f32 %v9978_v58, %v9898_v40  ;;  %v10009_v15 = vadd.f32 %v1476_v41, %v6759_v26  ;;  %vm3149_vm13 = vweird.f32 %v9884_v6  ;;  %vm10012_vm14 = vcmp.eq.f32.partialorder %v3152_v4, 8.507059e+37 }
 0x2c9   :  { %vm3163_vm15 = vweird.f32 %v9823_v57  ;;  %v10019_v7 = vadd.f32 %v9882_v11, %v6709_v0  ;;  %v4093_v56 = vpack.c.bf16 %v12731_v52, %v12730_v37  ;;  %v10026_v41 = vmul.f32 %v3126_v33, %v9566_v62  ;;  %vm10055_vm2 = vmor %vm3148_vm12, %vm3149_vm13 }
 0x2ca   :  { %v10023_v44 = vpop.eup %5675  ;;  %v3147_v51 = vadd.f32 %v9884_v6, %v3146_v20  ;;  %v3170_v10 = vor.u32 1.1754944e-38, %v3169_v36  ;;  %v3182_v48 = vand.u32 2147483647, %v9898_v40  ;;  %v10033_v4 = vmul.f32 %v3141_v27, %v9574_v21 }
 0x2cb   :  { %12732 = vst [vmem:[#allocation37_spill] sm:$0xff] %v10026_v41  ;;  %v10030_v22 = vpop.eup %5677  ;;  %vm3164_vm0 = vweird.f32 %v9909_v16  ;;  %vm10036_vm1 = vcmp.eq.f32.partialorder %v3167_v29, 8.507059e+37  ;;  %v10040_v37 = vor.u32 1.1754944e-38, %v3184_v12  ;;  %v5038_v62 = vmul.f32 -1.442695, %v9999_v55  ;;  %4692 = vmatmul.bf16.gmra.mxu3 %v4093_v56  ;;  %v10109_v29 = vpop.f32.mrf.mxu3 }
 0x2cc   :  { %12733 = vst [vmem:[#allocation41_spill] sm:$0xff] %v10033_v4  ;;  %v10043_v20 = vpop.eup %5679  ;;  %v3162_v36 = vadd.f32 %v9909_v16, %v3161_v5  ;;  %v3175_v33 = vsub.f32 1.0, %v3174_v13  ;;  %v5039_v52 = vmul.f32 -1.442695, %v10009_v15  ;;  %v4094_v21 = vpack.c.bf16 %v9499_v39, %v9379_v2  ;;  %vm10094_vm4 = vmor %vm3163_vm15, %vm3164_vm0 }
 0x2cd   :  { %v10049_v27 = vpop.eup %5681  ;;  %v3189_v12 = vmul.f32 %v10023_v44, %v9934_v1  ;;  %v5040_v5 = vmul.f32 -1.442695, %v10019_v7  ;;  %v10064_v13 = vadd.f32 %v9900_v34, %v6714_v53  ;;  %v4095_v2 = vpack.c.bf16 %v9544_v18, %v9414_v47  ;;  %v10079_v34 = vpop.f32.mrf.mxu0 }
 0x2ce   :  { %v3151_v39 = vsel %vm10055_vm2, %v9884_v6, %v3147_v51  ;;  %vm3178_vm3 = vweird.f32 %v9898_v40  ;;  %v3199_v23 = vand.u32 2147483648, %v9934_v1  ;;  %v3204_v56 = vmul.f32 %v10030_v22, %v9939_v28  ;;  %4430 = vmatmul.bf16.gmra.mxu0 %v4094_v21  ;;  %v10086_v6 = vpop.f32.mrf.mxu1 }
 0x2cf   :  { %12738 = vst [vmem:[#allocation18_spill] sm:$0xff] %v10064_v13  ;;  %v10077_v4 = vadd.f32 %v9914_v42, %v6753_v25  ;;  %v3219_v47 = vmul.f32 %v10043_v20, %v9948_v30  ;;  %5683 = vpow2.f32 %v5038_v62  ;;  %v10084_v18 = vadd.f32 %v1478_v54, %v6759_v26  ;;  %4519 = vmatmul.bf16.gmra.mxu1 %v4095_v2  ;;  %v10111_v2 = vpop.f32.mrf.mxu2 }
 0x2d0   :  { %v4096_v51 = vpack.c.bf16 %v9616_v50, %v9464_v14  ;;  %v3176_v21 = vmul.f32 %v9978_v58, %v3175_v33  ;;  %v3234_v54 = vmul.f32 %v10049_v27, %v9960_v61  ;;  %5685 = vpow2.f32 %v5039_v52 }
 0x2d1   :  { %12739 = vst [vmem:[#allocation20_spill] sm:$0xff] %v10077_v4  ;;  %v10103_v62 = vadd.f32 %v9976_v31, %v6709_v0  ;;  %v3166_v14 = vsel %vm10094_vm4, %v9909_v16, %v3162_v36  ;;  %v3190_v50 = vsub.f32 1.0, %v3189_v12  ;;  %5687 = vpow2.f32 %v5040_v5 }
 0x2d2   :  { %v5041_v57 = vmul.f32 -1.442695, %v10064_v13  ;;  %4608 = vmatmul.bf16.gmra.mxu2 %v4096_v51  ;;  %v3156_v33 = vsel %vm10012_vm14, %v9984_v19, %v3151_v39  ;;  %vm10116_vm5 = vcmp.eq.f32.partialorder %v3182_v48, 8.507059e+37  ;;  %v3197_v52 = vand.u32 2147483647, %v9934_v1 }
 0x2d3   :  { %v3205_v16 = vsub.f32 1.0, %v3204_v56  ;;  %v5042_v36 = vmul.f32 -1.442695, %v10077_v4  ;;  %vm3179_vm6 = vweird.f32 %v9978_v58  ;;  %vm3193_vm7 = vweird.f32 %v9934_v1 }
 0x2d4   :  { %v3212_v12 = vand.u32 2147483647, %v9939_v28  ;;  %v3220_v5 = vsub.f32 1.0, %v3219_v47  ;;  %v5043_v51 = vmul.f32 -1.442695, %v10084_v18  ;;  %v3171_v19 = vsel %vm10036_vm1, %v3170_v10, %v3166_v14  ;;  %vm10144_vm9 = vmor %vm3178_vm3, %vm3179_vm6 }
 0x2d5   :  { %v3177_v45 = vadd.f32 %v9978_v58, %v3176_v21  ;;  %v3235_v48 = vsub.f32 1.0, %v3234_v54  ;;  %v5044_v39 = vmul.f32 -1.442695, %v10103_v62  ;;  %v5684_v56 = vpop.eup %5683  ;;  %v10131_v42 = vmul.f32 %v3156_v33, %v9651_v3 }
 0x2d6   :  { %v3191_v4 = vmul.f32 %v10023_v44, %v3190_v50  ;;  %v3200_v13 = vor.u32 1.1754944e-38, %v3199_v23  ;;  %5689 = vpow2.f32 %v5041_v57  ;;  %v5686_v41 = vpop.eup %5685  ;;  %v3206_v47 = vmul.f32 %v10030_v22, %v3205_v16  ;;  %v12752_v16 = vld [vmem:[#allocation38_spill] sm:$0xff] }
 0x2d7   :  { %12744 = vst [vmem:[#allocation22_spill] sm:$0xff] %v10131_v42  ;;  %vm3208_vm8 = vweird.f32 %v9939_v28  ;;  %v3214_v10 = vand.u32 2147483648, %v9939_v28  ;;  %5691 = vpow2.f32 %v5042_v36  ;;  %v5688_v11 = vpop.eup %5687  ;;  %v10138_v21 = vmul.f32 %v3171_v19, %v9666_v24 }
 0x2d8   :  { %vm3194_vm10 = vweird.f32 %v10023_v44  ;;  %vm10149_vm11 = vcmp.eq.f32.partialorder %v3197_v52, 8.507059e+37  ;;  %v3221_v54 = vmul.f32 %v10043_v20, %v3220_v5  ;;  %5693 = vpow2.f32 %v5043_v51  ;;  %v12751_v52 = vld [vmem:[#allocation34_spill] sm:$0xff] }
 0x2d9   :  { %v3181_v24 = vsel %vm10144_vm9, %v9978_v58, %v3177_v45  ;;  %vm10157_vm12 = vcmp.eq.f32.partialorder %v3212_v12, 8.507059e+37  ;;  %v3236_v40 = vmul.f32 %v10049_v27, %v3235_v48  ;;  %v10162_v50 = vadd.f32 1.0, %v5684_v56  ;;  %v10181_v45 = vpop.f32.mrf.mxu3  ;;  %vm10187_vm0 = vmor %vm3193_vm7, %vm3194_vm10 }
 0x2da   :  { %5695 = vpow2.f32 %v5044_v39  ;;  %v3192_v57 = vadd.f32 %v10023_v44, %v3191_v4  ;;  %vm3223_vm13 = vweird.f32 %v9948_v30  ;;  %v10166_v33 = vadd.f32 1.0, %v5686_v41 }
 0x2db   :  { %v4097_v36 = vpack.c.bf16 %v12752_v16, %v12751_v52  ;;  %v3207_v58 = vadd.f32 %v10030_v22, %v3206_v47  ;;  %vm3209_vm14 = vweird.f32 %v10030_v22  ;;  %v3227_v12 = vand.u32 2147483647, %v9948_v30 }
 0x2dc   :  { %v10173_v5 = vadd.f32 1.0, %v5688_v11  ;;  %v5690_v51 = vpop.eup %5689  ;;  %v3186_v4 = vsel %vm10116_vm5, %v10040_v37, %v3181_v24  ;;  %v3222_v19 = vadd.f32 %v10043_v20, %v3221_v54  ;;  %vm3224_vm15 = vweird.f32 %v10043_v20  ;;  %vm10202_vm3 = vmor %vm3208_vm8, %vm3209_vm14 }
 0x2dd   :  { %v3229_v41 = vand.u32 2147483648, %v9948_v30  ;;  %4697 = vmatmul.bf16.gmra.mxu3 %v4097_v36  ;;  %v5692_v48 = vpop.eup %5691  ;;  %v3237_v37 = vadd.f32 %v10049_v27, %v3236_v40  ;;  %vm3238_vm1 = vweird.f32 %v9960_v61  ;;  %vm3239_vm2 = vweird.f32 %v10049_v27  ;;  %vm10216_vm4 = vmor %vm3223_vm13, %vm3224_vm15 }
 0x2de   :  { %5697 = vrcp.f32 %v10162_v50  ;;  %v5694_v31 = vpop.eup %5693  ;;  %v3196_v56 = vsel %vm10187_vm0, %v10023_v44, %v3192_v57  ;;  %v3242_v47 = vand.u32 2147483647, %v9960_v61  ;;  %v3244_v11 = vand.u32 2147483648, %v9960_v61  ;;  %vm10234_vm6 = vmor %vm3238_vm1, %vm3239_vm2 }
 0x2df   :  { %5699 = vrcp.f32 %v10166_v33  ;;  %v3211_v54 = vsel %vm10202_vm3, %v10030_v22, %v3207_v58  ;;  %v10221_v44 = vadd.f32 1.0, %v5690_v51  ;;  %v10225_v24 = vadd.f32 %v9987_v46, %v6714_v53 }
 0x2e0   :  { %v5696_v3 = vpop.eup %5695  ;;  %5701 = vrcp.f32 %v10173_v5  ;;  %v3215_v40 = vor.u32 1.1754944e-38, %v3214_v10  ;;  %v3226_v22 = vsel %vm10216_vm4, %v10043_v20, %v3222_v19  ;;  %vm3228_vm5 = vcmp.eq.f32.partialorder %v3227_v12, 8.507059e+37 }
 0x2e1   :  { %12759 = vst [vmem:[#allocation24_spill] sm:$0xff] %v10225_v24  ;;  %v10238_v57 = vadd.f32 1.0, %v5692_v48  ;;  %v3201_v46 = vsel %vm10149_vm11, %v3200_v13, %v3196_v56  ;;  %v3230_v52 = vor.u32 1.1754944e-38, %v3229_v41  ;;  %v3241_v10 = vsel %vm10234_vm6, %v10049_v27, %v3237_v37 }
 0x2e2   :  { %v10245_v20 = vadd.f32 1.0, %v5694_v31  ;;  %v10248_v16 = vmul.f32 %v3186_v4, %v9737_v60  ;;  %v3216_v61 = vsel %vm10157_vm12, %v3215_v40, %v3211_v54  ;;  %v3245_v36 = vor.u32 1.1754944e-38, %v3244_v11  ;;  %v10268_v4 = vpop.f32.mrf.mxu0 }
 0x2e3   :  { %v10252_v58 = vadd.f32 1.0, %v5696_v3  ;;  %v3231_v23 = vsel %vm3228_vm5, %v3230_v52, %v3226_v22  ;;  %vm3243_vm7 = vcmp.eq.f32.partialorder %v3242_v47, 8.507059e+37  ;;  %5703 = vrcp.f32 %v10221_v44 }
 0x2e4   :  { %v10254_v12 = vpop.eup %5697  ;;  %v5045_v13 = vmul.f32 -1.442695, %v10225_v24  ;;  %v10261_v51 = vmul.f32 %v3201_v46, %v9765_v32  ;;  %v3246_v60 = vsel %vm3243_vm7, %v3245_v36, %v3241_v10  ;;  %5705 = vrcp.f32 %v10238_v57  ;;  %v10278_v32 = vpop.f32.mrf.mxu1 }
 0x2e5   :  { %v10258_v27 = vpop.eup %5699  ;;  %v10266_v14 = vadd.f32 %v10001_v59, %v6753_v25  ;;  %v10273_v41 = vmul.f32 %v3216_v61, %v9799_v38  ;;  %v3259_v48 = vand.u32 2147483648, %v10162_v50  ;;  %v3274_v39 = vand.u32 2147483648, %v10166_v33  ;;  %12764 = vst [vmem:[#allocation23_spill] sm:$0xff] %v10278_v32 }
 0x2e6   :  { %v10270_v19 = vpop.eup %5701  ;;  %5707 = vrcp.f32 %v10245_v20  ;;  %v10281_v37 = vmul.f32 %v3231_v23, %v9810_v63  ;;  %v3249_v59 = vmul.f32 %v10254_v12, %v10162_v50  ;;  %v3289_v31 = vand.u32 2147483648, %v10173_v5  ;;  %v10296_v63 = vpop.f32.mrf.mxu2 }
 0x2e7   :  { %12762 = vst [vmem:[#allocation19_spill] sm:$0xff] %v10266_v14  ;;  %5709 = vrcp.f32 %v10252_v58  ;;  %v10288_v38 = vmul.f32 %v3246_v60, %v9817_v49  ;;  %v3264_v56 = vmul.f32 %v10258_v27, %v10166_v33  ;;  %v10294_v1 = vadd.f32 %v10109_v29, %v6759_v26  ;;  %v10325_v60 = vpop.f32.mrf.mxu3 }
 0x2e8   :  { %12763 = vst [vmem:[#allocation21_spill] sm:$0xff] %v10273_v41  ;;  %5711 = vpow2.f32 %v5045_v13  ;;  %v3257_v47 = vand.u32 2147483647, %v10162_v50  ;;  %v3279_v11 = vmul.f32 %v10270_v19, %v10173_v5  ;;  %v3304_v3 = vand.u32 2147483648, %v10221_v44 }
 0x2e9   :  { %12765 = vst [vmem:[#allocation25_spill] sm:$0xff] %v10281_v37  ;;  %v5046_v49 = vmul.f32 -1.442695, %v10266_v14  ;;  %v10303_v54 = vpop.eup %5703  ;;  %v10305_v28 = vor.u32 1.1754944e-38, %v3259_v48  ;;  %v3272_v40 = vand.u32 2147483647, %v10166_v33  ;;  %vm3254_vm8 = vweird.f32 %v10254_v12 }
 0x2ea   :  { %12766 = vst [vmem:[#allocation29_spill] sm:$0xff] %v10288_v38  ;;  %v10308_v22 = vor.u32 1.1754944e-38, %v3274_v39  ;;  %v3287_v29 = vand.u32 2147483647, %v10173_v5  ;;  %v10311_v30 = vpop.eup %5705  ;;  %v3250_v46 = vsub.f32 1.0, %v3249_v59  ;;  %v10314_v52 = vor.u32 1.1754944e-38, %v3289_v31  ;;  %v10352_v42 = vpop.f32.mrf.mxu0 }
 0x2eb   :  { %12767 = vst [vmem:[#allocation26_spill] sm:$0xff] %v10294_v1  ;;  %v3265_v36 = vsub.f32 1.0, %v3264_v56  ;;  %vm3269_vm9 = vweird.f32 %v10258_v27  ;;  %v5047_v23 = vmul.f32 -1.442695, %v10294_v1  ;;  %v10323_v13 = vadd.f32 %v10079_v34, %v6709_v0 }
 0x2ec   :  { %12768 = vst [vmem:[#allocation31_spill] sm:$0xff] %v10296_v63  ;;  %v10317_v61 = vpop.eup %5707  ;;  %vm3253_vm10 = vweird.f32 %v10162_v50  ;;  %v3280_v39 = vsub.f32 1.0, %v3279_v11  ;;  %v3294_v59 = vmul.f32 %v10303_v54, %v10221_v44  ;;  %v10332_v31 = vor.u32 1.1754944e-38, %v3304_v3  ;;  %v10358_v14 = vpop.f32.mrf.mxu1 }
 0x2ed   :  { %12769 = vst [vmem:[#allocation30_spill] sm:$0xff] %v10323_v13  ;;  %v10327_v48 = vpop.eup %5709  ;;  %5713 = vpow2.f32 %v5046_v49  ;;  %vm3268_vm11 = vweird.f32 %v10166_v33  ;;  %v3309_v34 = vmul.f32 %v10311_v30, %v10238_v57  ;;  %v3317_v10 = vand.u32 2147483647, %v10238_v57  ;;  %vm10404_vm4 = vmor %vm3253_vm10, %vm3254_vm8 }
 0x2ee   :  { %12770 = vst [vmem:[#allocation28_spill] sm:$0xff] %v10325_v60  ;;  %v5712_v56 = vpop.eup %5711  ;;  %v3319_v38 = vand.u32 2147483648, %v10238_v57  ;;  %v10341_v37 = vadd.f32 %v10086_v6, %v6714_v53  ;;  %v3251_v11 = vmul.f32 %v10254_v12, %v3250_v46  ;;  %vm3283_vm12 = vweird.f32 %v10173_v5  ;;  %vm10421_vm5 = vmor %vm3268_vm11, %vm3269_vm9 }
 0x2ef   :  { %v3324_v3 = vmul.f32 %v10317_v61, %v10245_v20  ;;  %v3332_v49 = vand.u32 2147483647, %v10245_v20  ;;  %v10350_v41 = vadd.f32 %v10111_v2, %v6753_v25  ;;  %12772 = vst [vmem:[#allocation32_spill] sm:$0xff] %v10352_v42  ;;  %v3266_v1 = vmul.f32 %v10258_v27, %v3265_v36  ;;  %v12776_v42 = vld [vmem:[#allocation35_spill] sm:$0xff] }
 0x2f0   :  { %v3339_v6 = vmul.f32 %v10327_v48, %v10252_v58  ;;  %5715 = vpow2.f32 %v5047_v23  ;;  %v5048_v46 = vmul.f32 -1.442695, %v10323_v13  ;;  %12773 = vst [vmem:[#allocation42_spill] sm:$0xff] %v10358_v14  ;;  %vm10360_vm13 = vcmp.eq.f32.partialorder %v3257_v47, 8.507059e+37  ;;  %v10371_v13 = vpop.f32.mrf.mxu2  ;;  %v12777_v14 = vld [vmem:[#allocation39_spill] sm:$0xff] }
 0x2f1   :  { %12771 = vst [vmem:[#allocation27_spill] sm:$0xff] %v10350_v41  ;;  %v3281_v60 = vmul.f32 %v10270_v19, %v3280_v39  ;;  %v3295_v2 = vsub.f32 1.0, %v3294_v59  ;;  %v10365_v63 = vadd.f32 1.0, %v5712_v56  ;;  %v4098_v36 = vpack.c.bf16 %v9864_v35, %v12776_v42 }
 0x2f2   :  { %vm3284_vm14 = vweird.f32 %v10270_v19  ;;  %v3310_v25 = vsub.f32 1.0, %v3309_v34  ;;  %v5049_v23 = vmul.f32 -1.442695, %v10341_v37  ;;  %v4099_v47 = vpack.c.bf16 %v9869_v8, %v12777_v14  ;;  %v12782_v14 = vld [vmem:[#allocation36_spill] sm:$0xff] }
 0x2f3   :  { %v5714_v32 = vpop.eup %5713  ;;  %v3252_v53 = vadd.f32 %v10254_v12, %v3251_v11  ;;  %vm10376_vm15 = vcmp.eq.f32.partialorder %v3272_v40, 8.507059e+37  ;;  %vm10380_vm0 = vcmp.eq.f32.partialorder %v3287_v29, 8.507059e+37  ;;  %vm3298_vm1 = vweird.f32 %v10221_v44  ;;  %4435 = vmatmul.bf16.gmra.mxu0 %v4098_v36  ;;  %v12783_v29 = vld [vmem:[#allocation40_spill] sm:$0xff]  ;;  %vm10437_vm7 = vmor %vm3283_vm12, %vm3284_vm14 }
 0x2f4   :  { %v3325_v35 = vsub.f32 1.0, %v3324_v3  ;;  %v5050_v42 = vmul.f32 -1.442695, %v10350_v41  ;;  %v10388_v56 = vadd.f32 %v10181_v45, %v6759_v26  ;;  %vm3313_vm2 = vweird.f32 %v10238_v57  ;;  %4524 = vmatmul.bf16.gmra.mxu1 %v4099_v47 }
 0x2f5   :  { %v3340_v8 = vsub.f32 1.0, %v3339_v6  ;;  %5717 = vpow2.f32 %v5048_v46  ;;  %v4100_v40 = vpack.c.bf16 %v9887_v17, %v12782_v14  ;;  %v4101_v34 = vpack.c.bf16 %v9942_v43, %v12783_v29  ;;  %v10412_v6 = vpop.f32.mrf.mxu3  ;;  %v10460_v14 = vpop.f32.mrf.mxu0 }
 0x2f6   :  { %v3267_v11 = vadd.f32 %v10258_v27, %v3266_v1  ;;  %v3282_v3 = vadd.f32 %v10270_v19, %v3281_v60  ;;  %v3296_v41 = vmul.f32 %v10303_v54, %v3295_v2  ;;  %vm3328_vm3 = vweird.f32 %v10245_v20  ;;  %v5716_v45 = vpop.eup %5715 }
 0x2f7   :  { %5719 = vrcp.f32 %v10365_v63  ;;  %v3311_v43 = vmul.f32 %v10311_v30, %v3310_v25  ;;  %v3334_v1 = vand.u32 2147483648, %v10245_v20  ;;  %v10410_v60 = vadd.f32 1.0, %v5714_v32  ;;  %4613 = vmatmul.bf16.gmra.mxu2 %v4100_v40  ;;  %4702 = vmatmul.bf16.gmra.mxu3 %v4101_v34 }
 0x2f8   :  { %5721 = vpow2.f32 %v5049_v23  ;;  %v3256_v46 = vsel %vm10404_vm4, %v10254_v12, %v3252_v53  ;;  %v12788_v25 = vand.u32 2147483647, %v10221_v44  ;;  %v3326_v2 = vmul.f32 %v10317_v61, %v3325_v35  ;;  %v12817_v44 = vld [vmem:[#allocation23_spill] sm:$0xff] }
 0x2f9   :  { %5723 = vpow2.f32 %v5050_v42  ;;  %v5051_v36 = vmul.f32 -1.442695, %v10388_v56  ;;  %vm3299_vm8 = vweird.f32 %v10303_v54  ;;  %vm10442_vm9 = vcmp.eq.f32.partialorder %v3317_v10, 8.507059e+37  ;;  %v12809_v42 = vld [vmem:[#allocation41_spill] sm:$0xff] }
 0x2fa   :  { %vm10427_vm6 = vcmp.eq.f32.partialorder %v12788_v25, 8.507059e+37  ;;  %v3320_v12 = vor.u32 1.1754944e-38, %v3319_v38  ;;  %v3341_v23 = vmul.f32 %v10327_v48, %v3340_v8  ;;  %v3271_v47 = vsel %vm10421_vm5, %v10258_v27, %v3267_v11 }
 0x2fb   :  { %v3286_v5 = vsel %vm10437_vm7, %v10270_v19, %v3282_v3  ;;  %v3297_v35 = vadd.f32 %v10303_v54, %v3296_v41  ;;  %vm10454_vm10 = vcmp.eq.f32.partialorder %v3332_v49, 8.507059e+37  ;;  %v10458_v10 = vadd.f32 1.0, %v5716_v45  ;;  %v5718_v38 = vpop.eup %5717  ;;  %v10468_v19 = vpop.f32.mrf.mxu1 }
 0x2fc   :  { %v3261_v8 = vsel %vm10360_vm13, %v10305_v28, %v3256_v46  ;;  %v3312_v27 = vadd.f32 %v10311_v30, %v3311_v43  ;;  %vm3314_vm11 = vweird.f32 %v10311_v30  ;;  %5725 = vrcp.f32 %v10410_v60  ;;  %vm10484_vm13 = vmor %vm3298_vm1, %vm3299_vm8  ;;  %v10490_v3 = vpop.f32.mrf.mxu2 }
 0x2fd   :  { %v10470_v41 = vpop.eup %5719  ;;  %v3327_v49 = vadd.f32 %v10317_v61, %v3326_v2  ;;  %vm3329_vm12 = vweird.f32 %v10317_v61  ;;  %v3335_v40 = vor.u32 1.1754944e-38, %v3334_v1  ;;  %5727 = vpow2.f32 %v5051_v36 }
 0x2fe   :  { %v5722_v29 = vpop.eup %5721  ;;  %v3276_v24 = vsel %vm10376_vm15, %v10308_v22, %v3271_v47  ;;  %v3291_v28 = vsel %vm10380_vm0, %v10314_v52, %v3286_v5  ;;  %v3342_v11 = vadd.f32 %v10327_v48, %v3341_v23  ;;  %vm3344_vm14 = vweird.f32 %v10327_v48  ;;  %vm10499_vm15 = vmor %vm3313_vm2, %vm3314_vm11  ;;  %v10576_v5 = vpop.f32.mrf.mxu3 }
 0x2ff   :  { %v5724_v39 = vpop.eup %5723  ;;  %v3301_v22 = vsel %vm10484_vm13, %v10303_v54, %v3297_v35  ;;  %v3347_v52 = vand.u32 2147483647, %v10252_v58  ;;  %v3349_v59 = vand.u32 2147483648, %v10252_v58  ;;  %5729 = vrcp.f32 %v10458_v10  ;;  %vm10513_vm0 = vmor %vm3328_vm3, %vm3329_vm12 }
 0x300   :  { %v3316_v45 = vsel %vm10499_vm15, %v10311_v30, %v3312_v27  ;;  %vm3343_vm1 = vweird.f32 %v10252_v58  ;;  %v3354_v54 = vmul.f32 %v10470_v41, %v10365_v63  ;;  %v10520_v17 = vadd.f32 1.0, %v5718_v38  ;;  %v12812_v27 = vld [vmem:[#allocation20_spill] sm:$0xff] }
 0x301   :  { %v10523_v43 = vmul.f32 %v3261_v8, %v9999_v55  ;;  %v10526_v30 = vmul.f32 %v3276_v24, %v10009_v15  ;;  %v3331_v20 = vsel %vm10513_vm0, %v10317_v61, %v3327_v49  ;;  %vm10533_vm2 = vmor %vm3343_vm1, %vm3344_vm14  ;;  %v10537_v58 = vadd.f32 1.0, %v5722_v29 }
 0x302   :  { %v10539_v46 = vpop.eup %5725  ;;  %v10542_v55 = vmul.f32 %v3291_v28, %v10019_v7  ;;  %v3306_v15 = vsel %vm10427_vm6, %v10332_v31, %v3301_v22  ;;  %v3346_v61 = vsel %vm10533_vm2, %v10327_v48, %v3342_v11  ;;  %v10550_v50 = vadd.f32 1.0, %v5724_v39  ;;  %v12808_v31 = vld [vmem:[#allocation37_spill] sm:$0xff]  ;;  %v12816_v22 = vld [vmem:[#allocation16_spill] sm:$0xff] }
 0x303   :  { %12803 = vst [vmem:[#allocation43_spill] sm:$0xff] %v10523_v43  ;;  %v5728_v25 = vpop.eup %5727  ;;  %v3321_v2 = vsel %vm10442_vm9, %v3320_v12, %v3316_v45  ;;  %vm3348_vm3 = vcmp.eq.f32.partialorder %v3347_v52, 8.507059e+37  ;;  %v3350_v36 = vor.u32 1.1754944e-38, %v3349_v59  ;;  %v4102_v7 = vpack.c.bf16 %v10138_v21, %v9963_v9  ;;  %v10569_v9 = vpop.f32.mrf.mxu0 }
 0x304   :  { %12804 = vst [vmem:[#allocation45_spill] sm:$0xff] %v10526_v30  ;;  %v3336_v53 = vsel %vm10454_vm10, %v3335_v40, %v3331_v20  ;;  %v3355_v32 = vsub.f32 1.0, %v3354_v54  ;;  %5731 = vrcp.f32 %v10520_v17  ;;  %v4103_v48 = vpack.c.bf16 %v10248_v16, %v12808_v31  ;;  %v10578_v35 = vpop.f32.mrf.mxu1  ;;  %v10597_v34 = vpop.f32.mrf.mxu2  ;;  %v12818_v54 = vld [vmem:[#allocation17_spill] sm:$0xff]  ;;  %v12819_v20 = vld [vmem:[#allocation31_spill] sm:$0xff] }
 0x305   :  { %12807 = vst [vmem:[#allocation44_spill] sm:$0xff] %v10542_v55  ;;  %v10561_v23 = vpop.eup %5729  ;;  %v3351_v47 = vsel %vm3348_vm3, %v3350_v36, %v3346_v61  ;;  %v3364_v33 = vand.u32 2147483648, %v10365_v63  ;;  %5733 = vrcp.f32 %v10537_v58  ;;  %v10567_v12 = vadd.f32 %v10268_v4, %v6709_v0  ;;  %4440 = vmatmul.bf16.gmra.mxu0 %v4102_v7  ;;  %v12810_v4 = vld [vmem:[#allocation18_spill] sm:$0xff] }
 0x306   :  { %v3369_v21 = vmul.f32 %v10539_v46, %v10410_v60  ;;  %5735 = vrcp.f32 %v10550_v50  ;;  %v10574_v16 = vadd.f32 1.0, %v5728_v25  ;;  %4529 = vmatmul.bf16.gmra.mxu1 %v4103_v48  ;;  %v4104_v38 = vpack.c.bf16 %v10261_v51, %v12809_v42  ;;  %v12823_v48 = vld [vmem:[#allocation32_spill] sm:$0xff]  ;;  %v12824_v42 = vld [vmem:[#allocation42_spill] sm:$0xff] }
 0x307   :  { %v10583_v8 = vmul.f32 %v3306_v15, %v12810_v4  ;;  %v10586_v49 = vmul.f32 %v3321_v2, %v12812_v27  ;;  %v10589_v40 = vmul.f32 %v3336_v53, %v10084_v18  ;;  %v3379_v29 = vand.u32 2147483648, %v10410_v60  ;;  %v12820_v2 = vld [vmem:[#allocation28_spill] sm:$0xff] }
 0x308   :  { %v3356_v24 = vmul.f32 %v10470_v41, %v3355_v32  ;;  %vm3358_vm4 = vweird.f32 %v10365_v63  ;;  %v3362_v28 = vand.u32 2147483647, %v10365_v63  ;;  %v3384_v51 = vmul.f32 %v10561_v23, %v10458_v10  ;;  %4618 = vmatmul.bf16.gmra.mxu2 %v4104_v38 }
 0x309   :  { %12811 = vst [vmem:[#allocation33_spill] sm:$0xff] %v10583_v8  ;;  %v10600_v11 = vmul.f32 %v3351_v47, %v10103_v62  ;;  %v10602_v39 = vor.u32 1.1754944e-38, %v3364_v33  ;;  %v5052_v18 = vmul.f32 -1.442695, %v10567_v12  ;;  %v10607_v52 = vadd.f32 %v12817_v44, %v12816_v22 }
 0x30a   :  { %12813 = vst [vmem:[#allocation34_spill] sm:$0xff] %v10586_v49  ;;  %v10609_v59 = vpop.eup %5731  ;;  %v3370_v45 = vsub.f32 1.0, %v3369_v21  ;;  %v3377_v57 = vand.u32 2147483647, %v10410_v60  ;;  %5737 = vrcp.f32 %v10574_v16  ;;  %v10615_v1 = vadd.f32 %v12819_v20, %v12818_v54 }
 0x30b   :  { %12814 = vst [vmem:[#allocation38_spill] sm:$0xff] %v10589_v40  ;;  %v10617_v62 = vpop.eup %5733  ;;  %v10619_v15 = vor.u32 1.1754944e-38, %v3379_v29  ;;  %v3392_v61 = vand.u32 2147483647, %v10458_v10  ;;  %v3394_v25 = vand.u32 2147483648, %v10458_v10  ;;  %v10625_v36 = vadd.f32 %v12820_v2, %v6759_v26  ;;  %v10686_v30 = vpop.f32.mrf.mxu0 }
 0x30c   :  { %12815 = vst [vmem:[#allocation35_spill] sm:$0xff] %v10600_v11  ;;  %v10627_v7 = vpop.eup %5735  ;;  %v3357_v53 = vadd.f32 %v10470_v41, %v3356_v24  ;;  %vm3359_vm5 = vweird.f32 %v10470_v41  ;;  %vm10631_vm6 = vcmp.eq.f32.partialorder %v3362_v28, 8.507059e+37  ;;  %vm3373_vm7 = vweird.f32 %v10410_v60  ;;  %v10688_v11 = vpop.f32.mrf.mxu1 }
 0x30d   :  { %v3385_v31 = vsub.f32 1.0, %v3384_v51  ;;  %v10638_v47 = vadd.f32 %v12823_v48, %v6709_v0  ;;  %v3399_v33 = vmul.f32 %v10609_v59, %v10520_v17  ;;  %5739 = vpow2.f32 %v5052_v18  ;;  %vm10657_vm8 = vmor %vm3358_vm4, %vm3359_vm5  ;;  %v10680_v48 = vpop.f32.mrf.mxu3  ;;  %12829 = vst [vmem:[#allocation39_spill] sm:$0xff] %v10686_v30 }
 0x30e   :  { %v5053_v21 = vmul.f32 -1.442695, %v10607_v52  ;;  %v10645_v38 = vadd.f32 %v12824_v42, %v12816_v22  ;;  %v3371_v4 = vmul.f32 %v10539_v46, %v3370_v45  ;;  %v3414_v27 = vmul.f32 %v10617_v62, %v10537_v58  ;;  %12830 = vst [vmem:[#allocation36_spill] sm:$0xff] %v10688_v11 }
 0x30f   :  { %v5054_v29 = vmul.f32 -1.442695, %v10615_v1  ;;  %v10653_v24 = vadd.f32 %v10371_v13, %v12818_v54  ;;  %v10661_v51 = vor.u32 1.1754944e-38, %v3394_v25  ;;  %v3407_v18 = vand.u32 2147483647, %v10520_v17 }
 0x310   :  { %v3429_v44 = vmul.f32 %v10627_v7, %v10550_v50  ;;  %v5055_v45 = vmul.f32 -1.442695, %v10625_v36  ;;  %v10667_v20 = vpop.eup %5737  ;;  %v3361_v13 = vsel %vm10657_vm8, %v10470_v41, %v3357_v53  ;;  %vm3374_vm9 = vweird.f32 %v10539_v46 }
 0x311   :  { %vm10673_vm10 = vcmp.eq.f32.partialorder %v3377_v57, 8.507059e+37  ;;  %vm3388_vm11 = vweird.f32 %v10458_v10  ;;  %v3409_v25 = vand.u32 2147483648, %v10520_v17  ;;  %v5056_v2 = vmul.f32 -1.442695, %v10638_v47  ;;  %vm10709_vm0 = vmor %vm3373_vm7, %vm3374_vm9 }
 0x312   :  { %v3386_v42 = vmul.f32 %v10561_v23, %v3385_v31  ;;  %v3400_v40 = vsub.f32 1.0, %v3399_v33  ;;  %5741 = vpow2.f32 %v5053_v21  ;;  %v5057_v41 = vmul.f32 -1.442695, %v10645_v38 }
 0x313   :  { %v3372_v53 = vadd.f32 %v10539_v46, %v3371_v4  ;;  %v3415_v57 = vsub.f32 1.0, %v3414_v27  ;;  %5743 = vpow2.f32 %v5054_v29  ;;  %v5058_v28 = vmul.f32 -1.442695, %v10653_v24  ;;  %v5740_v49 = vpop.eup %5739 }
 0x314   :  { %vm3403_vm12 = vweird.f32 %v10520_v17  ;;  %v3424_v43 = vand.u32 2147483648, %v10537_v58  ;;  %v3430_v31 = vsub.f32 1.0, %v3429_v44  ;;  %v3444_v33 = vmul.f32 %v10667_v20, %v10574_v16 }
 0x315   :  { %5745 = vpow2.f32 %v5055_v45  ;;  %vm3389_vm13 = vweird.f32 %v10561_v23  ;;  %vm10695_vm14 = vcmp.eq.f32.partialorder %v3392_v61, 8.507059e+37  ;;  %vm3418_vm15 = vweird.f32 %v10537_v58 }
 0x316   :  { %v3422_v4 = vand.u32 2147483647, %v10537_v58  ;;  %v3437_v27 = vand.u32 2147483647, %v10550_v50  ;;  %5747 = vpow2.f32 %v5056_v2  ;;  %v3366_v29 = vsel %vm10631_vm6, %v10602_v39, %v3361_v13  ;;  %vm10740_vm5 = vmor %vm3388_vm11, %vm3389_vm13 }
 0x317   :  { %v3387_v44 = vadd.f32 %v10561_v23, %v3386_v42  ;;  %v3401_v45 = vmul.f32 %v10609_v59, %v3400_v40  ;;  %5749 = vpow2.f32 %v5057_v41  ;;  %v3376_v2 = vsel %vm10709_vm0, %v10539_v46, %v3372_v53  ;;  %v12837_v42 = vld [vmem:[#allocation24_spill] sm:$0xff]  ;;  %v12859_v53 = vld [vmem:[#allocation30_spill] sm:$0xff] }
 0x318   :  { %v3416_v32 = vmul.f32 %v10617_v62, %v3415_v57  ;;  %v10719_v39 = vadd.f32 1.0, %v5740_v49  ;;  %5751 = vpow2.f32 %v5058_v28  ;;  %v5742_v13 = vpop.eup %5741  ;;  %v3410_v60 = vor.u32 1.1754944e-38, %v3409_v25 }
 0x319   :  { %v3425_v8 = vor.u32 1.1754944e-38, %v3424_v43  ;;  %v3431_v55 = vmul.f32 %v10627_v7, %v3430_v31  ;;  %v3445_v11 = vsub.f32 1.0, %v3444_v33  ;;  %v5744_v30 = vpop.eup %5743  ;;  %vm3404_vm1 = vweird.f32 %v10609_v59  ;;  %v10760_v31 = vpop.f32.mrf.mxu2 }
 0x31a   :  { %vm10723_vm2 = vcmp.eq.f32.partialorder %v3407_v18, 8.507059e+37  ;;  %vm3419_vm3 = vweird.f32 %v10617_v62  ;;  %vm3433_vm4 = vweird.f32 %v10550_v50  ;;  %v3439_v46 = vand.u32 2147483648, %v10550_v50  ;;  %v10762_v33 = vpop.f32.mrf.mxu3  ;;  %vm10773_vm9 = vmor %vm3403_vm12, %vm3404_vm1 }
 0x31b   :  { %v5746_v49 = vpop.eup %5745  ;;  %v10731_v25 = vmul.f32 %v3366_v29, %v12837_v42  ;;  %v3381_v43 = vsel %vm10673_vm10, %v10619_v15, %v3376_v2  ;;  %v3402_v41 = vadd.f32 %v10609_v59, %v3401_v45  ;;  %vm10745_vm6 = vcmp.eq.f32.partialorder %v3422_v4, 8.507059e+37  ;;  %vm10801_vm11 = vmor %vm3418_vm15, %vm3419_vm3 }
 0x31c   :  { %vm10749_vm7 = vcmp.eq.f32.partialorder %v3437_v27, 8.507059e+37  ;;  %v5748_v63 = vpop.eup %5747  ;;  %v3391_v15 = vsel %vm10740_vm5, %v10561_v23, %v3387_v44  ;;  %v3417_v10 = vadd.f32 %v10617_v62, %v3416_v32  ;;  %5753 = vrcp.f32 %v10719_v39  ;;  %v12849_v32 = vld [vmem:[#allocation19_spill] sm:$0xff] }
 0x31d   :  { %12838 = vst [vmem:[#allocation40_spill] sm:$0xff] %v10731_v25  ;;  %v10758_v28 = vadd.f32 1.0, %v5742_v13  ;;  %v5750_v4 = vpop.eup %5749  ;;  %v3432_v27 = vadd.f32 %v10627_v7, %v3431_v55  ;;  %vm3434_vm8 = vweird.f32 %v10627_v7  ;;  %v3446_v29 = vmul.f32 %v10667_v20, %v3445_v11  ;;  %v10786_v11 = vpop.f32.mrf.mxu1 }
 0x31e   :  { %v10767_v61 = vadd.f32 1.0, %v5744_v30  ;;  %v5752_v23 = vpop.eup %5751  ;;  %v3440_v45 = vor.u32 1.1754944e-38, %v3439_v46  ;;  %vm3448_vm10 = vweird.f32 %v10574_v16  ;;  %v10778_v2 = vadd.f32 1.0, %v5746_v49  ;;  %v10784_v30 = vpop.f32.mrf.mxu0  ;;  %12848 = vst [vmem:[#allocation41_spill] sm:$0xff] %v10786_v11  ;;  %vm10814_vm12 = vmor %vm3433_vm4, %vm3434_vm8 }
 0x31f   :  { %v10782_v55 = vadd.f32 %v10412_v6, %v6759_v26  ;;  %12847 = vst [vmem:[#allocation37_spill] sm:$0xff] %v10784_v30  ;;  %v10789_v13 = vmul.f32 %v3381_v43, %v12849_v32  ;;  %v3396_v17 = vsel %vm10695_vm14, %v10661_v51, %v3391_v15  ;;  %v3406_v46 = vsel %vm10773_vm9, %v10609_v59, %v3402_v41  ;;  %v12864_v32 = vld [vmem:[#allocation27_spill] sm:$0xff] }
 0x320   :  { %v10805_v49 = vadd.f32 1.0, %v5748_v63  ;;  %v3421_v42 = vsel %vm10801_vm11, %v10617_v62, %v3417_v10  ;;  %vm3449_vm13 = vweird.f32 %v10667_v20  ;;  %5755 = vrcp.f32 %v10758_v28  ;;  %v12855_v63 = vld [vmem:[#allocation26_spill] sm:$0xff] }
 0x321   :  { %12850 = vst [vmem:[#allocation18_spill] sm:$0xff] %v10789_v13  ;;  %v10820_v58 = vadd.f32 1.0, %v5750_v4  ;;  %v3436_v51 = vsel %vm10814_vm12, %v10627_v7, %v3432_v27  ;;  %v3447_v62 = vadd.f32 %v10667_v20, %v3446_v29  ;;  %5757 = vrcp.f32 %v10767_v61  ;;  %vm10853_vm14 = vmor %vm3448_vm10, %vm3449_vm13 }
 0x322   :  { %v10827_v21 = vadd.f32 1.0, %v5752_v23  ;;  %v10829_v50 = vpop.eup %5753  ;;  %v3452_v43 = vand.u32 2147483647, %v10574_v16  ;;  %v3454_v18 = vand.u32 2147483648, %v10574_v16  ;;  %5759 = vrcp.f32 %v10778_v2  ;;  %v10876_v44 = vpop.f32.mrf.mxu3 }
 0x323   :  { %v5059_v41 = vmul.f32 -1.442695, %v10782_v55  ;;  %v10836_v15 = vmul.f32 %v3396_v17, %v12855_v63  ;;  %v3411_v7 = vsel %vm10723_vm2, %v3410_v60, %v3406_v46  ;;  %5761 = vrcp.f32 %v10805_v49  ;;  %12862 = vst [vmem:[#allocation17_spill] sm:$0xff] %v10876_v44 }
 0x324   :  { %v10843_v10 = vadd.f32 %v10460_v14, %v6709_v0  ;;  %v3426_v4 = vsel %vm10745_vm6, %v3425_v8, %v3421_v42  ;;  %v3441_v27 = vsel %vm10749_vm7, %v3440_v45, %v3436_v51  ;;  %5763 = vrcp.f32 %v10820_v58 }
 0x325   :  { %12856 = vst [vmem:[#allocation20_spill] sm:$0xff] %v10836_v15  ;;  %v10860_v14 = vadd.f32 %v10468_v19, %v12816_v22  ;;  %v3451_v8 = vsel %vm10853_vm14, %v10667_v20, %v3447_v62  ;;  %v3459_v60 = vmul.f32 %v10829_v50, %v10719_v39  ;;  %v3469_v40 = vand.u32 2147483648, %v10719_v39  ;;  %v10874_v19 = vpop.f32.mrf.mxu2 }
 0x326   :  { %5765 = vrcp.f32 %v10827_v21  ;;  %v10869_v16 = vpop.eup %5755  ;;  %v10872_v57 = vmul.f32 %v3411_v7, %v12859_v53  ;;  %vm3453_vm15 = vcmp.eq.f32.partialorder %v3452_v43, 8.507059e+37  ;;  %v3455_v23 = vor.u32 1.1754944e-38, %v3454_v18  ;;  %12861 = vst [vmem:[#allocation23_spill] sm:$0xff] %v10874_v19  ;;  %v10900_v18 = vpop.f32.mrf.mxu1 }
 0x327   :  { %5767 = vpow2.f32 %v5059_v41  ;;  %v10878_v20 = vpop.eup %5757  ;;  %v10881_v45 = vmul.f32 %v3426_v4, %v10341_v37  ;;  %v10884_v17 = vmul.f32 %v3441_v27, %v12864_v32  ;;  %v3484_v46 = vand.u32 2147483648, %v10758_v28  ;;  %v10898_v37 = vpop.f32.mrf.mxu0  ;;  %12868 = vst [vmem:[#allocation24_spill] sm:$0xff] %v10900_v18 }
 0x328   :  { %12860 = vst [vmem:[#allocation16_spill] sm:$0xff] %v10872_v57  ;;  %v5060_v6 = vmul.f32 -1.442695, %v10843_v10  ;;  %v10888_v42 = vpop.eup %5759  ;;  %v10890_v59 = vsel %vm3453_vm15, %v3455_v23, %v3451_v8  ;;  %v3467_v51 = vand.u32 2147483647, %v10719_v39  ;;  %v10896_v43 = vadd.f32 %v10490_v3, %v12818_v54 }
 0x329   :  { %12863 = vst [vmem:[#allocation31_spill] sm:$0xff] %v10881_v45  ;;  %v5061_v62 = vmul.f32 -1.442695, %v10860_v14  ;;  %v10902_v41 = vpop.eup %5761  ;;  %v3460_v63 = vsub.f32 1.0, %v3459_v60  ;;  %v10904_v7 = vor.u32 1.1754944e-38, %v3469_v40  ;;  %v3499_v4 = vand.u32 2147483648, %v10767_v61 }
 0x32a   :  { %12865 = vst [vmem:[#allocation28_spill] sm:$0xff] %v10884_v17  ;;  %v10909_v27 = vadd.f32 %v10576_v5, %v6759_v26  ;;  %v10911_v29 = vpop.eup %5763  ;;  %v3474_v3 = vmul.f32 %v10869_v16, %v10758_v28  ;;  %v3482_v8 = vand.u32 2147483647, %v10758_v28  ;;  %v10919_v60 = vadd.f32 %v10569_v9, %v6709_v0 }
 0x32b   :  { %12866 = vst [vmem:[#allocation32_spill] sm:$0xff] %v10896_v43  ;;  %vm3463_vm0 = vweird.f32 %v10719_v39  ;;  %vm3464_vm1 = vweird.f32 %v10829_v50  ;;  %v10925_v5 = vor.u32 1.1754944e-38, %v3484_v46  ;;  %v3489_v23 = vmul.f32 %v10878_v20, %v10767_v61 }
 0x32c   :  { %12867 = vst [vmem:[#allocation42_spill] sm:$0xff] %v10898_v37  ;;  %v10921_v40 = vpop.eup %5765  ;;  %5769 = vpow2.f32 %v5060_v6  ;;  %v3504_v53 = vmul.f32 %v10888_v42, %v10778_v2  ;;  %v5062_v9 = vmul.f32 -1.442695, %v10896_v43  ;;  %v10934_v15 = vadd.f32 %v10578_v35, %v12816_v22  ;;  %v10960_v43 = vpop.f32.mrf.mxu3  ;;  %vm10981_vm9 = vmor %vm3463_vm0, %vm3464_vm1 }
 0x32d   :  { %12869 = vst [vmem:[#allocation19_spill] sm:$0xff] %v10909_v27  ;;  %v5768_v32 = vpop.eup %5767  ;;  %5771 = vpow2.f32 %v5061_v62  ;;  %v3461_v17 = vmul.f32 %v10829_v50, %v3460_v63  ;;  %v10937_v13 = vor.u32 1.1754944e-38, %v3499_v4  ;;  %v3519_v46 = vmul.f32 %v10902_v41, %v10805_v49 }
 0x32e   :  { %12870 = vst [vmem:[#allocation26_spill] sm:$0xff] %v10919_v60  ;;  %v5063_v6 = vmul.f32 -1.442695, %v10909_v27  ;;  %v3475_v45 = vsub.f32 1.0, %v3474_v3  ;;  %v3512_v25 = vand.u32 2147483647, %v10778_v2  ;;  %v3534_v62 = vmul.f32 %v10911_v29, %v10820_v58 }
 0x32f   :  { %v5064_v57 = vmul.f32 -1.442695, %v10919_v60  ;;  %vm10946_vm2 = vcmp.eq.f32.partialorder %v3467_v51, 8.507059e+37  ;;  %v3514_v63 = vand.u32 2147483648, %v10778_v2  ;;  %v3527_v4 = vand.u32 2147483647, %v10805_v49  ;;  %v10958_v51 = vpop.f32.mrf.mxu2 }
 0x330   :  { %v3549_v18 = vmul.f32 %v10921_v40, %v10827_v21  ;;  %v10954_v37 = vadd.f32 1.0, %v5768_v32  ;;  %vm3478_vm3 = vweird.f32 %v10758_v28  ;;  %v3490_v3 = vsub.f32 1.0, %v3489_v23  ;;  %12873 = vst [vmem:[#allocation30_spill] sm:$0xff] %v10958_v51 }
 0x331   :  { %v3505_v27 = vsub.f32 1.0, %v3504_v53  ;;  %5773 = vpow2.f32 %v5062_v9  ;;  %v5065_v60 = vmul.f32 -1.442695, %v10934_v15  ;;  %12874 = vst [vmem:[#allocation27_spill] sm:$0xff] %v10960_v43  ;;  %v3462_v19 = vadd.f32 %v10829_v50, %v3461_v17  ;;  %v10968_v9 = vpop.f32.mrf.mxu0  ;;  %v10970_v43 = vpop.f32.mrf.mxu1 }
 0x332   :  { %v5770_v44 = vpop.eup %5769  ;;  %vm3493_vm4 = vweird.f32 %v10767_v61  ;;  %v3520_v11 = vsub.f32 1.0, %v3519_v46  ;;  %v3529_v32 = vand.u32 2147483648, %v10805_v49  ;;  %5775 = vpow2.f32 %v5063_v6  ;;  %12875 = vst [vmem:[#allocation46_spill] sm:$0xff] %v10968_v9 }
 0x333   :  { %v5772_v30 = vpop.eup %5771  ;;  %v3476_v23 = vmul.f32 %v10869_v16, %v3475_v45  ;;  %vm3479_vm5 = vweird.f32 %v10869_v16  ;;  %vm3508_vm6 = vweird.f32 %v10778_v2  ;;  %v3535_v53 = vsub.f32 1.0, %v3534_v62  ;;  %12876 = vst [vmem:[#allocation47_spill] sm:$0xff] %v10970_v43 }
 0x334   :  { %5777 = vpow2.f32 %v5064_v57  ;;  %vm3494_vm7 = vweird.f32 %v10878_v20  ;;  %v10973_v17 = vor.u32 1.1754944e-38, %v3514_v63  ;;  %vm3523_vm8 = vweird.f32 %v10805_v49  ;;  %vm11033_vm1 = vmor %vm3478_vm3, %vm3479_vm5 }
 0x335   :  { %v3550_v46 = vsub.f32 1.0, %v3549_v18  ;;  %5779 = vrcp.f32 %v10954_v37  ;;  %v3491_v57 = vmul.f32 %v10878_v20, %v3490_v3  ;;  %v3506_v6 = vmul.f32 %v10888_v42, %v3505_v27 }
 0x336   :  { %v10987_v62 = vadd.f32 1.0, %v5770_v44  ;;  %5781 = vpow2.f32 %v5065_v60  ;;  %v3466_v18 = vsel %vm10981_vm9, %v10829_v50, %v3462_v19  ;;  %vm10992_vm10 = vcmp.eq.f32.partialorder %v3482_v8, 8.507059e+37 }
 0x337   :  { %v3521_v39 = vmul.f32 %v10902_v41, %v3520_v11  ;;  %v3542_v43 = vand.u32 2147483647, %v10820_v58  ;;  %v10998_v9 = vadd.f32 1.0, %v5772_v30  ;;  %v5774_v3 = vpop.eup %5773  ;;  %v3477_v27 = vadd.f32 %v10869_v16, %v3476_v23 }
 0x338   :  { %v12881_v44 = vand.u32 2147483647, %v10767_v61  ;;  %vm11007_vm12 = vcmp.eq.f32.partialorder %v3512_v25, 8.507059e+37  ;;  %v3530_v19 = vor.u32 1.1754944e-38, %v3529_v32  ;;  %v3536_v11 = vmul.f32 %v10911_v29, %v3535_v53  ;;  %v5776_v30 = vpop.eup %5775 }
 0x339   :  { %vm3538_vm13 = vweird.f32 %v10820_v58  ;;  %vm3509_vm14 = vweird.f32 %v10888_v42  ;;  %vm3524_vm15 = vweird.f32 %v10902_v41  ;;  %vm11015_vm0 = vcmp.eq.f32.partialorder %v3527_v4, 8.507059e+37  ;;  %v11095_v28 = vpop.f32.mrf.mxu1 }
 0x33a   :  { %vm11003_vm11 = vcmp.eq.f32.partialorder %v12881_v44, 8.507059e+37  ;;  %v3544_v23 = vand.u32 2147483648, %v10820_v58  ;;  %v3551_v25 = vmul.f32 %v10921_v40, %v3550_v46  ;;  %v5778_v45 = vpop.eup %5777  ;;  %v3471_v32 = vsel %vm10946_vm2, %v10904_v7, %v3466_v18  ;;  %vm11052_vm2 = vmor %vm3493_vm4, %vm3494_vm7 }
 0x33b   :  { %v3492_v53 = vadd.f32 %v10878_v20, %v3491_v57  ;;  %v3507_v44 = vadd.f32 %v10888_v42, %v3506_v6  ;;  %5783 = vrcp.f32 %v10987_v62  ;;  %v11027_v51 = vpop.eup %5779  ;;  %v3522_v46 = vadd.f32 %v10902_v41, %v3521_v39  ;;  %v11060_v39 = vpop.f32.mrf.mxu2  ;;  %vm11068_vm5 = vmor %vm3508_vm6, %vm3509_vm14 }
 0x33c   :  { %vm11038_vm9 = vcmp.eq.f32.partialorder %v3542_v43, 8.507059e+37  ;;  %5785 = vrcp.f32 %v10998_v9  ;;  %v11043_v35 = vadd.f32 1.0, %v5774_v3  ;;  %v5782_v57 = vpop.eup %5781  ;;  %v3481_v6 = vsel %vm11033_vm1, %v10869_v16, %v3477_v27  ;;  %v11062_v3 = vpop.f32.mrf.mxu3  ;;  %vm11086_vm6 = vmor %vm3523_vm8, %vm3524_vm15 }
 0x33d   :  { %v3537_v43 = vadd.f32 %v10911_v29, %v3536_v11  ;;  %vm3539_vm3 = vweird.f32 %v10911_v29  ;;  %v11058_v18 = vadd.f32 1.0, %v5776_v30  ;;  %12894 = vst [vmem:[#allocation48_spill] sm:$0xff] %v11062_v3  ;;  %v3552_v16 = vadd.f32 %v10921_v40, %v3551_v25  ;;  %v11093_v3 = vpop.f32.mrf.mxu0 }
 0x33e   :  { %vm3553_vm4 = vweird.f32 %v10827_v21  ;;  %vm3554_vm7 = vweird.f32 %v10921_v40  ;;  %v3557_v27 = vand.u32 2147483647, %v10827_v21  ;;  %v3496_v11 = vsel %vm11052_vm2, %v10878_v20, %v3492_v53  ;;  %vm11104_vm8 = vmor %vm3538_vm13, %vm3539_vm3 }
 0x33f   :  { %v3511_v2 = vsel %vm11068_vm5, %v10888_v42, %v3507_v44  ;;  %v3559_v25 = vand.u32 2147483648, %v10827_v21  ;;  %v11091_v4 = vadd.f32 1.0, %v5778_v45  ;;  %v3526_v20 = vsel %vm11086_vm6, %v10902_v41, %v3522_v46  ;;  %vm11125_vm13 = vmor %vm3553_vm4, %vm3554_vm7 }
 0x340   :  { %v3564_v42 = vmul.f32 %v11027_v51, %v10954_v37  ;;  %5787 = vrcp.f32 %v11043_v35  ;;  %v11111_v45 = vadd.f32 1.0, %v5782_v57  ;;  %v3486_v41 = vsel %vm10992_vm10, %v10925_v5, %v3481_v6 }
 0x341   :  { %v11113_v53 = vpop.eup %5783  ;;  %v3541_v58 = vsel %vm11104_vm8, %v10911_v29, %v3537_v43  ;;  %v3545_v44 = vor.u32 1.1754944e-38, %v3544_v23  ;;  %5789 = vrcp.f32 %v11058_v18  ;;  %v3501_v5 = vsel %vm11003_vm11, %v10937_v13, %v3496_v11 }
 0x342   :  { %v11130_v57 = vpop.eup %5785  ;;  %v3516_v29 = vsel %vm11007_vm12, %v10973_v17, %v3511_v2  ;;  %v3556_v21 = vsel %vm11125_vm13, %v10921_v40, %v3552_v16  ;;  %vm3558_vm10 = vcmp.eq.f32.partialorder %v3557_v27, 8.507059e+37  ;;  %v3531_v63 = vsel %vm11015_vm0, %v3530_v19, %v3526_v20 }
 0x343   :  { %v3560_v23 = vor.u32 1.1754944e-38, %v3559_v25  ;;  %5791 = vrcp.f32 %v11091_v4  ;;  %v11146_v6 = vadd.f32 %v10597_v34, %v12818_v54  ;;  %v3546_v13 = vsel %vm11038_vm9, %v3545_v44, %v3541_v58 }
 0x344   :  { %v3565_v60 = vsub.f32 1.0, %v3564_v42  ;;  %v3579_v17 = vmul.f32 %v11113_v53, %v10987_v62  ;;  %5793 = vrcp.f32 %v11111_v45  ;;  %v11155_v40 = vmul.f32 %v10890_v59, %v10388_v56 }
 0x345   :  { %12903 = vst [vmem:[#allocation49_spill] sm:$0xff] %v11146_v6  ;;  %v3561_v50 = vsel %vm3558_vm10, %v3560_v23, %v3556_v21  ;;  %v3574_v19 = vand.u32 2147483648, %v10954_v37  ;;  %v3594_v34 = vmul.f32 %v11130_v57, %v10998_v9  ;;  %v11163_v7 = vmul.f32 %v3471_v32, %v10567_v12  ;;  %v11186_v32 = vpop.f32.mrf.mxu3  ;;  %v11201_v49 = vpop.f32.mrf.mxu0 }
 0x346   :  { %v11160_v8 = vpop.eup %5787  ;;  %v11166_v43 = vmul.f32 %v3486_v41, %v10607_v52  ;;  %v11169_v61 = vmul.f32 %v3501_v5, %v10615_v1  ;;  %v3572_v56 = vand.u32 2147483647, %v10954_v37  ;;  %v11175_v16 = vmul.f32 %v3516_v29, %v10625_v36  ;;  %v11184_v52 = vpop.f32.mrf.mxu2 }
 0x347   :  { %v11172_v59 = vpop.eup %5789  ;;  %v11178_v27 = vmul.f32 %v3531_v63, %v10638_v47  ;;  %v11181_v11 = vmul.f32 %v3546_v13, %v10645_v38  ;;  %v5066_v12 = vmul.f32 -1.442695, %v11146_v6  ;;  %v11189_v1 = vmul.f32 %v3561_v50, %v10653_v24  ;;  %v11203_v24 = vpop.f32.mrf.mxu1 }
 0x348   :  { %12904 = vst [vmem:[#allocation50_spill] sm:$0xff] %v11166_v43  ;;  %v3566_v2 = vmul.f32 %v11027_v51, %v3565_v60  ;;  %vm3568_vm11 = vweird.f32 %v10954_v37  ;;  %v3580_v36 = vsub.f32 1.0, %v3579_v17  ;;  %v3575_v47 = vor.u32 1.1754944e-38, %v3574_v19 }
 0x349   :  { %12905 = vst [vmem:[#allocation51_spill] sm:$0xff] %v11169_v61  ;;  %v11193_v30 = vpop.eup %5791  ;;  %v3595_v25 = vsub.f32 1.0, %v3594_v34  ;;  %v3609_v38 = vmul.f32 %v11160_v8, %v11043_v35  ;;  %v11199_v20 = vadd.f32 %v10680_v48, %v6759_v26  ;;  %vm11207_vm12 = vcmp.eq.f32.partialorder %v3572_v56, 8.507059e+37  ;;  %v12918_v61 = vld [vmem:[#allocation39_spill] sm:$0xff] }
 0x34a   :  { %12906 = vst [vmem:[#allocation52_spill] sm:$0xff] %v11175_v16  ;;  %v11205_v42 = vpop.eup %5793  ;;  %vm3583_vm14 = vweird.f32 %v10987_v62  ;;  %v3587_v58 = vand.u32 2147483647, %v10987_v62  ;;  %v3589_v44 = vand.u32 2147483648, %v10987_v62  ;;  %v3604_v46 = vand.u32 2147483648, %v10998_v9 }
 0x34b   :  { %12907 = vst [vmem:[#allocation53_spill] sm:$0xff] %v11181_v11  ;;  %v3624_v48 = vmul.f32 %v11172_v59, %v11058_v18  ;;  %vm3598_vm15 = vweird.f32 %v10998_v9  ;;  %v3602_v5 = vand.u32 2147483647, %v10998_v9  ;;  %v3619_v29 = vand.u32 2147483648, %v11043_v35 }
 0x34c   :  { %12908 = vst [vmem:[#allocation54_spill] sm:$0xff] %v11189_v1  ;;  %5795 = vpow2.f32 %v5066_v12  ;;  %v3567_v21 = vadd.f32 %v11027_v51, %v3566_v2  ;;  %vm3569_vm0 = vweird.f32 %v11027_v51  ;;  %v3581_v63 = vmul.f32 %v11113_v53, %v3580_v36 }
 0x34d   :  { %12909 = vst [vmem:[#allocation55_spill] sm:$0xff] %v11199_v20  ;;  %v3639_v23 = vmul.f32 %v11193_v30, %v11091_v4  ;;  %v3596_v13 = vmul.f32 %v11130_v57, %v3595_v25  ;;  %v3610_v60 = vsub.f32 1.0, %v3609_v38  ;;  %v3654_v17 = vmul.f32 %v11205_v42, %v11111_v45  ;;  %vm11236_vm9 = vmor %vm3568_vm11, %vm3569_vm0  ;;  %v11262_v36 = vpop.f32.mrf.mxu0 }
 0x34e   :  { %v5067_v50 = vmul.f32 -1.442695, %v11199_v20  ;;  %vm11229_vm1 = vcmp.eq.f32.partialorder %v3587_v58, 8.507059e+37  ;;  %v3590_v34 = vor.u32 1.1754944e-38, %v3589_v44  ;;  %v3605_v56 = vor.u32 1.1754944e-38, %v3604_v46  ;;  %v11258_v20 = vpop.f32.mrf.mxu3 }
 0x34f   :  { %v3625_v12 = vsub.f32 1.0, %v3624_v48  ;;  %v3634_v2 = vand.u32 2147483648, %v11058_v18  ;;  %vm3584_vm2 = vweird.f32 %v11113_v53  ;;  %vm11241_vm3 = vcmp.eq.f32.partialorder %v3602_v5, 8.507059e+37  ;;  %v11256_v5 = vpop.f32.mrf.mxu2 }
 0x350   :  { %vm3613_vm5 = vweird.f32 %v11043_v35  ;;  %v3617_v38 = vand.u32 2147483647, %v11043_v35  ;;  %v11247_v58 = vor.u32 1.1754944e-38, %v3619_v29  ;;  %v3632_v44 = vand.u32 2147483647, %v11058_v18  ;;  %vm11278_vm6 = vmor %vm3583_vm14, %vm3584_vm2 }
 0x351   :  { %v3571_v37 = vsel %vm11236_vm9, %v11027_v51, %v3567_v21  ;;  %v3582_v46 = vadd.f32 %v11113_v53, %v3581_v63  ;;  %vm3599_vm4 = vweird.f32 %v11130_v57  ;;  %vm3628_vm7 = vweird.f32 %v11058_v18  ;;  %v11264_v51 = vpop.f32.mrf.mxu1 }
 0x352   :  { %v3640_v48 = vsub.f32 1.0, %v3639_v23  ;;  %v5796_v6 = vpop.eup %5795  ;;  %v3597_v29 = vadd.f32 %v11130_v57, %v3596_v13  ;;  %v3611_v16 = vmul.f32 %v11160_v8, %v3610_v60  ;;  %v3655_v1 = vsub.f32 1.0, %v3654_v17  ;;  %vm11296_vm11 = vmor %vm3598_vm15, %vm3599_vm4 }
 0x353   :  { %5797 = vpow2.f32 %v5067_v50  ;;  %v3626_v21 = vmul.f32 %v11172_v59, %v3625_v12  ;;  %v3635_v63 = vor.u32 1.1754944e-38, %v3634_v2  ;;  %v3647_v23 = vand.u32 2147483647, %v11091_v4 }
 0x354   :  { %v11270_v11 = vadd.f32 %v12918_v61, %v6709_v0  ;;  %v3576_v13 = vsel %vm11207_vm12, %v3575_v47, %v3571_v37  ;;  %vm3614_vm8 = vweird.f32 %v11160_v8  ;;  %vm11283_vm13 = vcmp.eq.f32.partialorder %v3617_v38, 8.507059e+37  ;;  %v12927_v38 = vld [vmem:[#allocation36_spill] sm:$0xff] }
 0x355   :  { %vm3643_vm10 = vweird.f32 %v11091_v4  ;;  %v3649_v61 = vand.u32 2147483648, %v11091_v4  ;;  %v3586_v47 = vsel %vm11278_vm6, %v11113_v53, %v3582_v46  ;;  %vm3629_vm12 = vweird.f32 %v11172_v59  ;;  %vm11339_vm9 = vmor %vm3613_vm5, %vm3614_vm8 }
 0x356   :  { %vm11301_vm14 = vcmp.eq.f32.partialorder %v3632_v44, 8.507059e+37  ;;  %v3641_v50 = vmul.f32 %v11193_v30, %v3640_v48  ;;  %v11306_v12 = vadd.f32 1.0, %v5796_v6  ;;  %v3601_v53 = vsel %vm11296_vm11, %v11130_v57, %v3597_v29  ;;  %vm11353_vm2 = vmor %vm3628_vm7, %vm3629_vm12  ;;  %v12951_v6 = vld [vmem:[#allocation19_spill] sm:$0xff] }
 0x357   :  { %v3612_v9 = vadd.f32 %v11160_v8, %v3611_v16  ;;  %v3656_v2 = vmul.f32 %v11205_v42, %v3655_v1  ;;  %v11315_v37 = vadd.f32 %v12927_v38, %v12816_v22  ;;  %v11318_v44 = vmul.f32 %v3576_v13, %v10782_v55  ;;  %v11366_v18 = vpop.f32.mrf.mxu2  ;;  %v11368_v13 = vpop.f32.mrf.mxu3  ;;  %v11410_v38 = vld [vmem:[#allocation5 + $0x2] ss:$0 sm:$0xff] }
 0x358   :  { %v3627_v46 = vadd.f32 %v11172_v59, %v3626_v21  ;;  %vm11321_vm15 = vcmp.eq.f32.partialorder %v3647_v23, 8.507059e+37  ;;  %v5068_v48 = vmul.f32 -1.442695, %v11270_v11  ;;  %v3591_v16 = vsel %vm11229_vm1, %v3590_v34, %v3586_v47 }
 0x359   :  { %12928 = vst [vmem:[#allocation39_spill] sm:$0xff] %v11318_v44  ;;  %v5798_v57 = vpop.eup %5797  ;;  %v3650_v1 = vor.u32 1.1754944e-38, %v3649_v61  ;;  %vm3658_vm0 = vweird.f32 %v11111_v45  ;;  %v11331_v29 = vadd.f32 %v10760_v31, %v12818_v54  ;;  %v3606_v55 = vsel %vm11241_vm3, %v3605_v56, %v3601_v53  ;;  %v11387_v53 = vpop.f32.mrf.mxu1 }
 0x35a   :  { %v3642_v19 = vadd.f32 %v11193_v30, %v3641_v50  ;;  %vm3644_vm1 = vweird.f32 %v11193_v30  ;;  %5799 = vrcp.f32 %v11306_v12  ;;  %v3616_v31 = vsel %vm11339_vm9, %v11160_v8, %v3612_v9  ;;  %v11385_v50 = vpop.f32.mrf.mxu0 }
 0x35b   :  { %12931 = vst [vmem:[#allocation36_spill] sm:$0xff] %v11331_v29  ;;  %v3657_v34 = vadd.f32 %v11205_v42, %v3656_v2  ;;  %vm3659_vm3 = vweird.f32 %v11205_v42  ;;  %v5069_v56 = vmul.f32 -1.442695, %v11315_v37  ;;  %v3631_v25 = vsel %vm11353_vm2, %v11172_v59, %v3627_v46  ;;  %vm11375_vm5 = vmor %vm3643_vm10, %vm3644_vm1  ;;  %v12942_v2 = vld [vmem:[#allocation37_spill] sm:$0xff] }
 0x35c   :  { %v3664_v8 = vand.u32 2147483648, %v11111_v45  ;;  %v11364_v23 = vadd.f32 1.0, %v5798_v57  ;;  %5801 = vpow2.f32 %v5068_v48  ;;  %v11371_v60 = vmul.f32 %v3591_v16, %v10843_v10  ;;  %vm11402_vm4 = vmor %vm3658_vm0, %vm3659_vm3  ;;  %v12946_v16 = vld [vmem:[#allocation23_spill] sm:$0xff] }
 0x35d   :  { %v3662_v59 = vand.u32 2147483647, %v11111_v45  ;;  %v5070_v47 = vmul.f32 -1.442695, %v11331_v29  ;;  %v11383_v62 = vadd.f32 %v10762_v33, %v6759_v26  ;;  %v11390_v10 = vmul.f32 %v3606_v55, %v10860_v14  ;;  %v12944_v45 = vld [vmem:[#allocation41_spill] sm:$0xff]  ;;  %v12978_v29 = vld [vmem:[#allocation20_spill] sm:$0xff] }
 0x35e   :  { %12936 = vst [vmem:[#allocation56_spill] sm:$0xff] %v11371_v60  ;;  %v3621_v4 = vsel %vm11283_vm13, %v11247_v58, %v3616_v31  ;;  %v3646_v9 = vsel %vm11375_vm5, %v11193_v30, %v3642_v19  ;;  %v11408_v14 = vadd.f32 %v12942_v2, %v6709_v0  ;;  %v3636_v58 = vsel %vm11301_vm14, %v3635_v63, %v3631_v25  ;;  %v12948_v31 = vld [vmem:[#allocation17_spill] sm:$0xff] }
 0x35f   :  { %12939 = vst [vmem:[#allocation57_spill] sm:$0xff] %v11383_v62  ;;  %v3661_v30 = vsel %vm11402_vm4, %v11205_v42, %v3657_v34  ;;  %5803 = vpow2.f32 %v5069_v56  ;;  %v11419_v17 = vadd.f32 %v12944_v45, %v12816_v22  ;;  %v3665_v48 = vor.u32 1.1754944e-38, %v3664_v8  ;;  %v12950_v56 = vld [vmem:[#allocation32_spill] sm:$0xff]  ;;  %v11455_v2 = vpop.f32.mrf.mxu2 }
 0x360   :  { %12943 = vst [vmem:[#allocation37_spill] sm:$0xff] %v11408_v14  ;;  %v11421_v46 = vpop.eup %5799  ;;  %v3679_v57 = vand.u32 2147483648, %v11306_v12  ;;  %5805 = vrcp.f32 %v11364_v23  ;;  %v11427_v41 = vadd.f32 %v12946_v16, %v12818_v54  ;;  %v3651_v63 = vsel %vm11321_vm15, %v3650_v1, %v3646_v9 }
 0x361   :  { %12945 = vst [vmem:[#allocation41_spill] sm:$0xff] %v11419_v17  ;;  %vm3663_vm7 = vcmp.eq.f32.partialorder %v3662_v59, 8.507059e+37  ;;  %5807 = vpow2.f32 %v5070_v47  ;;  %v5071_v42 = vmul.f32 -1.442695, %v11383_v62  ;;  %v5072_v19 = vmul.f32 -1.442695, %v11408_v14 }
 0x362   :  { %12947 = vst [vmem:[#allocation23_spill] sm:$0xff] %v11427_v41  ;;  %v5802_v55 = vpop.eup %5801  ;;  %v3666_v21 = vsel %vm3663_vm7, %v3665_v48, %v3661_v30  ;;  %v11435_v35 = vadd.f32 %v12948_v31, %v6759_v26  ;;  %v4397_v34 = vadd.f32 %v11410_v38, %v11093_v3  ;;  %v11440_v25 = vmul.f32 %v3621_v4, %v12950_v56  ;;  %v12953_v59 = vld [vmem:[#allocation26_spill] sm:$0xff]  ;;  %v11457_v4 = vpop.f32.mrf.mxu3 }
 0x363   :  { %v11443_v1 = vmul.f32 %v3636_v58, %v12951_v6  ;;  %v3669_v8 = vmul.f32 %v11421_v46, %v11306_v12  ;;  %v5073_v61 = vmul.f32 -1.442695, %v11419_v17  ;;  %v11449_v47 = vmul.f32 %v3651_v63, %v12953_v59  ;;  %v4406_v16 = vpop.f32.mrf.mxu0  ;;  %v4495_v63 = vpop.f32.mrf.mxu1 }
 0x364   :  { %12949 = vst [vmem:[#allocation17_spill] sm:$0xff] %v11435_v35  ;;  %v11452_v33 = vor.u32 1.1754944e-38, %v3679_v57  ;;  %v5074_v3 = vmul.f32 -1.442695, %v11427_v41  ;;  %v11460_v30 = vmul.f32 %v3666_v21, %v10934_v15  ;;  %v3694_v45 = vand.u32 2147483648, %v11364_v23  ;;  %v12955_v21 = vld [vmem:[#allocation42_spill] sm:$0xff] }
 0x365   :  { %12952 = vst [vmem:[#allocation32_spill] sm:$0xff] %v11443_v1  ;;  %v5804_v58 = vpop.eup %5803  ;;  %v11463_v48 = vadd.f32 1.0, %v5802_v55  ;;  %5809 = vpow2.f32 %v5071_v42  ;;  %v11469_v56 = vmul.f32 -1.442695, %v11435_v35  ;;  %v4486_v6 = vadd.f32 %v11095_v28, %v4397_v34  ;;  %v12958_v28 = vld [vmem:[#allocation22_spill] sm:$0xff]  ;;  %v12959_v34 = vld [vmem:[#allocation21_spill] sm:$0xff] }
 0x366   :  { %12954 = vst [vmem:[#allocation19_spill] sm:$0xff] %v11449_v47  ;;  %v11465_v31 = vpop.eup %5805  ;;  %5811 = vpow2.f32 %v5072_v19  ;;  %v3670_v15 = vsub.f32 1.0, %v3669_v8  ;;  %v11474_v9 = vadd.f32 %v12955_v21, %v6709_v0  ;;  %v4399_v42 = vadd.f32 %v11410_v38, %v11201_v49  ;;  %v12957_v19 = vld [vmem:[#allocation24_spill] sm:$0xff]  ;;  %v12992_v47 = vld [vmem:[#allocation49_spill] sm:$0xff] }
 0x367   :  { %v5808_v59 = vpop.eup %5807  ;;  %v4402_v55 = vadd.f32 %v11410_v38, %v11262_v36  ;;  %5813 = vpow2.f32 %v5073_v61  ;;  %v11482_v57 = vadd.f32 %v12957_v19, %v12816_v22  ;;  %v4575_v35 = vadd.f32 %v11184_v52, %v4486_v6 }
 0x368   :  { %12956 = vst [vmem:[#allocation26_spill] sm:$0xff] %v11474_v9  ;;  %v4105_v8 = vpack.c.bf16 %v12959_v34, %v12958_v28  ;;  %v3684_v21 = vmul.f32 %v11465_v31, %v11364_v23  ;;  %v11489_v41 = vor.u32 1.1754944e-38, %v3694_v45  ;;  %5815 = vrcp.f32 %v11463_v48 }
 0x369   :  { %v11492_v49 = vadd.f32 1.0, %v5804_v58  ;;  %v11494_v36 = vadd.f32 1.0, %v5808_v59  ;;  %v11498_v61 = vadd.f32 %v11060_v39, %v12818_v54  ;;  %v4664_v52 = vadd.f32 %v11186_v32, %v4575_v35  ;;  %v12961_v32 = vld [vmem:[#allocation30_spill] sm:$0xff] }
 0x36a   :  { %4707 = vmatmul.bf16.gmra.mxu3 %v4105_v8  ;;  %v4404_v6 = vadd.f32 %v11410_v38, %v11385_v50  ;;  %v3671_v45 = vmul.f32 %v11421_v46, %v3670_v15  ;;  %vm3674_vm6 = vweird.f32 %v11421_v46  ;;  %v4488_v58 = vadd.f32 %v11203_v24, %v4399_v42  ;;  %v5895_v50 = vld [vmem:[#allocation2] sm:$0xff]  ;;  %v4584_v8 = vpop.f32.mrf.mxu2  ;;  %v4673_v15 = vpop.f32.mrf.mxu3 }
 0x36b   :  { %12960 = vst [vmem:[#allocation42_spill] sm:$0xff] %v11498_v61  ;;  %v5810_v19 = vpop.eup %5809  ;;  %v4491_v59 = vadd.f32 %v11264_v51, %v4402_v55  ;;  %5817 = vpow2.f32 %v5074_v3  ;;  %v11510_v39 = vmul.f32 -1.442695, %v11474_v9  ;;  %v11514_v35 = vadd.f32 %v12961_v32, %v12818_v54  ;;  %v4408_v3 = vpop.f32.mrf.mxu0 }
 0x36c   :  { %v11507_v28 = vpop.eup %5811  ;;  %v4743_v34 = vadd.f32 %v5895_v50, %v4664_v52  ;;  %vm3673_vm8 = vweird.f32 %v11306_v12  ;;  %v3685_v17 = vsub.f32 1.0, %v3684_v21  ;;  %5819 = vrcp.f32 %v11492_v49  ;;  %v4497_v42 = vpop.f32.mrf.mxu1 }
 0x36d   :  { %12962 = vst [vmem:[#allocation24_spill] sm:$0xff] %v11514_v35  ;;  %v4577_v24 = vadd.f32 %v11256_v5, %v4488_v58  ;;  %v4580_v51 = vadd.f32 %v11366_v18, %v4491_v59  ;;  %v11520_v55 = vpop.eup %5813  ;;  %5821 = vrcp.f32 %v11494_v36  ;;  %v5082_v54 = vmul.f32 -1.442695, %v11498_v61  ;;  %v12963_v58 = vld [vmem:[#allocation25_spill] sm:$0xff]  ;;  %v12964_v59 = vld [vmem:[#allocation44_spill] sm:$0xff]  ;;  %vm11579_vm11 = vmor %vm3673_vm8, %vm3674_vm6 }
 0x36e   :  { %4775 = vst [vmem:[#allocation11] sm:$0xff] %v4743_v34  ;;  %v4493_v52 = vadd.f32 %v11387_v53, %v4404_v6  ;;  %v4407_v32 = vadd.f32 %v11410_v38, %v4406_v16  ;;  %v11526_v21 = vpop.eup %5815  ;;  %v11529_v50 = vadd.f32 %v11421_v46, %v3671_v45  ;;  %v4106_v9 = vpack.c.bf16 %v12964_v59, %v12963_v58  ;;  %v12965_v53 = vld [vmem:[#allocation29_spill] sm:$0xff]  ;;  %v12970_v59 = vld [vmem:[#allocation43_spill] sm:$0xff] }
 0x36f   :  { %v4666_v5 = vadd.f32 %v11258_v20, %v4577_v24  ;;  %v4669_v18 = vadd.f32 %v11368_v13, %v4580_v51  ;;  %v5078_v14 = vmul.f32 -1.442695, %v11514_v35  ;;  %v12966_v6 = vld [vmem:[#allocation33_spill] sm:$0xff]  ;;  %v12967_v62 = vand.u32 2147483647, %v11306_v12  ;;  %v5896_v13 = vld [vmem:[#allocation2 + $0x8] sm:$0xff] }
 0x370   :  { %v4582_v34 = vadd.f32 %v11455_v2, %v4493_v52  ;;  %v4496_v1 = vadd.f32 %v4495_v63, %v4407_v32  ;;  %v4107_v16 = vpack.c.bf16 %v12966_v6, %v12965_v53  ;;  %v3686_v20 = vmul.f32 %v11465_v31, %v3685_v17  ;;  %v5897_v51 = vld [vmem:[#allocation2 + $0x10] sm:$0xff]  ;;  %4445 = vmatmul.bf16.gmra.mxu0 %v4106_v9  ;;  %v12971_v35 = vld [vmem:[#allocation34_spill] sm:$0xff]  ;;  %v12974_v6 = vld [vmem:[#allocation40_spill] sm:$0xff] }
 0x371   :  { %vm11541_vm13 = vcmp.eq.f32.partialorder %v12967_v62, 8.507059e+37  ;;  %v4744_v24 = vadd.f32 %v5896_v13, %v4666_v5  ;;  %v4745_v58 = vadd.f32 %v5897_v51, %v4669_v18  ;;  %v4108_v2 = vpack.c.bf16 %v12971_v35, %v12970_v59  ;;  %v11548_v63 = vpop.eup %5817  ;;  %v12972_v35 = vld [vmem:[#allocation35_spill] sm:$0xff]  ;;  %v12973_v18 = vld [vmem:[#allocation16_spill] sm:$0xff] }
 0x372   :  { %v11552_v52 = vmul.f32 %v11526_v21, %v11463_v48  ;;  %5823 = vpow2.f32 %v5082_v54  ;;  %v4671_v62 = vadd.f32 %v11457_v4, %v4582_v34  ;;  %4534 = vmatmul.bf16.gmra.mxu1 %v4107_v16  ;;  %v4585_v32 = vadd.f32 %v4584_v8, %v4496_v1  ;;  %v11555_v17 = vpop.eup %5819  ;;  %v12975_v13 = vld [vmem:[#allocation31_spill] sm:$0xff]  ;;  %v5898_v1 = vld [vmem:[#allocation2 + $0x18] sm:$0xff]  ;;  %v4586_v34 = vpop.f32.mrf.mxu2 }
 0x373   :  { %vm3688_vm10 = vweird.f32 %v11364_v23  ;;  %v11558_v5 = vadd.f32 1.0, %v5810_v19  ;;  %4776 = vst [vmem:[#allocation11 + $0x8] sm:$0xff] %v4744_v24  ;;  %4623 = vmatmul.bf16.gmra.mxu2 %v4108_v2  ;;  %v4409_v9 = vadd.f32 %v11410_v38, %v4408_v3  ;;  %v11565_v51 = vpop.eup %5821  ;;  %5825 = vpow2.f32 %v5078_v14  ;;  %v4675_v19 = vpop.f32.mrf.mxu3  ;;  %v12976_v16 = vld [vmem:[#allocation18_spill] sm:$0xff]  ;;  %v12977_v24 = vld [vmem:[#allocation28_spill] sm:$0xff] }
 0x374   :  { %4777 = vst [vmem:[#allocation11 + $0x10] sm:$0xff] %v4745_v58  ;;  %v4746_v4 = vadd.f32 %v5898_v1, %v4671_v62  ;;  %v4674_v8 = vadd.f32 %v4673_v15, %v4585_v32  ;;  %v4411_v3 = vpop.f32.mrf.mxu0  ;;  %v4500_v61 = vpop.f32.mrf.mxu1  ;;  %v3709_v62 = vand.u32 2147483648, %v11463_v48  ;;  %v5899_v32 = vld [vmem:[#allocation2 + $0x20] sm:$0xff]  ;;  %v3676_v58 = vsel %vm11579_vm11, %v11421_v46, %v11529_v50  ;;  %v12988_v46 = vld [vmem:[#allocation45_spill] sm:$0xff]  ;;  %v12989_v50 = vld [vmem:[#allocation38_spill] sm:$0xff] }
 0x375   :  { %v4498_v2 = vadd.f32 %v4497_v42, %v4409_v9  ;;  %v3707_v42 = vand.u32 2147483647, %v11463_v48  ;;  %v12984_v12 = vand.u32 2147483647, %v11364_v23  ;;  %v4412_v14 = vadd.f32 %v11410_v38, %v4411_v3 }
 0x376   :  { %4778 = vst [vmem:[#allocation11 + $0x18] sm:$0xff] %v4746_v4  ;;  %v4747_v9 = vadd.f32 %v5899_v32, %v4674_v8  ;;  %vm3689_vm14 = vweird.f32 %v11465_v31  ;;  %v3700_v53 = vsub.f32 1.0, %v11552_v52  ;;  %5827 = vpow2.f32 %v11469_v56 }
 0x377   :  { %vm11593_vm12 = vcmp.eq.f32.partialorder %v12984_v12, 8.507059e+37  ;;  %v4587_v43 = vadd.f32 %v4586_v34, %v4498_v2  ;;  %v4109_v15 = vpack.c.bf16 %v12989_v50, %v12988_v46  ;;  %v3687_v12 = vadd.f32 %v11465_v31, %v3686_v20  ;;  %v5900_v46 = vld [vmem:[#allocation2 + $0x28] sm:$0xff]  ;;  %vm11626_vm0 = vmor %vm3688_vm10, %vm3689_vm14 }
 0x378   :  { %v5824_v32 = vpop.eup %5823  ;;  %4779 = vst [vmem:[#allocation11 + $0x20] sm:$0xff] %v4747_v9  ;;  %v3714_v34 = vmul.f32 %v11555_v17, %v11492_v49  ;;  %5829 = vrcp.f32 %v11558_v5  ;;  %v3681_v8 = vsel %vm11541_vm13, %v11452_v33, %v3676_v58  ;;  %v11612_v52 = vor.u32 1.1754944e-38, %v3709_v62 }
 0x379   :  { %v4676_v2 = vadd.f32 %v4675_v19, %v4587_v43  ;;  %v5826_v3 = vpop.eup %5825  ;;  %v3724_v56 = vand.u32 2147483648, %v11492_v49  ;;  %v3729_v9 = vmul.f32 %v11565_v51, %v11494_v36  ;;  %vm3703_vm15 = vweird.f32 %v11463_v48 }
 0x37a   :  { %4712 = vmatmul.bf16.gmra.mxu3 %v4109_v15  ;;  %v11618_v20 = vadd.f32 1.0, %v5824_v32  ;;  %v4501_v43 = vadd.f32 %v4500_v61, %v4412_v14  ;;  %v3701_v45 = vmul.f32 %v11526_v21, %v3700_v53  ;;  %v3722_v58 = vand.u32 2147483647, %v11492_v49  ;;  %v4589_v61 = vpop.f32.mrf.mxu2 }
 0x37b   :  { %v4748_v50 = vadd.f32 %v5900_v46, %v4676_v2  ;;  %v3737_v62 = vand.u32 2147483647, %v11494_v36  ;;  %v11634_v32 = vadd.f32 1.0, %v11507_v28  ;;  %v4678_v14 = vpop.f32.mrf.mxu3  ;;  %v3691_v15 = vsel %vm11626_vm0, %v11465_v31, %v3687_v12 }
 0x37c   :  { %v3715_v23 = vsub.f32 1.0, %v3714_v34  ;;  %v11639_v2 = vadd.f32 1.0, %v5826_v3  ;;  %v4590_v46 = vadd.f32 %v4589_v61, %v4501_v43  ;;  %v4413_v19 = vpop.f32.mrf.mxu0  ;;  %v4502_v53 = vpop.f32.mrf.mxu1  ;;  %v11642_v4 = vmul.f32 %v3681_v8, %v12992_v47 }
 0x37d   :  { %4780 = vst [vmem:[#allocation11 + $0x28] sm:$0xff] %v4748_v50  ;;  %v5828_v60 = vpop.eup %5827  ;;  %v11644_v44 = vor.u32 1.1754944e-38, %v3724_v56  ;;  %v3730_v28 = vsub.f32 1.0, %v3729_v9  ;;  %v3739_v1 = vand.u32 2147483648, %v11494_v36  ;;  %vm3704_vm9 = vweird.f32 %v11526_v21  ;;  %v5901_v9 = vld [vmem:[#allocation2 + $0x30] sm:$0xff] }
 0x37e   :  { %v11647_v54 = vpop.eup %5829  ;;  %vm11650_vm1 = vcmp.eq.f32.partialorder %v3707_v42, 8.507059e+37  ;;  %vm3718_vm2 = vweird.f32 %v11492_v49  ;;  %5831 = vrcp.f32 %v11618_v20  ;;  %v4679_v12 = vadd.f32 %v4678_v14, %v4590_v46  ;;  %vm11698_vm5 = vmor %vm3703_vm15, %vm3704_vm9 }
 0x37f   :  { %v4414_v47 = vadd.f32 %v11410_v38, %v4413_v19  ;;  %v3696_v8 = vsel %vm11593_vm12, %v11489_v41, %v3691_v15  ;;  %v3702_v34 = vadd.f32 %v11526_v21, %v3701_v45  ;;  %v3754_v3 = vand.u32 2147483648, %v11558_v5  ;;  %v12998_v15 = vld [vmem:[#allocation55_spill] sm:$0xff] }
 0x380   :  { %5833 = vrcp.f32 %v11634_v32  ;;  %v3716_v42 = vmul.f32 %v11555_v17, %v3715_v23  ;;  %vm3733_vm3 = vweird.f32 %v11494_v36  ;;  %v12995_v56 = vpack.c.bf16 %v12973_v18, %v12972_v35 }
 0x381   :  { %5835 = vrcp.f32 %v11639_v2  ;;  %v4749_v50 = vadd.f32 %v5901_v9, %v4679_v12  ;;  %v4119_v41 = vpack.c.bf16 %v11460_v30, %v11390_v10  ;;  %v3731_v59 = vmul.f32 %v11565_v51, %v3730_v28 }
 0x382   :  { %4450 = vmatmul.bf16.gmra.mxu0 %v12995_v56  ;;  %v3744_v43 = vmul.f32 %v11647_v54, %v11558_v5  ;;  %v11675_v19 = vadd.f32 1.0, %v11520_v55  ;;  %v12996_v33 = vpack.c.bf16 %v12975_v13, %v12974_v6  ;;  %v4120_v35 = vpack.c.bf16 %v11642_v4, %v11440_v25 }
 0x383   :  { %v11682_v18 = vor.u32 1.1754944e-38, %v3739_v1  ;;  %v3752_v45 = vand.u32 2147483647, %v11558_v5  ;;  %v11686_v61 = vadd.f32 1.0, %v11548_v63  ;;  %v12997_v14 = vpack.c.bf16 %v12977_v24, %v12976_v16  ;;  %4781 = vst [vmem:[#allocation11 + $0x30] sm:$0xff] %v4749_v50  ;;  %v4591_v16 = vpop.f32.mrf.mxu2  ;;  %v4680_v24 = vpop.f32.mrf.mxu3 }
 0x384   :  { %4539 = vmatmul.bf16.gmra.mxu1 %v12996_v33  ;;  %v4503_v55 = vadd.f32 %v4502_v53, %v4414_v47  ;;  %v11692_v23 = vmul.f32 %v3696_v8, %v12998_v15  ;;  %vm3719_vm4 = vweird.f32 %v11555_v17  ;;  %vm11703_vm7 = vcmp.eq.f32.partialorder %v3722_v58, 8.507059e+37  ;;  %v11710_v1 = vpop.eup %5831  ;;  %v4416_v12 = vpop.f32.mrf.mxu0  ;;  %v13012_v53 = vld [vmem:[#allocation48_spill] sm:$0xff] }
 0x385   :  { %4628 = vmatmul.bf16.gmra.mxu2 %v12997_v14  ;;  %vm3734_vm6 = vweird.f32 %v11565_v51  ;;  %v11708_v13 = vor.u32 1.1754944e-38, %v3754_v3  ;;  %v3706_v48 = vsel %vm11698_vm5, %v11526_v21, %v3702_v34  ;;  %v3717_v46 = vadd.f32 %v11555_v17, %v3716_v42  ;;  %v4505_v47 = vpop.f32.mrf.mxu1  ;;  %vm11741_vm13 = vmor %vm3718_vm2, %vm3719_vm4 }
 0x386   :  { %vm11716_vm8 = vcmp.eq.f32.partialorder %v3737_v62, 8.507059e+37  ;;  %v3769_v58 = vand.u32 2147483648, %v11634_v32  ;;  %v4592_v28 = vadd.f32 %v4591_v16, %v4503_v55  ;;  %v11721_v8 = vpop.eup %5833  ;;  %v3732_v3 = vadd.f32 %v11565_v51, %v3731_v59  ;;  %v13005_v62 = vld [vmem:[#allocation46_spill] sm:$0xff]  ;;  %vm11764_vm12 = vmor %vm3733_vm3, %vm3734_vm6 }
 0x387   :  { %v3745_v56 = vsub.f32 1.0, %v3744_v43  ;;  %v3767_v9 = vand.u32 2147483647, %v11634_v32  ;;  %5837 = vrcp.f32 %v11675_v19  ;;  %v11726_v21 = vpop.eup %5835  ;;  %v11731_v34 = vadd.f32 %v13005_v62, %v6709_v0  ;;  %v13008_v0 = vld [vmem:[#allocation47_spill] sm:$0xff]  ;;  %v5902_v55 = vld [vmem:[#allocation2 + $0x38] sm:$0xff] }
 0x388   :  { %5839 = vrcp.f32 %v11686_v61  ;;  %v4681_v42 = vadd.f32 %v4680_v24, %v4592_v28  ;;  %v4417_v50 = vadd.f32 %v11410_v38, %v4416_v12  ;;  %v3711_v59 = vsel %vm11650_vm1, %v11612_v52, %v3706_v48 }
 0x389   :  { %vm3748_vm10 = vweird.f32 %v11558_v5  ;;  %v11746_v33 = vadd.f32 1.0, %v5828_v60  ;;  %v11750_v14 = vadd.f32 %v13008_v0, %v12816_v22  ;;  %v3909_v31 = vmul.f32 %v11710_v1, %v11618_v20 }
 0x38a   :  { %v3721_v52 = vsel %vm11741_vm13, %v11555_v17, %v3717_v46  ;;  %vm3749_vm11 = vweird.f32 %v11647_v54  ;;  %v11758_v49 = vor.u32 1.1754944e-38, %v3769_v58  ;;  %v4750_v15 = vadd.f32 %v5902_v55, %v4681_v42 }
 0x38b   :  { %v3746_v60 = vmul.f32 %v11647_v54, %v3745_v56  ;;  %v3759_v6 = vmul.f32 %v11721_v8, %v11634_v32  ;;  %5841 = vpow2.f32 %v11510_v39  ;;  %v3849_v17 = vmul.f32 %v11726_v21, %v11639_v2  ;;  %v4594_v28 = vpop.f32.mrf.mxu2  ;;  %vm11823_vm14 = vmor %vm3748_vm10, %vm3749_vm11 }
 0x38c   :  { %v13011_v16 = vpack.c.bf16 %v11155_v40, %v12978_v29  ;;  %v11778_v36 = vmul.f32 %v3711_v59, %v11270_v11  ;;  %v3736_v24 = vsel %vm11764_vm12, %v11565_v51, %v3732_v3  ;;  %v5080_v48 = vmul.f32 -1.442695, %v11731_v34  ;;  %4782 = vst [vmem:[#allocation11 + $0x38] sm:$0xff] %v4750_v15  ;;  %v4683_v11 = vpop.f32.mrf.mxu3  ;;  %v4418_v62 = vpop.f32.mrf.mxu0 }
 0x38d   :  { %v4506_v46 = vadd.f32 %v4505_v47, %v4417_v50  ;;  %v11784_v58 = vpop.eup %5837  ;;  %v3782_v39 = vand.u32 2147483647, %v11675_v19  ;;  %5843 = vrcp.f32 %v11746_v33  ;;  %v5081_v40 = vmul.f32 -1.442695, %v11750_v14  ;;  %v4507_v42 = vpop.f32.mrf.mxu1 }
 0x38e   :  { %4717 = vmatmul.bf16.gmra.mxu3 %v13011_v16  ;;  %v3910_v29 = vsub.f32 1.0, %v3909_v31  ;;  %v11789_v12 = vpop.eup %5839  ;;  %v3726_v51 = vsel %vm11703_vm7, %v11644_v44, %v3721_v52  ;;  %v3784_v3 = vand.u32 2147483648, %v11675_v19  ;;  %v5077_v47 = vmul.f32 -1.442695, %v11482_v57 }
 0x38f   :  { %v4595_v56 = vadd.f32 %v4594_v28, %v4506_v46  ;;  %v3741_v50 = vsel %vm11716_vm8, %v11682_v18, %v3736_v24  ;;  %v11800_v59 = vadd.f32 %v11647_v54, %v3746_v60  ;;  %v3760_v43 = vsub.f32 1.0, %v3759_v6  ;;  %v13015_v6 = vld [vmem:[#allocation27_spill] sm:$0xff]  ;;  %v13017_v46 = vld [vmem:[#allocation36_spill] sm:$0xff] }
 0x390   :  { %v3850_v0 = vsub.f32 1.0, %v3849_v17  ;;  %v11804_v63 = vmul.f32 %v11784_v58, %v11675_v19  ;;  %5845 = vpow2.f32 %v5080_v48  ;;  %v4419_v31 = vadd.f32 %v11410_v38, %v4418_v62  ;;  %v5903_v24 = vld [vmem:[#allocation2 + $0x40] sm:$0xff] }
 0x391   :  { %v4684_v44 = vadd.f32 %v4683_v11, %v4595_v56  ;;  %v5842_v52 = vpop.eup %5841  ;;  %v11809_v55 = vmul.f32 %v11789_v12, %v11686_v61  ;;  %5847 = vpow2.f32 %v5081_v40  ;;  %v3911_v18 = vmul.f32 %v11710_v1, %v3910_v29  ;;  %v13018_v11 = vld [vmem:[#allocation53_spill] sm:$0xff] }
 0x392   :  { %v11814_v15 = vadd.f32 %v13012_v53, %v6759_v26  ;;  %v11817_v22 = vmul.f32 %v3726_v51, %v11315_v37  ;;  %5849 = vpow2.f32 %v5077_v47  ;;  %v11829_v17 = vadd.f32 %v13015_v6, %v6759_v26  ;;  %v13019_v51 = vld [vmem:[#allocation50_spill] sm:$0xff] }
 0x393   :  { %v13016_v16 = vpack.c.bf16 %v11178_v27, %v11163_v7  ;;  %v4751_v37 = vadd.f32 %v5903_v24, %v4684_v44  ;;  %v11834_v48 = vpop.eup %5843  ;;  %v11837_v40 = vmul.f32 %v3741_v50, %v13017_v46  ;;  %v3751_v29 = vsel %vm11823_vm14, %v11647_v54, %v11800_v59  ;;  %v13023_v54 = vld [vmem:[#allocation54_spill] sm:$0xff]  ;;  %v4596_v44 = vpop.f32.mrf.mxu2 }
 0x394   :  { %v11843_v28 = vor.u32 1.1754944e-38, %v3784_v3  ;;  %v3851_v26 = vmul.f32 %v11726_v21, %v3850_v0  ;;  %v13020_v7 = vpack.c.bf16 %v13018_v11, %v13019_v51  ;;  %vm11851_vm15 = vcmp.eq.f32.partialorder %v3752_v45, 8.507059e+37  ;;  %v13024_v3 = vld [vmem:[#allocation51_spill] sm:$0xff]  ;;  %v13035_v27 = vld [vmem:[#allocation42_spill] sm:$0xff] }
 0x395   :  { %4455 = vmatmul.bf16.gmra.mxu0 %v13016_v16  ;;  %v3761_v47 = vmul.f32 %v11721_v8, %v3760_v43  ;;  %v3775_v56 = vsub.f32 1.0, %v11804_v63  ;;  %v11857_v62 = vadd.f32 1.0, %v5842_v52  ;;  %v13025_v50 = vpack.c.bf16 %v13023_v54, %v13024_v3  ;;  %4783 = vst [vmem:[#allocation11 + $0x40] sm:$0xff] %v4751_v37  ;;  %v4685_v43 = vpop.f32.mrf.mxu3 }
 0x396   :  { %4544 = vmatmul.bf16.gmra.mxu1 %v13020_v7  ;;  %v4508_v59 = vadd.f32 %v4507_v42, %v4419_v31  ;;  %v3790_v0 = vsub.f32 1.0, %v11809_v55  ;;  %v3912_v5 = vadd.f32 %v11710_v1, %v3911_v18  ;;  %vm3914_vm0 = vweird.f32 %v11710_v1  ;;  %v5846_v53 = vpop.eup %5845  ;;  %v4421_v55 = vpop.f32.mrf.mxu0 }
 0x397   :  { %4633 = vmatmul.bf16.gmra.mxu2 %v13025_v50  ;;  %v5083_v45 = vmul.f32 -1.442695, %v11814_v15  ;;  %vm3764_vm9 = vweird.f32 %v11721_v8  ;;  %v11869_v63 = vmul.f32 %v11834_v48, %v11746_v33  ;;  %v5079_v52 = vmul.f32 -1.442695, %v11829_v17  ;;  %v4510_v18 = vpop.f32.mrf.mxu1  ;;  %v5848_v60 = vpop.eup %5847 }
 0x398   :  { %v3919_v42 = vand.u32 2147483648, %v11618_v20  ;;  %v4597_v31 = vadd.f32 %v4596_v44, %v4508_v59  ;;  %v3852_v6 = vadd.f32 %v11726_v21, %v3851_v26  ;;  %vm3854_vm1 = vweird.f32 %v11726_v21  ;;  %v5850_v24 = vpop.eup %5849  ;;  %v5904_v59 = vld [vmem:[#allocation2 + $0x48] sm:$0xff] }
 0x399   :  { %vm3913_vm2 = vweird.f32 %v11618_v20  ;;  %v3917_v16 = vand.u32 2147483647, %v11618_v20  ;;  %vm3763_vm3 = vweird.f32 %v11634_v32  ;;  %vm3853_vm5 = vweird.f32 %v11639_v2 }
 0x39a   :  { %v3859_v37 = vand.u32 2147483648, %v11639_v2  ;;  %vm11882_vm4 = vmor %vm3913_vm2, %vm3914_vm0  ;;  %v4686_v26 = vadd.f32 %v4685_v43, %v4597_v31  ;;  %v4422_v11 = vadd.f32 %v11410_v38, %v4421_v55  ;;  %v3857_v51 = vand.u32 2147483647, %v11639_v2 }
 0x39b   :  { %v11888_v7 = vadd.f32 1.0, %v5846_v53  ;;  %v3916_v20 = vsel %vm11882_vm4, %v11710_v1, %v3912_v5  ;;  %5851 = vpow2.f32 %v5083_v45  ;;  %vm11896_vm7 = vmor %vm3853_vm5, %vm3854_vm1  ;;  %v11900_v3 = vadd.f32 1.0, %v5848_v60  ;;  %v13030_v5 = vld [vmem:[#allocation39_spill] sm:$0xff]  ;;  %v13031_v45 = vld [vmem:[#allocation52_spill] sm:$0xff] }
 0x39c   :  { %5853 = vrcp.f32 %v11857_v62  ;;  %v3920_v50 = vor.u32 1.1754944e-38, %v3919_v42  ;;  %v4752_v2 = vadd.f32 %v5904_v59, %v4686_v26  ;;  %vm3778_vm6 = vweird.f32 %v11675_v19  ;;  %vm11944_vm14 = vmor %vm3763_vm3, %vm3764_vm9 }
 0x39d   :  { %v11903_v44 = vadd.f32 1.0, %v5850_v24  ;;  %v3856_v1 = vsel %vm11896_vm7, %v11726_v21, %v3852_v6  ;;  %5855 = vpow2.f32 %v5079_v52  ;;  %vm3918_vm8 = vcmp.eq.f32.partialorder %v3917_v16, 8.507059e+37  ;;  %v4688_v6 = vpop.f32.mrf.mxu3 }
 0x39e   :  { %v13032_v43 = vpack.c.bf16 %v13030_v5, %v13031_v45  ;;  %vm11913_vm13 = vcmp.eq.f32.partialorder %v3767_v9, 8.507059e+37  ;;  %v3797_v42 = vand.u32 2147483647, %v11686_v61  ;;  %v3860_v31 = vor.u32 1.1754944e-38, %v3859_v37  ;;  %4784 = vst [vmem:[#allocation11 + $0x48] sm:$0xff] %v4752_v2  ;;  %v4599_v9 = vpop.f32.mrf.mxu2  ;;  %v13043_v5 = vld [vmem:[#allocation24_spill] sm:$0xff] }
 0x39f   :  { %v3921_v55 = vsel %vm3918_vm8, %v3920_v50, %v3916_v20  ;;  %v4511_v60 = vadd.f32 %v4510_v18, %v4422_v11  ;;  %v3756_v21 = vsel %vm11851_vm15, %v11708_v13, %v3751_v29  ;;  %v3776_v52 = vmul.f32 %v11784_v58, %v3775_v56  ;;  %v4423_v18 = vpop.f32.mrf.mxu0  ;;  %v4512_v46 = vpop.f32.mrf.mxu1  ;;  %v13036_v50 = vld [vmem:[#allocation57_spill] sm:$0xff] }
 0x3a0   :  { %4722 = vmatmul.bf16.gmra.mxu3 %v13032_v43  ;;  %vm3793_vm10 = vweird.f32 %v11686_v61  ;;  %vm3858_vm11 = vcmp.eq.f32.partialorder %v3857_v51, 8.507059e+37  ;;  %5857 = vrcp.f32 %v11888_v7  ;;  %v3762_v16 = vadd.f32 %v11721_v8, %v3761_v47 }
 0x3a1   :  { %v3861_v24 = vsel %vm3858_vm11, %v3860_v31, %v3856_v1  ;;  %5859 = vrcp.f32 %v11900_v3  ;;  %v4600_v37 = vadd.f32 %v4599_v9, %v4511_v60  ;;  %v5852_v26 = vpop.eup %5851  ;;  %v3791_v13 = vmul.f32 %v11789_v12, %v3790_v0  ;;  %v13044_v31 = vld [vmem:[#allocation19_spill] sm:$0xff]  ;;  %v5905_v60 = vld [vmem:[#allocation2 + $0x50] sm:$0xff] }
 0x3a2   :  { %v3805_v29 = vsub.f32 1.0, %v11869_v63  ;;  %5861 = vrcp.f32 %v11903_v44  ;;  %v11930_v56 = vmul.f32 %v3921_v55, %v13035_v27  ;;  %v11932_v11 = vpop.eup %5853  ;;  %vm3779_vm12 = vweird.f32 %v11784_v58 }
 0x3a3   :  { %v3799_v47 = vand.u32 2147483648, %v11686_v61  ;;  %v4689_v51 = vadd.f32 %v4688_v6, %v4600_v37  ;;  %v4424_v20 = vadd.f32 %v11410_v38, %v4423_v18  ;;  %v5856_v54 = vpop.eup %5855  ;;  %v11938_v59 = vmul.f32 %v3756_v21, %v13036_v50  ;;  %vm11988_vm1 = vmor %vm3778_vm6, %vm3779_vm12 }
 0x3a4   :  { %v3777_v63 = vadd.f32 %v11784_v58, %v3776_v52  ;;  %vm11951_vm15 = vcmp.eq.f32.partialorder %v3782_v39, 8.507059e+37  ;;  %vm11955_vm0 = vcmp.eq.f32.partialorder %v3797_v42, 8.507059e+37  ;;  %v11960_v45 = vmul.f32 %v3861_v24, %v13043_v5  ;;  %v13045_v39 = vld [vmem:[#allocation56_spill] sm:$0xff] }
 0x3a5   :  { %v3766_v32 = vsel %vm11944_vm14, %v11721_v8, %v3762_v16  ;;  %vm3794_vm9 = vweird.f32 %v11789_v12  ;;  %v11966_v43 = vadd.f32 1.0, %v5852_v26  ;;  %v13046_v55 = vpack.c.bf16 %v13044_v31, %v13045_v39  ;;  %v4690_v27 = vpop.f32.mrf.mxu3 }
 0x3a6   :  { %v4753_v42 = vadd.f32 %v5905_v60, %v4689_v51  ;;  %v11971_v21 = vpop.eup %5857  ;;  %v3792_v52 = vadd.f32 %v11789_v12, %v3791_v13  ;;  %v3806_v9 = vmul.f32 %v11834_v48, %v3805_v29  ;;  %v3819_v6 = vmul.f32 %v11932_v11, %v11857_v62  ;;  %4549 = vmatmul.bf16.gmra.mxu1 %v4119_v41  ;;  %v4601_v29 = vpop.f32.mrf.mxu2  ;;  %vm12012_vm3 = vmor %vm3793_vm10, %vm3794_vm9 }
 0x3a7   :  { %4460 = vmatmul.bf16.gmra.mxu0 %v13046_v55  ;;  %v4128_v8 = vpack.c.bf16 %v11930_v56, %v11960_v45  ;;  %v11982_v16 = vpop.eup %5859  ;;  %v3800_v37 = vor.u32 1.1754944e-38, %v3799_v47  ;;  %vm3808_vm2 = vweird.f32 %v11746_v33  ;;  %v11993_v18 = vadd.f32 1.0, %v5856_v54  ;;  %4638 = vmatmul.bf16.gmra.mxu2 %v4120_v35  ;;  %v5906_v55 = vld [vmem:[#allocation2 + $0x58] sm:$0xff] }
 0x3a8   :  { %4785 = vst [vmem:[#allocation11 + $0x50] sm:$0xff] %v4753_v42  ;;  %v4513_v10 = vadd.f32 %v4512_v46, %v4424_v20  ;;  %v11998_v30 = vpop.eup %5861  ;;  %v3771_v41 = vsel %vm11913_vm13, %v11758_v49, %v3766_v32  ;;  %v3781_v19 = vsel %vm11988_vm1, %v11784_v58, %v3777_v63  ;;  %v3812_v26 = vand.u32 2147483647, %v11746_v33  ;;  %v4426_v49 = vpop.f32.mrf.mxu0  ;;  %v13053_v63 = vld [vmem:[#allocation32_spill] sm:$0xff]  ;;  %v13054_v42 = vld [vmem:[#allocation37_spill] sm:$0xff] }
 0x3a9   :  { %v3814_v13 = vand.u32 2147483648, %v11746_v33  ;;  %vm3809_vm5 = vweird.f32 %v11834_v48  ;;  %v3879_v4 = vmul.f32 %v11971_v21, %v11888_v7  ;;  %5863 = vrcp.f32 %v11966_v43  ;;  %v4515_v58 = vpop.f32.mrf.mxu1 }
 0x3aa   :  { %v4602_v35 = vadd.f32 %v4601_v29, %v4513_v10  ;;  %v3796_v53 = vsel %vm12012_vm3, %v11789_v12, %v3792_v52  ;;  %v3807_v61 = vadd.f32 %v11834_v48, %v3806_v9  ;;  %v3820_v46 = vsub.f32 1.0, %v3819_v6  ;;  %vm12047_vm7 = vmor %vm3808_vm2, %vm3809_vm5  ;;  %v13063_v9 = vld [vmem:[#allocation17_spill] sm:$0xff] }
 0x3ab   :  { %v3894_v47 = vmul.f32 %v11982_v16, %v11900_v3  ;;  %v3834_v51 = vmul.f32 %v11998_v30, %v11903_v44  ;;  %5865 = vrcp.f32 %v11993_v18  ;;  %v4427_v54 = vadd.f32 %v11410_v38, %v4426_v49 }
 0x3ac   :  { %v4691_v20 = vadd.f32 %v4690_v27, %v4602_v35  ;;  %vm12030_vm4 = vcmp.eq.f32.partialorder %v3812_v26, 8.507059e+37  ;;  %v3815_v0 = vor.u32 1.1754944e-38, %v3814_v13  ;;  %v3829_v12 = vand.u32 2147483648, %v11857_v62 }
 0x3ad   :  { %v4121_v5 = vpack.c.bf16 %v11692_v23, %v13053_v63  ;;  %v3786_v32 = vsel %vm11951_vm15, %v11843_v28, %v3781_v19  ;;  %v3801_v31 = vsel %vm11955_vm0, %v3800_v37, %v3796_v53  ;;  %v3880_v39 = vsub.f32 1.0, %v3879_v4  ;;  %v13057_v37 = vld [vmem:[#allocation41_spill] sm:$0xff]  ;;  %v4693_v29 = vpop.f32.mrf.mxu3  ;;  %v13070_v63 = vld [vmem:[#allocation26_spill] sm:$0xff] }
 0x3ae   :  { %v4754_v60 = vadd.f32 %v5906_v55, %v4691_v20  ;;  %v4054_v52 = vmul.f32 %v3771_v41, %v13054_v42  ;;  %v3821_v23 = vmul.f32 %v11932_v11, %v3820_v46  ;;  %vm3823_vm6 = vweird.f32 %v11857_v62  ;;  %v13058_v41 = vld [vmem:[#allocation23_spill] sm:$0xff]  ;;  %v4604_v13 = vpop.f32.mrf.mxu2 }
 0x3af   :  { %v3895_v28 = vsub.f32 1.0, %v3894_v47  ;;  %v12053_v2 = vpop.eup %5863  ;;  %v3811_v1 = vsel %vm12047_vm7, %v11834_v48, %v3807_v61  ;;  %v3827_v6 = vand.u32 2147483647, %v11857_v62  ;;  %v3835_v24 = vsub.f32 1.0, %v3834_v51 }
 0x3b0   :  { %4727 = vmatmul.bf16.gmra.mxu3 %v4121_v5  ;;  %4786 = vst [vmem:[#allocation11 + $0x58] sm:$0xff] %v4754_v60  ;;  %v4516_v33 = vadd.f32 %v4515_v58, %v4427_v54  ;;  %v4055_v10 = vmul.f32 %v3786_v32, %v13057_v37  ;;  %v4056_v19 = vmul.f32 %v3801_v31, %v13058_v41  ;;  %vm3824_vm8 = vweird.f32 %v11932_v11  ;;  %v4428_v35 = vpop.f32.mrf.mxu0  ;;  %v5907_v32 = vld [vmem:[#allocation2 + $0x60] sm:$0xff] }
 0x3b1   :  { %v12062_v26 = vor.u32 1.1754944e-38, %v3829_v12  ;;  %v12064_v27 = vpop.eup %5865  ;;  %vm3838_vm13 = vweird.f32 %v11903_v44  ;;  %v3842_v48 = vand.u32 2147483647, %v11903_v44  ;;  %v3881_v25 = vmul.f32 %v11971_v21, %v3880_v39  ;;  %v4517_v49 = vpop.f32.mrf.mxu1  ;;  %vm12099_vm15 = vmor %vm3823_vm6, %vm3824_vm8 }
 0x3b2   :  { %v4605_v4 = vadd.f32 %v4604_v13, %v4516_v33  ;;  %v3816_v58 = vsel %vm12030_vm4, %v3815_v0, %v3811_v1  ;;  %v12072_v53 = vadd.f32 %v11932_v11, %v3821_v23  ;;  %v3896_v61 = vmul.f32 %v11982_v16, %v3895_v28 }
 0x3b3   :  { %v3924_v46 = vmul.f32 %v12053_v2, %v11966_v43  ;;  %v3836_v47 = vmul.f32 %v11998_v30, %v3835_v24  ;;  %v4122_v51 = vpack.c.bf16 %v4054_v52, %v11778_v36  ;;  %v4429_v54 = vadd.f32 %v11410_v38, %v4428_v35 }
 0x3b4   :  { %v4694_v20 = vadd.f32 %v4693_v29, %v4605_v4  ;;  %vm3839_vm10 = vweird.f32 %v11998_v30  ;;  %v3864_v50 = vmul.f32 %v12064_v27, %v11993_v18  ;;  %v3887_v0 = vand.u32 2147483647, %v11888_v7 }
 0x3b5   :  { %v4123_v12 = vpack.c.bf16 %v4055_v10, %v11817_v22  ;;  %vm12085_vm11 = vcmp.eq.f32.partialorder %v3827_v6, 8.507059e+37  ;;  %v3882_v5 = vadd.f32 %v11971_v21, %v3881_v25  ;;  %vm3884_vm12 = vweird.f32 %v11971_v21  ;;  %vm12133_vm3 = vmor %vm3838_vm13, %vm3839_vm10 }
 0x3b6   :  { %v4124_v36 = vpack.c.bf16 %v4056_v19, %v11837_v40  ;;  %v4755_v31 = vadd.f32 %v5907_v32, %v4694_v20  ;;  %v3889_v39 = vand.u32 2147483648, %v11888_v7  ;;  %v3897_v55 = vadd.f32 %v11982_v16, %v3896_v61  ;;  %v4606_v6 = vpop.f32.mrf.mxu2 }
 0x3b7   :  { %4465 = vmatmul.bf16.gmra.mxu0 %v4122_v51  ;;  %vm3899_vm14 = vweird.f32 %v11982_v16  ;;  %v3925_v22 = vsub.f32 1.0, %v3924_v46  ;;  %4554 = vmatmul.bf16.gmra.mxu1 %v4123_v12  ;;  %v3837_v40 = vadd.f32 %v11998_v30, %v3836_v47  ;;  %vm3883_vm0 = vweird.f32 %v11888_v7  ;;  %v4695_v7 = vpop.f32.mrf.mxu3  ;;  %v5908_v47 = vld [vmem:[#allocation2 + $0x68] sm:$0xff] }
 0x3b8   :  { %v3904_v42 = vand.u32 2147483648, %v11900_v3  ;;  %4643 = vmatmul.bf16.gmra.mxu2 %v4124_v36  ;;  %4787 = vst [vmem:[#allocation11 + $0x60] sm:$0xff] %v4755_v31  ;;  %v4518_v52 = vadd.f32 %v4517_v49, %v4429_v54  ;;  %v4057_v23 = vmul.f32 %v3816_v58, %v13063_v9  ;;  %v3865_v28 = vsub.f32 1.0, %v3864_v50  ;;  %vm12109_vm9 = vmor %vm3883_vm0, %vm3884_vm12  ;;  %v4431_v41 = vpop.f32.mrf.mxu0 }
 0x3b9   :  { %vm3898_vm1 = vweird.f32 %v11900_v3  ;;  %v3902_v1 = vand.u32 2147483647, %v11900_v3  ;;  %v3826_v24 = vsel %vm12099_vm15, %v11932_v11, %v12072_v53  ;;  %v3844_v33 = vand.u32 2147483648, %v11903_v44  ;;  %v4520_v19 = vpop.f32.mrf.mxu1 }
 0x3ba   :  { %v3886_v37 = vsel %vm12109_vm9, %v11971_v21, %v3882_v5  ;;  %vm12125_vm2 = vmor %vm3898_vm1, %vm3899_vm14  ;;  %v4607_v3 = vadd.f32 %v4606_v6, %v4518_v52  ;;  %vm3888_vm5 = vcmp.eq.f32.partialorder %v3887_v0, 8.507059e+37  ;;  %v3890_v13 = vor.u32 1.1754944e-38, %v3889_v39  ;;  %v12181_v52 = vld [vmem:[#allocation5 + $0x2] ss:$0 sm:$0xff] }
 0x3bb   :  { %v3901_v21 = vsel %vm12125_vm2, %v11982_v16, %v3897_v55  ;;  %v3926_v29 = vmul.f32 %v12053_v2, %v3925_v22  ;;  %v3841_v25 = vsel %vm12133_vm3, %v11998_v30, %v3837_v40  ;;  %v3905_v4 = vor.u32 1.1754944e-38, %v3904_v42 }
 0x3bc   :  { %v4696_v35 = vadd.f32 %v4695_v7, %v4607_v3  ;;  %v4432_v49 = vadd.f32 %v11410_v38, %v4431_v41  ;;  %v3866_v58 = vmul.f32 %v12064_v27, %v3865_v28  ;;  %v3891_v53 = vsel %vm3888_vm5, %v3890_v13, %v3886_v37  ;;  %v5910_v28 = vld [vmem:[#allocation2 + $0x70] sm:$0xff]  ;;  %v5911_v13 = vld [vmem:[#allocation2 + $0x78] sm:$0xff] }
 0x3bd   :  { %vm3903_vm4 = vcmp.eq.f32.partialorder %v3902_v1, 8.507059e+37  ;;  %v4125_v61 = vpack.c.bf16 %v4057_v23, %v11938_v59  ;;  %vm3843_vm7 = vcmp.eq.f32.partialorder %v3842_v48, 8.507059e+37  ;;  %v3845_v16 = vor.u32 1.1754944e-38, %v3844_v33 }
 0x3be   :  { %v3906_v46 = vsel %vm3903_vm4, %v3905_v4, %v3901_v21  ;;  %v4756_v51 = vadd.f32 %v5908_v47, %v4696_v35  ;;  %v3831_v30 = vsel %vm12085_vm11, %v12062_v26, %v3826_v24  ;;  %vm3869_vm6 = vweird.f32 %v12064_v27  ;;  %v4609_v0 = vpop.f32.mrf.mxu2  ;;  %v5912_v35 = vld [vmem:[#allocation2 + $0x80] sm:$0xff]  ;;  %v5913_v47 = vld [vmem:[#allocation2 + $0x88] sm:$0xff] }
 0x3bf   :  { %v3927_v38 = vadd.f32 %v12053_v2, %v3926_v29  ;;  %vm3929_vm8 = vweird.f32 %v12053_v2  ;;  %v3846_v20 = vsel %vm3843_vm7, %v3845_v16, %v3841_v25  ;;  %v4062_v59 = vmul.f32 %v3891_v53, %v11731_v34  ;;  %v4698_v12 = vpop.f32.mrf.mxu3  ;;  %v5914_v34 = vld [vmem:[#allocation2 + $0x90] sm:$0xff] }
 0x3c0   :  { %4732 = vmatmul.bf16.gmra.mxu3 %v4125_v61  ;;  %v3934_v44 = vand.u32 2147483648, %v11966_v43  ;;  %4788 = vst [vmem:[#allocation11 + $0x68] sm:$0xff] %v4756_v51  ;;  %v4521_v48 = vadd.f32 %v4520_v19, %v4432_v49  ;;  %v3867_v54 = vadd.f32 %v12064_v27, %v3866_v58  ;;  %v4063_v50 = vmul.f32 %v3906_v46, %v11750_v14  ;;  %v4433_v31 = vpop.f32.mrf.mxu0 }
 0x3c1   :  { %vm3928_vm13 = vweird.f32 %v11966_v43  ;;  %v3932_v26 = vand.u32 2147483647, %v11966_v43  ;;  %v4058_v5 = vmul.f32 %v3831_v30, %v13070_v63  ;;  %v3874_v36 = vand.u32 2147483648, %v11993_v18  ;;  %v4522_v39 = vpop.f32.mrf.mxu1 }
 0x3c2   :  { %vm12165_vm10 = vmor %vm3928_vm13, %vm3929_vm8  ;;  %v4610_v32 = vadd.f32 %v4609_v0, %v4521_v48  ;;  %v4059_v14 = vmul.f32 %v3846_v20, %v11482_v57  ;;  %vm3868_vm11 = vweird.f32 %v11993_v18  ;;  %v3872_v43 = vand.u32 2147483647, %v11993_v18 }
 0x3c3   :  { %v3931_v55 = vsel %vm12165_vm10, %v12053_v2, %v3927_v38  ;;  %vm12177_vm12 = vmor %vm3868_vm11, %vm3869_vm6  ;;  %v3935_v60 = vor.u32 1.1754944e-38, %v3934_v44  ;;  %v4126_v40 = vpack.c.bf16 %v4062_v59, %v4058_v5  ;;  %v4434_v57 = vadd.f32 %v12181_v52, %v4433_v31 }
 0x3c4   :  { %v4699_v42 = vadd.f32 %v4698_v12, %v4610_v32  ;;  %v3871_v18 = vsel %vm12177_vm12, %v12064_v27, %v3867_v54  ;;  %vm3933_vm14 = vcmp.eq.f32.partialorder %v3932_v26, 8.507059e+37  ;;  %v4127_v9 = vpack.c.bf16 %v4063_v50, %v4059_v14 }
 0x3c5   :  { %v3875_v2 = vor.u32 1.1754944e-38, %v3874_v36  ;;  %v3936_v23 = vsel %vm3933_vm14, %v3935_v60, %v3931_v55  ;;  %vm3873_vm15 = vcmp.eq.f32.partialorder %v3872_v43, 8.507059e+37  ;;  %v4523_v6 = vadd.f32 %v4522_v39, %v4434_v57 }
 0x3c6   :  { %v4757_v62 = vadd.f32 %v5910_v28, %v4699_v42  ;;  %v4065_v7 = vmul.f32 %v3936_v23, %v11814_v15  ;;  %v4611_v24 = vpop.f32.mrf.mxu2  ;;  %v5915_v42 = vld [vmem:[#allocation2 + $0x98] sm:$0xff] }
 0x3c7   :  { %4470 = vmatmul.bf16.gmra.mxu0 %v4126_v40  ;;  %4559 = vmatmul.bf16.gmra.mxu1 %v4127_v9  ;;  %v3876_v1 = vsel %vm3873_vm15, %v3875_v2, %v3871_v18  ;;  %v4700_v27 = vpop.f32.mrf.mxu3  ;;  %v4612_v33 = vadd.f32 %v4611_v24, %v4523_v6 }
 0x3c8   :  { %4648 = vmatmul.bf16.gmra.mxu2 %v4128_v8  ;;  %4789 = vst [vmem:[#allocation11 + $0x70] sm:$0xff] %v4757_v62  ;;  %v4436_v37 = vpop.f32.mrf.mxu0  ;;  %v4061_v10 = vmul.f32 %v3876_v1, %v11829_v17 }
 0x3c9   :  { %v4701_v3 = vadd.f32 %v4700_v27, %v4612_v33  ;;  %v4437_v41 = vadd.f32 %v12181_v52, %v4436_v37  ;;  %v4525_v19 = vpop.f32.mrf.mxu1 }
 0x3ca   :  { %v4129_v11 = vpack.c.bf16 %v4065_v7, %v4061_v10  ;;  %v5916_v7 = vld [vmem:[#allocation2 + $0xa0] sm:$0xff] }
 0x3cb   :  { %v4758_v21 = vadd.f32 %v5911_v13, %v4701_v3  ;;  %v4526_v56 = vadd.f32 %v4525_v19, %v4437_v41  ;;  %v5917_v13 = vld [vmem:[#allocation2 + $0xa8] sm:$0xff] }
 0x3cd   :  { %4790 = vst [vmem:[#allocation11 + $0x78] sm:$0xff] %v4758_v21 }
 0x3ce   :  { %v4614_v45 = vpop.f32.mrf.mxu2 }
 0x3cf   :  { %v4703_v8 = vpop.f32.mrf.mxu3  ;;  %v4615_v29 = vadd.f32 %v4614_v45, %v4526_v56 }
 0x3d0   :  { %4737 = vmatmul.bf16.gmra.mxu3 %v4129_v11  ;;  %v4438_v15 = vpop.f32.mrf.mxu0 }
 0x3d1   :  { %v4704_v25 = vadd.f32 %v4703_v8, %v4615_v29  ;;  %v4439_v4 = vadd.f32 %v12181_v52, %v4438_v15  ;;  %v4527_v17 = vpop.f32.mrf.mxu1 }
 0x3d3   :  { %v4759_v49 = vadd.f32 %v5912_v35, %v4704_v25  ;;  %v4528_v58 = vadd.f32 %v4527_v17, %v4439_v4 }
 0x3d5   :  { %4791 = vst [vmem:[#allocation11 + $0x80] sm:$0xff] %v4759_v49  ;;  %v5918_v49 = vld [vmem:[#allocation2 + $0xb0] sm:$0xff] }
 0x3d6   :  { %v4616_v53 = vpop.f32.mrf.mxu2 }
 0x3d7   :  { %v4617_v61 = vadd.f32 %v4616_v53, %v4528_v58  ;;  %v4705_v16 = vpop.f32.mrf.mxu3 }
 0x3d8   :  { %v4441_v30 = vpop.f32.mrf.mxu0 }
 0x3d9   :  { %v4706_v46 = vadd.f32 %v4705_v16, %v4617_v61  ;;  %v4530_v38 = vpop.f32.mrf.mxu1  ;;  %v4442_v59 = vadd.f32 %v12181_v52, %v4441_v30 }
 0x3db   :  { %v4760_v51 = vadd.f32 %v5913_v47, %v4706_v46  ;;  %v4531_v54 = vadd.f32 %v4530_v38, %v4442_v59  ;;  %v5919_v38 = vld [vmem:[#allocation2 + $0xb8] sm:$0xff] }
 0x3dd   :  { %4792 = vst [vmem:[#allocation11 + $0x88] sm:$0xff] %v4760_v51 }
 0x3de   :  { %v4619_v20 = vpop.f32.mrf.mxu2 }
 0x3df   :  { %v4620_v50 = vadd.f32 %v4619_v20, %v4531_v54 }
 0x3e0   :  { %v4443_v44 = vpop.f32.mrf.mxu0 }
 0x3e1   :  { %v4532_v48 = vpop.f32.mrf.mxu1  ;;  %v4444_v26 = vadd.f32 %v12181_v52, %v4443_v44 }
 0x3e3   :  { %v4533_v31 = vadd.f32 %v4532_v48, %v4444_v26 }
 0x3e6   :  { %v4621_v0 = vpop.f32.mrf.mxu2 }
 0x3e7   :  { %v4622_v39 = vadd.f32 %v4621_v0, %v4533_v31 }
 0x3ed   :  { %v4708_v12 = vpop.f32.mrf.mxu3  ;;  %v4446_v5 = vpop.f32.mrf.mxu0 }
 0x3ee   :  { %v4709_v63 = vadd.f32 %v4708_v12, %v4620_v50  ;;  %v4447_v14 = vadd.f32 %v12181_v52, %v4446_v5 }
 0x3ef   :  { %v4535_v36 = vpop.f32.mrf.mxu1 }
 0x3f0   :  { %v4761_v32 = vadd.f32 %v5914_v34, %v4709_v63  ;;  %v4536_v18 = vadd.f32 %v4535_v36, %v4447_v14  ;;  %v5920_v63 = vld [vmem:[#allocation2 + $0xc0] sm:$0xff] }
 0x3f2   :  { %4793 = vst [vmem:[#allocation11 + $0x90] sm:$0xff] %v4761_v32 }
 0x3f5   :  { %v4710_v43 = vpop.f32.mrf.mxu3  ;;  %v4448_v60 = vpop.f32.mrf.mxu0 }
 0x3f6   :  { %v4711_v55 = vadd.f32 %v4710_v43, %v4622_v39  ;;  %v4624_v22 = vpop.f32.mrf.mxu2  ;;  %v4449_v2 = vadd.f32 %v12181_v52, %v4448_v60 }
 0x3f7   :  { %v4537_v40 = vpop.f32.mrf.mxu1  ;;  %v4625_v9 = vadd.f32 %v4624_v22, %v4536_v18  ;;  %v5921_v22 = vld [vmem:[#allocation2 + $0xc8] sm:$0xff] }
 0x3f8   :  { %v4762_v57 = vadd.f32 %v5915_v42, %v4711_v55  ;;  %v4538_v27 = vadd.f32 %v4537_v40, %v4449_v2 }
 0x3fa   :  { %4794 = vst [vmem:[#allocation11 + $0x98] sm:$0xff] %v4762_v57 }
 0x3fd   :  { %v4713_v23 = vpop.f32.mrf.mxu3 }
 0x3fe   :  { %v4714_v28 = vadd.f32 %v4713_v23, %v4625_v9  ;;  %v4626_v62 = vpop.f32.mrf.mxu2 }
 0x3ff   :  { %v4451_v1 = vpop.f32.mrf.mxu0  ;;  %v4627_v33 = vadd.f32 %v4626_v62, %v4538_v27 }
 0x400   :  { %v4763_v24 = vadd.f32 %v5916_v7, %v4714_v28  ;;  %v4452_v37 = vadd.f32 %v12181_v52, %v4451_v1  ;;  %v5922_v28 = vld [vmem:[#allocation2 + $0xd0] sm:$0xff] }
 0x401   :  { %v4540_v6 = vpop.f32.mrf.mxu1 }
 0x402   :  { %4795 = vst [vmem:[#allocation11 + $0xa0] sm:$0xff] %v4763_v24  ;;  %v4541_v56 = vadd.f32 %v4540_v6, %v4452_v37 }
 0x405   :  { %v4715_v10 = vpop.f32.mrf.mxu3 }
 0x406   :  { %v4716_v3 = vadd.f32 %v4715_v10, %v4627_v33 }
 0x407   :  { %v4453_v19 = vpop.f32.mrf.mxu0 }
 0x408   :  { %v4629_v41 = vpop.f32.mrf.mxu2  ;;  %v4764_v21 = vadd.f32 %v5917_v13, %v4716_v3  ;;  %v4454_v8 = vadd.f32 %v12181_v52, %v4453_v19  ;;  %v5923_v3 = vld [vmem:[#allocation2 + $0xd8] sm:$0xff] }
 0x409   :  { %v4542_v11 = vpop.f32.mrf.mxu1  ;;  %v4630_v45 = vadd.f32 %v4629_v41, %v4541_v56 }
 0x40a   :  { %4796 = vst [vmem:[#allocation11 + $0xa8] sm:$0xff] %v4764_v21  ;;  %v4543_v58 = vadd.f32 %v4542_v11, %v4454_v8 }
 0x410   :  { %v4631_v25 = vpop.f32.mrf.mxu2 }
 0x411   :  { %v4718_v29 = vpop.f32.mrf.mxu3  ;;  %v4632_v53 = vadd.f32 %v4631_v25, %v4543_v58 }
 0x412   :  { %v4719_v15 = vadd.f32 %v4718_v29, %v4630_v45  ;;  %v4456_v4 = vpop.f32.mrf.mxu0 }
 0x413   :  { %v4545_v35 = vpop.f32.mrf.mxu1  ;;  %v4457_v61 = vadd.f32 %v12181_v52, %v4456_v4 }
 0x414   :  { %v4765_v17 = vadd.f32 %v5918_v49, %v4719_v15  ;;  %v5924_v15 = vld [vmem:[#allocation2 + $0xe0] sm:$0xff] }
 0x415   :  { %v4546_v59 = vadd.f32 %v4545_v35, %v4457_v61 }
 0x416   :  { %4797 = vst [vmem:[#allocation11 + $0xb0] sm:$0xff] %v4765_v17 }
 0x419   :  { %v4720_v16 = vpop.f32.mrf.mxu3 }
 0x41a   :  { %v4721_v46 = vadd.f32 %v4720_v16, %v4632_v53  ;;  %v4634_v47 = vpop.f32.mrf.mxu2  ;;  %v4458_v51 = vpop.f32.mrf.mxu0  ;;  %v5925_v16 = vld [vmem:[#allocation2 + $0xe8] sm:$0xff] }
 0x41b   :  { %v4547_v30 = vpop.f32.mrf.mxu1  ;;  %v4635_v44 = vadd.f32 %v4634_v47, %v4546_v59  ;;  %v4459_v48 = vadd.f32 %v12181_v52, %v4458_v51 }
 0x41c   :  { %v4766_v20 = vadd.f32 %v5919_v38, %v4721_v46 }
 0x41d   :  { %v4548_v36 = vadd.f32 %v4547_v30, %v4459_v48 }
 0x41e   :  { %4798 = vst [vmem:[#allocation11 + $0xb8] sm:$0xff] %v4766_v20 }
 0x422   :  { %v4636_v26 = vpop.f32.mrf.mxu2 }
 0x423   :  { %v4723_v54 = vpop.f32.mrf.mxu3  ;;  %v4550_v12 = vpop.f32.mrf.mxu1  ;;  %v4637_v34 = vadd.f32 %v4636_v26, %v4548_v36 }
 0x424   :  { %v4724_v50 = vadd.f32 %v4723_v54, %v4635_v44  ;;  %v4461_v0 = vpop.f32.mrf.mxu0  ;;  %v5926_v54 = vld [vmem:[#allocation2 + $0xf0] sm:$0xff] }
 0x425   :  { %v4462_v32 = vadd.f32 %v12181_v52, %v4461_v0 }
 0x426   :  { %v4767_v5 = vadd.f32 %v5920_v63, %v4724_v50 }
 0x427   :  { %v4551_v40 = vadd.f32 %v4550_v12, %v4462_v32 }
 0x428   :  { %4799 = vst [vmem:[#allocation11 + $0xc0] sm:$0xff] %v4767_v5  ;;  %v5927_v5 = vld [vmem:[#allocation2 + $0xf8] sm:$0xff] }
 0x42a   :  { %v4639_v14 = vpop.f32.mrf.mxu2 }
 0x42b   :  { %v4725_v31 = vpop.f32.mrf.mxu3  ;;  %v4552_v55 = vpop.f32.mrf.mxu1  ;;  %v4640_v42 = vadd.f32 %v4639_v14, %v4551_v40 }
 0x42c   :  { %v4726_v39 = vadd.f32 %v4725_v31, %v4637_v34  ;;  %v4463_v43 = vpop.f32.mrf.mxu0 }
 0x42d   :  { %v4464_v57 = vadd.f32 %v12181_v52, %v4463_v43 }
 0x42e   :  { %v4768_v60 = vadd.f32 %v5921_v22, %v4726_v39 }
 0x42f   :  { %v4553_v1 = vadd.f32 %v4552_v55, %v4464_v57 }
 0x430   :  { %4800 = vst [vmem:[#allocation11 + $0xc8] sm:$0xff] %v4768_v60 }
 0x432   :  { %v4641_v2 = vpop.f32.mrf.mxu2 }
 0x433   :  { %v4728_v18 = vpop.f32.mrf.mxu3  ;;  %v4642_v7 = vadd.f32 %v4641_v2, %v4553_v1 }
 0x434   :  { %v4729_v9 = vadd.f32 %v4728_v18, %v4640_v42  ;;  %v4466_v23 = vpop.f32.mrf.mxu0  ;;  %v4555_v6 = vpop.f32.mrf.mxu1 }
 0x435   :  { %v4467_v24 = vadd.f32 %v12181_v52, %v4466_v23 }
 0x436   :  { %v4769_v62 = vadd.f32 %v5922_v28, %v4729_v9 }
 0x437   :  { %v4556_v19 = vadd.f32 %v4555_v6, %v4467_v24 }
 0x438   :  { %4801 = vst [vmem:[#allocation11 + $0xd0] sm:$0xff] %v4769_v62 }
 0x43b   :  { %v4730_v27 = vpop.f32.mrf.mxu3  ;;  %v4644_v37 = vpop.f32.mrf.mxu2 }
 0x43c   :  { %v4731_v33 = vadd.f32 %v4730_v27, %v4642_v7  ;;  %v4468_v10 = vpop.f32.mrf.mxu0  ;;  %v4645_v11 = vadd.f32 %v4644_v37, %v4556_v19  ;;  %v4557_v13 = vpop.f32.mrf.mxu1 }
 0x43d   :  { %v4469_v21 = vadd.f32 %v12181_v52, %v4468_v10 }
 0x43e   :  { %v4770_v41 = vadd.f32 %v5923_v3, %v4731_v33 }
 0x43f   :  { %v4558_v4 = vadd.f32 %v4557_v13, %v4469_v21 }
 0x440   :  { %4802 = vst [vmem:[#allocation11 + $0xd8] sm:$0xff] %v4770_v41 }
 0x443   :  { %v4733_v56 = vpop.f32.mrf.mxu3  ;;  %v4646_v8 = vpop.f32.mrf.mxu2 }
 0x444   :  { %v4734_v45 = vadd.f32 %v4733_v56, %v4645_v11  ;;  %v4471_v29 = vpop.f32.mrf.mxu0  ;;  %v4647_v35 = vadd.f32 %v4646_v8, %v4558_v4  ;;  %v4560_v58 = vpop.f32.mrf.mxu1 }
 0x445   :  { %v4472_v49 = vadd.f32 %v12181_v52, %v4471_v29 }
 0x446   :  { %v4771_v25 = vadd.f32 %v5924_v15, %v4734_v45 }
 0x447   :  { %v4561_v47 = vadd.f32 %v4560_v58, %v4472_v49 }
 0x448   :  { %4803 = vst [vmem:[#allocation11 + $0xe0] sm:$0xff] %v4771_v25 }
 0x44b   :  { %v4735_v17 = vpop.f32.mrf.mxu3  ;;  %v4649_v61 = vpop.f32.mrf.mxu2 }
 0x44c   :  { %v4736_v53 = vadd.f32 %v4735_v17, %v4647_v35  ;;  %v4473_v51 = vpop.f32.mrf.mxu0  ;;  %v4650_v30 = vadd.f32 %v4649_v61, %v4561_v47  ;;  %v4562_v44 = vpop.f32.mrf.mxu1 }
 0x44d   :  { %v4474_v38 = vadd.f32 %v12181_v52, %v4473_v51 }
 0x44e   :  { %v4772_v46 = vadd.f32 %v5925_v16, %v4736_v53 }
 0x44f   :  { %v4563_v26 = vadd.f32 %v4562_v44, %v4474_v38 }
 0x450   :  { %4804 = vst [vmem:[#allocation11 + $0xe8] sm:$0xff] %v4772_v46 }
 0x453   :  { %v4738_v20 = vpop.f32.mrf.mxu3  ;;  %v4651_v48 = vpop.f32.mrf.mxu2 }
 0x454   :  { %v4739_v59 = vadd.f32 %v4738_v20, %v4650_v30  ;;  %v4652_v0 = vadd.f32 %v4651_v48, %v4563_v26 }
 0x456   :  { %v4773_v50 = vadd.f32 %v5926_v54, %v4739_v59 }
 0x458   :  { %4805 = vst [vmem:[#allocation11 + $0xf0] sm:$0xff] %v4773_v50 }
 0x45b   :  { %v4740_v12 = vpop.f32.mrf.mxu3 }
 0x45c   :  { %v4741_v63 = vadd.f32 %v4740_v12, %v4652_v0 }
 0x45e   :  { %v4774_v36 = vadd.f32 %v5927_v5, %v4741_v63 }
 0x460   :  { %4806 = vst [vmem:[#allocation11 + $0xf8] sm:$0xff] %v4774_v36 }
 0x461   :  { %4819 = dma.vmem_to_hbm [thread:$0]  %s4812_s20, 4096, %s4814_s23, [#allocation4], %s6083_s10, %s6083_s10, %s6084_s3  }
 0x462   :  { %6078 = dma.done.wait [#allocation4], 4096  }
 0x463   :  { %6079 = vsyncadd [#allocation4], 4294963200 }
 0x464   :  { %4824 = vsyncpa [#allocation3], 1 }
 0x465   :  { %4825 = vsyncpa [#allocation6], 1 }
 0x466   :  { %4826 = vsyncpa [#allocation9], 1 }
 0x467   :  { %4827 = vsyncpa [#allocation4], 1 }

</bundles_post_ra>
